<compile_context>
chip_gen: v7x
topology: tpu7x:2x2x1
jax: 0.10.0
libtpu: 0.0.40
codegen_flags: <defaults>
</compile_context>

<pallas_src>
import math

import jax
import jax.numpy as jnp
from jax.experimental import pallas as pl
from jax.experimental.pallas import tpu as pltpu


# Matmul-operand dtype fed to the MXU.  On v6e / v7x (bf16-native MXU) set to
# jnp.bfloat16 to roughly halve per-matmul MXU occupancy on the serial RK
# chain; keep float32 on v5e and for bit-exact parity with the f32 reference.
MATMUL_DTYPE = jnp.float32


# ----------------------------- Dormand-Prince -------------------------------

_DOPRI5_STAGES = (
    (0.0, ()),
    (1.0 / 5.0, (1.0 / 5.0,)),
    (3.0 / 10.0, (3.0 / 40.0, 9.0 / 40.0)),
    (4.0 / 5.0, (44.0 / 45.0, -56.0 / 15.0, 32.0 / 9.0)),
    (8.0 / 9.0, (19372.0 / 6561.0, -25360.0 / 2187.0, 64448.0 / 6561.0,
                 -212.0 / 729.0)),
    (1.0, (9017.0 / 3168.0, -355.0 / 33.0, 46732.0 / 5247.0, 49.0 / 176.0,
           -5103.0 / 18656.0)),
)
_DOPRI5_B = (35.0 / 384.0, 0.0, 500.0 / 1113.0, 125.0 / 192.0,
             -2187.0 / 6784.0, 11.0 / 84.0)


def _rk45_step(vf, y, h):
    """One explicit Dormand-Prince step.  Fully unrolled at trace time.

    TODO(synk): torchdiffeq dopri5 adaptive step-size control is not
    reproduced; a fixed-grid single step per output interval is used.
    """
    ks = []
    for c, a_row in _DOPRI5_STAGES:
        yi = y
        for a_ij, k_j in zip(a_row, ks):
            if a_ij != 0.0:
                yi = yi + (h * a_ij) * k_j
        ks.append(vf(c, yi))
    y_new = y
    for b_j, k_j in zip(_DOPRI5_B, ks):
        if b_j != 0.0:
            y_new = y_new + (h * b_j) * k_j
    return y_new


# ------------------------------- fused kernel -------------------------------

def _fused_neural_ode_kernel(times_ref,     # SMEM  (T,)
                             coeffs_ref,    # VMEM  (T-1, 4B, D) [a;b;c/1;d/1] scaled
                             w_inyx_ref,    # VMEM  (H+D, H)  rows = [Wy ; Wx]
                             w0_ref, w1_ref, w2_ref,   # VMEM  MLP weights
                             iw_ref,        # VMEM  (D, H)  initial linear
                             dw_ref,        # VMEM  (H, O)  decoder
                             vecs_ref,      # VMEM  (8, H)  packed row vectors
                             out_ref,       # VMEM  (T*B, O)
                             traj_scr):     # VMEM  (T*B, H) trajectory scratch
    n_steps = coeffs_ref.shape[0]           # T - 1 (static)
    B = coeffs_ref.shape[1] // 4
    H = w0_ref.shape[0]
    D = coeffs_ref.shape[2]
    O = out_ref.shape[1]

    # Hoist all weight loads / row-vector slices once; they stay in vregs.
    w_inyx = w_inyx_ref[...]
    wy = w_inyx[0:H, :]
    wx = w_inyx[H:H + D, :]
    w0 = w0_ref[...]
    w1 = w1_ref[...]
    w2 = w2_ref[...]
    iw = iw_ref[...]
    dw = dw_ref[...]
    vecs = vecs_ref[...]
    wt = vecs[0:1, :]          # t-column of linear_in
    b_in = vecs[1:2, :]
    b0 = vecs[2:3, :]
    b1 = vecs[3:4, :]
    b2 = vecs[4:5, :]
    ib = vecs[5:6, :]
    db = vecs[6:7, 0:O]

    def mm(a, w):
        # Cast the activation to the weight dtype (bf16 on v6e/v7x if enabled,
        # identity for f32) and accumulate in f32 on the MXU.
        return jnp.dot(a.astype(w.dtype), w, preferred_element_type=jnp.float32)

    def vector_field(t_abs, frac, proj, y):
        # NeuralODEFunc.forward(t, y).  proj holds the spline coefficients of
        # this interval already projected through Wx, so x_t @ Wx is a
        # pure-VPU Horner evaluation (no per-stage (B,D)@(D,H) matmul and no
        # misaligned [t|y|x] concat).
        pa = proj[0 * B:1 * B, :]
        pb = proj[1 * B:2 * B, :]
        pc = proj[2 * B:3 * B, :]
        pd = proj[3 * B:4 * B, :]
        xw = pa + frac * (pb + frac * (pc + frac * pd))
        h1 = mm(y, wy) + xw + (t_abs * wt + b_in)
        g = mm(h1, w0) + b0
        g = jax.nn.silu(g)                 # LipSwish (0.909 folded into w1)
        g = mm(g, w1) + b1
        g = jax.nn.silu(g)                 # LipSwish (0.909 folded into w2)
        return mm(g, w2) + b2

    # y0 = initial(X(times[0]));  X(times[0]) is the 'a' coefficient of
    # interval 0 (rows 0:B of the packed coefficient slab).
    x_t0 = coeffs_ref[0][0:B, :]
    y = mm(x_t0, iw) + ib                  # (B, H)
    traj_scr[0:B, :] = y

    # Fully unrolled in-kernel time loop (T-1 static steps).  The carried ODE
    # state `y` stays in vregs; only the per-step trajectory row block is
    # stored (static sublane offsets) for the final batched decode.
    for step in range(n_steps):
        t0 = times_ref[step]
        h = times_ref[step + 1] - t0
        coef = coeffs_ref[step]            # (4B, D): [a; b; c; d] (pre-scaled)
        proj = mm(coef, wx)                # (4B, H): projected through Wx

        def vf(c, yy, t0=t0, h=h, proj=proj):
            frac = h * c
            return vector_field(t0 + frac, frac, proj, yy)

        y = _rk45_step(vf, y, h)
        traj_scr[(step + 1) * B:(step + 2) * B, :] = y

    # Single batched decode of the whole trajectory + single output write.
    out_ref[...] = mm(traj_scr[...], dw) + db


# --------------------------- parameter creation -----------------------------

def _linear_params(key, fan_in, fan_out):
    """PyTorch nn.Linear default init: U(-1/sqrt(fan_in), 1/sqrt(fan_in))."""
    kw, kb = jax.random.split(key)
    bound = 1.0 / math.sqrt(fan_in)
    w = jax.random.uniform(kw, (fan_in, fan_out), jnp.float32, -bound, bound)
    b = jax.random.uniform(kb, (1, fan_out), jnp.float32, -bound, bound)
    return w, b


def init_raw_params(key, input_dim, hidden_dim, output_dim, num_layers):
    assert num_layers == 2, "this script fuses a 2-hidden-layer MLP in the kernel"
    hh = hidden_dim  # NeuralODEModel passes hidden_hidden_dim = hidden_dim
    keys = jax.random.split(key, 6)
    win, b_in = _linear_params(keys[0], 1 + hidden_dim + input_dim, hidden_dim)
    w0, b0 = _linear_params(keys[1], hidden_dim, hh)           # MLP layer 0
    w1, b1 = _linear_params(keys[2], hh, hh)                   # MLP layer 1
    w2, b2 = _linear_params(keys[3], hh, hidden_dim)           # MLP output
    wi, bi = _linear_params(keys[4], input_dim, hidden_dim)    # self.initial
    wd, bd = _linear_params(keys[5], hidden_dim, output_dim)   # self.decoder
    return {"win": win, "bin": b_in, "w0": w0, "b0": b0, "w1": w1, "b1": b1,
            "w2": w2, "b2": b2, "iw": wi, "ib": bi, "dw": wd, "db": bd}


def pack_params(raw, matmul_dtype=MATMUL_DTYPE):
    """Kernel-side parameter layout (split/fold/pack)."""
    H = raw["w0"].shape[0]
    O = raw["dw"].shape[1]
    # Pack the 7 tiny row vectors into one (8, H) VMEM-resident buffer.
    vecs = jnp.zeros((8, H), jnp.float32)
    vecs = vecs.at[0, :].set(raw["win"][0, :])    # t column of linear_in
    vecs = vecs.at[1, :].set(raw["bin"][0, :])
    vecs = vecs.at[2, :].set(raw["b0"][0, :])
    vecs = vecs.at[3, :].set(raw["b1"][0, :])
    vecs = vecs.at[4, :].set(raw["b2"][0, :])
    vecs = vecs.at[5, :].set(raw["ib"][0, :])
    vecs = vecs.at[6, :O].set(raw["db"][0, :])
    return {
        # linear_in rows [y | x] (the t row lives in vecs[0]); (H+D, H)
        "w_inyx": raw["win"][1:, :].astype(matmul_dtype),
        "w0": raw["w0"].astype(matmul_dtype),
        # LipSwish 0.909 folded into the consumers of the activation
        "w1": (0.909 * raw["w1"]).astype(matmul_dtype),
        "w2": (0.909 * raw["w2"]).astype(matmul_dtype),
        "iw": raw["iw"].astype(matmul_dtype),
        "dw": raw["dw"].astype(matmul_dtype),
        "vecs": vecs,
    }


# ------------------------------ model forward -------------------------------

def _prep_coeffs(coeffs):
    """(B, T-1, 4D) torchcde layout [a, b, 2c, 3d] -> (T-1, 4B, D) with the
    0.5 / (1/3) evaluation constants folded in (piece-major, batch-minor)."""
    B = coeffs.shape[0]
    D = coeffs.shape[2] // 4
    a, b, two_c, three_d = jnp.split(coeffs, 4, axis=-1)        # (B, T-1, D)
    stack = jnp.stack([a, b, 0.5 * two_c, (1.0 / 3.0) * three_d], axis=0)
    stack = jnp.transpose(stack, (2, 0, 1, 3))                   # (T-1, 4, B, D)
    return stack.reshape(stack.shape[0], 4 * B, D)               # (T-1, 4B, D)


def neural_ode_forward(params, coeffs, times):
    """coeffs: (B, T-1, 4*input_dim) natural-cubic-spline coeffs (torchcde
    layout [a, b, 2c, 3d]); times: (T,).  Returns (B, T, output_dim)."""
    B = coeffs.shape[0]
    T = times.shape[0]
    H = params["dw"].shape[0]
    O = params["dw"].shape[1]

    coeffs_k = _prep_coeffs(coeffs)

    vmem = pl.BlockSpec(memory_space=pltpu.MemorySpace.VMEM)
    out_flat = pl.pallas_call(
        _fused_neural_ode_kernel,
        out_shape=jax.ShapeDtypeStruct((T * B, O), jnp.float32),
        in_specs=[
            pl.BlockSpec(memory_space=pltpu.MemorySpace.SMEM),   # times
            vmem,                                                # coeffs
            vmem, vmem, vmem, vmem,                              # w_inyx, w0, w1, w2
            vmem, vmem, vmem,                                    # iw, dw, vecs
        ],
        out_specs=vmem,
        scratch_shapes=[pltpu.VMEM((T * B, H), jnp.float32)],
    )(times, coeffs_k,
      params["w_inyx"], params["w0"], params["w1"], params["w2"],
      params["iw"], params["dw"], params["vecs"])

    z = out_flat.reshape(T, B, O)          # decoded odeint trajectory, time-major
    return jnp.transpose(z, (1, 0, 2))     # (B, T, O)


# --------------------------- pure-JAX reference ------------------------------

def neural_ode_reference(raw, coeffs, times):
    """Mirror of the PyTorch module with the same fixed-grid RK45 stepping."""
    a, b, two_c, three_d = jnp.split(coeffs, 4, axis=-1)         # (B, T-1, D)
    T = times.shape[0]

    def spline_eval(i, t):
        f = t - times[i]
        inner = 0.5 * two_c[:, i] + three_d[:, i] * (f / 3.0)
        inner = b[:, i] + inner * f
        return a[:, i] + inner * f

    def func(i, t, y):
        x_t = spline_eval(i, t)
        t_col = jnp.full((y.shape[0], 1), 1.0, jnp.float32) * t
        inp = jnp.concatenate([t_col, y, x_t], axis=-1)
        h1 = inp @ raw["win"] + raw["bin"]
        g = 0.909 * jax.nn.silu(h1 @ raw["w0"] + raw["b0"])
        g = 0.909 * jax.nn.silu(g @ raw["w1"] + raw["b1"])
        return g @ raw["w2"] + raw["b2"]

    y = spline_eval(0, times[0]) @ raw["iw"] + raw["ib"]
    traj = [y]
    for i in range(T - 1):
        t0 = times[i]
        h = times[i + 1] - t0

        def vf(c, yy, i=i, t0=t0, h=h):
            return func(i, t0 + h * c, yy)

        y = _rk45_step(vf, y, h)
        traj.append(y)
    z = jnp.transpose(jnp.stack(traj, axis=0), (1, 0, 2))        # (B, T, H)
    return z @ raw["dw"] + raw["db"]                             # (B, T, O)


# ----------------------------------- main ------------------------------------

if __name__ == "__main__":
    input_dim, hidden_dim, output_dim, num_layers = 4, 32, 4, 2
    B, T = 2, 8

    key = jax.random.PRNGKey(0)
    k_par, k_coef = jax.random.split(key)
    raw = init_raw_params(k_par, input_dim, hidden_dim, output_dim, num_layers)
    params = pack_params(raw)

    # spline coefficients in torchcde layout: (B, T-1, 4*input_dim)
    coeffs = jax.random.normal(k_coef, (B, T - 1, 4 * input_dim), jnp.float32)
    times = jnp.linspace(0.0, 1.0, T, dtype=jnp.float32)

    fwd = jax.jit(neural_ode_forward)
    out = fwd(params, coeffs, times)
    jax.block_until_ready(out)

    assert out.shape == (B, T, output_dim), out.shape
    assert bool(jnp.all(jnp.isfinite(out)))

    if MATMUL_DTYPE == jnp.float32:
        ref = neural_ode_reference(raw, coeffs, times)
        assert bool(jnp.allclose(out, ref, rtol=1e-3, atol=1e-3)), (
            float(jnp.max(jnp.abs(out - ref))))

    print("KERNEL_OK")
</pallas_src>

<mosaic_0001>
module attributes {stable_mosaic.version = 11 : i64} {
  func.func @_fused_neural_ode_kernel(%arg0: memref<8xf32, #tpu.memory_space<smem>>, %arg1: memref<7x8x4xf32, #tpu.memory_space<vmem>>, %arg2: memref<36x32xf32, #tpu.memory_space<vmem>>, %arg3: memref<32x32xf32, #tpu.memory_space<vmem>>, %arg4: memref<32x32xf32, #tpu.memory_space<vmem>>, %arg5: memref<32x32xf32, #tpu.memory_space<vmem>>, %arg6: memref<4x32xf32, #tpu.memory_space<vmem>>, %arg7: memref<32x4xf32, #tpu.memory_space<vmem>>, %arg8: memref<8x32xf32, #tpu.memory_space<vmem>>, %arg9: memref<16x4xf32, #tpu.memory_space<vmem>>, %arg10: memref<16x32xf32, #tpu.memory_space<vmem>>) attributes {dimension_semantics = [], scalar_prefetch = 0 : i64, scratch_operands = 1 : i64, tpu.core_type = #tpu.core_type<tc>} {
    %c0 = arith.constant 0 : index
    %c0_0 = arith.constant 0 : index
    %0 = vector.load %arg2[%c0, %c0_0] : memref<36x32xf32, #tpu.memory_space<vmem>>, vector<36x32xf32>
    %1 = vector.extract_strided_slice %0 {offsets = [0, 0], sizes = [32, 32], strides = [1, 1]} : vector<36x32xf32> to vector<32x32xf32>
    %2 = vector.extract_strided_slice %0 {offsets = [32, 0], sizes = [4, 32], strides = [1, 1]} : vector<36x32xf32> to vector<4x32xf32>
    %c0_1 = arith.constant 0 : index
    %c0_2 = arith.constant 0 : index
    %3 = vector.load %arg3[%c0_1, %c0_2] : memref<32x32xf32, #tpu.memory_space<vmem>>, vector<32x32xf32>
    %c0_3 = arith.constant 0 : index
    %c0_4 = arith.constant 0 : index
    %4 = vector.load %arg4[%c0_3, %c0_4] : memref<32x32xf32, #tpu.memory_space<vmem>>, vector<32x32xf32>
    %c0_5 = arith.constant 0 : index
    %c0_6 = arith.constant 0 : index
    %5 = vector.load %arg5[%c0_5, %c0_6] : memref<32x32xf32, #tpu.memory_space<vmem>>, vector<32x32xf32>
    %c0_7 = arith.constant 0 : index
    %c0_8 = arith.constant 0 : index
    %6 = vector.load %arg6[%c0_7, %c0_8] : memref<4x32xf32, #tpu.memory_space<vmem>>, vector<4x32xf32>
    %c0_9 = arith.constant 0 : index
    %c0_10 = arith.constant 0 : index
    %7 = vector.load %arg7[%c0_9, %c0_10] : memref<32x4xf32, #tpu.memory_space<vmem>>, vector<32x4xf32>
    %c0_11 = arith.constant 0 : index
    %c0_12 = arith.constant 0 : index
    %8 = vector.load %arg8[%c0_11, %c0_12] : memref<8x32xf32, #tpu.memory_space<vmem>>, vector<8x32xf32>
    %9 = vector.extract_strided_slice %8 {offsets = [0, 0], sizes = [1, 32], strides = [1, 1]} : vector<8x32xf32> to vector<1x32xf32>
    %10 = vector.extract_strided_slice %8 {offsets = [1, 0], sizes = [1, 32], strides = [1, 1]} : vector<8x32xf32> to vector<1x32xf32>
    %11 = vector.extract_strided_slice %8 {offsets = [2, 0], sizes = [1, 32], strides = [1, 1]} : vector<8x32xf32> to vector<1x32xf32>
    %12 = vector.extract_strided_slice %8 {offsets = [3, 0], sizes = [1, 32], strides = [1, 1]} : vector<8x32xf32> to vector<1x32xf32>
    %13 = vector.extract_strided_slice %8 {offsets = [4, 0], sizes = [1, 32], strides = [1, 1]} : vector<8x32xf32> to vector<1x32xf32>
    %14 = vector.extract_strided_slice %8 {offsets = [5, 0], sizes = [1, 32], strides = [1, 1]} : vector<8x32xf32> to vector<1x32xf32>
    %15 = vector.extract_strided_slice %8 {offsets = [6, 0], sizes = [1, 4], strides = [1, 1]} : vector<8x32xf32> to vector<1x4xf32>
    %c0_13 = arith.constant 0 : index
    %c0_14 = arith.constant 0 : index
    %c0_15 = arith.constant 0 : index
    %16 = vector.load %arg1[%c0_13, %c0_14, %c0_15] : memref<7x8x4xf32, #tpu.memory_space<vmem>>, vector<1x8x4xf32>
    %17 = vector.shape_cast %16 : vector<1x8x4xf32> to vector<8x4xf32>
    %18 = vector.extract_strided_slice %17 {offsets = [0, 0], sizes = [2, 4], strides = [1, 1]} : vector<8x4xf32> to vector<2x4xf32>
    %cst = arith.constant dense<0.000000e+00> : vector<2x32xf32>
    %19 = tpu.matmul %18, %6, %cst {dimension_numbers = #tpu.dot_dimension_numbers<[1], [0], [0], [1], [0, 0, 1, 1], [], []>} : vector<2x4xf32>, vector<4x32xf32>, vector<2x32xf32> -> vector<2x32xf32>
    %20 = vector.broadcast %14 : vector<1x32xf32> to vector<2x32xf32>
    %21 = arith.addf %19, %20 : vector<2x32xf32>
    %c0_16 = arith.constant 0 : index
    %c0_17 = arith.constant 0 : index
    %22 = vector.load %arg10[%c0_16, %c0_17] : memref<16x32xf32, #tpu.memory_space<vmem>>, vector<2x32xf32>
    tpu.vector_store %arg10[%c0_16, %c0_17], %21 {strides = array<i32>} : memref<16x32xf32, #tpu.memory_space<vmem>>, vector<2x32xf32>,
    %c0_18 = arith.constant 0 : index
    %23 = memref.load %arg0[%c0_18] : memref<8xf32, #tpu.memory_space<smem>>
    %c1 = arith.constant 1 : index
    %24 = memref.load %arg0[%c1] : memref<8xf32, #tpu.memory_space<smem>>
    %25 = arith.subf %24, %23 : f32
    %c0_19 = arith.constant 0 : index
    %c0_20 = arith.constant 0 : index
    %c0_21 = arith.constant 0 : index
    %26 = vector.load %arg1[%c0_19, %c0_20, %c0_21] : memref<7x8x4xf32, #tpu.memory_space<vmem>>, vector<1x8x4xf32>
    %27 = vector.shape_cast %26 : vector<1x8x4xf32> to vector<8x4xf32>
    %cst_22 = arith.constant dense<0.000000e+00> : vector<8x32xf32>
    %28 = tpu.matmul %27, %2, %cst_22 {dimension_numbers = #tpu.dot_dimension_numbers<[1], [0], [0], [1], [0, 0, 1, 1], [], []>} : vector<8x4xf32>, vector<4x32xf32>, vector<8x32xf32> -> vector<8x32xf32>
    %cst_23 = arith.constant 0.000000e+00 : f32
    %29 = arith.mulf %25, %cst_23 : f32
    %30 = arith.addf %23, %29 : f32
    %31 = vector.extract_strided_slice %28 {offsets = [0, 0], sizes = [2, 32], strides = [1, 1]} : vector<8x32xf32> to vector<2x32xf32>
    %32 = vector.extract_strided_slice %28 {offsets = [2, 0], sizes = [2, 32], strides = [1, 1]} : vector<8x32xf32> to vector<2x32xf32>
    %33 = vector.extract_strided_slice %28 {offsets = [4, 0], sizes = [2, 32], strides = [1, 1]} : vector<8x32xf32> to vector<2x32xf32>
    %34 = vector.extract_strided_slice %28 {offsets = [6, 0], sizes = [2, 32], strides = [1, 1]} : vector<8x32xf32> to vector<2x32xf32>
    %35 = vector.broadcast %29 : f32 to vector<2x32xf32>
    %36 = arith.mulf %35, %34 : vector<2x32xf32>
    %37 = arith.addf %33, %36 : vector<2x32xf32>
    %38 = vector.broadcast %29 : f32 to vector<2x32xf32>
    %39 = arith.mulf %38, %37 : vector<2x32xf32>
    %40 = arith.addf %32, %39 : vector<2x32xf32>
    %41 = vector.broadcast %29 : f32 to vector<2x32xf32>
    %42 = arith.mulf %41, %40 : vector<2x32xf32>
    %43 = arith.addf %31, %42 : vector<2x32xf32>
    %cst_24 = arith.constant dense<0.000000e+00> : vector<2x32xf32>
    %44 = tpu.matmul %21, %1, %cst_24 {dimension_numbers = #tpu.dot_dimension_numbers<[1], [0], [0], [1], [0, 0, 1, 1], [], []>} : vector<2x32xf32>, vector<32x32xf32>, vector<2x32xf32> -> vector<2x32xf32>
    %45 = arith.addf %44, %43 : vector<2x32xf32>
    %46 = vector.broadcast %30 : f32 to vector<1x32xf32>
    %47 = arith.mulf %46, %9 : vector<1x32xf32>
    %48 = arith.addf %47, %10 : vector<1x32xf32>
    %49 = vector.broadcast %48 : vector<1x32xf32> to vector<2x32xf32>
    %50 = arith.addf %45, %49 : vector<2x32xf32>
    %cst_25 = arith.constant dense<0.000000e+00> : vector<2x32xf32>
    %51 = tpu.matmul %50, %3, %cst_25 {dimension_numbers = #tpu.dot_dimension_numbers<[1], [0], [0], [1], [0, 0, 1, 1], [], []>} : vector<2x32xf32>, vector<32x32xf32>, vector<2x32xf32> -> vector<2x32xf32>
    %52 = vector.broadcast %11 : vector<1x32xf32> to vector<2x32xf32>
    %53 = arith.addf %51, %52 : vector<2x32xf32>
    %54 = arith.negf %53 : vector<2x32xf32>
    %55 = math.exp %54 : vector<2x32xf32>
    %cst_26 = arith.constant 1.000000e+00 : f32
    %56 = vector.broadcast %cst_26 : f32 to vector<2x32xf32>
    %57 = arith.addf %56, %55 : vector<2x32xf32>
    %58 = arith.divf %56, %57 : vector<2x32xf32>
    %59 = arith.mulf %53, %58 : vector<2x32xf32>
    %cst_27 = arith.constant dense<0.000000e+00> : vector<2x32xf32>
    %60 = tpu.matmul %59, %4, %cst_27 {dimension_numbers = #tpu.dot_dimension_numbers<[1], [0], [0], [1], [0, 0, 1, 1], [], []>} : vector<2x32xf32>, vector<32x32xf32>, vector<2x32xf32> -> vector<2x32xf32>
    %61 = vector.broadcast %12 : vector<1x32xf32> to vector<2x32xf32>
    %62 = arith.addf %60, %61 : vector<2x32xf32>
    %63 = arith.negf %62 : vector<2x32xf32>
    %64 = math.exp %63 : vector<2x32xf32>
    %cst_28 = arith.constant 1.000000e+00 : f32
    %65 = vector.broadcast %cst_28 : f32 to vector<2x32xf32>
    %66 = arith.addf %65, %64 : vector<2x32xf32>
    %67 = arith.divf %65, %66 : vector<2x32xf32>
    %68 = arith.mulf %62, %67 : vector<2x32xf32>
    %cst_29 = arith.constant dense<0.000000e+00> : vector<2x32xf32>
    %69 = tpu.matmul %68, %5, %cst_29 {dimension_numbers = #tpu.dot_dimension_numbers<[1], [0], [0], [1], [0, 0, 1, 1], [], []>} : vector<2x32xf32>, vector<32x32xf32>, vector<2x32xf32> -> vector<2x32xf32>
    %70 = vector.broadcast %13 : vector<1x32xf32> to vector<2x32xf32>
    %71 = arith.addf %69, %70 : vector<2x32xf32>
    %cst_30 = arith.constant 2.000000e-01 : f32
    %72 = arith.mulf %25, %cst_30 : f32
    %73 = vector.broadcast %72 : f32 to vector<2x32xf32>
    %74 = arith.mulf %73, %71 : vector<2x32xf32>
    %75 = arith.addf %21, %74 : vector<2x32xf32>
    %cst_31 = arith.constant 2.000000e-01 : f32
    %76 = arith.mulf %25, %cst_31 : f32
    %77 = arith.addf %23, %76 : f32
    %78 = vector.extract_strided_slice %28 {offsets = [0, 0], sizes = [2, 32], strides = [1, 1]} : vector<8x32xf32> to vector<2x32xf32>
    %79 = vector.extract_strided_slice %28 {offsets = [2, 0], sizes = [2, 32], strides = [1, 1]} : vector<8x32xf32> to vector<2x32xf32>
    %80 = vector.extract_strided_slice %28 {offsets = [4, 0], sizes = [2, 32], strides = [1, 1]} : vector<8x32xf32> to vector<2x32xf32>
    %81 = vector.extract_strided_slice %28 {offsets = [6, 0], sizes = [2, 32], strides = [1, 1]} : vector<8x32xf32> to vector<2x32xf32>
    %82 = vector.broadcast %76 : f32 to vector<2x32xf32>
    %83 = arith.mulf %82, %81 : vector<2x32xf32>
    %84 = arith.addf %80, %83 : vector<2x32xf32>
    %85 = vector.broadcast %76 : f32 to vector<2x32xf32>
    %86 = arith.mulf %85, %84 : vector<2x32xf32>
    %87 = arith.addf %79, %86 : vector<2x32xf32>
    %88 = vector.broadcast %76 : f32 to vector<2x32xf32>
    %89 = arith.mulf %88, %87 : vector<2x32xf32>
    %90 = arith.addf %78, %89 : vector<2x32xf32>
    %cst_32 = arith.constant dense<0.000000e+00> : vector<2x32xf32>
    %91 = tpu.matmul %75, %1, %cst_32 {dimension_numbers = #tpu.dot_dimension_numbers<[1], [0], [0], [1], [0, 0, 1, 1], [], []>} : vector<2x32xf32>, vector<32x32xf32>, vector<2x32xf32> -> vector<2x32xf32>
    %92 = arith.addf %91, %90 : vector<2x32xf32>
    %93 = vector.broadcast %77 : f32 to vector<1x32xf32>
    %94 = arith.mulf %93, %9 : vector<1x32xf32>
    %95 = arith.addf %94, %10 : vector<1x32xf32>
    %96 = vector.broadcast %95 : vector<1x32xf32> to vector<2x32xf32>
    %97 = arith.addf %92, %96 : vector<2x32xf32>
    %cst_33 = arith.constant dense<0.000000e+00> : vector<2x32xf32>
    %98 = tpu.matmul %97, %3, %cst_33 {dimension_numbers = #tpu.dot_dimension_numbers<[1], [0], [0], [1], [0, 0, 1, 1], [], []>} : vector<2x32xf32>, vector<32x32xf32>, vector<2x32xf32> -> vector<2x32xf32>
    %99 = vector.broadcast %11 : vector<1x32xf32> to vector<2x32xf32>
    %100 = arith.addf %98, %99 : vector<2x32xf32>
    %101 = arith.negf %100 : vector<2x32xf32>
    %102 = math.exp %101 : vector<2x32xf32>
    %cst_34 = arith.constant 1.000000e+00 : f32
    %103 = vector.broadcast %cst_34 : f32 to vector<2x32xf32>
    %104 = arith.addf %103, %102 : vector<2x32xf32>
    %105 = arith.divf %103, %104 : vector<2x32xf32>
    %106 = arith.mulf %100, %105 : vector<2x32xf32>
    %cst_35 = arith.constant dense<0.000000e+00> : vector<2x32xf32>
    %107 = tpu.matmul %106, %4, %cst_35 {dimension_numbers = #tpu.dot_dimension_numbers<[1], [0], [0], [1], [0, 0, 1, 1], [], []>} : vector<2x32xf32>, vector<32x32xf32>, vector<2x32xf32> -> vector<2x32xf32>
    %108 = vector.broadcast %12 : vector<1x32xf32> to vector<2x32xf32>
    %109 = arith.addf %107, %108 : vector<2x32xf32>
    %110 = arith.negf %109 : vector<2x32xf32>
    %111 = math.exp %110 : vector<2x32xf32>
    %cst_36 = arith.constant 1.000000e+00 : f32
    %112 = vector.broadcast %cst_36 : f32 to vector<2x32xf32>
    %113 = arith.addf %112, %111 : vector<2x32xf32>
    %114 = arith.divf %112, %113 : vector<2x32xf32>
    %115 = arith.mulf %109, %114 : vector<2x32xf32>
    %cst_37 = arith.constant dense<0.000000e+00> : vector<2x32xf32>
    %116 = tpu.matmul %115, %5, %cst_37 {dimension_numbers = #tpu.dot_dimension_numbers<[1], [0], [0], [1], [0, 0, 1, 1], [], []>} : vector<2x32xf32>, vector<32x32xf32>, vector<2x32xf32> -> vector<2x32xf32>
    %117 = vector.broadcast %13 : vector<1x32xf32> to vector<2x32xf32>
    %118 = arith.addf %116, %117 : vector<2x32xf32>
    %cst_38 = arith.constant 7.500000e-02 : f32
    %119 = arith.mulf %25, %cst_38 : f32
    %120 = vector.broadcast %119 : f32 to vector<2x32xf32>
    %121 = arith.mulf %120, %71 : vector<2x32xf32>
    %122 = arith.addf %21, %121 : vector<2x32xf32>
    %cst_39 = arith.constant 2.250000e-01 : f32
    %123 = arith.mulf %25, %cst_39 : f32
    %124 = vector.broadcast %123 : f32 to vector<2x32xf32>
    %125 = arith.mulf %124, %118 : vector<2x32xf32>
    %126 = arith.addf %122, %125 : vector<2x32xf32>
    %cst_40 = arith.constant 3.000000e-01 : f32
    %127 = arith.mulf %25, %cst_40 : f32
    %128 = arith.addf %23, %127 : f32
    %129 = vector.extract_strided_slice %28 {offsets = [0, 0], sizes = [2, 32], strides = [1, 1]} : vector<8x32xf32> to vector<2x32xf32>
    %130 = vector.extract_strided_slice %28 {offsets = [2, 0], sizes = [2, 32], strides = [1, 1]} : vector<8x32xf32> to vector<2x32xf32>
    %131 = vector.extract_strided_slice %28 {offsets = [4, 0], sizes = [2, 32], strides = [1, 1]} : vector<8x32xf32> to vector<2x32xf32>
    %132 = vector.extract_strided_slice %28 {offsets = [6, 0], sizes = [2, 32], strides = [1, 1]} : vector<8x32xf32> to vector<2x32xf32>
    %133 = vector.broadcast %127 : f32 to vector<2x32xf32>
    %134 = arith.mulf %133, %132 : vector<2x32xf32>
    %135 = arith.addf %131, %134 : vector<2x32xf32>
    %136 = vector.broadcast %127 : f32 to vector<2x32xf32>
    %137 = arith.mulf %136, %135 : vector<2x32xf32>
    %138 = arith.addf %130, %137 : vector<2x32xf32>
    %139 = vector.broadcast %127 : f32 to vector<2x32xf32>
    %140 = arith.mulf %139, %138 : vector<2x32xf32>
    %141 = arith.addf %129, %140 : vector<2x32xf32>
    %cst_41 = arith.constant dense<0.000000e+00> : vector<2x32xf32>
    %142 = tpu.matmul %126, %1, %cst_41 {dimension_numbers = #tpu.dot_dimension_numbers<[1], [0], [0], [1], [0, 0, 1, 1], [], []>} : vector<2x32xf32>, vector<32x32xf32>, vector<2x32xf32> -> vector<2x32xf32>
    %143 = arith.addf %142, %141 : vector<2x32xf32>
    %144 = vector.broadcast %128 : f32 to vector<1x32xf32>
    %145 = arith.mulf %144, %9 : vector<1x32xf32>
    %146 = arith.addf %145, %10 : vector<1x32xf32>
    %147 = vector.broadcast %146 : vector<1x32xf32> to vector<2x32xf32>
    %148 = arith.addf %143, %147 : vector<2x32xf32>
    %cst_42 = arith.constant dense<0.000000e+00> : vector<2x32xf32>
    %149 = tpu.matmul %148, %3, %cst_42 {dimension_numbers = #tpu.dot_dimension_numbers<[1], [0], [0], [1], [0, 0, 1, 1], [], []>} : vector<2x32xf32>, vector<32x32xf32>, vector<2x32xf32> -> vector<2x32xf32>
    %150 = vector.broadcast %11 : vector<1x32xf32> to vector<2x32xf32>
    %151 = arith.addf %149, %150 : vector<2x32xf32>
    %152 = arith.negf %151 : vector<2x32xf32>
    %153 = math.exp %152 : vector<2x32xf32>
    %cst_43 = arith.constant 1.000000e+00 : f32
    %154 = vector.broadcast %cst_43 : f32 to vector<2x32xf32>
    %155 = arith.addf %154, %153 : vector<2x32xf32>
    %156 = arith.divf %154, %155 : vector<2x32xf32>
    %157 = arith.mulf %151, %156 : vector<2x32xf32>
    %cst_44 = arith.constant dense<0.000000e+00> : vector<2x32xf32>
    %158 = tpu.matmul %157, %4, %cst_44 {dimension_numbers = #tpu.dot_dimension_numbers<[1], [0], [0], [1], [0, 0, 1, 1], [], []>} : vector<2x32xf32>, vector<32x32xf32>, vector<2x32xf32> -> vector<2x32xf32>
    %159 = vector.broadcast %12 : vector<1x32xf32> to vector<2x32xf32>
    %160 = arith.addf %158, %159 : vector<2x32xf32>
    %161 = arith.negf %160 : vector<2x32xf32>
    %162 = math.exp %161 : vector<2x32xf32>
    %cst_45 = arith.constant 1.000000e+00 : f32
    %163 = vector.broadcast %cst_45 : f32 to vector<2x32xf32>
    %164 = arith.addf %163, %162 : vector<2x32xf32>
    %165 = arith.divf %163, %164 : vector<2x32xf32>
    %166 = arith.mulf %160, %165 : vector<2x32xf32>
    %cst_46 = arith.constant dense<0.000000e+00> : vector<2x32xf32>
    %167 = tpu.matmul %166, %5, %cst_46 {dimension_numbers = #tpu.dot_dimension_numbers<[1], [0], [0], [1], [0, 0, 1, 1], [], []>} : vector<2x32xf32>, vector<32x32xf32>, vector<2x32xf32> -> vector<2x32xf32>
    %168 = vector.broadcast %13 : vector<1x32xf32> to vector<2x32xf32>
    %169 = arith.addf %167, %168 : vector<2x32xf32>
    %cst_47 = arith.constant 0.977777779 : f32
    %170 = arith.mulf %25, %cst_47 : f32
    %171 = vector.broadcast %170 : f32 to vector<2x32xf32>
    %172 = arith.mulf %171, %71 : vector<2x32xf32>
    %173 = arith.addf %21, %172 : vector<2x32xf32>
    %cst_48 = arith.constant -3.73333335 : f32
    %174 = arith.mulf %25, %cst_48 : f32
    %175 = vector.broadcast %174 : f32 to vector<2x32xf32>
    %176 = arith.mulf %175, %118 : vector<2x32xf32>
    %177 = arith.addf %173, %176 : vector<2x32xf32>
    %cst_49 = arith.constant 3.55555558 : f32
    %178 = arith.mulf %25, %cst_49 : f32
    %179 = vector.broadcast %178 : f32 to vector<2x32xf32>
    %180 = arith.mulf %179, %169 : vector<2x32xf32>
    %181 = arith.addf %177, %180 : vector<2x32xf32>
    %cst_50 = arith.constant 8.000000e-01 : f32
    %182 = arith.mulf %25, %cst_50 : f32
    %183 = arith.addf %23, %182 : f32
    %184 = vector.extract_strided_slice %28 {offsets = [0, 0], sizes = [2, 32], strides = [1, 1]} : vector<8x32xf32> to vector<2x32xf32>
    %185 = vector.extract_strided_slice %28 {offsets = [2, 0], sizes = [2, 32], strides = [1, 1]} : vector<8x32xf32> to vector<2x32xf32>
    %186 = vector.extract_strided_slice %28 {offsets = [4, 0], sizes = [2, 32], strides = [1, 1]} : vector<8x32xf32> to vector<2x32xf32>
    %187 = vector.extract_strided_slice %28 {offsets = [6, 0], sizes = [2, 32], strides = [1, 1]} : vector<8x32xf32> to vector<2x32xf32>
    %188 = vector.broadcast %182 : f32 to vector<2x32xf32>
    %189 = arith.mulf %188, %187 : vector<2x32xf32>
    %190 = arith.addf %186, %189 : vector<2x32xf32>
    %191 = vector.broadcast %182 : f32 to vector<2x32xf32>
    %192 = arith.mulf %191, %190 : vector<2x32xf32>
    %193 = arith.addf %185, %192 : vector<2x32xf32>
    %194 = vector.broadcast %182 : f32 to vector<2x32xf32>
    %195 = arith.mulf %194, %193 : vector<2x32xf32>
    %196 = arith.addf %184, %195 : vector<2x32xf32>
    %cst_51 = arith.constant dense<0.000000e+00> : vector<2x32xf32>
    %197 = tpu.matmul %181, %1, %cst_51 {dimension_numbers = #tpu.dot_dimension_numbers<[1], [0], [0], [1], [0, 0, 1, 1], [], []>} : vector<2x32xf32>, vector<32x32xf32>, vector<2x32xf32> -> vector<2x32xf32>
    %198 = arith.addf %197, %196 : vector<2x32xf32>
    %199 = vector.broadcast %183 : f32 to vector<1x32xf32>
    %200 = arith.mulf %199, %9 : vector<1x32xf32>
    %201 = arith.addf %200, %10 : vector<1x32xf32>
    %202 = vector.broadcast %201 : vector<1x32xf32> to vector<2x32xf32>
    %203 = arith.addf %198, %202 : vector<2x32xf32>
    %cst_52 = arith.constant dense<0.000000e+00> : vector<2x32xf32>
    %204 = tpu.matmul %203, %3, %cst_52 {dimension_numbers = #tpu.dot_dimension_numbers<[1], [0], [0], [1], [0, 0, 1, 1], [], []>} : vector<2x32xf32>, vector<32x32xf32>, vector<2x32xf32> -> vector<2x32xf32>
    %205 = vector.broadcast %11 : vector<1x32xf32> to vector<2x32xf32>
    %206 = arith.addf %204, %205 : vector<2x32xf32>
    %207 = arith.negf %206 : vector<2x32xf32>
    %208 = math.exp %207 : vector<2x32xf32>
    %cst_53 = arith.constant 1.000000e+00 : f32
    %209 = vector.broadcast %cst_53 : f32 to vector<2x32xf32>
    %210 = arith.addf %209, %208 : vector<2x32xf32>
    %211 = arith.divf %209, %210 : vector<2x32xf32>
    %212 = arith.mulf %206, %211 : vector<2x32xf32>
    %cst_54 = arith.constant dense<0.000000e+00> : vector<2x32xf32>
    %213 = tpu.matmul %212, %4, %cst_54 {dimension_numbers = #tpu.dot_dimension_numbers<[1], [0], [0], [1], [0, 0, 1, 1], [], []>} : vector<2x32xf32>, vector<32x32xf32>, vector<2x32xf32> -> vector<2x32xf32>
    %214 = vector.broadcast %12 : vector<1x32xf32> to vector<2x32xf32>
    %215 = arith.addf %213, %214 : vector<2x32xf32>
    %216 = arith.negf %215 : vector<2x32xf32>
    %217 = math.exp %216 : vector<2x32xf32>
    %cst_55 = arith.constant 1.000000e+00 : f32
    %218 = vector.broadcast %cst_55 : f32 to vector<2x32xf32>
    %219 = arith.addf %218, %217 : vector<2x32xf32>
    %220 = arith.divf %218, %219 : vector<2x32xf32>
    %221 = arith.mulf %215, %220 : vector<2x32xf32>
    %cst_56 = arith.constant dense<0.000000e+00> : vector<2x32xf32>
    %222 = tpu.matmul %221, %5, %cst_56 {dimension_numbers = #tpu.dot_dimension_numbers<[1], [0], [0], [1], [0, 0, 1, 1], [], []>} : vector<2x32xf32>, vector<32x32xf32>, vector<2x32xf32> -> vector<2x32xf32>
    %223 = vector.broadcast %13 : vector<1x32xf32> to vector<2x32xf32>
    %224 = arith.addf %222, %223 : vector<2x32xf32>
    %cst_57 = arith.constant 2.95259857 : f32
    %225 = arith.mulf %25, %cst_57 : f32
    %226 = vector.broadcast %225 : f32 to vector<2x32xf32>
    %227 = arith.mulf %226, %71 : vector<2x32xf32>
    %228 = arith.addf %21, %227 : vector<2x32xf32>
    %cst_58 = arith.constant -11.5957937 : f32
    %229 = arith.mulf %25, %cst_58 : f32
    %230 = vector.broadcast %229 : f32 to vector<2x32xf32>
    %231 = arith.mulf %230, %118 : vector<2x32xf32>
    %232 = arith.addf %228, %231 : vector<2x32xf32>
    %cst_59 = arith.constant 9.82289314 : f32
    %233 = arith.mulf %25, %cst_59 : f32
    %234 = vector.broadcast %233 : f32 to vector<2x32xf32>
    %235 = arith.mulf %234, %169 : vector<2x32xf32>
    %236 = arith.addf %232, %235 : vector<2x32xf32>
    %cst_60 = arith.constant -0.290809333 : f32
    %237 = arith.mulf %25, %cst_60 : f32
    %238 = vector.broadcast %237 : f32 to vector<2x32xf32>
    %239 = arith.mulf %238, %224 : vector<2x32xf32>
    %240 = arith.addf %236, %239 : vector<2x32xf32>
    %cst_61 = arith.constant 0.888888895 : f32
    %241 = arith.mulf %25, %cst_61 : f32
    %242 = arith.addf %23, %241 : f32
    %243 = vector.extract_strided_slice %28 {offsets = [0, 0], sizes = [2, 32], strides = [1, 1]} : vector<8x32xf32> to vector<2x32xf32>
    %244 = vector.extract_strided_slice %28 {offsets = [2, 0], sizes = [2, 32], strides = [1, 1]} : vector<8x32xf32> to vector<2x32xf32>
    %245 = vector.extract_strided_slice %28 {offsets = [4, 0], sizes = [2, 32], strides = [1, 1]} : vector<8x32xf32> to vector<2x32xf32>
    %246 = vector.extract_strided_slice %28 {offsets = [6, 0], sizes = [2, 32], strides = [1, 1]} : vector<8x32xf32> to vector<2x32xf32>
    %247 = vector.broadcast %241 : f32 to vector<2x32xf32>
    %248 = arith.mulf %247, %246 : vector<2x32xf32>
    %249 = arith.addf %245, %248 : vector<2x32xf32>
    %250 = vector.broadcast %241 : f32 to vector<2x32xf32>
    %251 = arith.mulf %250, %249 : vector<2x32xf32>
    %252 = arith.addf %244, %251 : vector<2x32xf32>
    %253 = vector.broadcast %241 : f32 to vector<2x32xf32>
    %254 = arith.mulf %253, %252 : vector<2x32xf32>
    %255 = arith.addf %243, %254 : vector<2x32xf32>
    %cst_62 = arith.constant dense<0.000000e+00> : vector<2x32xf32>
    %256 = tpu.matmul %240, %1, %cst_62 {dimension_numbers = #tpu.dot_dimension_numbers<[1], [0], [0], [1], [0, 0, 1, 1], [], []>} : vector<2x32xf32>, vector<32x32xf32>, vector<2x32xf32> -> vector<2x32xf32>
    %257 = arith.addf %256, %255 : vector<2x32xf32>
    %258 = vector.broadcast %242 : f32 to vector<1x32xf32>
    %259 = arith.mulf %258, %9 : vector<1x32xf32>
    %260 = arith.addf %259, %10 : vector<1x32xf32>
    %261 = vector.broadcast %260 : vector<1x32xf32> to vector<2x32xf32>
    %262 = arith.addf %257, %261 : vector<2x32xf32>
    %cst_63 = arith.constant dense<0.000000e+00> : vector<2x32xf32>
    %263 = tpu.matmul %262, %3, %cst_63 {dimension_numbers = #tpu.dot_dimension_numbers<[1], [0], [0], [1], [0, 0, 1, 1], [], []>} : vector<2x32xf32>, vector<32x32xf32>, vector<2x32xf32> -> vector<2x32xf32>
    %264 = vector.broadcast %11 : vector<1x32xf32> to vector<2x32xf32>
    %265 = arith.addf %263, %264 : vector<2x32xf32>
    %266 = arith.negf %265 : vector<2x32xf32>
    %267 = math.exp %266 : vector<2x32xf32>
    %cst_64 = arith.constant 1.000000e+00 : f32
    %268 = vector.broadcast %cst_64 : f32 to vector<2x32xf32>
    %269 = arith.addf %268, %267 : vector<2x32xf32>
    %270 = arith.divf %268, %269 : vector<2x32xf32>
    %271 = arith.mulf %265, %270 : vector<2x32xf32>
    %cst_65 = arith.constant dense<0.000000e+00> : vector<2x32xf32>
    %272 = tpu.matmul %271, %4, %cst_65 {dimension_numbers = #tpu.dot_dimension_numbers<[1], [0], [0], [1], [0, 0, 1, 1], [], []>} : vector<2x32xf32>, vector<32x32xf32>, vector<2x32xf32> -> vector<2x32xf32>
    %273 = vector.broadcast %12 : vector<1x32xf32> to vector<2x32xf32>
    %274 = arith.addf %272, %273 : vector<2x32xf32>
    %275 = arith.negf %274 : vector<2x32xf32>
    %276 = math.exp %275 : vector<2x32xf32>
    %cst_66 = arith.constant 1.000000e+00 : f32
    %277 = vector.broadcast %cst_66 : f32 to vector<2x32xf32>
    %278 = arith.addf %277, %276 : vector<2x32xf32>
    %279 = arith.divf %277, %278 : vector<2x32xf32>
    %280 = arith.mulf %274, %279 : vector<2x32xf32>
    %cst_67 = arith.constant dense<0.000000e+00> : vector<2x32xf32>
    %281 = tpu.matmul %280, %5, %cst_67 {dimension_numbers = #tpu.dot_dimension_numbers<[1], [0], [0], [1], [0, 0, 1, 1], [], []>} : vector<2x32xf32>, vector<32x32xf32>, vector<2x32xf32> -> vector<2x32xf32>
    %282 = vector.broadcast %13 : vector<1x32xf32> to vector<2x32xf32>
    %283 = arith.addf %281, %282 : vector<2x32xf32>
    %cst_68 = arith.constant 2.84627533 : f32
    %284 = arith.mulf %25, %cst_68 : f32
    %285 = vector.broadcast %284 : f32 to vector<2x32xf32>
    %286 = arith.mulf %285, %71 : vector<2x32xf32>
    %287 = arith.addf %21, %286 : vector<2x32xf32>
    %cst_69 = arith.constant -10.757576 : f32
    %288 = arith.mulf %25, %cst_69 : f32
    %289 = vector.broadcast %288 : f32 to vector<2x32xf32>
    %290 = arith.mulf %289, %118 : vector<2x32xf32>
    %291 = arith.addf %287, %290 : vector<2x32xf32>
    %cst_70 = arith.constant 8.90642261 : f32
    %292 = arith.mulf %25, %cst_70 : f32
    %293 = vector.broadcast %292 : f32 to vector<2x32xf32>
    %294 = arith.mulf %293, %169 : vector<2x32xf32>
    %295 = arith.addf %291, %294 : vector<2x32xf32>
    %cst_71 = arith.constant 0.278409094 : f32
    %296 = arith.mulf %25, %cst_71 : f32
    %297 = vector.broadcast %296 : f32 to vector<2x32xf32>
    %298 = arith.mulf %297, %224 : vector<2x32xf32>
    %299 = arith.addf %295, %298 : vector<2x32xf32>
    %cst_72 = arith.constant -0.273531318 : f32
    %300 = arith.mulf %25, %cst_72 : f32
    %301 = vector.broadcast %300 : f32 to vector<2x32xf32>
    %302 = arith.mulf %301, %283 : vector<2x32xf32>
    %303 = arith.addf %299, %302 : vector<2x32xf32>
    %cst_73 = arith.constant 1.000000e+00 : f32
    %304 = arith.mulf %25, %cst_73 : f32
    %305 = arith.addf %23, %304 : f32
    %306 = vector.extract_strided_slice %28 {offsets = [0, 0], sizes = [2, 32], strides = [1, 1]} : vector<8x32xf32> to vector<2x32xf32>
    %307 = vector.extract_strided_slice %28 {offsets = [2, 0], sizes = [2, 32], strides = [1, 1]} : vector<8x32xf32> to vector<2x32xf32>
    %308 = vector.extract_strided_slice %28 {offsets = [4, 0], sizes = [2, 32], strides = [1, 1]} : vector<8x32xf32> to vector<2x32xf32>
    %309 = vector.extract_strided_slice %28 {offsets = [6, 0], sizes = [2, 32], strides = [1, 1]} : vector<8x32xf32> to vector<2x32xf32>
    %310 = vector.broadcast %304 : f32 to vector<2x32xf32>
    %311 = arith.mulf %310, %309 : vector<2x32xf32>
    %312 = arith.addf %308, %311 : vector<2x32xf32>
    %313 = vector.broadcast %304 : f32 to vector<2x32xf32>
    %314 = arith.mulf %313, %312 : vector<2x32xf32>
    %315 = arith.addf %307, %314 : vector<2x32xf32>
    %316 = vector.broadcast %304 : f32 to vector<2x32xf32>
    %317 = arith.mulf %316, %315 : vector<2x32xf32>
    %318 = arith.addf %306, %317 : vector<2x32xf32>
    %cst_74 = arith.constant dense<0.000000e+00> : vector<2x32xf32>
    %319 = tpu.matmul %303, %1, %cst_74 {dimension_numbers = #tpu.dot_dimension_numbers<[1], [0], [0], [1], [0, 0, 1, 1], [], []>} : vector<2x32xf32>, vector<32x32xf32>, vector<2x32xf32> -> vector<2x32xf32>
    %320 = arith.addf %319, %318 : vector<2x32xf32>
    %321 = vector.broadcast %305 : f32 to vector<1x32xf32>
    %322 = arith.mulf %321, %9 : vector<1x32xf32>
    %323 = arith.addf %322, %10 : vector<1x32xf32>
    %324 = vector.broadcast %323 : vector<1x32xf32> to vector<2x32xf32>
    %325 = arith.addf %320, %324 : vector<2x32xf32>
    %cst_75 = arith.constant dense<0.000000e+00> : vector<2x32xf32>
    %326 = tpu.matmul %325, %3, %cst_75 {dimension_numbers = #tpu.dot_dimension_numbers<[1], [0], [0], [1], [0, 0, 1, 1], [], []>} : vector<2x32xf32>, vector<32x32xf32>, vector<2x32xf32> -> vector<2x32xf32>
    %327 = vector.broadcast %11 : vector<1x32xf32> to vector<2x32xf32>
    %328 = arith.addf %326, %327 : vector<2x32xf32>
    %329 = arith.negf %328 : vector<2x32xf32>
    %330 = math.exp %329 : vector<2x32xf32>
    %cst_76 = arith.constant 1.000000e+00 : f32
    %331 = vector.broadcast %cst_76 : f32 to vector<2x32xf32>
    %332 = arith.addf %331, %330 : vector<2x32xf32>
    %333 = arith.divf %331, %332 : vector<2x32xf32>
    %334 = arith.mulf %328, %333 : vector<2x32xf32>
    %cst_77 = arith.constant dense<0.000000e+00> : vector<2x32xf32>
    %335 = tpu.matmul %334, %4, %cst_77 {dimension_numbers = #tpu.dot_dimension_numbers<[1], [0], [0], [1], [0, 0, 1, 1], [], []>} : vector<2x32xf32>, vector<32x32xf32>, vector<2x32xf32> -> vector<2x32xf32>
    %336 = vector.broadcast %12 : vector<1x32xf32> to vector<2x32xf32>
    %337 = arith.addf %335, %336 : vector<2x32xf32>
    %338 = arith.negf %337 : vector<2x32xf32>
    %339 = math.exp %338 : vector<2x32xf32>
    %cst_78 = arith.constant 1.000000e+00 : f32
    %340 = vector.broadcast %cst_78 : f32 to vector<2x32xf32>
    %341 = arith.addf %340, %339 : vector<2x32xf32>
    %342 = arith.divf %340, %341 : vector<2x32xf32>
    %343 = arith.mulf %337, %342 : vector<2x32xf32>
    %cst_79 = arith.constant dense<0.000000e+00> : vector<2x32xf32>
    %344 = tpu.matmul %343, %5, %cst_79 {dimension_numbers = #tpu.dot_dimension_numbers<[1], [0], [0], [1], [0, 0, 1, 1], [], []>} : vector<2x32xf32>, vector<32x32xf32>, vector<2x32xf32> -> vector<2x32xf32>
    %345 = vector.broadcast %13 : vector<1x32xf32> to vector<2x32xf32>
    %346 = arith.addf %344, %345 : vector<2x32xf32>
    %cst_80 = arith.constant 0.0911458358 : f32
    %347 = arith.mulf %25, %cst_80 : f32
    %348 = vector.broadcast %347 : f32 to vector<2x32xf32>
    %349 = arith.mulf %348, %71 : vector<2x32xf32>
    %350 = arith.addf %21, %349 : vector<2x32xf32>
    %cst_81 = arith.constant 0.449236304 : f32
    %351 = arith.mulf %25, %cst_81 : f32
    %352 = vector.broadcast %351 : f32 to vector<2x32xf32>
    %353 = arith.mulf %352, %169 : vector<2x32xf32>
    %354 = arith.addf %350, %353 : vector<2x32xf32>
    %cst_82 = arith.constant 0.651041686 : f32
    %355 = arith.mulf %25, %cst_82 : f32
    %356 = vector.broadcast %355 : f32 to vector<2x32xf32>
    %357 = arith.mulf %356, %224 : vector<2x32xf32>
    %358 = arith.addf %354, %357 : vector<2x32xf32>
    %cst_83 = arith.constant -0.322376192 : f32
    %359 = arith.mulf %25, %cst_83 : f32
    %360 = vector.broadcast %359 : f32 to vector<2x32xf32>
    %361 = arith.mulf %360, %283 : vector<2x32xf32>
    %362 = arith.addf %358, %361 : vector<2x32xf32>
    %cst_84 = arith.constant 0.130952388 : f32
    %363 = arith.mulf %25, %cst_84 : f32
    %364 = vector.broadcast %363 : f32 to vector<2x32xf32>
    %365 = arith.mulf %364, %346 : vector<2x32xf32>
    %366 = arith.addf %362, %365 : vector<2x32xf32>
    %c2 = arith.constant 2 : index
    %c0_85 = arith.constant 0 : index
    %367 = vector.load %arg10[%c2, %c0_85] : memref<16x32xf32, #tpu.memory_space<vmem>>, vector<2x32xf32>
    tpu.vector_store %arg10[%c2, %c0_85], %366 {strides = array<i32>} : memref<16x32xf32, #tpu.memory_space<vmem>>, vector<2x32xf32>,
    %c1_86 = arith.constant 1 : index
    %368 = memref.load %arg0[%c1_86] : memref<8xf32, #tpu.memory_space<smem>>
    %c2_87 = arith.constant 2 : index
    %369 = memref.load %arg0[%c2_87] : memref<8xf32, #tpu.memory_space<smem>>
    %370 = arith.subf %369, %368 : f32
    %c1_88 = arith.constant 1 : index
    %c0_89 = arith.constant 0 : index
    %c0_90 = arith.constant 0 : index
    %371 = vector.load %arg1[%c1_88, %c0_89, %c0_90] : memref<7x8x4xf32, #tpu.memory_space<vmem>>, vector<1x8x4xf32>
    %372 = vector.shape_cast %371 : vector<1x8x4xf32> to vector<8x4xf32>
    %cst_91 = arith.constant dense<0.000000e+00> : vector<8x32xf32>
    %373 = tpu.matmul %372, %2, %cst_91 {dimension_numbers = #tpu.dot_dimension_numbers<[1], [0], [0], [1], [0, 0, 1, 1], [], []>} : vector<8x4xf32>, vector<4x32xf32>, vector<8x32xf32> -> vector<8x32xf32>
    %cst_92 = arith.constant 0.000000e+00 : f32
    %374 = arith.mulf %370, %cst_92 : f32
    %375 = arith.addf %368, %374 : f32
    %376 = vector.extract_strided_slice %373 {offsets = [0, 0], sizes = [2, 32], strides = [1, 1]} : vector<8x32xf32> to vector<2x32xf32>
    %377 = vector.extract_strided_slice %373 {offsets = [2, 0], sizes = [2, 32], strides = [1, 1]} : vector<8x32xf32> to vector<2x32xf32>
    %378 = vector.extract_strided_slice %373 {offsets = [4, 0], sizes = [2, 32], strides = [1, 1]} : vector<8x32xf32> to vector<2x32xf32>
    %379 = vector.extract_strided_slice %373 {offsets = [6, 0], sizes = [2, 32], strides = [1, 1]} : vector<8x32xf32> to vector<2x32xf32>
    %380 = vector.broadcast %374 : f32 to vector<2x32xf32>
    %381 = arith.mulf %380, %379 : vector<2x32xf32>
    %382 = arith.addf %378, %381 : vector<2x32xf32>
    %383 = vector.broadcast %374 : f32 to vector<2x32xf32>
    %384 = arith.mulf %383, %382 : vector<2x32xf32>
    %385 = arith.addf %377, %384 : vector<2x32xf32>
    %386 = vector.broadcast %374 : f32 to vector<2x32xf32>
    %387 = arith.mulf %386, %385 : vector<2x32xf32>
    %388 = arith.addf %376, %387 : vector<2x32xf32>
    %cst_93 = arith.constant dense<0.000000e+00> : vector<2x32xf32>
    %389 = tpu.matmul %366, %1, %cst_93 {dimension_numbers = #tpu.dot_dimension_numbers<[1], [0], [0], [1], [0, 0, 1, 1], [], []>} : vector<2x32xf32>, vector<32x32xf32>, vector<2x32xf32> -> vector<2x32xf32>
    %390 = arith.addf %389, %388 : vector<2x32xf32>
    %391 = vector.broadcast %375 : f32 to vector<1x32xf32>
    %392 = arith.mulf %391, %9 : vector<1x32xf32>
    %393 = arith.addf %392, %10 : vector<1x32xf32>
    %394 = vector.broadcast %393 : vector<1x32xf32> to vector<2x32xf32>
    %395 = arith.addf %390, %394 : vector<2x32xf32>
    %cst_94 = arith.constant dense<0.000000e+00> : vector<2x32xf32>
    %396 = tpu.matmul %395, %3, %cst_94 {dimension_numbers = #tpu.dot_dimension_numbers<[1], [0], [0], [1], [0, 0, 1, 1], [], []>} : vector<2x32xf32>, vector<32x32xf32>, vector<2x32xf32> -> vector<2x32xf32>
    %397 = vector.broadcast %11 : vector<1x32xf32> to vector<2x32xf32>
    %398 = arith.addf %396, %397 : vector<2x32xf32>
    %399 = arith.negf %398 : vector<2x32xf32>
    %400 = math.exp %399 : vector<2x32xf32>
    %cst_95 = arith.constant 1.000000e+00 : f32
    %401 = vector.broadcast %cst_95 : f32 to vector<2x32xf32>
    %402 = arith.addf %401, %400 : vector<2x32xf32>
    %403 = arith.divf %401, %402 : vector<2x32xf32>
    %404 = arith.mulf %398, %403 : vector<2x32xf32>
    %cst_96 = arith.constant dense<0.000000e+00> : vector<2x32xf32>
    %405 = tpu.matmul %404, %4, %cst_96 {dimension_numbers = #tpu.dot_dimension_numbers<[1], [0], [0], [1], [0, 0, 1, 1], [], []>} : vector<2x32xf32>, vector<32x32xf32>, vector<2x32xf32> -> vector<2x32xf32>
    %406 = vector.broadcast %12 : vector<1x32xf32> to vector<2x32xf32>
    %407 = arith.addf %405, %406 : vector<2x32xf32>
    %408 = arith.negf %407 : vector<2x32xf32>
    %409 = math.exp %408 : vector<2x32xf32>
    %cst_97 = arith.constant 1.000000e+00 : f32
    %410 = vector.broadcast %cst_97 : f32 to vector<2x32xf32>
    %411 = arith.addf %410, %409 : vector<2x32xf32>
    %412 = arith.divf %410, %411 : vector<2x32xf32>
    %413 = arith.mulf %407, %412 : vector<2x32xf32>
    %cst_98 = arith.constant dense<0.000000e+00> : vector<2x32xf32>
    %414 = tpu.matmul %413, %5, %cst_98 {dimension_numbers = #tpu.dot_dimension_numbers<[1], [0], [0], [1], [0, 0, 1, 1], [], []>} : vector<2x32xf32>, vector<32x32xf32>, vector<2x32xf32> -> vector<2x32xf32>
    %415 = vector.broadcast %13 : vector<1x32xf32> to vector<2x32xf32>
    %416 = arith.addf %414, %415 : vector<2x32xf32>
    %cst_99 = arith.constant 2.000000e-01 : f32
    %417 = arith.mulf %370, %cst_99 : f32
    %418 = vector.broadcast %417 : f32 to vector<2x32xf32>
    %419 = arith.mulf %418, %416 : vector<2x32xf32>
    %420 = arith.addf %366, %419 : vector<2x32xf32>
    %cst_100 = arith.constant 2.000000e-01 : f32
    %421 = arith.mulf %370, %cst_100 : f32
    %422 = arith.addf %368, %421 : f32
    %423 = vector.extract_strided_slice %373 {offsets = [0, 0], sizes = [2, 32], strides = [1, 1]} : vector<8x32xf32> to vector<2x32xf32>
    %424 = vector.extract_strided_slice %373 {offsets = [2, 0], sizes = [2, 32], strides = [1, 1]} : vector<8x32xf32> to vector<2x32xf32>
    %425 = vector.extract_strided_slice %373 {offsets = [4, 0], sizes = [2, 32], strides = [1, 1]} : vector<8x32xf32> to vector<2x32xf32>
    %426 = vector.extract_strided_slice %373 {offsets = [6, 0], sizes = [2, 32], strides = [1, 1]} : vector<8x32xf32> to vector<2x32xf32>
    %427 = vector.broadcast %421 : f32 to vector<2x32xf32>
    %428 = arith.mulf %427, %426 : vector<2x32xf32>
    %429 = arith.addf %425, %428 : vector<2x32xf32>
    %430 = vector.broadcast %421 : f32 to vector<2x32xf32>
    %431 = arith.mulf %430, %429 : vector<2x32xf32>
    %432 = arith.addf %424, %431 : vector<2x32xf32>
    %433 = vector.broadcast %421 : f32 to vector<2x32xf32>
    %434 = arith.mulf %433, %432 : vector<2x32xf32>
    %435 = arith.addf %423, %434 : vector<2x32xf32>
    %cst_101 = arith.constant dense<0.000000e+00> : vector<2x32xf32>
    %436 = tpu.matmul %420, %1, %cst_101 {dimension_numbers = #tpu.dot_dimension_numbers<[1], [0], [0], [1], [0, 0, 1, 1], [], []>} : vector<2x32xf32>, vector<32x32xf32>, vector<2x32xf32> -> vector<2x32xf32>
    %437 = arith.addf %436, %435 : vector<2x32xf32>
    %438 = vector.broadcast %422 : f32 to vector<1x32xf32>
    %439 = arith.mulf %438, %9 : vector<1x32xf32>
    %440 = arith.addf %439, %10 : vector<1x32xf32>
    %441 = vector.broadcast %440 : vector<1x32xf32> to vector<2x32xf32>
    %442 = arith.addf %437, %441 : vector<2x32xf32>
    %cst_102 = arith.constant dense<0.000000e+00> : vector<2x32xf32>
    %443 = tpu.matmul %442, %3, %cst_102 {dimension_numbers = #tpu.dot_dimension_numbers<[1], [0], [0], [1], [0, 0, 1, 1], [], []>} : vector<2x32xf32>, vector<32x32xf32>, vector<2x32xf32> -> vector<2x32xf32>
    %444 = vector.broadcast %11 : vector<1x32xf32> to vector<2x32xf32>
    %445 = arith.addf %443, %444 : vector<2x32xf32>
    %446 = arith.negf %445 : vector<2x32xf32>
    %447 = math.exp %446 : vector<2x32xf32>
    %cst_103 = arith.constant 1.000000e+00 : f32
    %448 = vector.broadcast %cst_103 : f32 to vector<2x32xf32>
    %449 = arith.addf %448, %447 : vector<2x32xf32>
    %450 = arith.divf %448, %449 : vector<2x32xf32>
    %451 = arith.mulf %445, %450 : vector<2x32xf32>
    %cst_104 = arith.constant dense<0.000000e+00> : vector<2x32xf32>
    %452 = tpu.matmul %451, %4, %cst_104 {dimension_numbers = #tpu.dot_dimension_numbers<[1], [0], [0], [1], [0, 0, 1, 1], [], []>} : vector<2x32xf32>, vector<32x32xf32>, vector<2x32xf32> -> vector<2x32xf32>
    %453 = vector.broadcast %12 : vector<1x32xf32> to vector<2x32xf32>
    %454 = arith.addf %452, %453 : vector<2x32xf32>
    %455 = arith.negf %454 : vector<2x32xf32>
    %456 = math.exp %455 : vector<2x32xf32>
    %cst_105 = arith.constant 1.000000e+00 : f32
    %457 = vector.broadcast %cst_105 : f32 to vector<2x32xf32>
    %458 = arith.addf %457, %456 : vector<2x32xf32>
    %459 = arith.divf %457, %458 : vector<2x32xf32>
    %460 = arith.mulf %454, %459 : vector<2x32xf32>
    %cst_106 = arith.constant dense<0.000000e+00> : vector<2x32xf32>
    %461 = tpu.matmul %460, %5, %cst_106 {dimension_numbers = #tpu.dot_dimension_numbers<[1], [0], [0], [1], [0, 0, 1, 1], [], []>} : vector<2x32xf32>, vector<32x32xf32>, vector<2x32xf32> -> vector<2x32xf32>
    %462 = vector.broadcast %13 : vector<1x32xf32> to vector<2x32xf32>
    %463 = arith.addf %461, %462 : vector<2x32xf32>
    %cst_107 = arith.constant 7.500000e-02 : f32
    %464 = arith.mulf %370, %cst_107 : f32
    %465 = vector.broadcast %464 : f32 to vector<2x32xf32>
    %466 = arith.mulf %465, %416 : vector<2x32xf32>
    %467 = arith.addf %366, %466 : vector<2x32xf32>
    %cst_108 = arith.constant 2.250000e-01 : f32
    %468 = arith.mulf %370, %cst_108 : f32
    %469 = vector.broadcast %468 : f32 to vector<2x32xf32>
    %470 = arith.mulf %469, %463 : vector<2x32xf32>
    %471 = arith.addf %467, %470 : vector<2x32xf32>
    %cst_109 = arith.constant 3.000000e-01 : f32
    %472 = arith.mulf %370, %cst_109 : f32
    %473 = arith.addf %368, %472 : f32
    %474 = vector.extract_strided_slice %373 {offsets = [0, 0], sizes = [2, 32], strides = [1, 1]} : vector<8x32xf32> to vector<2x32xf32>
    %475 = vector.extract_strided_slice %373 {offsets = [2, 0], sizes = [2, 32], strides = [1, 1]} : vector<8x32xf32> to vector<2x32xf32>
    %476 = vector.extract_strided_slice %373 {offsets = [4, 0], sizes = [2, 32], strides = [1, 1]} : vector<8x32xf32> to vector<2x32xf32>
    %477 = vector.extract_strided_slice %373 {offsets = [6, 0], sizes = [2, 32], strides = [1, 1]} : vector<8x32xf32> to vector<2x32xf32>
    %478 = vector.broadcast %472 : f32 to vector<2x32xf32>
    %479 = arith.mulf %478, %477 : vector<2x32xf32>
    %480 = arith.addf %476, %479 : vector<2x32xf32>
    %481 = vector.broadcast %472 : f32 to vector<2x32xf32>
    %482 = arith.mulf %481, %480 : vector<2x32xf32>
    %483 = arith.addf %475, %482 : vector<2x32xf32>
    %484 = vector.broadcast %472 : f32 to vector<2x32xf32>
    %485 = arith.mulf %484, %483 : vector<2x32xf32>
    %486 = arith.addf %474, %485 : vector<2x32xf32>
    %cst_110 = arith.constant dense<0.000000e+00> : vector<2x32xf32>
    %487 = tpu.matmul %471, %1, %cst_110 {dimension_numbers = #tpu.dot_dimension_numbers<[1], [0], [0], [1], [0, 0, 1, 1], [], []>} : vector<2x32xf32>, vector<32x32xf32>, vector<2x32xf32> -> vector<2x32xf32>
    %488 = arith.addf %487, %486 : vector<2x32xf32>
    %489 = vector.broadcast %473 : f32 to vector<1x32xf32>
    %490 = arith.mulf %489, %9 : vector<1x32xf32>
    %491 = arith.addf %490, %10 : vector<1x32xf32>
    %492 = vector.broadcast %491 : vector<1x32xf32> to vector<2x32xf32>
    %493 = arith.addf %488, %492 : vector<2x32xf32>
    %cst_111 = arith.constant dense<0.000000e+00> : vector<2x32xf32>
    %494 = tpu.matmul %493, %3, %cst_111 {dimension_numbers = #tpu.dot_dimension_numbers<[1], [0], [0], [1], [0, 0, 1, 1], [], []>} : vector<2x32xf32>, vector<32x32xf32>, vector<2x32xf32> -> vector<2x32xf32>
    %495 = vector.broadcast %11 : vector<1x32xf32> to vector<2x32xf32>
    %496 = arith.addf %494, %495 : vector<2x32xf32>
    %497 = arith.negf %496 : vector<2x32xf32>
    %498 = math.exp %497 : vector<2x32xf32>
    %cst_112 = arith.constant 1.000000e+00 : f32
    %499 = vector.broadcast %cst_112 : f32 to vector<2x32xf32>
    %500 = arith.addf %499, %498 : vector<2x32xf32>
    %501 = arith.divf %499, %500 : vector<2x32xf32>
    %502 = arith.mulf %496, %501 : vector<2x32xf32>
    %cst_113 = arith.constant dense<0.000000e+00> : vector<2x32xf32>
    %503 = tpu.matmul %502, %4, %cst_113 {dimension_numbers = #tpu.dot_dimension_numbers<[1], [0], [0], [1], [0, 0, 1, 1], [], []>} : vector<2x32xf32>, vector<32x32xf32>, vector<2x32xf32> -> vector<2x32xf32>
    %504 = vector.broadcast %12 : vector<1x32xf32> to vector<2x32xf32>
    %505 = arith.addf %503, %504 : vector<2x32xf32>
    %506 = arith.negf %505 : vector<2x32xf32>
    %507 = math.exp %506 : vector<2x32xf32>
    %cst_114 = arith.constant 1.000000e+00 : f32
    %508 = vector.broadcast %cst_114 : f32 to vector<2x32xf32>
    %509 = arith.addf %508, %507 : vector<2x32xf32>
    %510 = arith.divf %508, %509 : vector<2x32xf32>
    %511 = arith.mulf %505, %510 : vector<2x32xf32>
    %cst_115 = arith.constant dense<0.000000e+00> : vector<2x32xf32>
    %512 = tpu.matmul %511, %5, %cst_115 {dimension_numbers = #tpu.dot_dimension_numbers<[1], [0], [0], [1], [0, 0, 1, 1], [], []>} : vector<2x32xf32>, vector<32x32xf32>, vector<2x32xf32> -> vector<2x32xf32>
    %513 = vector.broadcast %13 : vector<1x32xf32> to vector<2x32xf32>
    %514 = arith.addf %512, %513 : vector<2x32xf32>
    %cst_116 = arith.constant 0.977777779 : f32
    %515 = arith.mulf %370, %cst_116 : f32
    %516 = vector.broadcast %515 : f32 to vector<2x32xf32>
    %517 = arith.mulf %516, %416 : vector<2x32xf32>
    %518 = arith.addf %366, %517 : vector<2x32xf32>
    %cst_117 = arith.constant -3.73333335 : f32
    %519 = arith.mulf %370, %cst_117 : f32
    %520 = vector.broadcast %519 : f32 to vector<2x32xf32>
    %521 = arith.mulf %520, %463 : vector<2x32xf32>
    %522 = arith.addf %518, %521 : vector<2x32xf32>
    %cst_118 = arith.constant 3.55555558 : f32
    %523 = arith.mulf %370, %cst_118 : f32
    %524 = vector.broadcast %523 : f32 to vector<2x32xf32>
    %525 = arith.mulf %524, %514 : vector<2x32xf32>
    %526 = arith.addf %522, %525 : vector<2x32xf32>
    %cst_119 = arith.constant 8.000000e-01 : f32
    %527 = arith.mulf %370, %cst_119 : f32
    %528 = arith.addf %368, %527 : f32
    %529 = vector.extract_strided_slice %373 {offsets = [0, 0], sizes = [2, 32], strides = [1, 1]} : vector<8x32xf32> to vector<2x32xf32>
    %530 = vector.extract_strided_slice %373 {offsets = [2, 0], sizes = [2, 32], strides = [1, 1]} : vector<8x32xf32> to vector<2x32xf32>
    %531 = vector.extract_strided_slice %373 {offsets = [4, 0], sizes = [2, 32], strides = [1, 1]} : vector<8x32xf32> to vector<2x32xf32>
    %532 = vector.extract_strided_slice %373 {offsets = [6, 0], sizes = [2, 32], strides = [1, 1]} : vector<8x32xf32> to vector<2x32xf32>
    %533 = vector.broadcast %527 : f32 to vector<2x32xf32>
    %534 = arith.mulf %533, %532 : vector<2x32xf32>
    %535 = arith.addf %531, %534 : vector<2x32xf32>
    %536 = vector.broadcast %527 : f32 to vector<2x32xf32>
    %537 = arith.mulf %536, %535 : vector<2x32xf32>
    %538 = arith.addf %530, %537 : vector<2x32xf32>
    %539 = vector.broadcast %527 : f32 to vector<2x32xf32>
    %540 = arith.mulf %539, %538 : vector<2x32xf32>
    %541 = arith.addf %529, %540 : vector<2x32xf32>
    %cst_120 = arith.constant dense<0.000000e+00> : vector<2x32xf32>
    %542 = tpu.matmul %526, %1, %cst_120 {dimension_numbers = #tpu.dot_dimension_numbers<[1], [0], [0], [1], [0, 0, 1, 1], [], []>} : vector<2x32xf32>, vector<32x32xf32>, vector<2x32xf32> -> vector<2x32xf32>
    %543 = arith.addf %542, %541 : vector<2x32xf32>
    %544 = vector.broadcast %528 : f32 to vector<1x32xf32>
    %545 = arith.mulf %544, %9 : vector<1x32xf32>
    %546 = arith.addf %545, %10 : vector<1x32xf32>
    %547 = vector.broadcast %546 : vector<1x32xf32> to vector<2x32xf32>
    %548 = arith.addf %543, %547 : vector<2x32xf32>
    %cst_121 = arith.constant dense<0.000000e+00> : vector<2x32xf32>
    %549 = tpu.matmul %548, %3, %cst_121 {dimension_numbers = #tpu.dot_dimension_numbers<[1], [0], [0], [1], [0, 0, 1, 1], [], []>} : vector<2x32xf32>, vector<32x32xf32>, vector<2x32xf32> -> vector<2x32xf32>
    %550 = vector.broadcast %11 : vector<1x32xf32> to vector<2x32xf32>
    %551 = arith.addf %549, %550 : vector<2x32xf32>
    %552 = arith.negf %551 : vector<2x32xf32>
    %553 = math.exp %552 : vector<2x32xf32>
    %cst_122 = arith.constant 1.000000e+00 : f32
    %554 = vector.broadcast %cst_122 : f32 to vector<2x32xf32>
    %555 = arith.addf %554, %553 : vector<2x32xf32>
    %556 = arith.divf %554, %555 : vector<2x32xf32>
    %557 = arith.mulf %551, %556 : vector<2x32xf32>
    %cst_123 = arith.constant dense<0.000000e+00> : vector<2x32xf32>
    %558 = tpu.matmul %557, %4, %cst_123 {dimension_numbers = #tpu.dot_dimension_numbers<[1], [0], [0], [1], [0, 0, 1, 1], [], []>} : vector<2x32xf32>, vector<32x32xf32>, vector<2x32xf32> -> vector<2x32xf32>
    %559 = vector.broadcast %12 : vector<1x32xf32> to vector<2x32xf32>
    %560 = arith.addf %558, %559 : vector<2x32xf32>
    %561 = arith.negf %560 : vector<2x32xf32>
    %562 = math.exp %561 : vector<2x32xf32>
    %cst_124 = arith.constant 1.000000e+00 : f32
    %563 = vector.broadcast %cst_124 : f32 to vector<2x32xf32>
    %564 = arith.addf %563, %562 : vector<2x32xf32>
    %565 = arith.divf %563, %564 : vector<2x32xf32>
    %566 = arith.mulf %560, %565 : vector<2x32xf32>
    %cst_125 = arith.constant dense<0.000000e+00> : vector<2x32xf32>
    %567 = tpu.matmul %566, %5, %cst_125 {dimension_numbers = #tpu.dot_dimension_numbers<[1], [0], [0], [1], [0, 0, 1, 1], [], []>} : vector<2x32xf32>, vector<32x32xf32>, vector<2x32xf32> -> vector<2x32xf32>
    %568 = vector.broadcast %13 : vector<1x32xf32> to vector<2x32xf32>
    %569 = arith.addf %567, %568 : vector<2x32xf32>
    %cst_126 = arith.constant 2.95259857 : f32
    %570 = arith.mulf %370, %cst_126 : f32
    %571 = vector.broadcast %570 : f32 to vector<2x32xf32>
    %572 = arith.mulf %571, %416 : vector<2x32xf32>
    %573 = arith.addf %366, %572 : vector<2x32xf32>
    %cst_127 = arith.constant -11.5957937 : f32
    %574 = arith.mulf %370, %cst_127 : f32
    %575 = vector.broadcast %574 : f32 to vector<2x32xf32>
    %576 = arith.mulf %575, %463 : vector<2x32xf32>
    %577 = arith.addf %573, %576 : vector<2x32xf32>
    %cst_128 = arith.constant 9.82289314 : f32
    %578 = arith.mulf %370, %cst_128 : f32
    %579 = vector.broadcast %578 : f32 to vector<2x32xf32>
    %580 = arith.mulf %579, %514 : vector<2x32xf32>
    %581 = arith.addf %577, %580 : vector<2x32xf32>
    %cst_129 = arith.constant -0.290809333 : f32
    %582 = arith.mulf %370, %cst_129 : f32
    %583 = vector.broadcast %582 : f32 to vector<2x32xf32>
    %584 = arith.mulf %583, %569 : vector<2x32xf32>
    %585 = arith.addf %581, %584 : vector<2x32xf32>
    %cst_130 = arith.constant 0.888888895 : f32
    %586 = arith.mulf %370, %cst_130 : f32
    %587 = arith.addf %368, %586 : f32
    %588 = vector.extract_strided_slice %373 {offsets = [0, 0], sizes = [2, 32], strides = [1, 1]} : vector<8x32xf32> to vector<2x32xf32>
    %589 = vector.extract_strided_slice %373 {offsets = [2, 0], sizes = [2, 32], strides = [1, 1]} : vector<8x32xf32> to vector<2x32xf32>
    %590 = vector.extract_strided_slice %373 {offsets = [4, 0], sizes = [2, 32], strides = [1, 1]} : vector<8x32xf32> to vector<2x32xf32>
    %591 = vector.extract_strided_slice %373 {offsets = [6, 0], sizes = [2, 32], strides = [1, 1]} : vector<8x32xf32> to vector<2x32xf32>
    %592 = vector.broadcast %586 : f32 to vector<2x32xf32>
    %593 = arith.mulf %592, %591 : vector<2x32xf32>
    %594 = arith.addf %590, %593 : vector<2x32xf32>
    %595 = vector.broadcast %586 : f32 to vector<2x32xf32>
    %596 = arith.mulf %595, %594 : vector<2x32xf32>
    %597 = arith.addf %589, %596 : vector<2x32xf32>
    %598 = vector.broadcast %586 : f32 to vector<2x32xf32>
    %599 = arith.mulf %598, %597 : vector<2x32xf32>
    %600 = arith.addf %588, %599 : vector<2x32xf32>
    %cst_131 = arith.constant dense<0.000000e+00> : vector<2x32xf32>
    %601 = tpu.matmul %585, %1, %cst_131 {dimension_numbers = #tpu.dot_dimension_numbers<[1], [0], [0], [1], [0, 0, 1, 1], [], []>} : vector<2x32xf32>, vector<32x32xf32>, vector<2x32xf32> -> vector<2x32xf32>
    %602 = arith.addf %601, %600 : vector<2x32xf32>
    %603 = vector.broadcast %587 : f32 to vector<1x32xf32>
    %604 = arith.mulf %603, %9 : vector<1x32xf32>
    %605 = arith.addf %604, %10 : vector<1x32xf32>
    %606 = vector.broadcast %605 : vector<1x32xf32> to vector<2x32xf32>
    %607 = arith.addf %602, %606 : vector<2x32xf32>
    %cst_132 = arith.constant dense<0.000000e+00> : vector<2x32xf32>
    %608 = tpu.matmul %607, %3, %cst_132 {dimension_numbers = #tpu.dot_dimension_numbers<[1], [0], [0], [1], [0, 0, 1, 1], [], []>} : vector<2x32xf32>, vector<32x32xf32>, vector<2x32xf32> -> vector<2x32xf32>
    %609 = vector.broadcast %11 : vector<1x32xf32> to vector<2x32xf32>
    %610 = arith.addf %608, %609 : vector<2x32xf32>
    %611 = arith.negf %610 : vector<2x32xf32>
    %612 = math.exp %611 : vector<2x32xf32>
    %cst_133 = arith.constant 1.000000e+00 : f32
    %613 = vector.broadcast %cst_133 : f32 to vector<2x32xf32>
    %614 = arith.addf %613, %612 : vector<2x32xf32>
    %615 = arith.divf %613, %614 : vector<2x32xf32>
    %616 = arith.mulf %610, %615 : vector<2x32xf32>
    %cst_134 = arith.constant dense<0.000000e+00> : vector<2x32xf32>
    %617 = tpu.matmul %616, %4, %cst_134 {dimension_numbers = #tpu.dot_dimension_numbers<[1], [0], [0], [1], [0, 0, 1, 1], [], []>} : vector<2x32xf32>, vector<32x32xf32>, vector<2x32xf32> -> vector<2x32xf32>
    %618 = vector.broadcast %12 : vector<1x32xf32> to vector<2x32xf32>
    %619 = arith.addf %617, %618 : vector<2x32xf32>
    %620 = arith.negf %619 : vector<2x32xf32>
    %621 = math.exp %620 : vector<2x32xf32>
    %cst_135 = arith.constant 1.000000e+00 : f32
    %622 = vector.broadcast %cst_135 : f32 to vector<2x32xf32>
    %623 = arith.addf %622, %621 : vector<2x32xf32>
    %624 = arith.divf %622, %623 : vector<2x32xf32>
    %625 = arith.mulf %619, %624 : vector<2x32xf32>
    %cst_136 = arith.constant dense<0.000000e+00> : vector<2x32xf32>
    %626 = tpu.matmul %625, %5, %cst_136 {dimension_numbers = #tpu.dot_dimension_numbers<[1], [0], [0], [1], [0, 0, 1, 1], [], []>} : vector<2x32xf32>, vector<32x32xf32>, vector<2x32xf32> -> vector<2x32xf32>
    %627 = vector.broadcast %13 : vector<1x32xf32> to vector<2x32xf32>
    %628 = arith.addf %626, %627 : vector<2x32xf32>
    %cst_137 = arith.constant 2.84627533 : f32
    %629 = arith.mulf %370, %cst_137 : f32
    %630 = vector.broadcast %629 : f32 to vector<2x32xf32>
    %631 = arith.mulf %630, %416 : vector<2x32xf32>
    %632 = arith.addf %366, %631 : vector<2x32xf32>
    %cst_138 = arith.constant -10.757576 : f32
    %633 = arith.mulf %370, %cst_138 : f32
    %634 = vector.broadcast %633 : f32 to vector<2x32xf32>
    %635 = arith.mulf %634, %463 : vector<2x32xf32>
    %636 = arith.addf %632, %635 : vector<2x32xf32>
    %cst_139 = arith.constant 8.90642261 : f32
    %637 = arith.mulf %370, %cst_139 : f32
    %638 = vector.broadcast %637 : f32 to vector<2x32xf32>
    %639 = arith.mulf %638, %514 : vector<2x32xf32>
    %640 = arith.addf %636, %639 : vector<2x32xf32>
    %cst_140 = arith.constant 0.278409094 : f32
    %641 = arith.mulf %370, %cst_140 : f32
    %642 = vector.broadcast %641 : f32 to vector<2x32xf32>
    %643 = arith.mulf %642, %569 : vector<2x32xf32>
    %644 = arith.addf %640, %643 : vector<2x32xf32>
    %cst_141 = arith.constant -0.273531318 : f32
    %645 = arith.mulf %370, %cst_141 : f32
    %646 = vector.broadcast %645 : f32 to vector<2x32xf32>
    %647 = arith.mulf %646, %628 : vector<2x32xf32>
    %648 = arith.addf %644, %647 : vector<2x32xf32>
    %cst_142 = arith.constant 1.000000e+00 : f32
    %649 = arith.mulf %370, %cst_142 : f32
    %650 = arith.addf %368, %649 : f32
    %651 = vector.extract_strided_slice %373 {offsets = [0, 0], sizes = [2, 32], strides = [1, 1]} : vector<8x32xf32> to vector<2x32xf32>
    %652 = vector.extract_strided_slice %373 {offsets = [2, 0], sizes = [2, 32], strides = [1, 1]} : vector<8x32xf32> to vector<2x32xf32>
    %653 = vector.extract_strided_slice %373 {offsets = [4, 0], sizes = [2, 32], strides = [1, 1]} : vector<8x32xf32> to vector<2x32xf32>
    %654 = vector.extract_strided_slice %373 {offsets = [6, 0], sizes = [2, 32], strides = [1, 1]} : vector<8x32xf32> to vector<2x32xf32>
    %655 = vector.broadcast %649 : f32 to vector<2x32xf32>
    %656 = arith.mulf %655, %654 : vector<2x32xf32>
    %657 = arith.addf %653, %656 : vector<2x32xf32>
    %658 = vector.broadcast %649 : f32 to vector<2x32xf32>
    %659 = arith.mulf %658, %657 : vector<2x32xf32>
    %660 = arith.addf %652, %659 : vector<2x32xf32>
    %661 = vector.broadcast %649 : f32 to vector<2x32xf32>
    %662 = arith.mulf %661, %660 : vector<2x32xf32>
    %663 = arith.addf %651, %662 : vector<2x32xf32>
    %cst_143 = arith.constant dense<0.000000e+00> : vector<2x32xf32>
    %664 = tpu.matmul %648, %1, %cst_143 {dimension_numbers = #tpu.dot_dimension_numbers<[1], [0], [0], [1], [0, 0, 1, 1], [], []>} : vector<2x32xf32>, vector<32x32xf32>, vector<2x32xf32> -> vector<2x32xf32>
    %665 = arith.addf %664, %663 : vector<2x32xf32>
    %666 = vector.broadcast %650 : f32 to vector<1x32xf32>
    %667 = arith.mulf %666, %9 : vector<1x32xf32>
    %668 = arith.addf %667, %10 : vector<1x32xf32>
    %669 = vector.broadcast %668 : vector<1x32xf32> to vector<2x32xf32>
    %670 = arith.addf %665, %669 : vector<2x32xf32>
    %cst_144 = arith.constant dense<0.000000e+00> : vector<2x32xf32>
    %671 = tpu.matmul %670, %3, %cst_144 {dimension_numbers = #tpu.dot_dimension_numbers<[1], [0], [0], [1], [0, 0, 1, 1], [], []>} : vector<2x32xf32>, vector<32x32xf32>, vector<2x32xf32> -> vector<2x32xf32>
    %672 = vector.broadcast %11 : vector<1x32xf32> to vector<2x32xf32>
    %673 = arith.addf %671, %672 : vector<2x32xf32>
    %674 = arith.negf %673 : vector<2x32xf32>
    %675 = math.exp %674 : vector<2x32xf32>
    %cst_145 = arith.constant 1.000000e+00 : f32
    %676 = vector.broadcast %cst_145 : f32 to vector<2x32xf32>
    %677 = arith.addf %676, %675 : vector<2x32xf32>
    %678 = arith.divf %676, %677 : vector<2x32xf32>
    %679 = arith.mulf %673, %678 : vector<2x32xf32>
    %cst_146 = arith.constant dense<0.000000e+00> : vector<2x32xf32>
    %680 = tpu.matmul %679, %4, %cst_146 {dimension_numbers = #tpu.dot_dimension_numbers<[1], [0], [0], [1], [0, 0, 1, 1], [], []>} : vector<2x32xf32>, vector<32x32xf32>, vector<2x32xf32> -> vector<2x32xf32>
    %681 = vector.broadcast %12 : vector<1x32xf32> to vector<2x32xf32>
    %682 = arith.addf %680, %681 : vector<2x32xf32>
    %683 = arith.negf %682 : vector<2x32xf32>
    %684 = math.exp %683 : vector<2x32xf32>
    %cst_147 = arith.constant 1.000000e+00 : f32
    %685 = vector.broadcast %cst_147 : f32 to vector<2x32xf32>
    %686 = arith.addf %685, %684 : vector<2x32xf32>
    %687 = arith.divf %685, %686 : vector<2x32xf32>
    %688 = arith.mulf %682, %687 : vector<2x32xf32>
    %cst_148 = arith.constant dense<0.000000e+00> : vector<2x32xf32>
    %689 = tpu.matmul %688, %5, %cst_148 {dimension_numbers = #tpu.dot_dimension_numbers<[1], [0], [0], [1], [0, 0, 1, 1], [], []>} : vector<2x32xf32>, vector<32x32xf32>, vector<2x32xf32> -> vector<2x32xf32>
    %690 = vector.broadcast %13 : vector<1x32xf32> to vector<2x32xf32>
    %691 = arith.addf %689, %690 : vector<2x32xf32>
    %cst_149 = arith.constant 0.0911458358 : f32
    %692 = arith.mulf %370, %cst_149 : f32
    %693 = vector.broadcast %692 : f32 to vector<2x32xf32>
    %694 = arith.mulf %693, %416 : vector<2x32xf32>
    %695 = arith.addf %366, %694 : vector<2x32xf32>
    %cst_150 = arith.constant 0.449236304 : f32
    %696 = arith.mulf %370, %cst_150 : f32
    %697 = vector.broadcast %696 : f32 to vector<2x32xf32>
    %698 = arith.mulf %697, %514 : vector<2x32xf32>
    %699 = arith.addf %695, %698 : vector<2x32xf32>
    %cst_151 = arith.constant 0.651041686 : f32
    %700 = arith.mulf %370, %cst_151 : f32
    %701 = vector.broadcast %700 : f32 to vector<2x32xf32>
    %702 = arith.mulf %701, %569 : vector<2x32xf32>
    %703 = arith.addf %699, %702 : vector<2x32xf32>
    %cst_152 = arith.constant -0.322376192 : f32
    %704 = arith.mulf %370, %cst_152 : f32
    %705 = vector.broadcast %704 : f32 to vector<2x32xf32>
    %706 = arith.mulf %705, %628 : vector<2x32xf32>
    %707 = arith.addf %703, %706 : vector<2x32xf32>
    %cst_153 = arith.constant 0.130952388 : f32
    %708 = arith.mulf %370, %cst_153 : f32
    %709 = vector.broadcast %708 : f32 to vector<2x32xf32>
    %710 = arith.mulf %709, %691 : vector<2x32xf32>
    %711 = arith.addf %707, %710 : vector<2x32xf32>
    %c4 = arith.constant 4 : index
    %c0_154 = arith.constant 0 : index
    %712 = vector.load %arg10[%c4, %c0_154] : memref<16x32xf32, #tpu.memory_space<vmem>>, vector<2x32xf32>
    tpu.vector_store %arg10[%c4, %c0_154], %711 {strides = array<i32>} : memref<16x32xf32, #tpu.memory_space<vmem>>, vector<2x32xf32>,
    %c2_155 = arith.constant 2 : index
    %713 = memref.load %arg0[%c2_155] : memref<8xf32, #tpu.memory_space<smem>>
    %c3 = arith.constant 3 : index
    %714 = memref.load %arg0[%c3] : memref<8xf32, #tpu.memory_space<smem>>
    %715 = arith.subf %714, %713 : f32
    %c2_156 = arith.constant 2 : index
    %c0_157 = arith.constant 0 : index
    %c0_158 = arith.constant 0 : index
    %716 = vector.load %arg1[%c2_156, %c0_157, %c0_158] : memref<7x8x4xf32, #tpu.memory_space<vmem>>, vector<1x8x4xf32>
    %717 = vector.shape_cast %716 : vector<1x8x4xf32> to vector<8x4xf32>
    %cst_159 = arith.constant dense<0.000000e+00> : vector<8x32xf32>
    %718 = tpu.matmul %717, %2, %cst_159 {dimension_numbers = #tpu.dot_dimension_numbers<[1], [0], [0], [1], [0, 0, 1, 1], [], []>} : vector<8x4xf32>, vector<4x32xf32>, vector<8x32xf32> -> vector<8x32xf32>
    %cst_160 = arith.constant 0.000000e+00 : f32
    %719 = arith.mulf %715, %cst_160 : f32
    %720 = arith.addf %713, %719 : f32
    %721 = vector.extract_strided_slice %718 {offsets = [0, 0], sizes = [2, 32], strides = [1, 1]} : vector<8x32xf32> to vector<2x32xf32>
    %722 = vector.extract_strided_slice %718 {offsets = [2, 0], sizes = [2, 32], strides = [1, 1]} : vector<8x32xf32> to vector<2x32xf32>
    %723 = vector.extract_strided_slice %718 {offsets = [4, 0], sizes = [2, 32], strides = [1, 1]} : vector<8x32xf32> to vector<2x32xf32>
    %724 = vector.extract_strided_slice %718 {offsets = [6, 0], sizes = [2, 32], strides = [1, 1]} : vector<8x32xf32> to vector<2x32xf32>
    %725 = vector.broadcast %719 : f32 to vector<2x32xf32>
    %726 = arith.mulf %725, %724 : vector<2x32xf32>
    %727 = arith.addf %723, %726 : vector<2x32xf32>
    %728 = vector.broadcast %719 : f32 to vector<2x32xf32>
    %729 = arith.mulf %728, %727 : vector<2x32xf32>
    %730 = arith.addf %722, %729 : vector<2x32xf32>
    %731 = vector.broadcast %719 : f32 to vector<2x32xf32>
    %732 = arith.mulf %731, %730 : vector<2x32xf32>
    %733 = arith.addf %721, %732 : vector<2x32xf32>
    %cst_161 = arith.constant dense<0.000000e+00> : vector<2x32xf32>
    %734 = tpu.matmul %711, %1, %cst_161 {dimension_numbers = #tpu.dot_dimension_numbers<[1], [0], [0], [1], [0, 0, 1, 1], [], []>} : vector<2x32xf32>, vector<32x32xf32>, vector<2x32xf32> -> vector<2x32xf32>
    %735 = arith.addf %734, %733 : vector<2x32xf32>
    %736 = vector.broadcast %720 : f32 to vector<1x32xf32>
    %737 = arith.mulf %736, %9 : vector<1x32xf32>
    %738 = arith.addf %737, %10 : vector<1x32xf32>
    %739 = vector.broadcast %738 : vector<1x32xf32> to vector<2x32xf32>
    %740 = arith.addf %735, %739 : vector<2x32xf32>
    %cst_162 = arith.constant dense<0.000000e+00> : vector<2x32xf32>
    %741 = tpu.matmul %740, %3, %cst_162 {dimension_numbers = #tpu.dot_dimension_numbers<[1], [0], [0], [1], [0, 0, 1, 1], [], []>} : vector<2x32xf32>, vector<32x32xf32>, vector<2x32xf32> -> vector<2x32xf32>
    %742 = vector.broadcast %11 : vector<1x32xf32> to vector<2x32xf32>
    %743 = arith.addf %741, %742 : vector<2x32xf32>
    %744 = arith.negf %743 : vector<2x32xf32>
    %745 = math.exp %744 : vector<2x32xf32>
    %cst_163 = arith.constant 1.000000e+00 : f32
    %746 = vector.broadcast %cst_163 : f32 to vector<2x32xf32>
    %747 = arith.addf %746, %745 : vector<2x32xf32>
    %748 = arith.divf %746, %747 : vector<2x32xf32>
    %749 = arith.mulf %743, %748 : vector<2x32xf32>
    %cst_164 = arith.constant dense<0.000000e+00> : vector<2x32xf32>
    %750 = tpu.matmul %749, %4, %cst_164 {dimension_numbers = #tpu.dot_dimension_numbers<[1], [0], [0], [1], [0, 0, 1, 1], [], []>} : vector<2x32xf32>, vector<32x32xf32>, vector<2x32xf32> -> vector<2x32xf32>
    %751 = vector.broadcast %12 : vector<1x32xf32> to vector<2x32xf32>
    %752 = arith.addf %750, %751 : vector<2x32xf32>
    %753 = arith.negf %752 : vector<2x32xf32>
    %754 = math.exp %753 : vector<2x32xf32>
    %cst_165 = arith.constant 1.000000e+00 : f32
    %755 = vector.broadcast %cst_165 : f32 to vector<2x32xf32>
    %756 = arith.addf %755, %754 : vector<2x32xf32>
    %757 = arith.divf %755, %756 : vector<2x32xf32>
    %758 = arith.mulf %752, %757 : vector<2x32xf32>
    %cst_166 = arith.constant dense<0.000000e+00> : vector<2x32xf32>
    %759 = tpu.matmul %758, %5, %cst_166 {dimension_numbers = #tpu.dot_dimension_numbers<[1], [0], [0], [1], [0, 0, 1, 1], [], []>} : vector<2x32xf32>, vector<32x32xf32>, vector<2x32xf32> -> vector<2x32xf32>
    %760 = vector.broadcast %13 : vector<1x32xf32> to vector<2x32xf32>
    %761 = arith.addf %759, %760 : vector<2x32xf32>
    %cst_167 = arith.constant 2.000000e-01 : f32
    %762 = arith.mulf %715, %cst_167 : f32
    %763 = vector.broadcast %762 : f32 to vector<2x32xf32>
    %764 = arith.mulf %763, %761 : vector<2x32xf32>
    %765 = arith.addf %711, %764 : vector<2x32xf32>
    %cst_168 = arith.constant 2.000000e-01 : f32
    %766 = arith.mulf %715, %cst_168 : f32
    %767 = arith.addf %713, %766 : f32
    %768 = vector.extract_strided_slice %718 {offsets = [0, 0], sizes = [2, 32], strides = [1, 1]} : vector<8x32xf32> to vector<2x32xf32>
    %769 = vector.extract_strided_slice %718 {offsets = [2, 0], sizes = [2, 32], strides = [1, 1]} : vector<8x32xf32> to vector<2x32xf32>
    %770 = vector.extract_strided_slice %718 {offsets = [4, 0], sizes = [2, 32], strides = [1, 1]} : vector<8x32xf32> to vector<2x32xf32>
    %771 = vector.extract_strided_slice %718 {offsets = [6, 0], sizes = [2, 32], strides = [1, 1]} : vector<8x32xf32> to vector<2x32xf32>
    %772 = vector.broadcast %766 : f32 to vector<2x32xf32>
    %773 = arith.mulf %772, %771 : vector<2x32xf32>
    %774 = arith.addf %770, %773 : vector<2x32xf32>
    %775 = vector.broadcast %766 : f32 to vector<2x32xf32>
    %776 = arith.mulf %775, %774 : vector<2x32xf32>
    %777 = arith.addf %769, %776 : vector<2x32xf32>
    %778 = vector.broadcast %766 : f32 to vector<2x32xf32>
    %779 = arith.mulf %778, %777 : vector<2x32xf32>
    %780 = arith.addf %768, %779 : vector<2x32xf32>
    %cst_169 = arith.constant dense<0.000000e+00> : vector<2x32xf32>
    %781 = tpu.matmul %765, %1, %cst_169 {dimension_numbers = #tpu.dot_dimension_numbers<[1], [0], [0], [1], [0, 0, 1, 1], [], []>} : vector<2x32xf32>, vector<32x32xf32>, vector<2x32xf32> -> vector<2x32xf32>
    %782 = arith.addf %781, %780 : vector<2x32xf32>
    %783 = vector.broadcast %767 : f32 to vector<1x32xf32>
    %784 = arith.mulf %783, %9 : vector<1x32xf32>
    %785 = arith.addf %784, %10 : vector<1x32xf32>
    %786 = vector.broadcast %785 : vector<1x32xf32> to vector<2x32xf32>
    %787 = arith.addf %782, %786 : vector<2x32xf32>
    %cst_170 = arith.constant dense<0.000000e+00> : vector<2x32xf32>
    %788 = tpu.matmul %787, %3, %cst_170 {dimension_numbers = #tpu.dot_dimension_numbers<[1], [0], [0], [1], [0, 0, 1, 1], [], []>} : vector<2x32xf32>, vector<32x32xf32>, vector<2x32xf32> -> vector<2x32xf32>
    %789 = vector.broadcast %11 : vector<1x32xf32> to vector<2x32xf32>
    %790 = arith.addf %788, %789 : vector<2x32xf32>
    %791 = arith.negf %790 : vector<2x32xf32>
    %792 = math.exp %791 : vector<2x32xf32>
    %cst_171 = arith.constant 1.000000e+00 : f32
    %793 = vector.broadcast %cst_171 : f32 to vector<2x32xf32>
    %794 = arith.addf %793, %792 : vector<2x32xf32>
    %795 = arith.divf %793, %794 : vector<2x32xf32>
    %796 = arith.mulf %790, %795 : vector<2x32xf32>
    %cst_172 = arith.constant dense<0.000000e+00> : vector<2x32xf32>
    %797 = tpu.matmul %796, %4, %cst_172 {dimension_numbers = #tpu.dot_dimension_numbers<[1], [0], [0], [1], [0, 0, 1, 1], [], []>} : vector<2x32xf32>, vector<32x32xf32>, vector<2x32xf32> -> vector<2x32xf32>
    %798 = vector.broadcast %12 : vector<1x32xf32> to vector<2x32xf32>
    %799 = arith.addf %797, %798 : vector<2x32xf32>
    %800 = arith.negf %799 : vector<2x32xf32>
    %801 = math.exp %800 : vector<2x32xf32>
    %cst_173 = arith.constant 1.000000e+00 : f32
    %802 = vector.broadcast %cst_173 : f32 to vector<2x32xf32>
    %803 = arith.addf %802, %801 : vector<2x32xf32>
    %804 = arith.divf %802, %803 : vector<2x32xf32>
    %805 = arith.mulf %799, %804 : vector<2x32xf32>
    %cst_174 = arith.constant dense<0.000000e+00> : vector<2x32xf32>
    %806 = tpu.matmul %805, %5, %cst_174 {dimension_numbers = #tpu.dot_dimension_numbers<[1], [0], [0], [1], [0, 0, 1, 1], [], []>} : vector<2x32xf32>, vector<32x32xf32>, vector<2x32xf32> -> vector<2x32xf32>
    %807 = vector.broadcast %13 : vector<1x32xf32> to vector<2x32xf32>
    %808 = arith.addf %806, %807 : vector<2x32xf32>
    %cst_175 = arith.constant 7.500000e-02 : f32
    %809 = arith.mulf %715, %cst_175 : f32
    %810 = vector.broadcast %809 : f32 to vector<2x32xf32>
    %811 = arith.mulf %810, %761 : vector<2x32xf32>
    %812 = arith.addf %711, %811 : vector<2x32xf32>
    %cst_176 = arith.constant 2.250000e-01 : f32
    %813 = arith.mulf %715, %cst_176 : f32
    %814 = vector.broadcast %813 : f32 to vector<2x32xf32>
    %815 = arith.mulf %814, %808 : vector<2x32xf32>
    %816 = arith.addf %812, %815 : vector<2x32xf32>
    %cst_177 = arith.constant 3.000000e-01 : f32
    %817 = arith.mulf %715, %cst_177 : f32
    %818 = arith.addf %713, %817 : f32
    %819 = vector.extract_strided_slice %718 {offsets = [0, 0], sizes = [2, 32], strides = [1, 1]} : vector<8x32xf32> to vector<2x32xf32>
    %820 = vector.extract_strided_slice %718 {offsets = [2, 0], sizes = [2, 32], strides = [1, 1]} : vector<8x32xf32> to vector<2x32xf32>
    %821 = vector.extract_strided_slice %718 {offsets = [4, 0], sizes = [2, 32], strides = [1, 1]} : vector<8x32xf32> to vector<2x32xf32>
    %822 = vector.extract_strided_slice %718 {offsets = [6, 0], sizes = [2, 32], strides = [1, 1]} : vector<8x32xf32> to vector<2x32xf32>
    %823 = vector.broadcast %817 : f32 to vector<2x32xf32>
    %824 = arith.mulf %823, %822 : vector<2x32xf32>
    %825 = arith.addf %821, %824 : vector<2x32xf32>
    %826 = vector.broadcast %817 : f32 to vector<2x32xf32>
    %827 = arith.mulf %826, %825 : vector<2x32xf32>
    %828 = arith.addf %820, %827 : vector<2x32xf32>
    %829 = vector.broadcast %817 : f32 to vector<2x32xf32>
    %830 = arith.mulf %829, %828 : vector<2x32xf32>
    %831 = arith.addf %819, %830 : vector<2x32xf32>
    %cst_178 = arith.constant dense<0.000000e+00> : vector<2x32xf32>
    %832 = tpu.matmul %816, %1, %cst_178 {dimension_numbers = #tpu.dot_dimension_numbers<[1], [0], [0], [1], [0, 0, 1, 1], [], []>} : vector<2x32xf32>, vector<32x32xf32>, vector<2x32xf32> -> vector<2x32xf32>
    %833 = arith.addf %832, %831 : vector<2x32xf32>
    %834 = vector.broadcast %818 : f32 to vector<1x32xf32>
    %835 = arith.mulf %834, %9 : vector<1x32xf32>
    %836 = arith.addf %835, %10 : vector<1x32xf32>
    %837 = vector.broadcast %836 : vector<1x32xf32> to vector<2x32xf32>
    %838 = arith.addf %833, %837 : vector<2x32xf32>
    %cst_179 = arith.constant dense<0.000000e+00> : vector<2x32xf32>
    %839 = tpu.matmul %838, %3, %cst_179 {dimension_numbers = #tpu.dot_dimension_numbers<[1], [0], [0], [1], [0, 0, 1, 1], [], []>} : vector<2x32xf32>, vector<32x32xf32>, vector<2x32xf32> -> vector<2x32xf32>
    %840 = vector.broadcast %11 : vector<1x32xf32> to vector<2x32xf32>
    %841 = arith.addf %839, %840 : vector<2x32xf32>
    %842 = arith.negf %841 : vector<2x32xf32>
    %843 = math.exp %842 : vector<2x32xf32>
    %cst_180 = arith.constant 1.000000e+00 : f32
    %844 = vector.broadcast %cst_180 : f32 to vector<2x32xf32>
    %845 = arith.addf %844, %843 : vector<2x32xf32>
    %846 = arith.divf %844, %845 : vector<2x32xf32>
    %847 = arith.mulf %841, %846 : vector<2x32xf32>
    %cst_181 = arith.constant dense<0.000000e+00> : vector<2x32xf32>
    %848 = tpu.matmul %847, %4, %cst_181 {dimension_numbers = #tpu.dot_dimension_numbers<[1], [0], [0], [1], [0, 0, 1, 1], [], []>} : vector<2x32xf32>, vector<32x32xf32>, vector<2x32xf32> -> vector<2x32xf32>
    %849 = vector.broadcast %12 : vector<1x32xf32> to vector<2x32xf32>
    %850 = arith.addf %848, %849 : vector<2x32xf32>
    %851 = arith.negf %850 : vector<2x32xf32>
    %852 = math.exp %851 : vector<2x32xf32>
    %cst_182 = arith.constant 1.000000e+00 : f32
    %853 = vector.broadcast %cst_182 : f32 to vector<2x32xf32>
    %854 = arith.addf %853, %852 : vector<2x32xf32>
    %855 = arith.divf %853, %854 : vector<2x32xf32>
    %856 = arith.mulf %850, %855 : vector<2x32xf32>
    %cst_183 = arith.constant dense<0.000000e+00> : vector<2x32xf32>
    %857 = tpu.matmul %856, %5, %cst_183 {dimension_numbers = #tpu.dot_dimension_numbers<[1], [0], [0], [1], [0, 0, 1, 1], [], []>} : vector<2x32xf32>, vector<32x32xf32>, vector<2x32xf32> -> vector<2x32xf32>
    %858 = vector.broadcast %13 : vector<1x32xf32> to vector<2x32xf32>
    %859 = arith.addf %857, %858 : vector<2x32xf32>
    %cst_184 = arith.constant 0.977777779 : f32
    %860 = arith.mulf %715, %cst_184 : f32
    %861 = vector.broadcast %860 : f32 to vector<2x32xf32>
    %862 = arith.mulf %861, %761 : vector<2x32xf32>
    %863 = arith.addf %711, %862 : vector<2x32xf32>
    %cst_185 = arith.constant -3.73333335 : f32
    %864 = arith.mulf %715, %cst_185 : f32
    %865 = vector.broadcast %864 : f32 to vector<2x32xf32>
    %866 = arith.mulf %865, %808 : vector<2x32xf32>
    %867 = arith.addf %863, %866 : vector<2x32xf32>
    %cst_186 = arith.constant 3.55555558 : f32
    %868 = arith.mulf %715, %cst_186 : f32
    %869 = vector.broadcast %868 : f32 to vector<2x32xf32>
    %870 = arith.mulf %869, %859 : vector<2x32xf32>
    %871 = arith.addf %867, %870 : vector<2x32xf32>
    %cst_187 = arith.constant 8.000000e-01 : f32
    %872 = arith.mulf %715, %cst_187 : f32
    %873 = arith.addf %713, %872 : f32
    %874 = vector.extract_strided_slice %718 {offsets = [0, 0], sizes = [2, 32], strides = [1, 1]} : vector<8x32xf32> to vector<2x32xf32>
    %875 = vector.extract_strided_slice %718 {offsets = [2, 0], sizes = [2, 32], strides = [1, 1]} : vector<8x32xf32> to vector<2x32xf32>
    %876 = vector.extract_strided_slice %718 {offsets = [4, 0], sizes = [2, 32], strides = [1, 1]} : vector<8x32xf32> to vector<2x32xf32>
    %877 = vector.extract_strided_slice %718 {offsets = [6, 0], sizes = [2, 32], strides = [1, 1]} : vector<8x32xf32> to vector<2x32xf32>
    %878 = vector.broadcast %872 : f32 to vector<2x32xf32>
    %879 = arith.mulf %878, %877 : vector<2x32xf32>
    %880 = arith.addf %876, %879 : vector<2x32xf32>
    %881 = vector.broadcast %872 : f32 to vector<2x32xf32>
    %882 = arith.mulf %881, %880 : vector<2x32xf32>
    %883 = arith.addf %875, %882 : vector<2x32xf32>
    %884 = vector.broadcast %872 : f32 to vector<2x32xf32>
    %885 = arith.mulf %884, %883 : vector<2x32xf32>
    %886 = arith.addf %874, %885 : vector<2x32xf32>
    %cst_188 = arith.constant dense<0.000000e+00> : vector<2x32xf32>
    %887 = tpu.matmul %871, %1, %cst_188 {dimension_numbers = #tpu.dot_dimension_numbers<[1], [0], [0], [1], [0, 0, 1, 1], [], []>} : vector<2x32xf32>, vector<32x32xf32>, vector<2x32xf32> -> vector<2x32xf32>
    %888 = arith.addf %887, %886 : vector<2x32xf32>
    %889 = vector.broadcast %873 : f32 to vector<1x32xf32>
    %890 = arith.mulf %889, %9 : vector<1x32xf32>
    %891 = arith.addf %890, %10 : vector<1x32xf32>
    %892 = vector.broadcast %891 : vector<1x32xf32> to vector<2x32xf32>
    %893 = arith.addf %888, %892 : vector<2x32xf32>
    %cst_189 = arith.constant dense<0.000000e+00> : vector<2x32xf32>
    %894 = tpu.matmul %893, %3, %cst_189 {dimension_numbers = #tpu.dot_dimension_numbers<[1], [0], [0], [1], [0, 0, 1, 1], [], []>} : vector<2x32xf32>, vector<32x32xf32>, vector<2x32xf32> -> vector<2x32xf32>
    %895 = vector.broadcast %11 : vector<1x32xf32> to vector<2x32xf32>
    %896 = arith.addf %894, %895 : vector<2x32xf32>
    %897 = arith.negf %896 : vector<2x32xf32>
    %898 = math.exp %897 : vector<2x32xf32>
    %cst_190 = arith.constant 1.000000e+00 : f32
    %899 = vector.broadcast %cst_190 : f32 to vector<2x32xf32>
    %900 = arith.addf %899, %898 : vector<2x32xf32>
    %901 = arith.divf %899, %900 : vector<2x32xf32>
    %902 = arith.mulf %896, %901 : vector<2x32xf32>
    %cst_191 = arith.constant dense<0.000000e+00> : vector<2x32xf32>
    %903 = tpu.matmul %902, %4, %cst_191 {dimension_numbers = #tpu.dot_dimension_numbers<[1], [0], [0], [1], [0, 0, 1, 1], [], []>} : vector<2x32xf32>, vector<32x32xf32>, vector<2x32xf32> -> vector<2x32xf32>
    %904 = vector.broadcast %12 : vector<1x32xf32> to vector<2x32xf32>
    %905 = arith.addf %903, %904 : vector<2x32xf32>
    %906 = arith.negf %905 : vector<2x32xf32>
    %907 = math.exp %906 : vector<2x32xf32>
    %cst_192 = arith.constant 1.000000e+00 : f32
    %908 = vector.broadcast %cst_192 : f32 to vector<2x32xf32>
    %909 = arith.addf %908, %907 : vector<2x32xf32>
    %910 = arith.divf %908, %909 : vector<2x32xf32>
    %911 = arith.mulf %905, %910 : vector<2x32xf32>
    %cst_193 = arith.constant dense<0.000000e+00> : vector<2x32xf32>
    %912 = tpu.matmul %911, %5, %cst_193 {dimension_numbers = #tpu.dot_dimension_numbers<[1], [0], [0], [1], [0, 0, 1, 1], [], []>} : vector<2x32xf32>, vector<32x32xf32>, vector<2x32xf32> -> vector<2x32xf32>
    %913 = vector.broadcast %13 : vector<1x32xf32> to vector<2x32xf32>
    %914 = arith.addf %912, %913 : vector<2x32xf32>
    %cst_194 = arith.constant 2.95259857 : f32
    %915 = arith.mulf %715, %cst_194 : f32
    %916 = vector.broadcast %915 : f32 to vector<2x32xf32>
    %917 = arith.mulf %916, %761 : vector<2x32xf32>
    %918 = arith.addf %711, %917 : vector<2x32xf32>
    %cst_195 = arith.constant -11.5957937 : f32
    %919 = arith.mulf %715, %cst_195 : f32
    %920 = vector.broadcast %919 : f32 to vector<2x32xf32>
    %921 = arith.mulf %920, %808 : vector<2x32xf32>
    %922 = arith.addf %918, %921 : vector<2x32xf32>
    %cst_196 = arith.constant 9.82289314 : f32
    %923 = arith.mulf %715, %cst_196 : f32
    %924 = vector.broadcast %923 : f32 to vector<2x32xf32>
    %925 = arith.mulf %924, %859 : vector<2x32xf32>
    %926 = arith.addf %922, %925 : vector<2x32xf32>
    %cst_197 = arith.constant -0.290809333 : f32
    %927 = arith.mulf %715, %cst_197 : f32
    %928 = vector.broadcast %927 : f32 to vector<2x32xf32>
    %929 = arith.mulf %928, %914 : vector<2x32xf32>
    %930 = arith.addf %926, %929 : vector<2x32xf32>
    %cst_198 = arith.constant 0.888888895 : f32
    %931 = arith.mulf %715, %cst_198 : f32
    %932 = arith.addf %713, %931 : f32
    %933 = vector.extract_strided_slice %718 {offsets = [0, 0], sizes = [2, 32], strides = [1, 1]} : vector<8x32xf32> to vector<2x32xf32>
    %934 = vector.extract_strided_slice %718 {offsets = [2, 0], sizes = [2, 32], strides = [1, 1]} : vector<8x32xf32> to vector<2x32xf32>
    %935 = vector.extract_strided_slice %718 {offsets = [4, 0], sizes = [2, 32], strides = [1, 1]} : vector<8x32xf32> to vector<2x32xf32>
    %936 = vector.extract_strided_slice %718 {offsets = [6, 0], sizes = [2, 32], strides = [1, 1]} : vector<8x32xf32> to vector<2x32xf32>
    %937 = vector.broadcast %931 : f32 to vector<2x32xf32>
    %938 = arith.mulf %937, %936 : vector<2x32xf32>
    %939 = arith.addf %935, %938 : vector<2x32xf32>
    %940 = vector.broadcast %931 : f32 to vector<2x32xf32>
    %941 = arith.mulf %940, %939 : vector<2x32xf32>
    %942 = arith.addf %934, %941 : vector<2x32xf32>
    %943 = vector.broadcast %931 : f32 to vector<2x32xf32>
    %944 = arith.mulf %943, %942 : vector<2x32xf32>
    %945 = arith.addf %933, %944 : vector<2x32xf32>
    %cst_199 = arith.constant dense<0.000000e+00> : vector<2x32xf32>
    %946 = tpu.matmul %930, %1, %cst_199 {dimension_numbers = #tpu.dot_dimension_numbers<[1], [0], [0], [1], [0, 0, 1, 1], [], []>} : vector<2x32xf32>, vector<32x32xf32>, vector<2x32xf32> -> vector<2x32xf32>
    %947 = arith.addf %946, %945 : vector<2x32xf32>
    %948 = vector.broadcast %932 : f32 to vector<1x32xf32>
    %949 = arith.mulf %948, %9 : vector<1x32xf32>
    %950 = arith.addf %949, %10 : vector<1x32xf32>
    %951 = vector.broadcast %950 : vector<1x32xf32> to vector<2x32xf32>
    %952 = arith.addf %947, %951 : vector<2x32xf32>
    %cst_200 = arith.constant dense<0.000000e+00> : vector<2x32xf32>
    %953 = tpu.matmul %952, %3, %cst_200 {dimension_numbers = #tpu.dot_dimension_numbers<[1], [0], [0], [1], [0, 0, 1, 1], [], []>} : vector<2x32xf32>, vector<32x32xf32>, vector<2x32xf32> -> vector<2x32xf32>
    %954 = vector.broadcast %11 : vector<1x32xf32> to vector<2x32xf32>
    %955 = arith.addf %953, %954 : vector<2x32xf32>
    %956 = arith.negf %955 : vector<2x32xf32>
    %957 = math.exp %956 : vector<2x32xf32>
    %cst_201 = arith.constant 1.000000e+00 : f32
    %958 = vector.broadcast %cst_201 : f32 to vector<2x32xf32>
    %959 = arith.addf %958, %957 : vector<2x32xf32>
    %960 = arith.divf %958, %959 : vector<2x32xf32>
    %961 = arith.mulf %955, %960 : vector<2x32xf32>
    %cst_202 = arith.constant dense<0.000000e+00> : vector<2x32xf32>
    %962 = tpu.matmul %961, %4, %cst_202 {dimension_numbers = #tpu.dot_dimension_numbers<[1], [0], [0], [1], [0, 0, 1, 1], [], []>} : vector<2x32xf32>, vector<32x32xf32>, vector<2x32xf32> -> vector<2x32xf32>
    %963 = vector.broadcast %12 : vector<1x32xf32> to vector<2x32xf32>
    %964 = arith.addf %962, %963 : vector<2x32xf32>
    %965 = arith.negf %964 : vector<2x32xf32>
    %966 = math.exp %965 : vector<2x32xf32>
    %cst_203 = arith.constant 1.000000e+00 : f32
    %967 = vector.broadcast %cst_203 : f32 to vector<2x32xf32>
    %968 = arith.addf %967, %966 : vector<2x32xf32>
    %969 = arith.divf %967, %968 : vector<2x32xf32>
    %970 = arith.mulf %964, %969 : vector<2x32xf32>
    %cst_204 = arith.constant dense<0.000000e+00> : vector<2x32xf32>
    %971 = tpu.matmul %970, %5, %cst_204 {dimension_numbers = #tpu.dot_dimension_numbers<[1], [0], [0], [1], [0, 0, 1, 1], [], []>} : vector<2x32xf32>, vector<32x32xf32>, vector<2x32xf32> -> vector<2x32xf32>
    %972 = vector.broadcast %13 : vector<1x32xf32> to vector<2x32xf32>
    %973 = arith.addf %971, %972 : vector<2x32xf32>
    %cst_205 = arith.constant 2.84627533 : f32
    %974 = arith.mulf %715, %cst_205 : f32
    %975 = vector.broadcast %974 : f32 to vector<2x32xf32>
    %976 = arith.mulf %975, %761 : vector<2x32xf32>
    %977 = arith.addf %711, %976 : vector<2x32xf32>
    %cst_206 = arith.constant -10.757576 : f32
    %978 = arith.mulf %715, %cst_206 : f32
    %979 = vector.broadcast %978 : f32 to vector<2x32xf32>
    %980 = arith.mulf %979, %808 : vector<2x32xf32>
    %981 = arith.addf %977, %980 : vector<2x32xf32>
    %cst_207 = arith.constant 8.90642261 : f32
    %982 = arith.mulf %715, %cst_207 : f32
    %983 = vector.broadcast %982 : f32 to vector<2x32xf32>
    %984 = arith.mulf %983, %859 : vector<2x32xf32>
    %985 = arith.addf %981, %984 : vector<2x32xf32>
    %cst_208 = arith.constant 0.278409094 : f32
    %986 = arith.mulf %715, %cst_208 : f32
    %987 = vector.broadcast %986 : f32 to vector<2x32xf32>
    %988 = arith.mulf %987, %914 : vector<2x32xf32>
    %989 = arith.addf %985, %988 : vector<2x32xf32>
    %cst_209 = arith.constant -0.273531318 : f32
    %990 = arith.mulf %715, %cst_209 : f32
    %991 = vector.broadcast %990 : f32 to vector<2x32xf32>
    %992 = arith.mulf %991, %973 : vector<2x32xf32>
    %993 = arith.addf %989, %992 : vector<2x32xf32>
    %cst_210 = arith.constant 1.000000e+00 : f32
    %994 = arith.mulf %715, %cst_210 : f32
    %995 = arith.addf %713, %994 : f32
    %996 = vector.extract_strided_slice %718 {offsets = [0, 0], sizes = [2, 32], strides = [1, 1]} : vector<8x32xf32> to vector<2x32xf32>
    %997 = vector.extract_strided_slice %718 {offsets = [2, 0], sizes = [2, 32], strides = [1, 1]} : vector<8x32xf32> to vector<2x32xf32>
    %998 = vector.extract_strided_slice %718 {offsets = [4, 0], sizes = [2, 32], strides = [1, 1]} : vector<8x32xf32> to vector<2x32xf32>
    %999 = vector.extract_strided_slice %718 {offsets = [6, 0], sizes = [2, 32], strides = [1, 1]} : vector<8x32xf32> to vector<2x32xf32>
    %1000 = vector.broadcast %994 : f32 to vector<2x32xf32>
    %1001 = arith.mulf %1000, %999 : vector<2x32xf32>
    %1002 = arith.addf %998, %1001 : vector<2x32xf32>
    %1003 = vector.broadcast %994 : f32 to vector<2x32xf32>
    %1004 = arith.mulf %1003, %1002 : vector<2x32xf32>
    %1005 = arith.addf %997, %1004 : vector<2x32xf32>
    %1006 = vector.broadcast %994 : f32 to vector<2x32xf32>
    %1007 = arith.mulf %1006, %1005 : vector<2x32xf32>
    %1008 = arith.addf %996, %1007 : vector<2x32xf32>
    %cst_211 = arith.constant dense<0.000000e+00> : vector<2x32xf32>
    %1009 = tpu.matmul %993, %1, %cst_211 {dimension_numbers = #tpu.dot_dimension_numbers<[1], [0], [0], [1], [0, 0, 1, 1], [], []>} : vector<2x32xf32>, vector<32x32xf32>, vector<2x32xf32> -> vector<2x32xf32>
    %1010 = arith.addf %1009, %1008 : vector<2x32xf32>
    %1011 = vector.broadcast %995 : f32 to vector<1x32xf32>
    %1012 = arith.mulf %1011, %9 : vector<1x32xf32>
    %1013 = arith.addf %1012, %10 : vector<1x32xf32>
    %1014 = vector.broadcast %1013 : vector<1x32xf32> to vector<2x32xf32>
    %1015 = arith.addf %1010, %1014 : vector<2x32xf32>
    %cst_212 = arith.constant dense<0.000000e+00> : vector<2x32xf32>
    %1016 = tpu.matmul %1015, %3, %cst_212 {dimension_numbers = #tpu.dot_dimension_numbers<[1], [0], [0], [1], [0, 0, 1, 1], [], []>} : vector<2x32xf32>, vector<32x32xf32>, vector<2x32xf32> -> vector<2x32xf32>
    %1017 = vector.broadcast %11 : vector<1x32xf32> to vector<2x32xf32>
    %1018 = arith.addf %1016, %1017 : vector<2x32xf32>
    %1019 = arith.negf %1018 : vector<2x32xf32>
    %1020 = math.exp %1019 : vector<2x32xf32>
    %cst_213 = arith.constant 1.000000e+00 : f32
    %1021 = vector.broadcast %cst_213 : f32 to vector<2x32xf32>
    %1022 = arith.addf %1021, %1020 : vector<2x32xf32>
    %1023 = arith.divf %1021, %1022 : vector<2x32xf32>
    %1024 = arith.mulf %1018, %1023 : vector<2x32xf32>
    %cst_214 = arith.constant dense<0.000000e+00> : vector<2x32xf32>
    %1025 = tpu.matmul %1024, %4, %cst_214 {dimension_numbers = #tpu.dot_dimension_numbers<[1], [0], [0], [1], [0, 0, 1, 1], [], []>} : vector<2x32xf32>, vector<32x32xf32>, vector<2x32xf32> -> vector<2x32xf32>
    %1026 = vector.broadcast %12 : vector<1x32xf32> to vector<2x32xf32>
    %1027 = arith.addf %1025, %1026 : vector<2x32xf32>
    %1028 = arith.negf %1027 : vector<2x32xf32>
    %1029 = math.exp %1028 : vector<2x32xf32>
    %cst_215 = arith.constant 1.000000e+00 : f32
    %1030 = vector.broadcast %cst_215 : f32 to vector<2x32xf32>
    %1031 = arith.addf %1030, %1029 : vector<2x32xf32>
    %1032 = arith.divf %1030, %1031 : vector<2x32xf32>
    %1033 = arith.mulf %1027, %1032 : vector<2x32xf32>
    %cst_216 = arith.constant dense<0.000000e+00> : vector<2x32xf32>
    %1034 = tpu.matmul %1033, %5, %cst_216 {dimension_numbers = #tpu.dot_dimension_numbers<[1], [0], [0], [1], [0, 0, 1, 1], [], []>} : vector<2x32xf32>, vector<32x32xf32>, vector<2x32xf32> -> vector<2x32xf32>
    %1035 = vector.broadcast %13 : vector<1x32xf32> to vector<2x32xf32>
    %1036 = arith.addf %1034, %1035 : vector<2x32xf32>
    %cst_217 = arith.constant 0.0911458358 : f32
    %1037 = arith.mulf %715, %cst_217 : f32
    %1038 = vector.broadcast %1037 : f32 to vector<2x32xf32>
    %1039 = arith.mulf %1038, %761 : vector<2x32xf32>
    %1040 = arith.addf %711, %1039 : vector<2x32xf32>
    %cst_218 = arith.constant 0.449236304 : f32
    %1041 = arith.mulf %715, %cst_218 : f32
    %1042 = vector.broadcast %1041 : f32 to vector<2x32xf32>
    %1043 = arith.mulf %1042, %859 : vector<2x32xf32>
    %1044 = arith.addf %1040, %1043 : vector<2x32xf32>
    %cst_219 = arith.constant 0.651041686 : f32
    %1045 = arith.mulf %715, %cst_219 : f32
    %1046 = vector.broadcast %1045 : f32 to vector<2x32xf32>
    %1047 = arith.mulf %1046, %914 : vector<2x32xf32>
    %1048 = arith.addf %1044, %1047 : vector<2x32xf32>
    %cst_220 = arith.constant -0.322376192 : f32
    %1049 = arith.mulf %715, %cst_220 : f32
    %1050 = vector.broadcast %1049 : f32 to vector<2x32xf32>
    %1051 = arith.mulf %1050, %973 : vector<2x32xf32>
    %1052 = arith.addf %1048, %1051 : vector<2x32xf32>
    %cst_221 = arith.constant 0.130952388 : f32
    %1053 = arith.mulf %715, %cst_221 : f32
    %1054 = vector.broadcast %1053 : f32 to vector<2x32xf32>
    %1055 = arith.mulf %1054, %1036 : vector<2x32xf32>
    %1056 = arith.addf %1052, %1055 : vector<2x32xf32>
    %c6 = arith.constant 6 : index
    %c0_222 = arith.constant 0 : index
    %1057 = vector.load %arg10[%c6, %c0_222] : memref<16x32xf32, #tpu.memory_space<vmem>>, vector<2x32xf32>
    tpu.vector_store %arg10[%c6, %c0_222], %1056 {strides = array<i32>} : memref<16x32xf32, #tpu.memory_space<vmem>>, vector<2x32xf32>,
    %c3_223 = arith.constant 3 : index
    %1058 = memref.load %arg0[%c3_223] : memref<8xf32, #tpu.memory_space<smem>>
    %c4_224 = arith.constant 4 : index
    %1059 = memref.load %arg0[%c4_224] : memref<8xf32, #tpu.memory_space<smem>>
    %1060 = arith.subf %1059, %1058 : f32
    %c3_225 = arith.constant 3 : index
    %c0_226 = arith.constant 0 : index
    %c0_227 = arith.constant 0 : index
    %1061 = vector.load %arg1[%c3_225, %c0_226, %c0_227] : memref<7x8x4xf32, #tpu.memory_space<vmem>>, vector<1x8x4xf32>
    %1062 = vector.shape_cast %1061 : vector<1x8x4xf32> to vector<8x4xf32>
    %cst_228 = arith.constant dense<0.000000e+00> : vector<8x32xf32>
    %1063 = tpu.matmul %1062, %2, %cst_228 {dimension_numbers = #tpu.dot_dimension_numbers<[1], [0], [0], [1], [0, 0, 1, 1], [], []>} : vector<8x4xf32>, vector<4x32xf32>, vector<8x32xf32> -> vector<8x32xf32>
    %cst_229 = arith.constant 0.000000e+00 : f32
    %1064 = arith.mulf %1060, %cst_229 : f32
    %1065 = arith.addf %1058, %1064 : f32
    %1066 = vector.extract_strided_slice %1063 {offsets = [0, 0], sizes = [2, 32], strides = [1, 1]} : vector<8x32xf32> to vector<2x32xf32>
    %1067 = vector.extract_strided_slice %1063 {offsets = [2, 0], sizes = [2, 32], strides = [1, 1]} : vector<8x32xf32> to vector<2x32xf32>
    %1068 = vector.extract_strided_slice %1063 {offsets = [4, 0], sizes = [2, 32], strides = [1, 1]} : vector<8x32xf32> to vector<2x32xf32>
    %1069 = vector.extract_strided_slice %1063 {offsets = [6, 0], sizes = [2, 32], strides = [1, 1]} : vector<8x32xf32> to vector<2x32xf32>
    %1070 = vector.broadcast %1064 : f32 to vector<2x32xf32>
    %1071 = arith.mulf %1070, %1069 : vector<2x32xf32>
    %1072 = arith.addf %1068, %1071 : vector<2x32xf32>
    %1073 = vector.broadcast %1064 : f32 to vector<2x32xf32>
    %1074 = arith.mulf %1073, %1072 : vector<2x32xf32>
    %1075 = arith.addf %1067, %1074 : vector<2x32xf32>
    %1076 = vector.broadcast %1064 : f32 to vector<2x32xf32>
    %1077 = arith.mulf %1076, %1075 : vector<2x32xf32>
    %1078 = arith.addf %1066, %1077 : vector<2x32xf32>
    %cst_230 = arith.constant dense<0.000000e+00> : vector<2x32xf32>
    %1079 = tpu.matmul %1056, %1, %cst_230 {dimension_numbers = #tpu.dot_dimension_numbers<[1], [0], [0], [1], [0, 0, 1, 1], [], []>} : vector<2x32xf32>, vector<32x32xf32>, vector<2x32xf32> -> vector<2x32xf32>
    %1080 = arith.addf %1079, %1078 : vector<2x32xf32>
    %1081 = vector.broadcast %1065 : f32 to vector<1x32xf32>
    %1082 = arith.mulf %1081, %9 : vector<1x32xf32>
    %1083 = arith.addf %1082, %10 : vector<1x32xf32>
    %1084 = vector.broadcast %1083 : vector<1x32xf32> to vector<2x32xf32>
    %1085 = arith.addf %1080, %1084 : vector<2x32xf32>
    %cst_231 = arith.constant dense<0.000000e+00> : vector<2x32xf32>
    %1086 = tpu.matmul %1085, %3, %cst_231 {dimension_numbers = #tpu.dot_dimension_numbers<[1], [0], [0], [1], [0, 0, 1, 1], [], []>} : vector<2x32xf32>, vector<32x32xf32>, vector<2x32xf32> -> vector<2x32xf32>
    %1087 = vector.broadcast %11 : vector<1x32xf32> to vector<2x32xf32>
    %1088 = arith.addf %1086, %1087 : vector<2x32xf32>
    %1089 = arith.negf %1088 : vector<2x32xf32>
    %1090 = math.exp %1089 : vector<2x32xf32>
    %cst_232 = arith.constant 1.000000e+00 : f32
    %1091 = vector.broadcast %cst_232 : f32 to vector<2x32xf32>
    %1092 = arith.addf %1091, %1090 : vector<2x32xf32>
    %1093 = arith.divf %1091, %1092 : vector<2x32xf32>
    %1094 = arith.mulf %1088, %1093 : vector<2x32xf32>
    %cst_233 = arith.constant dense<0.000000e+00> : vector<2x32xf32>
    %1095 = tpu.matmul %1094, %4, %cst_233 {dimension_numbers = #tpu.dot_dimension_numbers<[1], [0], [0], [1], [0, 0, 1, 1], [], []>} : vector<2x32xf32>, vector<32x32xf32>, vector<2x32xf32> -> vector<2x32xf32>
    %1096 = vector.broadcast %12 : vector<1x32xf32> to vector<2x32xf32>
    %1097 = arith.addf %1095, %1096 : vector<2x32xf32>
    %1098 = arith.negf %1097 : vector<2x32xf32>
    %1099 = math.exp %1098 : vector<2x32xf32>
    %cst_234 = arith.constant 1.000000e+00 : f32
    %1100 = vector.broadcast %cst_234 : f32 to vector<2x32xf32>
    %1101 = arith.addf %1100, %1099 : vector<2x32xf32>
    %1102 = arith.divf %1100, %1101 : vector<2x32xf32>
    %1103 = arith.mulf %1097, %1102 : vector<2x32xf32>
    %cst_235 = arith.constant dense<0.000000e+00> : vector<2x32xf32>
    %1104 = tpu.matmul %1103, %5, %cst_235 {dimension_numbers = #tpu.dot_dimension_numbers<[1], [0], [0], [1], [0, 0, 1, 1], [], []>} : vector<2x32xf32>, vector<32x32xf32>, vector<2x32xf32> -> vector<2x32xf32>
    %1105 = vector.broadcast %13 : vector<1x32xf32> to vector<2x32xf32>
    %1106 = arith.addf %1104, %1105 : vector<2x32xf32>
    %cst_236 = arith.constant 2.000000e-01 : f32
    %1107 = arith.mulf %1060, %cst_236 : f32
    %1108 = vector.broadcast %1107 : f32 to vector<2x32xf32>
    %1109 = arith.mulf %1108, %1106 : vector<2x32xf32>
    %1110 = arith.addf %1056, %1109 : vector<2x32xf32>
    %cst_237 = arith.constant 2.000000e-01 : f32
    %1111 = arith.mulf %1060, %cst_237 : f32
    %1112 = arith.addf %1058, %1111 : f32
    %1113 = vector.extract_strided_slice %1063 {offsets = [0, 0], sizes = [2, 32], strides = [1, 1]} : vector<8x32xf32> to vector<2x32xf32>
    %1114 = vector.extract_strided_slice %1063 {offsets = [2, 0], sizes = [2, 32], strides = [1, 1]} : vector<8x32xf32> to vector<2x32xf32>
    %1115 = vector.extract_strided_slice %1063 {offsets = [4, 0], sizes = [2, 32], strides = [1, 1]} : vector<8x32xf32> to vector<2x32xf32>
    %1116 = vector.extract_strided_slice %1063 {offsets = [6, 0], sizes = [2, 32], strides = [1, 1]} : vector<8x32xf32> to vector<2x32xf32>
    %1117 = vector.broadcast %1111 : f32 to vector<2x32xf32>
    %1118 = arith.mulf %1117, %1116 : vector<2x32xf32>
    %1119 = arith.addf %1115, %1118 : vector<2x32xf32>
    %1120 = vector.broadcast %1111 : f32 to vector<2x32xf32>
    %1121 = arith.mulf %1120, %1119 : vector<2x32xf32>
    %1122 = arith.addf %1114, %1121 : vector<2x32xf32>
    %1123 = vector.broadcast %1111 : f32 to vector<2x32xf32>
    %1124 = arith.mulf %1123, %1122 : vector<2x32xf32>
    %1125 = arith.addf %1113, %1124 : vector<2x32xf32>
    %cst_238 = arith.constant dense<0.000000e+00> : vector<2x32xf32>
    %1126 = tpu.matmul %1110, %1, %cst_238 {dimension_numbers = #tpu.dot_dimension_numbers<[1], [0], [0], [1], [0, 0, 1, 1], [], []>} : vector<2x32xf32>, vector<32x32xf32>, vector<2x32xf32> -> vector<2x32xf32>
    %1127 = arith.addf %1126, %1125 : vector<2x32xf32>
    %1128 = vector.broadcast %1112 : f32 to vector<1x32xf32>
    %1129 = arith.mulf %1128, %9 : vector<1x32xf32>
    %1130 = arith.addf %1129, %10 : vector<1x32xf32>
    %1131 = vector.broadcast %1130 : vector<1x32xf32> to vector<2x32xf32>
    %1132 = arith.addf %1127, %1131 : vector<2x32xf32>
    %cst_239 = arith.constant dense<0.000000e+00> : vector<2x32xf32>
    %1133 = tpu.matmul %1132, %3, %cst_239 {dimension_numbers = #tpu.dot_dimension_numbers<[1], [0], [0], [1], [0, 0, 1, 1], [], []>} : vector<2x32xf32>, vector<32x32xf32>, vector<2x32xf32> -> vector<2x32xf32>
    %1134 = vector.broadcast %11 : vector<1x32xf32> to vector<2x32xf32>
    %1135 = arith.addf %1133, %1134 : vector<2x32xf32>
    %1136 = arith.negf %1135 : vector<2x32xf32>
    %1137 = math.exp %1136 : vector<2x32xf32>
    %cst_240 = arith.constant 1.000000e+00 : f32
    %1138 = vector.broadcast %cst_240 : f32 to vector<2x32xf32>
    %1139 = arith.addf %1138, %1137 : vector<2x32xf32>
    %1140 = arith.divf %1138, %1139 : vector<2x32xf32>
    %1141 = arith.mulf %1135, %1140 : vector<2x32xf32>
    %cst_241 = arith.constant dense<0.000000e+00> : vector<2x32xf32>
    %1142 = tpu.matmul %1141, %4, %cst_241 {dimension_numbers = #tpu.dot_dimension_numbers<[1], [0], [0], [1], [0, 0, 1, 1], [], []>} : vector<2x32xf32>, vector<32x32xf32>, vector<2x32xf32> -> vector<2x32xf32>
    %1143 = vector.broadcast %12 : vector<1x32xf32> to vector<2x32xf32>
    %1144 = arith.addf %1142, %1143 : vector<2x32xf32>
    %1145 = arith.negf %1144 : vector<2x32xf32>
    %1146 = math.exp %1145 : vector<2x32xf32>
    %cst_242 = arith.constant 1.000000e+00 : f32
    %1147 = vector.broadcast %cst_242 : f32 to vector<2x32xf32>
    %1148 = arith.addf %1147, %1146 : vector<2x32xf32>
    %1149 = arith.divf %1147, %1148 : vector<2x32xf32>
    %1150 = arith.mulf %1144, %1149 : vector<2x32xf32>
    %cst_243 = arith.constant dense<0.000000e+00> : vector<2x32xf32>
    %1151 = tpu.matmul %1150, %5, %cst_243 {dimension_numbers = #tpu.dot_dimension_numbers<[1], [0], [0], [1], [0, 0, 1, 1], [], []>} : vector<2x32xf32>, vector<32x32xf32>, vector<2x32xf32> -> vector<2x32xf32>
    %1152 = vector.broadcast %13 : vector<1x32xf32> to vector<2x32xf32>
    %1153 = arith.addf %1151, %1152 : vector<2x32xf32>
    %cst_244 = arith.constant 7.500000e-02 : f32
    %1154 = arith.mulf %1060, %cst_244 : f32
    %1155 = vector.broadcast %1154 : f32 to vector<2x32xf32>
    %1156 = arith.mulf %1155, %1106 : vector<2x32xf32>
    %1157 = arith.addf %1056, %1156 : vector<2x32xf32>
    %cst_245 = arith.constant 2.250000e-01 : f32
    %1158 = arith.mulf %1060, %cst_245 : f32
    %1159 = vector.broadcast %1158 : f32 to vector<2x32xf32>
    %1160 = arith.mulf %1159, %1153 : vector<2x32xf32>
    %1161 = arith.addf %1157, %1160 : vector<2x32xf32>
    %cst_246 = arith.constant 3.000000e-01 : f32
    %1162 = arith.mulf %1060, %cst_246 : f32
    %1163 = arith.addf %1058, %1162 : f32
    %1164 = vector.extract_strided_slice %1063 {offsets = [0, 0], sizes = [2, 32], strides = [1, 1]} : vector<8x32xf32> to vector<2x32xf32>
    %1165 = vector.extract_strided_slice %1063 {offsets = [2, 0], sizes = [2, 32], strides = [1, 1]} : vector<8x32xf32> to vector<2x32xf32>
    %1166 = vector.extract_strided_slice %1063 {offsets = [4, 0], sizes = [2, 32], strides = [1, 1]} : vector<8x32xf32> to vector<2x32xf32>
    %1167 = vector.extract_strided_slice %1063 {offsets = [6, 0], sizes = [2, 32], strides = [1, 1]} : vector<8x32xf32> to vector<2x32xf32>
    %1168 = vector.broadcast %1162 : f32 to vector<2x32xf32>
    %1169 = arith.mulf %1168, %1167 : vector<2x32xf32>
    %1170 = arith.addf %1166, %1169 : vector<2x32xf32>
    %1171 = vector.broadcast %1162 : f32 to vector<2x32xf32>
    %1172 = arith.mulf %1171, %1170 : vector<2x32xf32>
    %1173 = arith.addf %1165, %1172 : vector<2x32xf32>
    %1174 = vector.broadcast %1162 : f32 to vector<2x32xf32>
    %1175 = arith.mulf %1174, %1173 : vector<2x32xf32>
    %1176 = arith.addf %1164, %1175 : vector<2x32xf32>
    %cst_247 = arith.constant dense<0.000000e+00> : vector<2x32xf32>
    %1177 = tpu.matmul %1161, %1, %cst_247 {dimension_numbers = #tpu.dot_dimension_numbers<[1], [0], [0], [1], [0, 0, 1, 1], [], []>} : vector<2x32xf32>, vector<32x32xf32>, vector<2x32xf32> -> vector<2x32xf32>
    %1178 = arith.addf %1177, %1176 : vector<2x32xf32>
    %1179 = vector.broadcast %1163 : f32 to vector<1x32xf32>
    %1180 = arith.mulf %1179, %9 : vector<1x32xf32>
    %1181 = arith.addf %1180, %10 : vector<1x32xf32>
    %1182 = vector.broadcast %1181 : vector<1x32xf32> to vector<2x32xf32>
    %1183 = arith.addf %1178, %1182 : vector<2x32xf32>
    %cst_248 = arith.constant dense<0.000000e+00> : vector<2x32xf32>
    %1184 = tpu.matmul %1183, %3, %cst_248 {dimension_numbers = #tpu.dot_dimension_numbers<[1], [0], [0], [1], [0, 0, 1, 1], [], []>} : vector<2x32xf32>, vector<32x32xf32>, vector<2x32xf32> -> vector<2x32xf32>
    %1185 = vector.broadcast %11 : vector<1x32xf32> to vector<2x32xf32>
    %1186 = arith.addf %1184, %1185 : vector<2x32xf32>
    %1187 = arith.negf %1186 : vector<2x32xf32>
    %1188 = math.exp %1187 : vector<2x32xf32>
    %cst_249 = arith.constant 1.000000e+00 : f32
    %1189 = vector.broadcast %cst_249 : f32 to vector<2x32xf32>
    %1190 = arith.addf %1189, %1188 : vector<2x32xf32>
    %1191 = arith.divf %1189, %1190 : vector<2x32xf32>
    %1192 = arith.mulf %1186, %1191 : vector<2x32xf32>
    %cst_250 = arith.constant dense<0.000000e+00> : vector<2x32xf32>
    %1193 = tpu.matmul %1192, %4, %cst_250 {dimension_numbers = #tpu.dot_dimension_numbers<[1], [0], [0], [1], [0, 0, 1, 1], [], []>} : vector<2x32xf32>, vector<32x32xf32>, vector<2x32xf32> -> vector<2x32xf32>
    %1194 = vector.broadcast %12 : vector<1x32xf32> to vector<2x32xf32>
    %1195 = arith.addf %1193, %1194 : vector<2x32xf32>
    %1196 = arith.negf %1195 : vector<2x32xf32>
    %1197 = math.exp %1196 : vector<2x32xf32>
    %cst_251 = arith.constant 1.000000e+00 : f32
    %1198 = vector.broadcast %cst_251 : f32 to vector<2x32xf32>
    %1199 = arith.addf %1198, %1197 : vector<2x32xf32>
    %1200 = arith.divf %1198, %1199 : vector<2x32xf32>
    %1201 = arith.mulf %1195, %1200 : vector<2x32xf32>
    %cst_252 = arith.constant dense<0.000000e+00> : vector<2x32xf32>
    %1202 = tpu.matmul %1201, %5, %cst_252 {dimension_numbers = #tpu.dot_dimension_numbers<[1], [0], [0], [1], [0, 0, 1, 1], [], []>} : vector<2x32xf32>, vector<32x32xf32>, vector<2x32xf32> -> vector<2x32xf32>
    %1203 = vector.broadcast %13 : vector<1x32xf32> to vector<2x32xf32>
    %1204 = arith.addf %1202, %1203 : vector<2x32xf32>
    %cst_253 = arith.constant 0.977777779 : f32
    %1205 = arith.mulf %1060, %cst_253 : f32
    %1206 = vector.broadcast %1205 : f32 to vector<2x32xf32>
    %1207 = arith.mulf %1206, %1106 : vector<2x32xf32>
    %1208 = arith.addf %1056, %1207 : vector<2x32xf32>
    %cst_254 = arith.constant -3.73333335 : f32
    %1209 = arith.mulf %1060, %cst_254 : f32
    %1210 = vector.broadcast %1209 : f32 to vector<2x32xf32>
    %1211 = arith.mulf %1210, %1153 : vector<2x32xf32>
    %1212 = arith.addf %1208, %1211 : vector<2x32xf32>
    %cst_255 = arith.constant 3.55555558 : f32
    %1213 = arith.mulf %1060, %cst_255 : f32
    %1214 = vector.broadcast %1213 : f32 to vector<2x32xf32>
    %1215 = arith.mulf %1214, %1204 : vector<2x32xf32>
    %1216 = arith.addf %1212, %1215 : vector<2x32xf32>
    %cst_256 = arith.constant 8.000000e-01 : f32
    %1217 = arith.mulf %1060, %cst_256 : f32
    %1218 = arith.addf %1058, %1217 : f32
    %1219 = vector.extract_strided_slice %1063 {offsets = [0, 0], sizes = [2, 32], strides = [1, 1]} : vector<8x32xf32> to vector<2x32xf32>
    %1220 = vector.extract_strided_slice %1063 {offsets = [2, 0], sizes = [2, 32], strides = [1, 1]} : vector<8x32xf32> to vector<2x32xf32>
    %1221 = vector.extract_strided_slice %1063 {offsets = [4, 0], sizes = [2, 32], strides = [1, 1]} : vector<8x32xf32> to vector<2x32xf32>
    %1222 = vector.extract_strided_slice %1063 {offsets = [6, 0], sizes = [2, 32], strides = [1, 1]} : vector<8x32xf32> to vector<2x32xf32>
    %1223 = vector.broadcast %1217 : f32 to vector<2x32xf32>
    %1224 = arith.mulf %1223, %1222 : vector<2x32xf32>
    %1225 = arith.addf %1221, %1224 : vector<2x32xf32>
    %1226 = vector.broadcast %1217 : f32 to vector<2x32xf32>
    %1227 = arith.mulf %1226, %1225 : vector<2x32xf32>
    %1228 = arith.addf %1220, %1227 : vector<2x32xf32>
    %1229 = vector.broadcast %1217 : f32 to vector<2x32xf32>
    %1230 = arith.mulf %1229, %1228 : vector<2x32xf32>
    %1231 = arith.addf %1219, %1230 : vector<2x32xf32>
    %cst_257 = arith.constant dense<0.000000e+00> : vector<2x32xf32>
    %1232 = tpu.matmul %1216, %1, %cst_257 {dimension_numbers = #tpu.dot_dimension_numbers<[1], [0], [0], [1], [0, 0, 1, 1], [], []>} : vector<2x32xf32>, vector<32x32xf32>, vector<2x32xf32> -> vector<2x32xf32>
    %1233 = arith.addf %1232, %1231 : vector<2x32xf32>
    %1234 = vector.broadcast %1218 : f32 to vector<1x32xf32>
    %1235 = arith.mulf %1234, %9 : vector<1x32xf32>
    %1236 = arith.addf %1235, %10 : vector<1x32xf32>
    %1237 = vector.broadcast %1236 : vector<1x32xf32> to vector<2x32xf32>
    %1238 = arith.addf %1233, %1237 : vector<2x32xf32>
    %cst_258 = arith.constant dense<0.000000e+00> : vector<2x32xf32>
    %1239 = tpu.matmul %1238, %3, %cst_258 {dimension_numbers = #tpu.dot_dimension_numbers<[1], [0], [0], [1], [0, 0, 1, 1], [], []>} : vector<2x32xf32>, vector<32x32xf32>, vector<2x32xf32> -> vector<2x32xf32>
    %1240 = vector.broadcast %11 : vector<1x32xf32> to vector<2x32xf32>
    %1241 = arith.addf %1239, %1240 : vector<2x32xf32>
    %1242 = arith.negf %1241 : vector<2x32xf32>
    %1243 = math.exp %1242 : vector<2x32xf32>
    %cst_259 = arith.constant 1.000000e+00 : f32
    %1244 = vector.broadcast %cst_259 : f32 to vector<2x32xf32>
    %1245 = arith.addf %1244, %1243 : vector<2x32xf32>
    %1246 = arith.divf %1244, %1245 : vector<2x32xf32>
    %1247 = arith.mulf %1241, %1246 : vector<2x32xf32>
    %cst_260 = arith.constant dense<0.000000e+00> : vector<2x32xf32>
    %1248 = tpu.matmul %1247, %4, %cst_260 {dimension_numbers = #tpu.dot_dimension_numbers<[1], [0], [0], [1], [0, 0, 1, 1], [], []>} : vector<2x32xf32>, vector<32x32xf32>, vector<2x32xf32> -> vector<2x32xf32>
    %1249 = vector.broadcast %12 : vector<1x32xf32> to vector<2x32xf32>
    %1250 = arith.addf %1248, %1249 : vector<2x32xf32>
    %1251 = arith.negf %1250 : vector<2x32xf32>
    %1252 = math.exp %1251 : vector<2x32xf32>
    %cst_261 = arith.constant 1.000000e+00 : f32
    %1253 = vector.broadcast %cst_261 : f32 to vector<2x32xf32>
    %1254 = arith.addf %1253, %1252 : vector<2x32xf32>
    %1255 = arith.divf %1253, %1254 : vector<2x32xf32>
    %1256 = arith.mulf %1250, %1255 : vector<2x32xf32>
    %cst_262 = arith.constant dense<0.000000e+00> : vector<2x32xf32>
    %1257 = tpu.matmul %1256, %5, %cst_262 {dimension_numbers = #tpu.dot_dimension_numbers<[1], [0], [0], [1], [0, 0, 1, 1], [], []>} : vector<2x32xf32>, vector<32x32xf32>, vector<2x32xf32> -> vector<2x32xf32>
    %1258 = vector.broadcast %13 : vector<1x32xf32> to vector<2x32xf32>
    %1259 = arith.addf %1257, %1258 : vector<2x32xf32>
    %cst_263 = arith.constant 2.95259857 : f32
    %1260 = arith.mulf %1060, %cst_263 : f32
    %1261 = vector.broadcast %1260 : f32 to vector<2x32xf32>
    %1262 = arith.mulf %1261, %1106 : vector<2x32xf32>
    %1263 = arith.addf %1056, %1262 : vector<2x32xf32>
    %cst_264 = arith.constant -11.5957937 : f32
    %1264 = arith.mulf %1060, %cst_264 : f32
    %1265 = vector.broadcast %1264 : f32 to vector<2x32xf32>
    %1266 = arith.mulf %1265, %1153 : vector<2x32xf32>
    %1267 = arith.addf %1263, %1266 : vector<2x32xf32>
    %cst_265 = arith.constant 9.82289314 : f32
    %1268 = arith.mulf %1060, %cst_265 : f32
    %1269 = vector.broadcast %1268 : f32 to vector<2x32xf32>
    %1270 = arith.mulf %1269, %1204 : vector<2x32xf32>
    %1271 = arith.addf %1267, %1270 : vector<2x32xf32>
    %cst_266 = arith.constant -0.290809333 : f32
    %1272 = arith.mulf %1060, %cst_266 : f32
    %1273 = vector.broadcast %1272 : f32 to vector<2x32xf32>
    %1274 = arith.mulf %1273, %1259 : vector<2x32xf32>
    %1275 = arith.addf %1271, %1274 : vector<2x32xf32>
    %cst_267 = arith.constant 0.888888895 : f32
    %1276 = arith.mulf %1060, %cst_267 : f32
    %1277 = arith.addf %1058, %1276 : f32
    %1278 = vector.extract_strided_slice %1063 {offsets = [0, 0], sizes = [2, 32], strides = [1, 1]} : vector<8x32xf32> to vector<2x32xf32>
    %1279 = vector.extract_strided_slice %1063 {offsets = [2, 0], sizes = [2, 32], strides = [1, 1]} : vector<8x32xf32> to vector<2x32xf32>
    %1280 = vector.extract_strided_slice %1063 {offsets = [4, 0], sizes = [2, 32], strides = [1, 1]} : vector<8x32xf32> to vector<2x32xf32>
    %1281 = vector.extract_strided_slice %1063 {offsets = [6, 0], sizes = [2, 32], strides = [1, 1]} : vector<8x32xf32> to vector<2x32xf32>
    %1282 = vector.broadcast %1276 : f32 to vector<2x32xf32>
    %1283 = arith.mulf %1282, %1281 : vector<2x32xf32>
    %1284 = arith.addf %1280, %1283 : vector<2x32xf32>
    %1285 = vector.broadcast %1276 : f32 to vector<2x32xf32>
    %1286 = arith.mulf %1285, %1284 : vector<2x32xf32>
    %1287 = arith.addf %1279, %1286 : vector<2x32xf32>
    %1288 = vector.broadcast %1276 : f32 to vector<2x32xf32>
    %1289 = arith.mulf %1288, %1287 : vector<2x32xf32>
    %1290 = arith.addf %1278, %1289 : vector<2x32xf32>
    %cst_268 = arith.constant dense<0.000000e+00> : vector<2x32xf32>
    %1291 = tpu.matmul %1275, %1, %cst_268 {dimension_numbers = #tpu.dot_dimension_numbers<[1], [0], [0], [1], [0, 0, 1, 1], [], []>} : vector<2x32xf32>, vector<32x32xf32>, vector<2x32xf32> -> vector<2x32xf32>
    %1292 = arith.addf %1291, %1290 : vector<2x32xf32>
    %1293 = vector.broadcast %1277 : f32 to vector<1x32xf32>
    %1294 = arith.mulf %1293, %9 : vector<1x32xf32>
    %1295 = arith.addf %1294, %10 : vector<1x32xf32>
    %1296 = vector.broadcast %1295 : vector<1x32xf32> to vector<2x32xf32>
    %1297 = arith.addf %1292, %1296 : vector<2x32xf32>
    %cst_269 = arith.constant dense<0.000000e+00> : vector<2x32xf32>
    %1298 = tpu.matmul %1297, %3, %cst_269 {dimension_numbers = #tpu.dot_dimension_numbers<[1], [0], [0], [1], [0, 0, 1, 1], [], []>} : vector<2x32xf32>, vector<32x32xf32>, vector<2x32xf32> -> vector<2x32xf32>
    %1299 = vector.broadcast %11 : vector<1x32xf32> to vector<2x32xf32>
    %1300 = arith.addf %1298, %1299 : vector<2x32xf32>
    %1301 = arith.negf %1300 : vector<2x32xf32>
    %1302 = math.exp %1301 : vector<2x32xf32>
    %cst_270 = arith.constant 1.000000e+00 : f32
    %1303 = vector.broadcast %cst_270 : f32 to vector<2x32xf32>
    %1304 = arith.addf %1303, %1302 : vector<2x32xf32>
    %1305 = arith.divf %1303, %1304 : vector<2x32xf32>
    %1306 = arith.mulf %1300, %1305 : vector<2x32xf32>
    %cst_271 = arith.constant dense<0.000000e+00> : vector<2x32xf32>
    %1307 = tpu.matmul %1306, %4, %cst_271 {dimension_numbers = #tpu.dot_dimension_numbers<[1], [0], [0], [1], [0, 0, 1, 1], [], []>} : vector<2x32xf32>, vector<32x32xf32>, vector<2x32xf32> -> vector<2x32xf32>
    %1308 = vector.broadcast %12 : vector<1x32xf32> to vector<2x32xf32>
    %1309 = arith.addf %1307, %1308 : vector<2x32xf32>
    %1310 = arith.negf %1309 : vector<2x32xf32>
    %1311 = math.exp %1310 : vector<2x32xf32>
    %cst_272 = arith.constant 1.000000e+00 : f32
    %1312 = vector.broadcast %cst_272 : f32 to vector<2x32xf32>
    %1313 = arith.addf %1312, %1311 : vector<2x32xf32>
    %1314 = arith.divf %1312, %1313 : vector<2x32xf32>
    %1315 = arith.mulf %1309, %1314 : vector<2x32xf32>
    %cst_273 = arith.constant dense<0.000000e+00> : vector<2x32xf32>
    %1316 = tpu.matmul %1315, %5, %cst_273 {dimension_numbers = #tpu.dot_dimension_numbers<[1], [0], [0], [1], [0, 0, 1, 1], [], []>} : vector<2x32xf32>, vector<32x32xf32>, vector<2x32xf32> -> vector<2x32xf32>
    %1317 = vector.broadcast %13 : vector<1x32xf32> to vector<2x32xf32>
    %1318 = arith.addf %1316, %1317 : vector<2x32xf32>
    %cst_274 = arith.constant 2.84627533 : f32
    %1319 = arith.mulf %1060, %cst_274 : f32
    %1320 = vector.broadcast %1319 : f32 to vector<2x32xf32>
    %1321 = arith.mulf %1320, %1106 : vector<2x32xf32>
    %1322 = arith.addf %1056, %1321 : vector<2x32xf32>
    %cst_275 = arith.constant -10.757576 : f32
    %1323 = arith.mulf %1060, %cst_275 : f32
    %1324 = vector.broadcast %1323 : f32 to vector<2x32xf32>
    %1325 = arith.mulf %1324, %1153 : vector<2x32xf32>
    %1326 = arith.addf %1322, %1325 : vector<2x32xf32>
    %cst_276 = arith.constant 8.90642261 : f32
    %1327 = arith.mulf %1060, %cst_276 : f32
    %1328 = vector.broadcast %1327 : f32 to vector<2x32xf32>
    %1329 = arith.mulf %1328, %1204 : vector<2x32xf32>
    %1330 = arith.addf %1326, %1329 : vector<2x32xf32>
    %cst_277 = arith.constant 0.278409094 : f32
    %1331 = arith.mulf %1060, %cst_277 : f32
    %1332 = vector.broadcast %1331 : f32 to vector<2x32xf32>
    %1333 = arith.mulf %1332, %1259 : vector<2x32xf32>
    %1334 = arith.addf %1330, %1333 : vector<2x32xf32>
    %cst_278 = arith.constant -0.273531318 : f32
    %1335 = arith.mulf %1060, %cst_278 : f32
    %1336 = vector.broadcast %1335 : f32 to vector<2x32xf32>
    %1337 = arith.mulf %1336, %1318 : vector<2x32xf32>
    %1338 = arith.addf %1334, %1337 : vector<2x32xf32>
    %cst_279 = arith.constant 1.000000e+00 : f32
    %1339 = arith.mulf %1060, %cst_279 : f32
    %1340 = arith.addf %1058, %1339 : f32
    %1341 = vector.extract_strided_slice %1063 {offsets = [0, 0], sizes = [2, 32], strides = [1, 1]} : vector<8x32xf32> to vector<2x32xf32>
    %1342 = vector.extract_strided_slice %1063 {offsets = [2, 0], sizes = [2, 32], strides = [1, 1]} : vector<8x32xf32> to vector<2x32xf32>
    %1343 = vector.extract_strided_slice %1063 {offsets = [4, 0], sizes = [2, 32], strides = [1, 1]} : vector<8x32xf32> to vector<2x32xf32>
    %1344 = vector.extract_strided_slice %1063 {offsets = [6, 0], sizes = [2, 32], strides = [1, 1]} : vector<8x32xf32> to vector<2x32xf32>
    %1345 = vector.broadcast %1339 : f32 to vector<2x32xf32>
    %1346 = arith.mulf %1345, %1344 : vector<2x32xf32>
    %1347 = arith.addf %1343, %1346 : vector<2x32xf32>
    %1348 = vector.broadcast %1339 : f32 to vector<2x32xf32>
    %1349 = arith.mulf %1348, %1347 : vector<2x32xf32>
    %1350 = arith.addf %1342, %1349 : vector<2x32xf32>
    %1351 = vector.broadcast %1339 : f32 to vector<2x32xf32>
    %1352 = arith.mulf %1351, %1350 : vector<2x32xf32>
    %1353 = arith.addf %1341, %1352 : vector<2x32xf32>
    %cst_280 = arith.constant dense<0.000000e+00> : vector<2x32xf32>
    %1354 = tpu.matmul %1338, %1, %cst_280 {dimension_numbers = #tpu.dot_dimension_numbers<[1], [0], [0], [1], [0, 0, 1, 1], [], []>} : vector<2x32xf32>, vector<32x32xf32>, vector<2x32xf32> -> vector<2x32xf32>
    %1355 = arith.addf %1354, %1353 : vector<2x32xf32>
    %1356 = vector.broadcast %1340 : f32 to vector<1x32xf32>
    %1357 = arith.mulf %1356, %9 : vector<1x32xf32>
    %1358 = arith.addf %1357, %10 : vector<1x32xf32>
    %1359 = vector.broadcast %1358 : vector<1x32xf32> to vector<2x32xf32>
    %1360 = arith.addf %1355, %1359 : vector<2x32xf32>
    %cst_281 = arith.constant dense<0.000000e+00> : vector<2x32xf32>
    %1361 = tpu.matmul %1360, %3, %cst_281 {dimension_numbers = #tpu.dot_dimension_numbers<[1], [0], [0], [1], [0, 0, 1, 1], [], []>} : vector<2x32xf32>, vector<32x32xf32>, vector<2x32xf32> -> vector<2x32xf32>
    %1362 = vector.broadcast %11 : vector<1x32xf32> to vector<2x32xf32>
    %1363 = arith.addf %1361, %1362 : vector<2x32xf32>
    %1364 = arith.negf %1363 : vector<2x32xf32>
    %1365 = math.exp %1364 : vector<2x32xf32>
    %cst_282 = arith.constant 1.000000e+00 : f32
    %1366 = vector.broadcast %cst_282 : f32 to vector<2x32xf32>
    %1367 = arith.addf %1366, %1365 : vector<2x32xf32>
    %1368 = arith.divf %1366, %1367 : vector<2x32xf32>
    %1369 = arith.mulf %1363, %1368 : vector<2x32xf32>
    %cst_283 = arith.constant dense<0.000000e+00> : vector<2x32xf32>
    %1370 = tpu.matmul %1369, %4, %cst_283 {dimension_numbers = #tpu.dot_dimension_numbers<[1], [0], [0], [1], [0, 0, 1, 1], [], []>} : vector<2x32xf32>, vector<32x32xf32>, vector<2x32xf32> -> vector<2x32xf32>
    %1371 = vector.broadcast %12 : vector<1x32xf32> to vector<2x32xf32>
    %1372 = arith.addf %1370, %1371 : vector<2x32xf32>
    %1373 = arith.negf %1372 : vector<2x32xf32>
    %1374 = math.exp %1373 : vector<2x32xf32>
    %cst_284 = arith.constant 1.000000e+00 : f32
    %1375 = vector.broadcast %cst_284 : f32 to vector<2x32xf32>
    %1376 = arith.addf %1375, %1374 : vector<2x32xf32>
    %1377 = arith.divf %1375, %1376 : vector<2x32xf32>
    %1378 = arith.mulf %1372, %1377 : vector<2x32xf32>
    %cst_285 = arith.constant dense<0.000000e+00> : vector<2x32xf32>
    %1379 = tpu.matmul %1378, %5, %cst_285 {dimension_numbers = #tpu.dot_dimension_numbers<[1], [0], [0], [1], [0, 0, 1, 1], [], []>} : vector<2x32xf32>, vector<32x32xf32>, vector<2x32xf32> -> vector<2x32xf32>
    %1380 = vector.broadcast %13 : vector<1x32xf32> to vector<2x32xf32>
    %1381 = arith.addf %1379, %1380 : vector<2x32xf32>
    %cst_286 = arith.constant 0.0911458358 : f32
    %1382 = arith.mulf %1060, %cst_286 : f32
    %1383 = vector.broadcast %1382 : f32 to vector<2x32xf32>
    %1384 = arith.mulf %1383, %1106 : vector<2x32xf32>
    %1385 = arith.addf %1056, %1384 : vector<2x32xf32>
    %cst_287 = arith.constant 0.449236304 : f32
    %1386 = arith.mulf %1060, %cst_287 : f32
    %1387 = vector.broadcast %1386 : f32 to vector<2x32xf32>
    %1388 = arith.mulf %1387, %1204 : vector<2x32xf32>
    %1389 = arith.addf %1385, %1388 : vector<2x32xf32>
    %cst_288 = arith.constant 0.651041686 : f32
    %1390 = arith.mulf %1060, %cst_288 : f32
    %1391 = vector.broadcast %1390 : f32 to vector<2x32xf32>
    %1392 = arith.mulf %1391, %1259 : vector<2x32xf32>
    %1393 = arith.addf %1389, %1392 : vector<2x32xf32>
    %cst_289 = arith.constant -0.322376192 : f32
    %1394 = arith.mulf %1060, %cst_289 : f32
    %1395 = vector.broadcast %1394 : f32 to vector<2x32xf32>
    %1396 = arith.mulf %1395, %1318 : vector<2x32xf32>
    %1397 = arith.addf %1393, %1396 : vector<2x32xf32>
    %cst_290 = arith.constant 0.130952388 : f32
    %1398 = arith.mulf %1060, %cst_290 : f32
    %1399 = vector.broadcast %1398 : f32 to vector<2x32xf32>
    %1400 = arith.mulf %1399, %1381 : vector<2x32xf32>
    %1401 = arith.addf %1397, %1400 : vector<2x32xf32>
    %c8 = arith.constant 8 : index
    %c0_291 = arith.constant 0 : index
    %1402 = vector.load %arg10[%c8, %c0_291] : memref<16x32xf32, #tpu.memory_space<vmem>>, vector<2x32xf32>
    tpu.vector_store %arg10[%c8, %c0_291], %1401 {strides = array<i32>} : memref<16x32xf32, #tpu.memory_space<vmem>>, vector<2x32xf32>,
    %c4_292 = arith.constant 4 : index
    %1403 = memref.load %arg0[%c4_292] : memref<8xf32, #tpu.memory_space<smem>>
    %c5 = arith.constant 5 : index
    %1404 = memref.load %arg0[%c5] : memref<8xf32, #tpu.memory_space<smem>>
    %1405 = arith.subf %1404, %1403 : f32
    %c4_293 = arith.constant 4 : index
    %c0_294 = arith.constant 0 : index
    %c0_295 = arith.constant 0 : index
    %1406 = vector.load %arg1[%c4_293, %c0_294, %c0_295] : memref<7x8x4xf32, #tpu.memory_space<vmem>>, vector<1x8x4xf32>
    %1407 = vector.shape_cast %1406 : vector<1x8x4xf32> to vector<8x4xf32>
    %cst_296 = arith.constant dense<0.000000e+00> : vector<8x32xf32>
    %1408 = tpu.matmul %1407, %2, %cst_296 {dimension_numbers = #tpu.dot_dimension_numbers<[1], [0], [0], [1], [0, 0, 1, 1], [], []>} : vector<8x4xf32>, vector<4x32xf32>, vector<8x32xf32> -> vector<8x32xf32>
    %cst_297 = arith.constant 0.000000e+00 : f32
    %1409 = arith.mulf %1405, %cst_297 : f32
    %1410 = arith.addf %1403, %1409 : f32
    %1411 = vector.extract_strided_slice %1408 {offsets = [0, 0], sizes = [2, 32], strides = [1, 1]} : vector<8x32xf32> to vector<2x32xf32>
    %1412 = vector.extract_strided_slice %1408 {offsets = [2, 0], sizes = [2, 32], strides = [1, 1]} : vector<8x32xf32> to vector<2x32xf32>
    %1413 = vector.extract_strided_slice %1408 {offsets = [4, 0], sizes = [2, 32], strides = [1, 1]} : vector<8x32xf32> to vector<2x32xf32>
    %1414 = vector.extract_strided_slice %1408 {offsets = [6, 0], sizes = [2, 32], strides = [1, 1]} : vector<8x32xf32> to vector<2x32xf32>
    %1415 = vector.broadcast %1409 : f32 to vector<2x32xf32>
    %1416 = arith.mulf %1415, %1414 : vector<2x32xf32>
    %1417 = arith.addf %1413, %1416 : vector<2x32xf32>
    %1418 = vector.broadcast %1409 : f32 to vector<2x32xf32>
    %1419 = arith.mulf %1418, %1417 : vector<2x32xf32>
    %1420 = arith.addf %1412, %1419 : vector<2x32xf32>
    %1421 = vector.broadcast %1409 : f32 to vector<2x32xf32>
    %1422 = arith.mulf %1421, %1420 : vector<2x32xf32>
    %1423 = arith.addf %1411, %1422 : vector<2x32xf32>
    %cst_298 = arith.constant dense<0.000000e+00> : vector<2x32xf32>
    %1424 = tpu.matmul %1401, %1, %cst_298 {dimension_numbers = #tpu.dot_dimension_numbers<[1], [0], [0], [1], [0, 0, 1, 1], [], []>} : vector<2x32xf32>, vector<32x32xf32>, vector<2x32xf32> -> vector<2x32xf32>
    %1425 = arith.addf %1424, %1423 : vector<2x32xf32>
    %1426 = vector.broadcast %1410 : f32 to vector<1x32xf32>
    %1427 = arith.mulf %1426, %9 : vector<1x32xf32>
    %1428 = arith.addf %1427, %10 : vector<1x32xf32>
    %1429 = vector.broadcast %1428 : vector<1x32xf32> to vector<2x32xf32>
    %1430 = arith.addf %1425, %1429 : vector<2x32xf32>
    %cst_299 = arith.constant dense<0.000000e+00> : vector<2x32xf32>
    %1431 = tpu.matmul %1430, %3, %cst_299 {dimension_numbers = #tpu.dot_dimension_numbers<[1], [0], [0], [1], [0, 0, 1, 1], [], []>} : vector<2x32xf32>, vector<32x32xf32>, vector<2x32xf32> -> vector<2x32xf32>
    %1432 = vector.broadcast %11 : vector<1x32xf32> to vector<2x32xf32>
    %1433 = arith.addf %1431, %1432 : vector<2x32xf32>
    %1434 = arith.negf %1433 : vector<2x32xf32>
    %1435 = math.exp %1434 : vector<2x32xf32>
    %cst_300 = arith.constant 1.000000e+00 : f32
    %1436 = vector.broadcast %cst_300 : f32 to vector<2x32xf32>
    %1437 = arith.addf %1436, %1435 : vector<2x32xf32>
    %1438 = arith.divf %1436, %1437 : vector<2x32xf32>
    %1439 = arith.mulf %1433, %1438 : vector<2x32xf32>
    %cst_301 = arith.constant dense<0.000000e+00> : vector<2x32xf32>
    %1440 = tpu.matmul %1439, %4, %cst_301 {dimension_numbers = #tpu.dot_dimension_numbers<[1], [0], [0], [1], [0, 0, 1, 1], [], []>} : vector<2x32xf32>, vector<32x32xf32>, vector<2x32xf32> -> vector<2x32xf32>
    %1441 = vector.broadcast %12 : vector<1x32xf32> to vector<2x32xf32>
    %1442 = arith.addf %1440, %1441 : vector<2x32xf32>
    %1443 = arith.negf %1442 : vector<2x32xf32>
    %1444 = math.exp %1443 : vector<2x32xf32>
    %cst_302 = arith.constant 1.000000e+00 : f32
    %1445 = vector.broadcast %cst_302 : f32 to vector<2x32xf32>
    %1446 = arith.addf %1445, %1444 : vector<2x32xf32>
    %1447 = arith.divf %1445, %1446 : vector<2x32xf32>
    %1448 = arith.mulf %1442, %1447 : vector<2x32xf32>
    %cst_303 = arith.constant dense<0.000000e+00> : vector<2x32xf32>
    %1449 = tpu.matmul %1448, %5, %cst_303 {dimension_numbers = #tpu.dot_dimension_numbers<[1], [0], [0], [1], [0, 0, 1, 1], [], []>} : vector<2x32xf32>, vector<32x32xf32>, vector<2x32xf32> -> vector<2x32xf32>
    %1450 = vector.broadcast %13 : vector<1x32xf32> to vector<2x32xf32>
    %1451 = arith.addf %1449, %1450 : vector<2x32xf32>
    %cst_304 = arith.constant 2.000000e-01 : f32
    %1452 = arith.mulf %1405, %cst_304 : f32
    %1453 = vector.broadcast %1452 : f32 to vector<2x32xf32>
    %1454 = arith.mulf %1453, %1451 : vector<2x32xf32>
    %1455 = arith.addf %1401, %1454 : vector<2x32xf32>
    %cst_305 = arith.constant 2.000000e-01 : f32
    %1456 = arith.mulf %1405, %cst_305 : f32
    %1457 = arith.addf %1403, %1456 : f32
    %1458 = vector.extract_strided_slice %1408 {offsets = [0, 0], sizes = [2, 32], strides = [1, 1]} : vector<8x32xf32> to vector<2x32xf32>
    %1459 = vector.extract_strided_slice %1408 {offsets = [2, 0], sizes = [2, 32], strides = [1, 1]} : vector<8x32xf32> to vector<2x32xf32>
    %1460 = vector.extract_strided_slice %1408 {offsets = [4, 0], sizes = [2, 32], strides = [1, 1]} : vector<8x32xf32> to vector<2x32xf32>
    %1461 = vector.extract_strided_slice %1408 {offsets = [6, 0], sizes = [2, 32], strides = [1, 1]} : vector<8x32xf32> to vector<2x32xf32>
    %1462 = vector.broadcast %1456 : f32 to vector<2x32xf32>
    %1463 = arith.mulf %1462, %1461 : vector<2x32xf32>
    %1464 = arith.addf %1460, %1463 : vector<2x32xf32>
    %1465 = vector.broadcast %1456 : f32 to vector<2x32xf32>
    %1466 = arith.mulf %1465, %1464 : vector<2x32xf32>
    %1467 = arith.addf %1459, %1466 : vector<2x32xf32>
    %1468 = vector.broadcast %1456 : f32 to vector<2x32xf32>
    %1469 = arith.mulf %1468, %1467 : vector<2x32xf32>
    %1470 = arith.addf %1458, %1469 : vector<2x32xf32>
    %cst_306 = arith.constant dense<0.000000e+00> : vector<2x32xf32>
    %1471 = tpu.matmul %1455, %1, %cst_306 {dimension_numbers = #tpu.dot_dimension_numbers<[1], [0], [0], [1], [0, 0, 1, 1], [], []>} : vector<2x32xf32>, vector<32x32xf32>, vector<2x32xf32> -> vector<2x32xf32>
    %1472 = arith.addf %1471, %1470 : vector<2x32xf32>
    %1473 = vector.broadcast %1457 : f32 to vector<1x32xf32>
    %1474 = arith.mulf %1473, %9 : vector<1x32xf32>
    %1475 = arith.addf %1474, %10 : vector<1x32xf32>
    %1476 = vector.broadcast %1475 : vector<1x32xf32> to vector<2x32xf32>
    %1477 = arith.addf %1472, %1476 : vector<2x32xf32>
    %cst_307 = arith.constant dense<0.000000e+00> : vector<2x32xf32>
    %1478 = tpu.matmul %1477, %3, %cst_307 {dimension_numbers = #tpu.dot_dimension_numbers<[1], [0], [0], [1], [0, 0, 1, 1], [], []>} : vector<2x32xf32>, vector<32x32xf32>, vector<2x32xf32> -> vector<2x32xf32>
    %1479 = vector.broadcast %11 : vector<1x32xf32> to vector<2x32xf32>
    %1480 = arith.addf %1478, %1479 : vector<2x32xf32>
    %1481 = arith.negf %1480 : vector<2x32xf32>
    %1482 = math.exp %1481 : vector<2x32xf32>
    %cst_308 = arith.constant 1.000000e+00 : f32
    %1483 = vector.broadcast %cst_308 : f32 to vector<2x32xf32>
    %1484 = arith.addf %1483, %1482 : vector<2x32xf32>
    %1485 = arith.divf %1483, %1484 : vector<2x32xf32>
    %1486 = arith.mulf %1480, %1485 : vector<2x32xf32>
    %cst_309 = arith.constant dense<0.000000e+00> : vector<2x32xf32>
    %1487 = tpu.matmul %1486, %4, %cst_309 {dimension_numbers = #tpu.dot_dimension_numbers<[1], [0], [0], [1], [0, 0, 1, 1], [], []>} : vector<2x32xf32>, vector<32x32xf32>, vector<2x32xf32> -> vector<2x32xf32>
    %1488 = vector.broadcast %12 : vector<1x32xf32> to vector<2x32xf32>
    %1489 = arith.addf %1487, %1488 : vector<2x32xf32>
    %1490 = arith.negf %1489 : vector<2x32xf32>
    %1491 = math.exp %1490 : vector<2x32xf32>
    %cst_310 = arith.constant 1.000000e+00 : f32
    %1492 = vector.broadcast %cst_310 : f32 to vector<2x32xf32>
    %1493 = arith.addf %1492, %1491 : vector<2x32xf32>
    %1494 = arith.divf %1492, %1493 : vector<2x32xf32>
    %1495 = arith.mulf %1489, %1494 : vector<2x32xf32>
    %cst_311 = arith.constant dense<0.000000e+00> : vector<2x32xf32>
    %1496 = tpu.matmul %1495, %5, %cst_311 {dimension_numbers = #tpu.dot_dimension_numbers<[1], [0], [0], [1], [0, 0, 1, 1], [], []>} : vector<2x32xf32>, vector<32x32xf32>, vector<2x32xf32> -> vector<2x32xf32>
    %1497 = vector.broadcast %13 : vector<1x32xf32> to vector<2x32xf32>
    %1498 = arith.addf %1496, %1497 : vector<2x32xf32>
    %cst_312 = arith.constant 7.500000e-02 : f32
    %1499 = arith.mulf %1405, %cst_312 : f32
    %1500 = vector.broadcast %1499 : f32 to vector<2x32xf32>
    %1501 = arith.mulf %1500, %1451 : vector<2x32xf32>
    %1502 = arith.addf %1401, %1501 : vector<2x32xf32>
    %cst_313 = arith.constant 2.250000e-01 : f32
    %1503 = arith.mulf %1405, %cst_313 : f32
    %1504 = vector.broadcast %1503 : f32 to vector<2x32xf32>
    %1505 = arith.mulf %1504, %1498 : vector<2x32xf32>
    %1506 = arith.addf %1502, %1505 : vector<2x32xf32>
    %cst_314 = arith.constant 3.000000e-01 : f32
    %1507 = arith.mulf %1405, %cst_314 : f32
    %1508 = arith.addf %1403, %1507 : f32
    %1509 = vector.extract_strided_slice %1408 {offsets = [0, 0], sizes = [2, 32], strides = [1, 1]} : vector<8x32xf32> to vector<2x32xf32>
    %1510 = vector.extract_strided_slice %1408 {offsets = [2, 0], sizes = [2, 32], strides = [1, 1]} : vector<8x32xf32> to vector<2x32xf32>
    %1511 = vector.extract_strided_slice %1408 {offsets = [4, 0], sizes = [2, 32], strides = [1, 1]} : vector<8x32xf32> to vector<2x32xf32>
    %1512 = vector.extract_strided_slice %1408 {offsets = [6, 0], sizes = [2, 32], strides = [1, 1]} : vector<8x32xf32> to vector<2x32xf32>
    %1513 = vector.broadcast %1507 : f32 to vector<2x32xf32>
    %1514 = arith.mulf %1513, %1512 : vector<2x32xf32>
    %1515 = arith.addf %1511, %1514 : vector<2x32xf32>
    %1516 = vector.broadcast %1507 : f32 to vector<2x32xf32>
    %1517 = arith.mulf %1516, %1515 : vector<2x32xf32>
    %1518 = arith.addf %1510, %1517 : vector<2x32xf32>
    %1519 = vector.broadcast %1507 : f32 to vector<2x32xf32>
    %1520 = arith.mulf %1519, %1518 : vector<2x32xf32>
    %1521 = arith.addf %1509, %1520 : vector<2x32xf32>
    %cst_315 = arith.constant dense<0.000000e+00> : vector<2x32xf32>
    %1522 = tpu.matmul %1506, %1, %cst_315 {dimension_numbers = #tpu.dot_dimension_numbers<[1], [0], [0], [1], [0, 0, 1, 1], [], []>} : vector<2x32xf32>, vector<32x32xf32>, vector<2x32xf32> -> vector<2x32xf32>
    %1523 = arith.addf %1522, %1521 : vector<2x32xf32>
    %1524 = vector.broadcast %1508 : f32 to vector<1x32xf32>
    %1525 = arith.mulf %1524, %9 : vector<1x32xf32>
    %1526 = arith.addf %1525, %10 : vector<1x32xf32>
    %1527 = vector.broadcast %1526 : vector<1x32xf32> to vector<2x32xf32>
    %1528 = arith.addf %1523, %1527 : vector<2x32xf32>
    %cst_316 = arith.constant dense<0.000000e+00> : vector<2x32xf32>
    %1529 = tpu.matmul %1528, %3, %cst_316 {dimension_numbers = #tpu.dot_dimension_numbers<[1], [0], [0], [1], [0, 0, 1, 1], [], []>} : vector<2x32xf32>, vector<32x32xf32>, vector<2x32xf32> -> vector<2x32xf32>
    %1530 = vector.broadcast %11 : vector<1x32xf32> to vector<2x32xf32>
    %1531 = arith.addf %1529, %1530 : vector<2x32xf32>
    %1532 = arith.negf %1531 : vector<2x32xf32>
    %1533 = math.exp %1532 : vector<2x32xf32>
    %cst_317 = arith.constant 1.000000e+00 : f32
    %1534 = vector.broadcast %cst_317 : f32 to vector<2x32xf32>
    %1535 = arith.addf %1534, %1533 : vector<2x32xf32>
    %1536 = arith.divf %1534, %1535 : vector<2x32xf32>
    %1537 = arith.mulf %1531, %1536 : vector<2x32xf32>
    %cst_318 = arith.constant dense<0.000000e+00> : vector<2x32xf32>
    %1538 = tpu.matmul %1537, %4, %cst_318 {dimension_numbers = #tpu.dot_dimension_numbers<[1], [0], [0], [1], [0, 0, 1, 1], [], []>} : vector<2x32xf32>, vector<32x32xf32>, vector<2x32xf32> -> vector<2x32xf32>
    %1539 = vector.broadcast %12 : vector<1x32xf32> to vector<2x32xf32>
    %1540 = arith.addf %1538, %1539 : vector<2x32xf32>
    %1541 = arith.negf %1540 : vector<2x32xf32>
    %1542 = math.exp %1541 : vector<2x32xf32>
    %cst_319 = arith.constant 1.000000e+00 : f32
    %1543 = vector.broadcast %cst_319 : f32 to vector<2x32xf32>
    %1544 = arith.addf %1543, %1542 : vector<2x32xf32>
    %1545 = arith.divf %1543, %1544 : vector<2x32xf32>
    %1546 = arith.mulf %1540, %1545 : vector<2x32xf32>
    %cst_320 = arith.constant dense<0.000000e+00> : vector<2x32xf32>
    %1547 = tpu.matmul %1546, %5, %cst_320 {dimension_numbers = #tpu.dot_dimension_numbers<[1], [0], [0], [1], [0, 0, 1, 1], [], []>} : vector<2x32xf32>, vector<32x32xf32>, vector<2x32xf32> -> vector<2x32xf32>
    %1548 = vector.broadcast %13 : vector<1x32xf32> to vector<2x32xf32>
    %1549 = arith.addf %1547, %1548 : vector<2x32xf32>
    %cst_321 = arith.constant 0.977777779 : f32
    %1550 = arith.mulf %1405, %cst_321 : f32
    %1551 = vector.broadcast %1550 : f32 to vector<2x32xf32>
    %1552 = arith.mulf %1551, %1451 : vector<2x32xf32>
    %1553 = arith.addf %1401, %1552 : vector<2x32xf32>
    %cst_322 = arith.constant -3.73333335 : f32
    %1554 = arith.mulf %1405, %cst_322 : f32
    %1555 = vector.broadcast %1554 : f32 to vector<2x32xf32>
    %1556 = arith.mulf %1555, %1498 : vector<2x32xf32>
    %1557 = arith.addf %1553, %1556 : vector<2x32xf32>
    %cst_323 = arith.constant 3.55555558 : f32
    %1558 = arith.mulf %1405, %cst_323 : f32
    %1559 = vector.broadcast %1558 : f32 to vector<2x32xf32>
    %1560 = arith.mulf %1559, %1549 : vector<2x32xf32>
    %1561 = arith.addf %1557, %1560 : vector<2x32xf32>
    %cst_324 = arith.constant 8.000000e-01 : f32
    %1562 = arith.mulf %1405, %cst_324 : f32
    %1563 = arith.addf %1403, %1562 : f32
    %1564 = vector.extract_strided_slice %1408 {offsets = [0, 0], sizes = [2, 32], strides = [1, 1]} : vector<8x32xf32> to vector<2x32xf32>
    %1565 = vector.extract_strided_slice %1408 {offsets = [2, 0], sizes = [2, 32], strides = [1, 1]} : vector<8x32xf32> to vector<2x32xf32>
    %1566 = vector.extract_strided_slice %1408 {offsets = [4, 0], sizes = [2, 32], strides = [1, 1]} : vector<8x32xf32> to vector<2x32xf32>
    %1567 = vector.extract_strided_slice %1408 {offsets = [6, 0], sizes = [2, 32], strides = [1, 1]} : vector<8x32xf32> to vector<2x32xf32>
    %1568 = vector.broadcast %1562 : f32 to vector<2x32xf32>
    %1569 = arith.mulf %1568, %1567 : vector<2x32xf32>
    %1570 = arith.addf %1566, %1569 : vector<2x32xf32>
    %1571 = vector.broadcast %1562 : f32 to vector<2x32xf32>
    %1572 = arith.mulf %1571, %1570 : vector<2x32xf32>
    %1573 = arith.addf %1565, %1572 : vector<2x32xf32>
    %1574 = vector.broadcast %1562 : f32 to vector<2x32xf32>
    %1575 = arith.mulf %1574, %1573 : vector<2x32xf32>
    %1576 = arith.addf %1564, %1575 : vector<2x32xf32>
    %cst_325 = arith.constant dense<0.000000e+00> : vector<2x32xf32>
    %1577 = tpu.matmul %1561, %1, %cst_325 {dimension_numbers = #tpu.dot_dimension_numbers<[1], [0], [0], [1], [0, 0, 1, 1], [], []>} : vector<2x32xf32>, vector<32x32xf32>, vector<2x32xf32> -> vector<2x32xf32>
    %1578 = arith.addf %1577, %1576 : vector<2x32xf32>
    %1579 = vector.broadcast %1563 : f32 to vector<1x32xf32>
    %1580 = arith.mulf %1579, %9 : vector<1x32xf32>
    %1581 = arith.addf %1580, %10 : vector<1x32xf32>
    %1582 = vector.broadcast %1581 : vector<1x32xf32> to vector<2x32xf32>
    %1583 = arith.addf %1578, %1582 : vector<2x32xf32>
    %cst_326 = arith.constant dense<0.000000e+00> : vector<2x32xf32>
    %1584 = tpu.matmul %1583, %3, %cst_326 {dimension_numbers = #tpu.dot_dimension_numbers<[1], [0], [0], [1], [0, 0, 1, 1], [], []>} : vector<2x32xf32>, vector<32x32xf32>, vector<2x32xf32> -> vector<2x32xf32>
    %1585 = vector.broadcast %11 : vector<1x32xf32> to vector<2x32xf32>
    %1586 = arith.addf %1584, %1585 : vector<2x32xf32>
    %1587 = arith.negf %1586 : vector<2x32xf32>
    %1588 = math.exp %1587 : vector<2x32xf32>
    %cst_327 = arith.constant 1.000000e+00 : f32
    %1589 = vector.broadcast %cst_327 : f32 to vector<2x32xf32>
    %1590 = arith.addf %1589, %1588 : vector<2x32xf32>
    %1591 = arith.divf %1589, %1590 : vector<2x32xf32>
    %1592 = arith.mulf %1586, %1591 : vector<2x32xf32>
    %cst_328 = arith.constant dense<0.000000e+00> : vector<2x32xf32>
    %1593 = tpu.matmul %1592, %4, %cst_328 {dimension_numbers = #tpu.dot_dimension_numbers<[1], [0], [0], [1], [0, 0, 1, 1], [], []>} : vector<2x32xf32>, vector<32x32xf32>, vector<2x32xf32> -> vector<2x32xf32>
    %1594 = vector.broadcast %12 : vector<1x32xf32> to vector<2x32xf32>
    %1595 = arith.addf %1593, %1594 : vector<2x32xf32>
    %1596 = arith.negf %1595 : vector<2x32xf32>
    %1597 = math.exp %1596 : vector<2x32xf32>
    %cst_329 = arith.constant 1.000000e+00 : f32
    %1598 = vector.broadcast %cst_329 : f32 to vector<2x32xf32>
    %1599 = arith.addf %1598, %1597 : vector<2x32xf32>
    %1600 = arith.divf %1598, %1599 : vector<2x32xf32>
    %1601 = arith.mulf %1595, %1600 : vector<2x32xf32>
    %cst_330 = arith.constant dense<0.000000e+00> : vector<2x32xf32>
    %1602 = tpu.matmul %1601, %5, %cst_330 {dimension_numbers = #tpu.dot_dimension_numbers<[1], [0], [0], [1], [0, 0, 1, 1], [], []>} : vector<2x32xf32>, vector<32x32xf32>, vector<2x32xf32> -> vector<2x32xf32>
    %1603 = vector.broadcast %13 : vector<1x32xf32> to vector<2x32xf32>
    %1604 = arith.addf %1602, %1603 : vector<2x32xf32>
    %cst_331 = arith.constant 2.95259857 : f32
    %1605 = arith.mulf %1405, %cst_331 : f32
    %1606 = vector.broadcast %1605 : f32 to vector<2x32xf32>
    %1607 = arith.mulf %1606, %1451 : vector<2x32xf32>
    %1608 = arith.addf %1401, %1607 : vector<2x32xf32>
    %cst_332 = arith.constant -11.5957937 : f32
    %1609 = arith.mulf %1405, %cst_332 : f32
    %1610 = vector.broadcast %1609 : f32 to vector<2x32xf32>
    %1611 = arith.mulf %1610, %1498 : vector<2x32xf32>
    %1612 = arith.addf %1608, %1611 : vector<2x32xf32>
    %cst_333 = arith.constant 9.82289314 : f32
    %1613 = arith.mulf %1405, %cst_333 : f32
    %1614 = vector.broadcast %1613 : f32 to vector<2x32xf32>
    %1615 = arith.mulf %1614, %1549 : vector<2x32xf32>
    %1616 = arith.addf %1612, %1615 : vector<2x32xf32>
    %cst_334 = arith.constant -0.290809333 : f32
    %1617 = arith.mulf %1405, %cst_334 : f32
    %1618 = vector.broadcast %1617 : f32 to vector<2x32xf32>
    %1619 = arith.mulf %1618, %1604 : vector<2x32xf32>
    %1620 = arith.addf %1616, %1619 : vector<2x32xf32>
    %cst_335 = arith.constant 0.888888895 : f32
    %1621 = arith.mulf %1405, %cst_335 : f32
    %1622 = arith.addf %1403, %1621 : f32
    %1623 = vector.extract_strided_slice %1408 {offsets = [0, 0], sizes = [2, 32], strides = [1, 1]} : vector<8x32xf32> to vector<2x32xf32>
    %1624 = vector.extract_strided_slice %1408 {offsets = [2, 0], sizes = [2, 32], strides = [1, 1]} : vector<8x32xf32> to vector<2x32xf32>
    %1625 = vector.extract_strided_slice %1408 {offsets = [4, 0], sizes = [2, 32], strides = [1, 1]} : vector<8x32xf32> to vector<2x32xf32>
    %1626 = vector.extract_strided_slice %1408 {offsets = [6, 0], sizes = [2, 32], strides = [1, 1]} : vector<8x32xf32> to vector<2x32xf32>
    %1627 = vector.broadcast %1621 : f32 to vector<2x32xf32>
    %1628 = arith.mulf %1627, %1626 : vector<2x32xf32>
    %1629 = arith.addf %1625, %1628 : vector<2x32xf32>
    %1630 = vector.broadcast %1621 : f32 to vector<2x32xf32>
    %1631 = arith.mulf %1630, %1629 : vector<2x32xf32>
    %1632 = arith.addf %1624, %1631 : vector<2x32xf32>
    %1633 = vector.broadcast %1621 : f32 to vector<2x32xf32>
    %1634 = arith.mulf %1633, %1632 : vector<2x32xf32>
    %1635 = arith.addf %1623, %1634 : vector<2x32xf32>
    %cst_336 = arith.constant dense<0.000000e+00> : vector<2x32xf32>
    %1636 = tpu.matmul %1620, %1, %cst_336 {dimension_numbers = #tpu.dot_dimension_numbers<[1], [0], [0], [1], [0, 0, 1, 1], [], []>} : vector<2x32xf32>, vector<32x32xf32>, vector<2x32xf32> -> vector<2x32xf32>
    %1637 = arith.addf %1636, %1635 : vector<2x32xf32>
    %1638 = vector.broadcast %1622 : f32 to vector<1x32xf32>
    %1639 = arith.mulf %1638, %9 : vector<1x32xf32>
    %1640 = arith.addf %1639, %10 : vector<1x32xf32>
    %1641 = vector.broadcast %1640 : vector<1x32xf32> to vector<2x32xf32>
    %1642 = arith.addf %1637, %1641 : vector<2x32xf32>
    %cst_337 = arith.constant dense<0.000000e+00> : vector<2x32xf32>
    %1643 = tpu.matmul %1642, %3, %cst_337 {dimension_numbers = #tpu.dot_dimension_numbers<[1], [0], [0], [1], [0, 0, 1, 1], [], []>} : vector<2x32xf32>, vector<32x32xf32>, vector<2x32xf32> -> vector<2x32xf32>
    %1644 = vector.broadcast %11 : vector<1x32xf32> to vector<2x32xf32>
    %1645 = arith.addf %1643, %1644 : vector<2x32xf32>
    %1646 = arith.negf %1645 : vector<2x32xf32>
    %1647 = math.exp %1646 : vector<2x32xf32>
    %cst_338 = arith.constant 1.000000e+00 : f32
    %1648 = vector.broadcast %cst_338 : f32 to vector<2x32xf32>
    %1649 = arith.addf %1648, %1647 : vector<2x32xf32>
    %1650 = arith.divf %1648, %1649 : vector<2x32xf32>
    %1651 = arith.mulf %1645, %1650 : vector<2x32xf32>
    %cst_339 = arith.constant dense<0.000000e+00> : vector<2x32xf32>
    %1652 = tpu.matmul %1651, %4, %cst_339 {dimension_numbers = #tpu.dot_dimension_numbers<[1], [0], [0], [1], [0, 0, 1, 1], [], []>} : vector<2x32xf32>, vector<32x32xf32>, vector<2x32xf32> -> vector<2x32xf32>
    %1653 = vector.broadcast %12 : vector<1x32xf32> to vector<2x32xf32>
    %1654 = arith.addf %1652, %1653 : vector<2x32xf32>
    %1655 = arith.negf %1654 : vector<2x32xf32>
    %1656 = math.exp %1655 : vector<2x32xf32>
    %cst_340 = arith.constant 1.000000e+00 : f32
    %1657 = vector.broadcast %cst_340 : f32 to vector<2x32xf32>
    %1658 = arith.addf %1657, %1656 : vector<2x32xf32>
    %1659 = arith.divf %1657, %1658 : vector<2x32xf32>
    %1660 = arith.mulf %1654, %1659 : vector<2x32xf32>
    %cst_341 = arith.constant dense<0.000000e+00> : vector<2x32xf32>
    %1661 = tpu.matmul %1660, %5, %cst_341 {dimension_numbers = #tpu.dot_dimension_numbers<[1], [0], [0], [1], [0, 0, 1, 1], [], []>} : vector<2x32xf32>, vector<32x32xf32>, vector<2x32xf32> -> vector<2x32xf32>
    %1662 = vector.broadcast %13 : vector<1x32xf32> to vector<2x32xf32>
    %1663 = arith.addf %1661, %1662 : vector<2x32xf32>
    %cst_342 = arith.constant 2.84627533 : f32
    %1664 = arith.mulf %1405, %cst_342 : f32
    %1665 = vector.broadcast %1664 : f32 to vector<2x32xf32>
    %1666 = arith.mulf %1665, %1451 : vector<2x32xf32>
    %1667 = arith.addf %1401, %1666 : vector<2x32xf32>
    %cst_343 = arith.constant -10.757576 : f32
    %1668 = arith.mulf %1405, %cst_343 : f32
    %1669 = vector.broadcast %1668 : f32 to vector<2x32xf32>
    %1670 = arith.mulf %1669, %1498 : vector<2x32xf32>
    %1671 = arith.addf %1667, %1670 : vector<2x32xf32>
    %cst_344 = arith.constant 8.90642261 : f32
    %1672 = arith.mulf %1405, %cst_344 : f32
    %1673 = vector.broadcast %1672 : f32 to vector<2x32xf32>
    %1674 = arith.mulf %1673, %1549 : vector<2x32xf32>
    %1675 = arith.addf %1671, %1674 : vector<2x32xf32>
    %cst_345 = arith.constant 0.278409094 : f32
    %1676 = arith.mulf %1405, %cst_345 : f32
    %1677 = vector.broadcast %1676 : f32 to vector<2x32xf32>
    %1678 = arith.mulf %1677, %1604 : vector<2x32xf32>
    %1679 = arith.addf %1675, %1678 : vector<2x32xf32>
    %cst_346 = arith.constant -0.273531318 : f32
    %1680 = arith.mulf %1405, %cst_346 : f32
    %1681 = vector.broadcast %1680 : f32 to vector<2x32xf32>
    %1682 = arith.mulf %1681, %1663 : vector<2x32xf32>
    %1683 = arith.addf %1679, %1682 : vector<2x32xf32>
    %cst_347 = arith.constant 1.000000e+00 : f32
    %1684 = arith.mulf %1405, %cst_347 : f32
    %1685 = arith.addf %1403, %1684 : f32
    %1686 = vector.extract_strided_slice %1408 {offsets = [0, 0], sizes = [2, 32], strides = [1, 1]} : vector<8x32xf32> to vector<2x32xf32>
    %1687 = vector.extract_strided_slice %1408 {offsets = [2, 0], sizes = [2, 32], strides = [1, 1]} : vector<8x32xf32> to vector<2x32xf32>
    %1688 = vector.extract_strided_slice %1408 {offsets = [4, 0], sizes = [2, 32], strides = [1, 1]} : vector<8x32xf32> to vector<2x32xf32>
    %1689 = vector.extract_strided_slice %1408 {offsets = [6, 0], sizes = [2, 32], strides = [1, 1]} : vector<8x32xf32> to vector<2x32xf32>
    %1690 = vector.broadcast %1684 : f32 to vector<2x32xf32>
    %1691 = arith.mulf %1690, %1689 : vector<2x32xf32>
    %1692 = arith.addf %1688, %1691 : vector<2x32xf32>
    %1693 = vector.broadcast %1684 : f32 to vector<2x32xf32>
    %1694 = arith.mulf %1693, %1692 : vector<2x32xf32>
    %1695 = arith.addf %1687, %1694 : vector<2x32xf32>
    %1696 = vector.broadcast %1684 : f32 to vector<2x32xf32>
    %1697 = arith.mulf %1696, %1695 : vector<2x32xf32>
    %1698 = arith.addf %1686, %1697 : vector<2x32xf32>
    %cst_348 = arith.constant dense<0.000000e+00> : vector<2x32xf32>
    %1699 = tpu.matmul %1683, %1, %cst_348 {dimension_numbers = #tpu.dot_dimension_numbers<[1], [0], [0], [1], [0, 0, 1, 1], [], []>} : vector<2x32xf32>, vector<32x32xf32>, vector<2x32xf32> -> vector<2x32xf32>
    %1700 = arith.addf %1699, %1698 : vector<2x32xf32>
    %1701 = vector.broadcast %1685 : f32 to vector<1x32xf32>
    %1702 = arith.mulf %1701, %9 : vector<1x32xf32>
    %1703 = arith.addf %1702, %10 : vector<1x32xf32>
    %1704 = vector.broadcast %1703 : vector<1x32xf32> to vector<2x32xf32>
    %1705 = arith.addf %1700, %1704 : vector<2x32xf32>
    %cst_349 = arith.constant dense<0.000000e+00> : vector<2x32xf32>
    %1706 = tpu.matmul %1705, %3, %cst_349 {dimension_numbers = #tpu.dot_dimension_numbers<[1], [0], [0], [1], [0, 0, 1, 1], [], []>} : vector<2x32xf32>, vector<32x32xf32>, vector<2x32xf32> -> vector<2x32xf32>
    %1707 = vector.broadcast %11 : vector<1x32xf32> to vector<2x32xf32>
    %1708 = arith.addf %1706, %1707 : vector<2x32xf32>
    %1709 = arith.negf %1708 : vector<2x32xf32>
    %1710 = math.exp %1709 : vector<2x32xf32>
    %cst_350 = arith.constant 1.000000e+00 : f32
    %1711 = vector.broadcast %cst_350 : f32 to vector<2x32xf32>
    %1712 = arith.addf %1711, %1710 : vector<2x32xf32>
    %1713 = arith.divf %1711, %1712 : vector<2x32xf32>
    %1714 = arith.mulf %1708, %1713 : vector<2x32xf32>
    %cst_351 = arith.constant dense<0.000000e+00> : vector<2x32xf32>
    %1715 = tpu.matmul %1714, %4, %cst_351 {dimension_numbers = #tpu.dot_dimension_numbers<[1], [0], [0], [1], [0, 0, 1, 1], [], []>} : vector<2x32xf32>, vector<32x32xf32>, vector<2x32xf32> -> vector<2x32xf32>
    %1716 = vector.broadcast %12 : vector<1x32xf32> to vector<2x32xf32>
    %1717 = arith.addf %1715, %1716 : vector<2x32xf32>
    %1718 = arith.negf %1717 : vector<2x32xf32>
    %1719 = math.exp %1718 : vector<2x32xf32>
    %cst_352 = arith.constant 1.000000e+00 : f32
    %1720 = vector.broadcast %cst_352 : f32 to vector<2x32xf32>
    %1721 = arith.addf %1720, %1719 : vector<2x32xf32>
    %1722 = arith.divf %1720, %1721 : vector<2x32xf32>
    %1723 = arith.mulf %1717, %1722 : vector<2x32xf32>
    %cst_353 = arith.constant dense<0.000000e+00> : vector<2x32xf32>
    %1724 = tpu.matmul %1723, %5, %cst_353 {dimension_numbers = #tpu.dot_dimension_numbers<[1], [0], [0], [1], [0, 0, 1, 1], [], []>} : vector<2x32xf32>, vector<32x32xf32>, vector<2x32xf32> -> vector<2x32xf32>
    %1725 = vector.broadcast %13 : vector<1x32xf32> to vector<2x32xf32>
    %1726 = arith.addf %1724, %1725 : vector<2x32xf32>
    %cst_354 = arith.constant 0.0911458358 : f32
    %1727 = arith.mulf %1405, %cst_354 : f32
    %1728 = vector.broadcast %1727 : f32 to vector<2x32xf32>
    %1729 = arith.mulf %1728, %1451 : vector<2x32xf32>
    %1730 = arith.addf %1401, %1729 : vector<2x32xf32>
    %cst_355 = arith.constant 0.449236304 : f32
    %1731 = arith.mulf %1405, %cst_355 : f32
    %1732 = vector.broadcast %1731 : f32 to vector<2x32xf32>
    %1733 = arith.mulf %1732, %1549 : vector<2x32xf32>
    %1734 = arith.addf %1730, %1733 : vector<2x32xf32>
    %cst_356 = arith.constant 0.651041686 : f32
    %1735 = arith.mulf %1405, %cst_356 : f32
    %1736 = vector.broadcast %1735 : f32 to vector<2x32xf32>
    %1737 = arith.mulf %1736, %1604 : vector<2x32xf32>
    %1738 = arith.addf %1734, %1737 : vector<2x32xf32>
    %cst_357 = arith.constant -0.322376192 : f32
    %1739 = arith.mulf %1405, %cst_357 : f32
    %1740 = vector.broadcast %1739 : f32 to vector<2x32xf32>
    %1741 = arith.mulf %1740, %1663 : vector<2x32xf32>
    %1742 = arith.addf %1738, %1741 : vector<2x32xf32>
    %cst_358 = arith.constant 0.130952388 : f32
    %1743 = arith.mulf %1405, %cst_358 : f32
    %1744 = vector.broadcast %1743 : f32 to vector<2x32xf32>
    %1745 = arith.mulf %1744, %1726 : vector<2x32xf32>
    %1746 = arith.addf %1742, %1745 : vector<2x32xf32>
    %c10 = arith.constant 10 : index
    %c0_359 = arith.constant 0 : index
    %1747 = vector.load %arg10[%c10, %c0_359] : memref<16x32xf32, #tpu.memory_space<vmem>>, vector<2x32xf32>
    tpu.vector_store %arg10[%c10, %c0_359], %1746 {strides = array<i32>} : memref<16x32xf32, #tpu.memory_space<vmem>>, vector<2x32xf32>,
    %c5_360 = arith.constant 5 : index
    %1748 = memref.load %arg0[%c5_360] : memref<8xf32, #tpu.memory_space<smem>>
    %c6_361 = arith.constant 6 : index
    %1749 = memref.load %arg0[%c6_361] : memref<8xf32, #tpu.memory_space<smem>>
    %1750 = arith.subf %1749, %1748 : f32
    %c5_362 = arith.constant 5 : index
    %c0_363 = arith.constant 0 : index
    %c0_364 = arith.constant 0 : index
    %1751 = vector.load %arg1[%c5_362, %c0_363, %c0_364] : memref<7x8x4xf32, #tpu.memory_space<vmem>>, vector<1x8x4xf32>
    %1752 = vector.shape_cast %1751 : vector<1x8x4xf32> to vector<8x4xf32>
    %cst_365 = arith.constant dense<0.000000e+00> : vector<8x32xf32>
    %1753 = tpu.matmul %1752, %2, %cst_365 {dimension_numbers = #tpu.dot_dimension_numbers<[1], [0], [0], [1], [0, 0, 1, 1], [], []>} : vector<8x4xf32>, vector<4x32xf32>, vector<8x32xf32> -> vector<8x32xf32>
    %cst_366 = arith.constant 0.000000e+00 : f32
    %1754 = arith.mulf %1750, %cst_366 : f32
    %1755 = arith.addf %1748, %1754 : f32
    %1756 = vector.extract_strided_slice %1753 {offsets = [0, 0], sizes = [2, 32], strides = [1, 1]} : vector<8x32xf32> to vector<2x32xf32>
    %1757 = vector.extract_strided_slice %1753 {offsets = [2, 0], sizes = [2, 32], strides = [1, 1]} : vector<8x32xf32> to vector<2x32xf32>
    %1758 = vector.extract_strided_slice %1753 {offsets = [4, 0], sizes = [2, 32], strides = [1, 1]} : vector<8x32xf32> to vector<2x32xf32>
    %1759 = vector.extract_strided_slice %1753 {offsets = [6, 0], sizes = [2, 32], strides = [1, 1]} : vector<8x32xf32> to vector<2x32xf32>
    %1760 = vector.broadcast %1754 : f32 to vector<2x32xf32>
    %1761 = arith.mulf %1760, %1759 : vector<2x32xf32>
    %1762 = arith.addf %1758, %1761 : vector<2x32xf32>
    %1763 = vector.broadcast %1754 : f32 to vector<2x32xf32>
    %1764 = arith.mulf %1763, %1762 : vector<2x32xf32>
    %1765 = arith.addf %1757, %1764 : vector<2x32xf32>
    %1766 = vector.broadcast %1754 : f32 to vector<2x32xf32>
    %1767 = arith.mulf %1766, %1765 : vector<2x32xf32>
    %1768 = arith.addf %1756, %1767 : vector<2x32xf32>
    %cst_367 = arith.constant dense<0.000000e+00> : vector<2x32xf32>
    %1769 = tpu.matmul %1746, %1, %cst_367 {dimension_numbers = #tpu.dot_dimension_numbers<[1], [0], [0], [1], [0, 0, 1, 1], [], []>} : vector<2x32xf32>, vector<32x32xf32>, vector<2x32xf32> -> vector<2x32xf32>
    %1770 = arith.addf %1769, %1768 : vector<2x32xf32>
    %1771 = vector.broadcast %1755 : f32 to vector<1x32xf32>
    %1772 = arith.mulf %1771, %9 : vector<1x32xf32>
    %1773 = arith.addf %1772, %10 : vector<1x32xf32>
    %1774 = vector.broadcast %1773 : vector<1x32xf32> to vector<2x32xf32>
    %1775 = arith.addf %1770, %1774 : vector<2x32xf32>
    %cst_368 = arith.constant dense<0.000000e+00> : vector<2x32xf32>
    %1776 = tpu.matmul %1775, %3, %cst_368 {dimension_numbers = #tpu.dot_dimension_numbers<[1], [0], [0], [1], [0, 0, 1, 1], [], []>} : vector<2x32xf32>, vector<32x32xf32>, vector<2x32xf32> -> vector<2x32xf32>
    %1777 = vector.broadcast %11 : vector<1x32xf32> to vector<2x32xf32>
    %1778 = arith.addf %1776, %1777 : vector<2x32xf32>
    %1779 = arith.negf %1778 : vector<2x32xf32>
    %1780 = math.exp %1779 : vector<2x32xf32>
    %cst_369 = arith.constant 1.000000e+00 : f32
    %1781 = vector.broadcast %cst_369 : f32 to vector<2x32xf32>
    %1782 = arith.addf %1781, %1780 : vector<2x32xf32>
    %1783 = arith.divf %1781, %1782 : vector<2x32xf32>
    %1784 = arith.mulf %1778, %1783 : vector<2x32xf32>
    %cst_370 = arith.constant dense<0.000000e+00> : vector<2x32xf32>
    %1785 = tpu.matmul %1784, %4, %cst_370 {dimension_numbers = #tpu.dot_dimension_numbers<[1], [0], [0], [1], [0, 0, 1, 1], [], []>} : vector<2x32xf32>, vector<32x32xf32>, vector<2x32xf32> -> vector<2x32xf32>
    %1786 = vector.broadcast %12 : vector<1x32xf32> to vector<2x32xf32>
    %1787 = arith.addf %1785, %1786 : vector<2x32xf32>
    %1788 = arith.negf %1787 : vector<2x32xf32>
    %1789 = math.exp %1788 : vector<2x32xf32>
    %cst_371 = arith.constant 1.000000e+00 : f32
    %1790 = vector.broadcast %cst_371 : f32 to vector<2x32xf32>
    %1791 = arith.addf %1790, %1789 : vector<2x32xf32>
    %1792 = arith.divf %1790, %1791 : vector<2x32xf32>
    %1793 = arith.mulf %1787, %1792 : vector<2x32xf32>
    %cst_372 = arith.constant dense<0.000000e+00> : vector<2x32xf32>
    %1794 = tpu.matmul %1793, %5, %cst_372 {dimension_numbers = #tpu.dot_dimension_numbers<[1], [0], [0], [1], [0, 0, 1, 1], [], []>} : vector<2x32xf32>, vector<32x32xf32>, vector<2x32xf32> -> vector<2x32xf32>
    %1795 = vector.broadcast %13 : vector<1x32xf32> to vector<2x32xf32>
    %1796 = arith.addf %1794, %1795 : vector<2x32xf32>
    %cst_373 = arith.constant 2.000000e-01 : f32
    %1797 = arith.mulf %1750, %cst_373 : f32
    %1798 = vector.broadcast %1797 : f32 to vector<2x32xf32>
    %1799 = arith.mulf %1798, %1796 : vector<2x32xf32>
    %1800 = arith.addf %1746, %1799 : vector<2x32xf32>
    %cst_374 = arith.constant 2.000000e-01 : f32
    %1801 = arith.mulf %1750, %cst_374 : f32
    %1802 = arith.addf %1748, %1801 : f32
    %1803 = vector.extract_strided_slice %1753 {offsets = [0, 0], sizes = [2, 32], strides = [1, 1]} : vector<8x32xf32> to vector<2x32xf32>
    %1804 = vector.extract_strided_slice %1753 {offsets = [2, 0], sizes = [2, 32], strides = [1, 1]} : vector<8x32xf32> to vector<2x32xf32>
    %1805 = vector.extract_strided_slice %1753 {offsets = [4, 0], sizes = [2, 32], strides = [1, 1]} : vector<8x32xf32> to vector<2x32xf32>
    %1806 = vector.extract_strided_slice %1753 {offsets = [6, 0], sizes = [2, 32], strides = [1, 1]} : vector<8x32xf32> to vector<2x32xf32>
    %1807 = vector.broadcast %1801 : f32 to vector<2x32xf32>
    %1808 = arith.mulf %1807, %1806 : vector<2x32xf32>
    %1809 = arith.addf %1805, %1808 : vector<2x32xf32>
    %1810 = vector.broadcast %1801 : f32 to vector<2x32xf32>
    %1811 = arith.mulf %1810, %1809 : vector<2x32xf32>
    %1812 = arith.addf %1804, %1811 : vector<2x32xf32>
    %1813 = vector.broadcast %1801 : f32 to vector<2x32xf32>
    %1814 = arith.mulf %1813, %1812 : vector<2x32xf32>
    %1815 = arith.addf %1803, %1814 : vector<2x32xf32>
    %cst_375 = arith.constant dense<0.000000e+00> : vector<2x32xf32>
    %1816 = tpu.matmul %1800, %1, %cst_375 {dimension_numbers = #tpu.dot_dimension_numbers<[1], [0], [0], [1], [0, 0, 1, 1], [], []>} : vector<2x32xf32>, vector<32x32xf32>, vector<2x32xf32> -> vector<2x32xf32>
    %1817 = arith.addf %1816, %1815 : vector<2x32xf32>
    %1818 = vector.broadcast %1802 : f32 to vector<1x32xf32>
    %1819 = arith.mulf %1818, %9 : vector<1x32xf32>
    %1820 = arith.addf %1819, %10 : vector<1x32xf32>
    %1821 = vector.broadcast %1820 : vector<1x32xf32> to vector<2x32xf32>
    %1822 = arith.addf %1817, %1821 : vector<2x32xf32>
    %cst_376 = arith.constant dense<0.000000e+00> : vector<2x32xf32>
    %1823 = tpu.matmul %1822, %3, %cst_376 {dimension_numbers = #tpu.dot_dimension_numbers<[1], [0], [0], [1], [0, 0, 1, 1], [], []>} : vector<2x32xf32>, vector<32x32xf32>, vector<2x32xf32> -> vector<2x32xf32>
    %1824 = vector.broadcast %11 : vector<1x32xf32> to vector<2x32xf32>
    %1825 = arith.addf %1823, %1824 : vector<2x32xf32>
    %1826 = arith.negf %1825 : vector<2x32xf32>
    %1827 = math.exp %1826 : vector<2x32xf32>
    %cst_377 = arith.constant 1.000000e+00 : f32
    %1828 = vector.broadcast %cst_377 : f32 to vector<2x32xf32>
    %1829 = arith.addf %1828, %1827 : vector<2x32xf32>
    %1830 = arith.divf %1828, %1829 : vector<2x32xf32>
    %1831 = arith.mulf %1825, %1830 : vector<2x32xf32>
    %cst_378 = arith.constant dense<0.000000e+00> : vector<2x32xf32>
    %1832 = tpu.matmul %1831, %4, %cst_378 {dimension_numbers = #tpu.dot_dimension_numbers<[1], [0], [0], [1], [0, 0, 1, 1], [], []>} : vector<2x32xf32>, vector<32x32xf32>, vector<2x32xf32> -> vector<2x32xf32>
    %1833 = vector.broadcast %12 : vector<1x32xf32> to vector<2x32xf32>
    %1834 = arith.addf %1832, %1833 : vector<2x32xf32>
    %1835 = arith.negf %1834 : vector<2x32xf32>
    %1836 = math.exp %1835 : vector<2x32xf32>
    %cst_379 = arith.constant 1.000000e+00 : f32
    %1837 = vector.broadcast %cst_379 : f32 to vector<2x32xf32>
    %1838 = arith.addf %1837, %1836 : vector<2x32xf32>
    %1839 = arith.divf %1837, %1838 : vector<2x32xf32>
    %1840 = arith.mulf %1834, %1839 : vector<2x32xf32>
    %cst_380 = arith.constant dense<0.000000e+00> : vector<2x32xf32>
    %1841 = tpu.matmul %1840, %5, %cst_380 {dimension_numbers = #tpu.dot_dimension_numbers<[1], [0], [0], [1], [0, 0, 1, 1], [], []>} : vector<2x32xf32>, vector<32x32xf32>, vector<2x32xf32> -> vector<2x32xf32>
    %1842 = vector.broadcast %13 : vector<1x32xf32> to vector<2x32xf32>
    %1843 = arith.addf %1841, %1842 : vector<2x32xf32>
    %cst_381 = arith.constant 7.500000e-02 : f32
    %1844 = arith.mulf %1750, %cst_381 : f32
    %1845 = vector.broadcast %1844 : f32 to vector<2x32xf32>
    %1846 = arith.mulf %1845, %1796 : vector<2x32xf32>
    %1847 = arith.addf %1746, %1846 : vector<2x32xf32>
    %cst_382 = arith.constant 2.250000e-01 : f32
    %1848 = arith.mulf %1750, %cst_382 : f32
    %1849 = vector.broadcast %1848 : f32 to vector<2x32xf32>
    %1850 = arith.mulf %1849, %1843 : vector<2x32xf32>
    %1851 = arith.addf %1847, %1850 : vector<2x32xf32>
    %cst_383 = arith.constant 3.000000e-01 : f32
    %1852 = arith.mulf %1750, %cst_383 : f32
    %1853 = arith.addf %1748, %1852 : f32
    %1854 = vector.extract_strided_slice %1753 {offsets = [0, 0], sizes = [2, 32], strides = [1, 1]} : vector<8x32xf32> to vector<2x32xf32>
    %1855 = vector.extract_strided_slice %1753 {offsets = [2, 0], sizes = [2, 32], strides = [1, 1]} : vector<8x32xf32> to vector<2x32xf32>
    %1856 = vector.extract_strided_slice %1753 {offsets = [4, 0], sizes = [2, 32], strides = [1, 1]} : vector<8x32xf32> to vector<2x32xf32>
    %1857 = vector.extract_strided_slice %1753 {offsets = [6, 0], sizes = [2, 32], strides = [1, 1]} : vector<8x32xf32> to vector<2x32xf32>
    %1858 = vector.broadcast %1852 : f32 to vector<2x32xf32>
    %1859 = arith.mulf %1858, %1857 : vector<2x32xf32>
    %1860 = arith.addf %1856, %1859 : vector<2x32xf32>
    %1861 = vector.broadcast %1852 : f32 to vector<2x32xf32>
    %1862 = arith.mulf %1861, %1860 : vector<2x32xf32>
    %1863 = arith.addf %1855, %1862 : vector<2x32xf32>
    %1864 = vector.broadcast %1852 : f32 to vector<2x32xf32>
    %1865 = arith.mulf %1864, %1863 : vector<2x32xf32>
    %1866 = arith.addf %1854, %1865 : vector<2x32xf32>
    %cst_384 = arith.constant dense<0.000000e+00> : vector<2x32xf32>
    %1867 = tpu.matmul %1851, %1, %cst_384 {dimension_numbers = #tpu.dot_dimension_numbers<[1], [0], [0], [1], [0, 0, 1, 1], [], []>} : vector<2x32xf32>, vector<32x32xf32>, vector<2x32xf32> -> vector<2x32xf32>
    %1868 = arith.addf %1867, %1866 : vector<2x32xf32>
    %1869 = vector.broadcast %1853 : f32 to vector<1x32xf32>
    %1870 = arith.mulf %1869, %9 : vector<1x32xf32>
    %1871 = arith.addf %1870, %10 : vector<1x32xf32>
    %1872 = vector.broadcast %1871 : vector<1x32xf32> to vector<2x32xf32>
    %1873 = arith.addf %1868, %1872 : vector<2x32xf32>
    %cst_385 = arith.constant dense<0.000000e+00> : vector<2x32xf32>
    %1874 = tpu.matmul %1873, %3, %cst_385 {dimension_numbers = #tpu.dot_dimension_numbers<[1], [0], [0], [1], [0, 0, 1, 1], [], []>} : vector<2x32xf32>, vector<32x32xf32>, vector<2x32xf32> -> vector<2x32xf32>
    %1875 = vector.broadcast %11 : vector<1x32xf32> to vector<2x32xf32>
    %1876 = arith.addf %1874, %1875 : vector<2x32xf32>
    %1877 = arith.negf %1876 : vector<2x32xf32>
    %1878 = math.exp %1877 : vector<2x32xf32>
    %cst_386 = arith.constant 1.000000e+00 : f32
    %1879 = vector.broadcast %cst_386 : f32 to vector<2x32xf32>
    %1880 = arith.addf %1879, %1878 : vector<2x32xf32>
    %1881 = arith.divf %1879, %1880 : vector<2x32xf32>
    %1882 = arith.mulf %1876, %1881 : vector<2x32xf32>
    %cst_387 = arith.constant dense<0.000000e+00> : vector<2x32xf32>
    %1883 = tpu.matmul %1882, %4, %cst_387 {dimension_numbers = #tpu.dot_dimension_numbers<[1], [0], [0], [1], [0, 0, 1, 1], [], []>} : vector<2x32xf32>, vector<32x32xf32>, vector<2x32xf32> -> vector<2x32xf32>
    %1884 = vector.broadcast %12 : vector<1x32xf32> to vector<2x32xf32>
    %1885 = arith.addf %1883, %1884 : vector<2x32xf32>
    %1886 = arith.negf %1885 : vector<2x32xf32>
    %1887 = math.exp %1886 : vector<2x32xf32>
    %cst_388 = arith.constant 1.000000e+00 : f32
    %1888 = vector.broadcast %cst_388 : f32 to vector<2x32xf32>
    %1889 = arith.addf %1888, %1887 : vector<2x32xf32>
    %1890 = arith.divf %1888, %1889 : vector<2x32xf32>
    %1891 = arith.mulf %1885, %1890 : vector<2x32xf32>
    %cst_389 = arith.constant dense<0.000000e+00> : vector<2x32xf32>
    %1892 = tpu.matmul %1891, %5, %cst_389 {dimension_numbers = #tpu.dot_dimension_numbers<[1], [0], [0], [1], [0, 0, 1, 1], [], []>} : vector<2x32xf32>, vector<32x32xf32>, vector<2x32xf32> -> vector<2x32xf32>
    %1893 = vector.broadcast %13 : vector<1x32xf32> to vector<2x32xf32>
    %1894 = arith.addf %1892, %1893 : vector<2x32xf32>
    %cst_390 = arith.constant 0.977777779 : f32
    %1895 = arith.mulf %1750, %cst_390 : f32
    %1896 = vector.broadcast %1895 : f32 to vector<2x32xf32>
    %1897 = arith.mulf %1896, %1796 : vector<2x32xf32>
    %1898 = arith.addf %1746, %1897 : vector<2x32xf32>
    %cst_391 = arith.constant -3.73333335 : f32
    %1899 = arith.mulf %1750, %cst_391 : f32
    %1900 = vector.broadcast %1899 : f32 to vector<2x32xf32>
    %1901 = arith.mulf %1900, %1843 : vector<2x32xf32>
    %1902 = arith.addf %1898, %1901 : vector<2x32xf32>
    %cst_392 = arith.constant 3.55555558 : f32
    %1903 = arith.mulf %1750, %cst_392 : f32
    %1904 = vector.broadcast %1903 : f32 to vector<2x32xf32>
    %1905 = arith.mulf %1904, %1894 : vector<2x32xf32>
    %1906 = arith.addf %1902, %1905 : vector<2x32xf32>
    %cst_393 = arith.constant 8.000000e-01 : f32
    %1907 = arith.mulf %1750, %cst_393 : f32
    %1908 = arith.addf %1748, %1907 : f32
    %1909 = vector.extract_strided_slice %1753 {offsets = [0, 0], sizes = [2, 32], strides = [1, 1]} : vector<8x32xf32> to vector<2x32xf32>
    %1910 = vector.extract_strided_slice %1753 {offsets = [2, 0], sizes = [2, 32], strides = [1, 1]} : vector<8x32xf32> to vector<2x32xf32>
    %1911 = vector.extract_strided_slice %1753 {offsets = [4, 0], sizes = [2, 32], strides = [1, 1]} : vector<8x32xf32> to vector<2x32xf32>
    %1912 = vector.extract_strided_slice %1753 {offsets = [6, 0], sizes = [2, 32], strides = [1, 1]} : vector<8x32xf32> to vector<2x32xf32>
    %1913 = vector.broadcast %1907 : f32 to vector<2x32xf32>
    %1914 = arith.mulf %1913, %1912 : vector<2x32xf32>
    %1915 = arith.addf %1911, %1914 : vector<2x32xf32>
    %1916 = vector.broadcast %1907 : f32 to vector<2x32xf32>
    %1917 = arith.mulf %1916, %1915 : vector<2x32xf32>
    %1918 = arith.addf %1910, %1917 : vector<2x32xf32>
    %1919 = vector.broadcast %1907 : f32 to vector<2x32xf32>
    %1920 = arith.mulf %1919, %1918 : vector<2x32xf32>
    %1921 = arith.addf %1909, %1920 : vector<2x32xf32>
    %cst_394 = arith.constant dense<0.000000e+00> : vector<2x32xf32>
    %1922 = tpu.matmul %1906, %1, %cst_394 {dimension_numbers = #tpu.dot_dimension_numbers<[1], [0], [0], [1], [0, 0, 1, 1], [], []>} : vector<2x32xf32>, vector<32x32xf32>, vector<2x32xf32> -> vector<2x32xf32>
    %1923 = arith.addf %1922, %1921 : vector<2x32xf32>
    %1924 = vector.broadcast %1908 : f32 to vector<1x32xf32>
    %1925 = arith.mulf %1924, %9 : vector<1x32xf32>
    %1926 = arith.addf %1925, %10 : vector<1x32xf32>
    %1927 = vector.broadcast %1926 : vector<1x32xf32> to vector<2x32xf32>
    %1928 = arith.addf %1923, %1927 : vector<2x32xf32>
    %cst_395 = arith.constant dense<0.000000e+00> : vector<2x32xf32>
    %1929 = tpu.matmul %1928, %3, %cst_395 {dimension_numbers = #tpu.dot_dimension_numbers<[1], [0], [0], [1], [0, 0, 1, 1], [], []>} : vector<2x32xf32>, vector<32x32xf32>, vector<2x32xf32> -> vector<2x32xf32>
    %1930 = vector.broadcast %11 : vector<1x32xf32> to vector<2x32xf32>
    %1931 = arith.addf %1929, %1930 : vector<2x32xf32>
    %1932 = arith.negf %1931 : vector<2x32xf32>
    %1933 = math.exp %1932 : vector<2x32xf32>
    %cst_396 = arith.constant 1.000000e+00 : f32
    %1934 = vector.broadcast %cst_396 : f32 to vector<2x32xf32>
    %1935 = arith.addf %1934, %1933 : vector<2x32xf32>
    %1936 = arith.divf %1934, %1935 : vector<2x32xf32>
    %1937 = arith.mulf %1931, %1936 : vector<2x32xf32>
    %cst_397 = arith.constant dense<0.000000e+00> : vector<2x32xf32>
    %1938 = tpu.matmul %1937, %4, %cst_397 {dimension_numbers = #tpu.dot_dimension_numbers<[1], [0], [0], [1], [0, 0, 1, 1], [], []>} : vector<2x32xf32>, vector<32x32xf32>, vector<2x32xf32> -> vector<2x32xf32>
    %1939 = vector.broadcast %12 : vector<1x32xf32> to vector<2x32xf32>
    %1940 = arith.addf %1938, %1939 : vector<2x32xf32>
    %1941 = arith.negf %1940 : vector<2x32xf32>
    %1942 = math.exp %1941 : vector<2x32xf32>
    %cst_398 = arith.constant 1.000000e+00 : f32
    %1943 = vector.broadcast %cst_398 : f32 to vector<2x32xf32>
    %1944 = arith.addf %1943, %1942 : vector<2x32xf32>
    %1945 = arith.divf %1943, %1944 : vector<2x32xf32>
    %1946 = arith.mulf %1940, %1945 : vector<2x32xf32>
    %cst_399 = arith.constant dense<0.000000e+00> : vector<2x32xf32>
    %1947 = tpu.matmul %1946, %5, %cst_399 {dimension_numbers = #tpu.dot_dimension_numbers<[1], [0], [0], [1], [0, 0, 1, 1], [], []>} : vector<2x32xf32>, vector<32x32xf32>, vector<2x32xf32> -> vector<2x32xf32>
    %1948 = vector.broadcast %13 : vector<1x32xf32> to vector<2x32xf32>
    %1949 = arith.addf %1947, %1948 : vector<2x32xf32>
    %cst_400 = arith.constant 2.95259857 : f32
    %1950 = arith.mulf %1750, %cst_400 : f32
    %1951 = vector.broadcast %1950 : f32 to vector<2x32xf32>
    %1952 = arith.mulf %1951, %1796 : vector<2x32xf32>
    %1953 = arith.addf %1746, %1952 : vector<2x32xf32>
    %cst_401 = arith.constant -11.5957937 : f32
    %1954 = arith.mulf %1750, %cst_401 : f32
    %1955 = vector.broadcast %1954 : f32 to vector<2x32xf32>
    %1956 = arith.mulf %1955, %1843 : vector<2x32xf32>
    %1957 = arith.addf %1953, %1956 : vector<2x32xf32>
    %cst_402 = arith.constant 9.82289314 : f32
    %1958 = arith.mulf %1750, %cst_402 : f32
    %1959 = vector.broadcast %1958 : f32 to vector<2x32xf32>
    %1960 = arith.mulf %1959, %1894 : vector<2x32xf32>
    %1961 = arith.addf %1957, %1960 : vector<2x32xf32>
    %cst_403 = arith.constant -0.290809333 : f32
    %1962 = arith.mulf %1750, %cst_403 : f32
    %1963 = vector.broadcast %1962 : f32 to vector<2x32xf32>
    %1964 = arith.mulf %1963, %1949 : vector<2x32xf32>
    %1965 = arith.addf %1961, %1964 : vector<2x32xf32>
    %cst_404 = arith.constant 0.888888895 : f32
    %1966 = arith.mulf %1750, %cst_404 : f32
    %1967 = arith.addf %1748, %1966 : f32
    %1968 = vector.extract_strided_slice %1753 {offsets = [0, 0], sizes = [2, 32], strides = [1, 1]} : vector<8x32xf32> to vector<2x32xf32>
    %1969 = vector.extract_strided_slice %1753 {offsets = [2, 0], sizes = [2, 32], strides = [1, 1]} : vector<8x32xf32> to vector<2x32xf32>
    %1970 = vector.extract_strided_slice %1753 {offsets = [4, 0], sizes = [2, 32], strides = [1, 1]} : vector<8x32xf32> to vector<2x32xf32>
    %1971 = vector.extract_strided_slice %1753 {offsets = [6, 0], sizes = [2, 32], strides = [1, 1]} : vector<8x32xf32> to vector<2x32xf32>
    %1972 = vector.broadcast %1966 : f32 to vector<2x32xf32>
    %1973 = arith.mulf %1972, %1971 : vector<2x32xf32>
    %1974 = arith.addf %1970, %1973 : vector<2x32xf32>
    %1975 = vector.broadcast %1966 : f32 to vector<2x32xf32>
    %1976 = arith.mulf %1975, %1974 : vector<2x32xf32>
    %1977 = arith.addf %1969, %1976 : vector<2x32xf32>
    %1978 = vector.broadcast %1966 : f32 to vector<2x32xf32>
    %1979 = arith.mulf %1978, %1977 : vector<2x32xf32>
    %1980 = arith.addf %1968, %1979 : vector<2x32xf32>
    %cst_405 = arith.constant dense<0.000000e+00> : vector<2x32xf32>
    %1981 = tpu.matmul %1965, %1, %cst_405 {dimension_numbers = #tpu.dot_dimension_numbers<[1], [0], [0], [1], [0, 0, 1, 1], [], []>} : vector<2x32xf32>, vector<32x32xf32>, vector<2x32xf32> -> vector<2x32xf32>
    %1982 = arith.addf %1981, %1980 : vector<2x32xf32>
    %1983 = vector.broadcast %1967 : f32 to vector<1x32xf32>
    %1984 = arith.mulf %1983, %9 : vector<1x32xf32>
    %1985 = arith.addf %1984, %10 : vector<1x32xf32>
    %1986 = vector.broadcast %1985 : vector<1x32xf32> to vector<2x32xf32>
    %1987 = arith.addf %1982, %1986 : vector<2x32xf32>
    %cst_406 = arith.constant dense<0.000000e+00> : vector<2x32xf32>
    %1988 = tpu.matmul %1987, %3, %cst_406 {dimension_numbers = #tpu.dot_dimension_numbers<[1], [0], [0], [1], [0, 0, 1, 1], [], []>} : vector<2x32xf32>, vector<32x32xf32>, vector<2x32xf32> -> vector<2x32xf32>
    %1989 = vector.broadcast %11 : vector<1x32xf32> to vector<2x32xf32>
    %1990 = arith.addf %1988, %1989 : vector<2x32xf32>
    %1991 = arith.negf %1990 : vector<2x32xf32>
    %1992 = math.exp %1991 : vector<2x32xf32>
    %cst_407 = arith.constant 1.000000e+00 : f32
    %1993 = vector.broadcast %cst_407 : f32 to vector<2x32xf32>
    %1994 = arith.addf %1993, %1992 : vector<2x32xf32>
    %1995 = arith.divf %1993, %1994 : vector<2x32xf32>
    %1996 = arith.mulf %1990, %1995 : vector<2x32xf32>
    %cst_408 = arith.constant dense<0.000000e+00> : vector<2x32xf32>
    %1997 = tpu.matmul %1996, %4, %cst_408 {dimension_numbers = #tpu.dot_dimension_numbers<[1], [0], [0], [1], [0, 0, 1, 1], [], []>} : vector<2x32xf32>, vector<32x32xf32>, vector<2x32xf32> -> vector<2x32xf32>
    %1998 = vector.broadcast %12 : vector<1x32xf32> to vector<2x32xf32>
    %1999 = arith.addf %1997, %1998 : vector<2x32xf32>
    %2000 = arith.negf %1999 : vector<2x32xf32>
    %2001 = math.exp %2000 : vector<2x32xf32>
    %cst_409 = arith.constant 1.000000e+00 : f32
    %2002 = vector.broadcast %cst_409 : f32 to vector<2x32xf32>
    %2003 = arith.addf %2002, %2001 : vector<2x32xf32>
    %2004 = arith.divf %2002, %2003 : vector<2x32xf32>
    %2005 = arith.mulf %1999, %2004 : vector<2x32xf32>
    %cst_410 = arith.constant dense<0.000000e+00> : vector<2x32xf32>
    %2006 = tpu.matmul %2005, %5, %cst_410 {dimension_numbers = #tpu.dot_dimension_numbers<[1], [0], [0], [1], [0, 0, 1, 1], [], []>} : vector<2x32xf32>, vector<32x32xf32>, vector<2x32xf32> -> vector<2x32xf32>
    %2007 = vector.broadcast %13 : vector<1x32xf32> to vector<2x32xf32>
    %2008 = arith.addf %2006, %2007 : vector<2x32xf32>
    %cst_411 = arith.constant 2.84627533 : f32
    %2009 = arith.mulf %1750, %cst_411 : f32
    %2010 = vector.broadcast %2009 : f32 to vector<2x32xf32>
    %2011 = arith.mulf %2010, %1796 : vector<2x32xf32>
    %2012 = arith.addf %1746, %2011 : vector<2x32xf32>
    %cst_412 = arith.constant -10.757576 : f32
    %2013 = arith.mulf %1750, %cst_412 : f32
    %2014 = vector.broadcast %2013 : f32 to vector<2x32xf32>
    %2015 = arith.mulf %2014, %1843 : vector<2x32xf32>
    %2016 = arith.addf %2012, %2015 : vector<2x32xf32>
    %cst_413 = arith.constant 8.90642261 : f32
    %2017 = arith.mulf %1750, %cst_413 : f32
    %2018 = vector.broadcast %2017 : f32 to vector<2x32xf32>
    %2019 = arith.mulf %2018, %1894 : vector<2x32xf32>
    %2020 = arith.addf %2016, %2019 : vector<2x32xf32>
    %cst_414 = arith.constant 0.278409094 : f32
    %2021 = arith.mulf %1750, %cst_414 : f32
    %2022 = vector.broadcast %2021 : f32 to vector<2x32xf32>
    %2023 = arith.mulf %2022, %1949 : vector<2x32xf32>
    %2024 = arith.addf %2020, %2023 : vector<2x32xf32>
    %cst_415 = arith.constant -0.273531318 : f32
    %2025 = arith.mulf %1750, %cst_415 : f32
    %2026 = vector.broadcast %2025 : f32 to vector<2x32xf32>
    %2027 = arith.mulf %2026, %2008 : vector<2x32xf32>
    %2028 = arith.addf %2024, %2027 : vector<2x32xf32>
    %cst_416 = arith.constant 1.000000e+00 : f32
    %2029 = arith.mulf %1750, %cst_416 : f32
    %2030 = arith.addf %1748, %2029 : f32
    %2031 = vector.extract_strided_slice %1753 {offsets = [0, 0], sizes = [2, 32], strides = [1, 1]} : vector<8x32xf32> to vector<2x32xf32>
    %2032 = vector.extract_strided_slice %1753 {offsets = [2, 0], sizes = [2, 32], strides = [1, 1]} : vector<8x32xf32> to vector<2x32xf32>
    %2033 = vector.extract_strided_slice %1753 {offsets = [4, 0], sizes = [2, 32], strides = [1, 1]} : vector<8x32xf32> to vector<2x32xf32>
    %2034 = vector.extract_strided_slice %1753 {offsets = [6, 0], sizes = [2, 32], strides = [1, 1]} : vector<8x32xf32> to vector<2x32xf32>
    %2035 = vector.broadcast %2029 : f32 to vector<2x32xf32>
    %2036 = arith.mulf %2035, %2034 : vector<2x32xf32>
    %2037 = arith.addf %2033, %2036 : vector<2x32xf32>
    %2038 = vector.broadcast %2029 : f32 to vector<2x32xf32>
    %2039 = arith.mulf %2038, %2037 : vector<2x32xf32>
    %2040 = arith.addf %2032, %2039 : vector<2x32xf32>
    %2041 = vector.broadcast %2029 : f32 to vector<2x32xf32>
    %2042 = arith.mulf %2041, %2040 : vector<2x32xf32>
    %2043 = arith.addf %2031, %2042 : vector<2x32xf32>
    %cst_417 = arith.constant dense<0.000000e+00> : vector<2x32xf32>
    %2044 = tpu.matmul %2028, %1, %cst_417 {dimension_numbers = #tpu.dot_dimension_numbers<[1], [0], [0], [1], [0, 0, 1, 1], [], []>} : vector<2x32xf32>, vector<32x32xf32>, vector<2x32xf32> -> vector<2x32xf32>
    %2045 = arith.addf %2044, %2043 : vector<2x32xf32>
    %2046 = vector.broadcast %2030 : f32 to vector<1x32xf32>
    %2047 = arith.mulf %2046, %9 : vector<1x32xf32>
    %2048 = arith.addf %2047, %10 : vector<1x32xf32>
    %2049 = vector.broadcast %2048 : vector<1x32xf32> to vector<2x32xf32>
    %2050 = arith.addf %2045, %2049 : vector<2x32xf32>
    %cst_418 = arith.constant dense<0.000000e+00> : vector<2x32xf32>
    %2051 = tpu.matmul %2050, %3, %cst_418 {dimension_numbers = #tpu.dot_dimension_numbers<[1], [0], [0], [1], [0, 0, 1, 1], [], []>} : vector<2x32xf32>, vector<32x32xf32>, vector<2x32xf32> -> vector<2x32xf32>
    %2052 = vector.broadcast %11 : vector<1x32xf32> to vector<2x32xf32>
    %2053 = arith.addf %2051, %2052 : vector<2x32xf32>
    %2054 = arith.negf %2053 : vector<2x32xf32>
    %2055 = math.exp %2054 : vector<2x32xf32>
    %cst_419 = arith.constant 1.000000e+00 : f32
    %2056 = vector.broadcast %cst_419 : f32 to vector<2x32xf32>
    %2057 = arith.addf %2056, %2055 : vector<2x32xf32>
    %2058 = arith.divf %2056, %2057 : vector<2x32xf32>
    %2059 = arith.mulf %2053, %2058 : vector<2x32xf32>
    %cst_420 = arith.constant dense<0.000000e+00> : vector<2x32xf32>
    %2060 = tpu.matmul %2059, %4, %cst_420 {dimension_numbers = #tpu.dot_dimension_numbers<[1], [0], [0], [1], [0, 0, 1, 1], [], []>} : vector<2x32xf32>, vector<32x32xf32>, vector<2x32xf32> -> vector<2x32xf32>
    %2061 = vector.broadcast %12 : vector<1x32xf32> to vector<2x32xf32>
    %2062 = arith.addf %2060, %2061 : vector<2x32xf32>
    %2063 = arith.negf %2062 : vector<2x32xf32>
    %2064 = math.exp %2063 : vector<2x32xf32>
    %cst_421 = arith.constant 1.000000e+00 : f32
    %2065 = vector.broadcast %cst_421 : f32 to vector<2x32xf32>
    %2066 = arith.addf %2065, %2064 : vector<2x32xf32>
    %2067 = arith.divf %2065, %2066 : vector<2x32xf32>
    %2068 = arith.mulf %2062, %2067 : vector<2x32xf32>
    %cst_422 = arith.constant dense<0.000000e+00> : vector<2x32xf32>
    %2069 = tpu.matmul %2068, %5, %cst_422 {dimension_numbers = #tpu.dot_dimension_numbers<[1], [0], [0], [1], [0, 0, 1, 1], [], []>} : vector<2x32xf32>, vector<32x32xf32>, vector<2x32xf32> -> vector<2x32xf32>
    %2070 = vector.broadcast %13 : vector<1x32xf32> to vector<2x32xf32>
    %2071 = arith.addf %2069, %2070 : vector<2x32xf32>
    %cst_423 = arith.constant 0.0911458358 : f32
    %2072 = arith.mulf %1750, %cst_423 : f32
    %2073 = vector.broadcast %2072 : f32 to vector<2x32xf32>
    %2074 = arith.mulf %2073, %1796 : vector<2x32xf32>
    %2075 = arith.addf %1746, %2074 : vector<2x32xf32>
    %cst_424 = arith.constant 0.449236304 : f32
    %2076 = arith.mulf %1750, %cst_424 : f32
    %2077 = vector.broadcast %2076 : f32 to vector<2x32xf32>
    %2078 = arith.mulf %2077, %1894 : vector<2x32xf32>
    %2079 = arith.addf %2075, %2078 : vector<2x32xf32>
    %cst_425 = arith.constant 0.651041686 : f32
    %2080 = arith.mulf %1750, %cst_425 : f32
    %2081 = vector.broadcast %2080 : f32 to vector<2x32xf32>
    %2082 = arith.mulf %2081, %1949 : vector<2x32xf32>
    %2083 = arith.addf %2079, %2082 : vector<2x32xf32>
    %cst_426 = arith.constant -0.322376192 : f32
    %2084 = arith.mulf %1750, %cst_426 : f32
    %2085 = vector.broadcast %2084 : f32 to vector<2x32xf32>
    %2086 = arith.mulf %2085, %2008 : vector<2x32xf32>
    %2087 = arith.addf %2083, %2086 : vector<2x32xf32>
    %cst_427 = arith.constant 0.130952388 : f32
    %2088 = arith.mulf %1750, %cst_427 : f32
    %2089 = vector.broadcast %2088 : f32 to vector<2x32xf32>
    %2090 = arith.mulf %2089, %2071 : vector<2x32xf32>
    %2091 = arith.addf %2087, %2090 : vector<2x32xf32>
    %c12 = arith.constant 12 : index
    %c0_428 = arith.constant 0 : index
    %2092 = vector.load %arg10[%c12, %c0_428] : memref<16x32xf32, #tpu.memory_space<vmem>>, vector<2x32xf32>
    tpu.vector_store %arg10[%c12, %c0_428], %2091 {strides = array<i32>} : memref<16x32xf32, #tpu.memory_space<vmem>>, vector<2x32xf32>,
    %c6_429 = arith.constant 6 : index
    %2093 = memref.load %arg0[%c6_429] : memref<8xf32, #tpu.memory_space<smem>>
    %c7 = arith.constant 7 : index
    %2094 = memref.load %arg0[%c7] : memref<8xf32, #tpu.memory_space<smem>>
    %2095 = arith.subf %2094, %2093 : f32
    %c6_430 = arith.constant 6 : index
    %c0_431 = arith.constant 0 : index
    %c0_432 = arith.constant 0 : index
    %2096 = vector.load %arg1[%c6_430, %c0_431, %c0_432] : memref<7x8x4xf32, #tpu.memory_space<vmem>>, vector<1x8x4xf32>
    %2097 = vector.shape_cast %2096 : vector<1x8x4xf32> to vector<8x4xf32>
    %cst_433 = arith.constant dense<0.000000e+00> : vector<8x32xf32>
    %2098 = tpu.matmul %2097, %2, %cst_433 {dimension_numbers = #tpu.dot_dimension_numbers<[1], [0], [0], [1], [0, 0, 1, 1], [], []>} : vector<8x4xf32>, vector<4x32xf32>, vector<8x32xf32> -> vector<8x32xf32>
    %cst_434 = arith.constant 0.000000e+00 : f32
    %2099 = arith.mulf %2095, %cst_434 : f32
    %2100 = arith.addf %2093, %2099 : f32
    %2101 = vector.extract_strided_slice %2098 {offsets = [0, 0], sizes = [2, 32], strides = [1, 1]} : vector<8x32xf32> to vector<2x32xf32>
    %2102 = vector.extract_strided_slice %2098 {offsets = [2, 0], sizes = [2, 32], strides = [1, 1]} : vector<8x32xf32> to vector<2x32xf32>
    %2103 = vector.extract_strided_slice %2098 {offsets = [4, 0], sizes = [2, 32], strides = [1, 1]} : vector<8x32xf32> to vector<2x32xf32>
    %2104 = vector.extract_strided_slice %2098 {offsets = [6, 0], sizes = [2, 32], strides = [1, 1]} : vector<8x32xf32> to vector<2x32xf32>
    %2105 = vector.broadcast %2099 : f32 to vector<2x32xf32>
    %2106 = arith.mulf %2105, %2104 : vector<2x32xf32>
    %2107 = arith.addf %2103, %2106 : vector<2x32xf32>
    %2108 = vector.broadcast %2099 : f32 to vector<2x32xf32>
    %2109 = arith.mulf %2108, %2107 : vector<2x32xf32>
    %2110 = arith.addf %2102, %2109 : vector<2x32xf32>
    %2111 = vector.broadcast %2099 : f32 to vector<2x32xf32>
    %2112 = arith.mulf %2111, %2110 : vector<2x32xf32>
    %2113 = arith.addf %2101, %2112 : vector<2x32xf32>
    %cst_435 = arith.constant dense<0.000000e+00> : vector<2x32xf32>
    %2114 = tpu.matmul %2091, %1, %cst_435 {dimension_numbers = #tpu.dot_dimension_numbers<[1], [0], [0], [1], [0, 0, 1, 1], [], []>} : vector<2x32xf32>, vector<32x32xf32>, vector<2x32xf32> -> vector<2x32xf32>
    %2115 = arith.addf %2114, %2113 : vector<2x32xf32>
    %2116 = vector.broadcast %2100 : f32 to vector<1x32xf32>
    %2117 = arith.mulf %2116, %9 : vector<1x32xf32>
    %2118 = arith.addf %2117, %10 : vector<1x32xf32>
    %2119 = vector.broadcast %2118 : vector<1x32xf32> to vector<2x32xf32>
    %2120 = arith.addf %2115, %2119 : vector<2x32xf32>
    %cst_436 = arith.constant dense<0.000000e+00> : vector<2x32xf32>
    %2121 = tpu.matmul %2120, %3, %cst_436 {dimension_numbers = #tpu.dot_dimension_numbers<[1], [0], [0], [1], [0, 0, 1, 1], [], []>} : vector<2x32xf32>, vector<32x32xf32>, vector<2x32xf32> -> vector<2x32xf32>
    %2122 = vector.broadcast %11 : vector<1x32xf32> to vector<2x32xf32>
    %2123 = arith.addf %2121, %2122 : vector<2x32xf32>
    %2124 = arith.negf %2123 : vector<2x32xf32>
    %2125 = math.exp %2124 : vector<2x32xf32>
    %cst_437 = arith.constant 1.000000e+00 : f32
    %2126 = vector.broadcast %cst_437 : f32 to vector<2x32xf32>
    %2127 = arith.addf %2126, %2125 : vector<2x32xf32>
    %2128 = arith.divf %2126, %2127 : vector<2x32xf32>
    %2129 = arith.mulf %2123, %2128 : vector<2x32xf32>
    %cst_438 = arith.constant dense<0.000000e+00> : vector<2x32xf32>
    %2130 = tpu.matmul %2129, %4, %cst_438 {dimension_numbers = #tpu.dot_dimension_numbers<[1], [0], [0], [1], [0, 0, 1, 1], [], []>} : vector<2x32xf32>, vector<32x32xf32>, vector<2x32xf32> -> vector<2x32xf32>
    %2131 = vector.broadcast %12 : vector<1x32xf32> to vector<2x32xf32>
    %2132 = arith.addf %2130, %2131 : vector<2x32xf32>
    %2133 = arith.negf %2132 : vector<2x32xf32>
    %2134 = math.exp %2133 : vector<2x32xf32>
    %cst_439 = arith.constant 1.000000e+00 : f32
    %2135 = vector.broadcast %cst_439 : f32 to vector<2x32xf32>
    %2136 = arith.addf %2135, %2134 : vector<2x32xf32>
    %2137 = arith.divf %2135, %2136 : vector<2x32xf32>
    %2138 = arith.mulf %2132, %2137 : vector<2x32xf32>
    %cst_440 = arith.constant dense<0.000000e+00> : vector<2x32xf32>
    %2139 = tpu.matmul %2138, %5, %cst_440 {dimension_numbers = #tpu.dot_dimension_numbers<[1], [0], [0], [1], [0, 0, 1, 1], [], []>} : vector<2x32xf32>, vector<32x32xf32>, vector<2x32xf32> -> vector<2x32xf32>
    %2140 = vector.broadcast %13 : vector<1x32xf32> to vector<2x32xf32>
    %2141 = arith.addf %2139, %2140 : vector<2x32xf32>
    %cst_441 = arith.constant 2.000000e-01 : f32
    %2142 = arith.mulf %2095, %cst_441 : f32
    %2143 = vector.broadcast %2142 : f32 to vector<2x32xf32>
    %2144 = arith.mulf %2143, %2141 : vector<2x32xf32>
    %2145 = arith.addf %2091, %2144 : vector<2x32xf32>
    %cst_442 = arith.constant 2.000000e-01 : f32
    %2146 = arith.mulf %2095, %cst_442 : f32
    %2147 = arith.addf %2093, %2146 : f32
    %2148 = vector.extract_strided_slice %2098 {offsets = [0, 0], sizes = [2, 32], strides = [1, 1]} : vector<8x32xf32> to vector<2x32xf32>
    %2149 = vector.extract_strided_slice %2098 {offsets = [2, 0], sizes = [2, 32], strides = [1, 1]} : vector<8x32xf32> to vector<2x32xf32>
    %2150 = vector.extract_strided_slice %2098 {offsets = [4, 0], sizes = [2, 32], strides = [1, 1]} : vector<8x32xf32> to vector<2x32xf32>
    %2151 = vector.extract_strided_slice %2098 {offsets = [6, 0], sizes = [2, 32], strides = [1, 1]} : vector<8x32xf32> to vector<2x32xf32>
    %2152 = vector.broadcast %2146 : f32 to vector<2x32xf32>
    %2153 = arith.mulf %2152, %2151 : vector<2x32xf32>
    %2154 = arith.addf %2150, %2153 : vector<2x32xf32>
    %2155 = vector.broadcast %2146 : f32 to vector<2x32xf32>
    %2156 = arith.mulf %2155, %2154 : vector<2x32xf32>
    %2157 = arith.addf %2149, %2156 : vector<2x32xf32>
    %2158 = vector.broadcast %2146 : f32 to vector<2x32xf32>
    %2159 = arith.mulf %2158, %2157 : vector<2x32xf32>
    %2160 = arith.addf %2148, %2159 : vector<2x32xf32>
    %cst_443 = arith.constant dense<0.000000e+00> : vector<2x32xf32>
    %2161 = tpu.matmul %2145, %1, %cst_443 {dimension_numbers = #tpu.dot_dimension_numbers<[1], [0], [0], [1], [0, 0, 1, 1], [], []>} : vector<2x32xf32>, vector<32x32xf32>, vector<2x32xf32> -> vector<2x32xf32>
    %2162 = arith.addf %2161, %2160 : vector<2x32xf32>
    %2163 = vector.broadcast %2147 : f32 to vector<1x32xf32>
    %2164 = arith.mulf %2163, %9 : vector<1x32xf32>
    %2165 = arith.addf %2164, %10 : vector<1x32xf32>
    %2166 = vector.broadcast %2165 : vector<1x32xf32> to vector<2x32xf32>
    %2167 = arith.addf %2162, %2166 : vector<2x32xf32>
    %cst_444 = arith.constant dense<0.000000e+00> : vector<2x32xf32>
    %2168 = tpu.matmul %2167, %3, %cst_444 {dimension_numbers = #tpu.dot_dimension_numbers<[1], [0], [0], [1], [0, 0, 1, 1], [], []>} : vector<2x32xf32>, vector<32x32xf32>, vector<2x32xf32> -> vector<2x32xf32>
    %2169 = vector.broadcast %11 : vector<1x32xf32> to vector<2x32xf32>
    %2170 = arith.addf %2168, %2169 : vector<2x32xf32>
    %2171 = arith.negf %2170 : vector<2x32xf32>
    %2172 = math.exp %2171 : vector<2x32xf32>
    %cst_445 = arith.constant 1.000000e+00 : f32
    %2173 = vector.broadcast %cst_445 : f32 to vector<2x32xf32>
    %2174 = arith.addf %2173, %2172 : vector<2x32xf32>
    %2175 = arith.divf %2173, %2174 : vector<2x32xf32>
    %2176 = arith.mulf %2170, %2175 : vector<2x32xf32>
    %cst_446 = arith.constant dense<0.000000e+00> : vector<2x32xf32>
    %2177 = tpu.matmul %2176, %4, %cst_446 {dimension_numbers = #tpu.dot_dimension_numbers<[1], [0], [0], [1], [0, 0, 1, 1], [], []>} : vector<2x32xf32>, vector<32x32xf32>, vector<2x32xf32> -> vector<2x32xf32>
    %2178 = vector.broadcast %12 : vector<1x32xf32> to vector<2x32xf32>
    %2179 = arith.addf %2177, %2178 : vector<2x32xf32>
    %2180 = arith.negf %2179 : vector<2x32xf32>
    %2181 = math.exp %2180 : vector<2x32xf32>
    %cst_447 = arith.constant 1.000000e+00 : f32
    %2182 = vector.broadcast %cst_447 : f32 to vector<2x32xf32>
    %2183 = arith.addf %2182, %2181 : vector<2x32xf32>
    %2184 = arith.divf %2182, %2183 : vector<2x32xf32>
    %2185 = arith.mulf %2179, %2184 : vector<2x32xf32>
    %cst_448 = arith.constant dense<0.000000e+00> : vector<2x32xf32>
    %2186 = tpu.matmul %2185, %5, %cst_448 {dimension_numbers = #tpu.dot_dimension_numbers<[1], [0], [0], [1], [0, 0, 1, 1], [], []>} : vector<2x32xf32>, vector<32x32xf32>, vector<2x32xf32> -> vector<2x32xf32>
    %2187 = vector.broadcast %13 : vector<1x32xf32> to vector<2x32xf32>
    %2188 = arith.addf %2186, %2187 : vector<2x32xf32>
    %cst_449 = arith.constant 7.500000e-02 : f32
    %2189 = arith.mulf %2095, %cst_449 : f32
    %2190 = vector.broadcast %2189 : f32 to vector<2x32xf32>
    %2191 = arith.mulf %2190, %2141 : vector<2x32xf32>
    %2192 = arith.addf %2091, %2191 : vector<2x32xf32>
    %cst_450 = arith.constant 2.250000e-01 : f32
    %2193 = arith.mulf %2095, %cst_450 : f32
    %2194 = vector.broadcast %2193 : f32 to vector<2x32xf32>
    %2195 = arith.mulf %2194, %2188 : vector<2x32xf32>
    %2196 = arith.addf %2192, %2195 : vector<2x32xf32>
    %cst_451 = arith.constant 3.000000e-01 : f32
    %2197 = arith.mulf %2095, %cst_451 : f32
    %2198 = arith.addf %2093, %2197 : f32
    %2199 = vector.extract_strided_slice %2098 {offsets = [0, 0], sizes = [2, 32], strides = [1, 1]} : vector<8x32xf32> to vector<2x32xf32>
    %2200 = vector.extract_strided_slice %2098 {offsets = [2, 0], sizes = [2, 32], strides = [1, 1]} : vector<8x32xf32> to vector<2x32xf32>
    %2201 = vector.extract_strided_slice %2098 {offsets = [4, 0], sizes = [2, 32], strides = [1, 1]} : vector<8x32xf32> to vector<2x32xf32>
    %2202 = vector.extract_strided_slice %2098 {offsets = [6, 0], sizes = [2, 32], strides = [1, 1]} : vector<8x32xf32> to vector<2x32xf32>
    %2203 = vector.broadcast %2197 : f32 to vector<2x32xf32>
    %2204 = arith.mulf %2203, %2202 : vector<2x32xf32>
    %2205 = arith.addf %2201, %2204 : vector<2x32xf32>
    %2206 = vector.broadcast %2197 : f32 to vector<2x32xf32>
    %2207 = arith.mulf %2206, %2205 : vector<2x32xf32>
    %2208 = arith.addf %2200, %2207 : vector<2x32xf32>
    %2209 = vector.broadcast %2197 : f32 to vector<2x32xf32>
    %2210 = arith.mulf %2209, %2208 : vector<2x32xf32>
    %2211 = arith.addf %2199, %2210 : vector<2x32xf32>
    %cst_452 = arith.constant dense<0.000000e+00> : vector<2x32xf32>
    %2212 = tpu.matmul %2196, %1, %cst_452 {dimension_numbers = #tpu.dot_dimension_numbers<[1], [0], [0], [1], [0, 0, 1, 1], [], []>} : vector<2x32xf32>, vector<32x32xf32>, vector<2x32xf32> -> vector<2x32xf32>
    %2213 = arith.addf %2212, %2211 : vector<2x32xf32>
    %2214 = vector.broadcast %2198 : f32 to vector<1x32xf32>
    %2215 = arith.mulf %2214, %9 : vector<1x32xf32>
    %2216 = arith.addf %2215, %10 : vector<1x32xf32>
    %2217 = vector.broadcast %2216 : vector<1x32xf32> to vector<2x32xf32>
    %2218 = arith.addf %2213, %2217 : vector<2x32xf32>
    %cst_453 = arith.constant dense<0.000000e+00> : vector<2x32xf32>
    %2219 = tpu.matmul %2218, %3, %cst_453 {dimension_numbers = #tpu.dot_dimension_numbers<[1], [0], [0], [1], [0, 0, 1, 1], [], []>} : vector<2x32xf32>, vector<32x32xf32>, vector<2x32xf32> -> vector<2x32xf32>
    %2220 = vector.broadcast %11 : vector<1x32xf32> to vector<2x32xf32>
    %2221 = arith.addf %2219, %2220 : vector<2x32xf32>
    %2222 = arith.negf %2221 : vector<2x32xf32>
    %2223 = math.exp %2222 : vector<2x32xf32>
    %cst_454 = arith.constant 1.000000e+00 : f32
    %2224 = vector.broadcast %cst_454 : f32 to vector<2x32xf32>
    %2225 = arith.addf %2224, %2223 : vector<2x32xf32>
    %2226 = arith.divf %2224, %2225 : vector<2x32xf32>
    %2227 = arith.mulf %2221, %2226 : vector<2x32xf32>
    %cst_455 = arith.constant dense<0.000000e+00> : vector<2x32xf32>
    %2228 = tpu.matmul %2227, %4, %cst_455 {dimension_numbers = #tpu.dot_dimension_numbers<[1], [0], [0], [1], [0, 0, 1, 1], [], []>} : vector<2x32xf32>, vector<32x32xf32>, vector<2x32xf32> -> vector<2x32xf32>
    %2229 = vector.broadcast %12 : vector<1x32xf32> to vector<2x32xf32>
    %2230 = arith.addf %2228, %2229 : vector<2x32xf32>
    %2231 = arith.negf %2230 : vector<2x32xf32>
    %2232 = math.exp %2231 : vector<2x32xf32>
    %cst_456 = arith.constant 1.000000e+00 : f32
    %2233 = vector.broadcast %cst_456 : f32 to vector<2x32xf32>
    %2234 = arith.addf %2233, %2232 : vector<2x32xf32>
    %2235 = arith.divf %2233, %2234 : vector<2x32xf32>
    %2236 = arith.mulf %2230, %2235 : vector<2x32xf32>
    %cst_457 = arith.constant dense<0.000000e+00> : vector<2x32xf32>
    %2237 = tpu.matmul %2236, %5, %cst_457 {dimension_numbers = #tpu.dot_dimension_numbers<[1], [0], [0], [1], [0, 0, 1, 1], [], []>} : vector<2x32xf32>, vector<32x32xf32>, vector<2x32xf32> -> vector<2x32xf32>
    %2238 = vector.broadcast %13 : vector<1x32xf32> to vector<2x32xf32>
    %2239 = arith.addf %2237, %2238 : vector<2x32xf32>
    %cst_458 = arith.constant 0.977777779 : f32
    %2240 = arith.mulf %2095, %cst_458 : f32
    %2241 = vector.broadcast %2240 : f32 to vector<2x32xf32>
    %2242 = arith.mulf %2241, %2141 : vector<2x32xf32>
    %2243 = arith.addf %2091, %2242 : vector<2x32xf32>
    %cst_459 = arith.constant -3.73333335 : f32
    %2244 = arith.mulf %2095, %cst_459 : f32
    %2245 = vector.broadcast %2244 : f32 to vector<2x32xf32>
    %2246 = arith.mulf %2245, %2188 : vector<2x32xf32>
    %2247 = arith.addf %2243, %2246 : vector<2x32xf32>
    %cst_460 = arith.constant 3.55555558 : f32
    %2248 = arith.mulf %2095, %cst_460 : f32
    %2249 = vector.broadcast %2248 : f32 to vector<2x32xf32>
    %2250 = arith.mulf %2249, %2239 : vector<2x32xf32>
    %2251 = arith.addf %2247, %2250 : vector<2x32xf32>
    %cst_461 = arith.constant 8.000000e-01 : f32
    %2252 = arith.mulf %2095, %cst_461 : f32
    %2253 = arith.addf %2093, %2252 : f32
    %2254 = vector.extract_strided_slice %2098 {offsets = [0, 0], sizes = [2, 32], strides = [1, 1]} : vector<8x32xf32> to vector<2x32xf32>
    %2255 = vector.extract_strided_slice %2098 {offsets = [2, 0], sizes = [2, 32], strides = [1, 1]} : vector<8x32xf32> to vector<2x32xf32>
    %2256 = vector.extract_strided_slice %2098 {offsets = [4, 0], sizes = [2, 32], strides = [1, 1]} : vector<8x32xf32> to vector<2x32xf32>
    %2257 = vector.extract_strided_slice %2098 {offsets = [6, 0], sizes = [2, 32], strides = [1, 1]} : vector<8x32xf32> to vector<2x32xf32>
    %2258 = vector.broadcast %2252 : f32 to vector<2x32xf32>
    %2259 = arith.mulf %2258, %2257 : vector<2x32xf32>
    %2260 = arith.addf %2256, %2259 : vector<2x32xf32>
    %2261 = vector.broadcast %2252 : f32 to vector<2x32xf32>
    %2262 = arith.mulf %2261, %2260 : vector<2x32xf32>
    %2263 = arith.addf %2255, %2262 : vector<2x32xf32>
    %2264 = vector.broadcast %2252 : f32 to vector<2x32xf32>
    %2265 = arith.mulf %2264, %2263 : vector<2x32xf32>
    %2266 = arith.addf %2254, %2265 : vector<2x32xf32>
    %cst_462 = arith.constant dense<0.000000e+00> : vector<2x32xf32>
    %2267 = tpu.matmul %2251, %1, %cst_462 {dimension_numbers = #tpu.dot_dimension_numbers<[1], [0], [0], [1], [0, 0, 1, 1], [], []>} : vector<2x32xf32>, vector<32x32xf32>, vector<2x32xf32> -> vector<2x32xf32>
    %2268 = arith.addf %2267, %2266 : vector<2x32xf32>
    %2269 = vector.broadcast %2253 : f32 to vector<1x32xf32>
    %2270 = arith.mulf %2269, %9 : vector<1x32xf32>
    %2271 = arith.addf %2270, %10 : vector<1x32xf32>
    %2272 = vector.broadcast %2271 : vector<1x32xf32> to vector<2x32xf32>
    %2273 = arith.addf %2268, %2272 : vector<2x32xf32>
    %cst_463 = arith.constant dense<0.000000e+00> : vector<2x32xf32>
    %2274 = tpu.matmul %2273, %3, %cst_463 {dimension_numbers = #tpu.dot_dimension_numbers<[1], [0], [0], [1], [0, 0, 1, 1], [], []>} : vector<2x32xf32>, vector<32x32xf32>, vector<2x32xf32> -> vector<2x32xf32>
    %2275 = vector.broadcast %11 : vector<1x32xf32> to vector<2x32xf32>
    %2276 = arith.addf %2274, %2275 : vector<2x32xf32>
    %2277 = arith.negf %2276 : vector<2x32xf32>
    %2278 = math.exp %2277 : vector<2x32xf32>
    %cst_464 = arith.constant 1.000000e+00 : f32
    %2279 = vector.broadcast %cst_464 : f32 to vector<2x32xf32>
    %2280 = arith.addf %2279, %2278 : vector<2x32xf32>
    %2281 = arith.divf %2279, %2280 : vector<2x32xf32>
    %2282 = arith.mulf %2276, %2281 : vector<2x32xf32>
    %cst_465 = arith.constant dense<0.000000e+00> : vector<2x32xf32>
    %2283 = tpu.matmul %2282, %4, %cst_465 {dimension_numbers = #tpu.dot_dimension_numbers<[1], [0], [0], [1], [0, 0, 1, 1], [], []>} : vector<2x32xf32>, vector<32x32xf32>, vector<2x32xf32> -> vector<2x32xf32>
    %2284 = vector.broadcast %12 : vector<1x32xf32> to vector<2x32xf32>
    %2285 = arith.addf %2283, %2284 : vector<2x32xf32>
    %2286 = arith.negf %2285 : vector<2x32xf32>
    %2287 = math.exp %2286 : vector<2x32xf32>
    %cst_466 = arith.constant 1.000000e+00 : f32
    %2288 = vector.broadcast %cst_466 : f32 to vector<2x32xf32>
    %2289 = arith.addf %2288, %2287 : vector<2x32xf32>
    %2290 = arith.divf %2288, %2289 : vector<2x32xf32>
    %2291 = arith.mulf %2285, %2290 : vector<2x32xf32>
    %cst_467 = arith.constant dense<0.000000e+00> : vector<2x32xf32>
    %2292 = tpu.matmul %2291, %5, %cst_467 {dimension_numbers = #tpu.dot_dimension_numbers<[1], [0], [0], [1], [0, 0, 1, 1], [], []>} : vector<2x32xf32>, vector<32x32xf32>, vector<2x32xf32> -> vector<2x32xf32>
    %2293 = vector.broadcast %13 : vector<1x32xf32> to vector<2x32xf32>
    %2294 = arith.addf %2292, %2293 : vector<2x32xf32>
    %cst_468 = arith.constant 2.95259857 : f32
    %2295 = arith.mulf %2095, %cst_468 : f32
    %2296 = vector.broadcast %2295 : f32 to vector<2x32xf32>
    %2297 = arith.mulf %2296, %2141 : vector<2x32xf32>
    %2298 = arith.addf %2091, %2297 : vector<2x32xf32>
    %cst_469 = arith.constant -11.5957937 : f32
    %2299 = arith.mulf %2095, %cst_469 : f32
    %2300 = vector.broadcast %2299 : f32 to vector<2x32xf32>
    %2301 = arith.mulf %2300, %2188 : vector<2x32xf32>
    %2302 = arith.addf %2298, %2301 : vector<2x32xf32>
    %cst_470 = arith.constant 9.82289314 : f32
    %2303 = arith.mulf %2095, %cst_470 : f32
    %2304 = vector.broadcast %2303 : f32 to vector<2x32xf32>
    %2305 = arith.mulf %2304, %2239 : vector<2x32xf32>
    %2306 = arith.addf %2302, %2305 : vector<2x32xf32>
    %cst_471 = arith.constant -0.290809333 : f32
    %2307 = arith.mulf %2095, %cst_471 : f32
    %2308 = vector.broadcast %2307 : f32 to vector<2x32xf32>
    %2309 = arith.mulf %2308, %2294 : vector<2x32xf32>
    %2310 = arith.addf %2306, %2309 : vector<2x32xf32>
    %cst_472 = arith.constant 0.888888895 : f32
    %2311 = arith.mulf %2095, %cst_472 : f32
    %2312 = arith.addf %2093, %2311 : f32
    %2313 = vector.extract_strided_slice %2098 {offsets = [0, 0], sizes = [2, 32], strides = [1, 1]} : vector<8x32xf32> to vector<2x32xf32>
    %2314 = vector.extract_strided_slice %2098 {offsets = [2, 0], sizes = [2, 32], strides = [1, 1]} : vector<8x32xf32> to vector<2x32xf32>
    %2315 = vector.extract_strided_slice %2098 {offsets = [4, 0], sizes = [2, 32], strides = [1, 1]} : vector<8x32xf32> to vector<2x32xf32>
    %2316 = vector.extract_strided_slice %2098 {offsets = [6, 0], sizes = [2, 32], strides = [1, 1]} : vector<8x32xf32> to vector<2x32xf32>
    %2317 = vector.broadcast %2311 : f32 to vector<2x32xf32>
    %2318 = arith.mulf %2317, %2316 : vector<2x32xf32>
    %2319 = arith.addf %2315, %2318 : vector<2x32xf32>
    %2320 = vector.broadcast %2311 : f32 to vector<2x32xf32>
    %2321 = arith.mulf %2320, %2319 : vector<2x32xf32>
    %2322 = arith.addf %2314, %2321 : vector<2x32xf32>
    %2323 = vector.broadcast %2311 : f32 to vector<2x32xf32>
    %2324 = arith.mulf %2323, %2322 : vector<2x32xf32>
    %2325 = arith.addf %2313, %2324 : vector<2x32xf32>
    %cst_473 = arith.constant dense<0.000000e+00> : vector<2x32xf32>
    %2326 = tpu.matmul %2310, %1, %cst_473 {dimension_numbers = #tpu.dot_dimension_numbers<[1], [0], [0], [1], [0, 0, 1, 1], [], []>} : vector<2x32xf32>, vector<32x32xf32>, vector<2x32xf32> -> vector<2x32xf32>
    %2327 = arith.addf %2326, %2325 : vector<2x32xf32>
    %2328 = vector.broadcast %2312 : f32 to vector<1x32xf32>
    %2329 = arith.mulf %2328, %9 : vector<1x32xf32>
    %2330 = arith.addf %2329, %10 : vector<1x32xf32>
    %2331 = vector.broadcast %2330 : vector<1x32xf32> to vector<2x32xf32>
    %2332 = arith.addf %2327, %2331 : vector<2x32xf32>
    %cst_474 = arith.constant dense<0.000000e+00> : vector<2x32xf32>
    %2333 = tpu.matmul %2332, %3, %cst_474 {dimension_numbers = #tpu.dot_dimension_numbers<[1], [0], [0], [1], [0, 0, 1, 1], [], []>} : vector<2x32xf32>, vector<32x32xf32>, vector<2x32xf32> -> vector<2x32xf32>
    %2334 = vector.broadcast %11 : vector<1x32xf32> to vector<2x32xf32>
    %2335 = arith.addf %2333, %2334 : vector<2x32xf32>
    %2336 = arith.negf %2335 : vector<2x32xf32>
    %2337 = math.exp %2336 : vector<2x32xf32>
    %cst_475 = arith.constant 1.000000e+00 : f32
    %2338 = vector.broadcast %cst_475 : f32 to vector<2x32xf32>
    %2339 = arith.addf %2338, %2337 : vector<2x32xf32>
    %2340 = arith.divf %2338, %2339 : vector<2x32xf32>
    %2341 = arith.mulf %2335, %2340 : vector<2x32xf32>
    %cst_476 = arith.constant dense<0.000000e+00> : vector<2x32xf32>
    %2342 = tpu.matmul %2341, %4, %cst_476 {dimension_numbers = #tpu.dot_dimension_numbers<[1], [0], [0], [1], [0, 0, 1, 1], [], []>} : vector<2x32xf32>, vector<32x32xf32>, vector<2x32xf32> -> vector<2x32xf32>
    %2343 = vector.broadcast %12 : vector<1x32xf32> to vector<2x32xf32>
    %2344 = arith.addf %2342, %2343 : vector<2x32xf32>
    %2345 = arith.negf %2344 : vector<2x32xf32>
    %2346 = math.exp %2345 : vector<2x32xf32>
    %cst_477 = arith.constant 1.000000e+00 : f32
    %2347 = vector.broadcast %cst_477 : f32 to vector<2x32xf32>
    %2348 = arith.addf %2347, %2346 : vector<2x32xf32>
    %2349 = arith.divf %2347, %2348 : vector<2x32xf32>
    %2350 = arith.mulf %2344, %2349 : vector<2x32xf32>
    %cst_478 = arith.constant dense<0.000000e+00> : vector<2x32xf32>
    %2351 = tpu.matmul %2350, %5, %cst_478 {dimension_numbers = #tpu.dot_dimension_numbers<[1], [0], [0], [1], [0, 0, 1, 1], [], []>} : vector<2x32xf32>, vector<32x32xf32>, vector<2x32xf32> -> vector<2x32xf32>
    %2352 = vector.broadcast %13 : vector<1x32xf32> to vector<2x32xf32>
    %2353 = arith.addf %2351, %2352 : vector<2x32xf32>
    %cst_479 = arith.constant 2.84627533 : f32
    %2354 = arith.mulf %2095, %cst_479 : f32
    %2355 = vector.broadcast %2354 : f32 to vector<2x32xf32>
    %2356 = arith.mulf %2355, %2141 : vector<2x32xf32>
    %2357 = arith.addf %2091, %2356 : vector<2x32xf32>
    %cst_480 = arith.constant -10.757576 : f32
    %2358 = arith.mulf %2095, %cst_480 : f32
    %2359 = vector.broadcast %2358 : f32 to vector<2x32xf32>
    %2360 = arith.mulf %2359, %2188 : vector<2x32xf32>
    %2361 = arith.addf %2357, %2360 : vector<2x32xf32>
    %cst_481 = arith.constant 8.90642261 : f32
    %2362 = arith.mulf %2095, %cst_481 : f32
    %2363 = vector.broadcast %2362 : f32 to vector<2x32xf32>
    %2364 = arith.mulf %2363, %2239 : vector<2x32xf32>
    %2365 = arith.addf %2361, %2364 : vector<2x32xf32>
    %cst_482 = arith.constant 0.278409094 : f32
    %2366 = arith.mulf %2095, %cst_482 : f32
    %2367 = vector.broadcast %2366 : f32 to vector<2x32xf32>
    %2368 = arith.mulf %2367, %2294 : vector<2x32xf32>
    %2369 = arith.addf %2365, %2368 : vector<2x32xf32>
    %cst_483 = arith.constant -0.273531318 : f32
    %2370 = arith.mulf %2095, %cst_483 : f32
    %2371 = vector.broadcast %2370 : f32 to vector<2x32xf32>
    %2372 = arith.mulf %2371, %2353 : vector<2x32xf32>
    %2373 = arith.addf %2369, %2372 : vector<2x32xf32>
    %cst_484 = arith.constant 1.000000e+00 : f32
    %2374 = arith.mulf %2095, %cst_484 : f32
    %2375 = arith.addf %2093, %2374 : f32
    %2376 = vector.extract_strided_slice %2098 {offsets = [0, 0], sizes = [2, 32], strides = [1, 1]} : vector<8x32xf32> to vector<2x32xf32>
    %2377 = vector.extract_strided_slice %2098 {offsets = [2, 0], sizes = [2, 32], strides = [1, 1]} : vector<8x32xf32> to vector<2x32xf32>
    %2378 = vector.extract_strided_slice %2098 {offsets = [4, 0], sizes = [2, 32], strides = [1, 1]} : vector<8x32xf32> to vector<2x32xf32>
    %2379 = vector.extract_strided_slice %2098 {offsets = [6, 0], sizes = [2, 32], strides = [1, 1]} : vector<8x32xf32> to vector<2x32xf32>
    %2380 = vector.broadcast %2374 : f32 to vector<2x32xf32>
    %2381 = arith.mulf %2380, %2379 : vector<2x32xf32>
    %2382 = arith.addf %2378, %2381 : vector<2x32xf32>
    %2383 = vector.broadcast %2374 : f32 to vector<2x32xf32>
    %2384 = arith.mulf %2383, %2382 : vector<2x32xf32>
    %2385 = arith.addf %2377, %2384 : vector<2x32xf32>
    %2386 = vector.broadcast %2374 : f32 to vector<2x32xf32>
    %2387 = arith.mulf %2386, %2385 : vector<2x32xf32>
    %2388 = arith.addf %2376, %2387 : vector<2x32xf32>
    %cst_485 = arith.constant dense<0.000000e+00> : vector<2x32xf32>
    %2389 = tpu.matmul %2373, %1, %cst_485 {dimension_numbers = #tpu.dot_dimension_numbers<[1], [0], [0], [1], [0, 0, 1, 1], [], []>} : vector<2x32xf32>, vector<32x32xf32>, vector<2x32xf32> -> vector<2x32xf32>
    %2390 = arith.addf %2389, %2388 : vector<2x32xf32>
    %2391 = vector.broadcast %2375 : f32 to vector<1x32xf32>
    %2392 = arith.mulf %2391, %9 : vector<1x32xf32>
    %2393 = arith.addf %2392, %10 : vector<1x32xf32>
    %2394 = vector.broadcast %2393 : vector<1x32xf32> to vector<2x32xf32>
    %2395 = arith.addf %2390, %2394 : vector<2x32xf32>
    %cst_486 = arith.constant dense<0.000000e+00> : vector<2x32xf32>
    %2396 = tpu.matmul %2395, %3, %cst_486 {dimension_numbers = #tpu.dot_dimension_numbers<[1], [0], [0], [1], [0, 0, 1, 1], [], []>} : vector<2x32xf32>, vector<32x32xf32>, vector<2x32xf32> -> vector<2x32xf32>
    %2397 = vector.broadcast %11 : vector<1x32xf32> to vector<2x32xf32>
    %2398 = arith.addf %2396, %2397 : vector<2x32xf32>
    %2399 = arith.negf %2398 : vector<2x32xf32>
    %2400 = math.exp %2399 : vector<2x32xf32>
    %cst_487 = arith.constant 1.000000e+00 : f32
    %2401 = vector.broadcast %cst_487 : f32 to vector<2x32xf32>
    %2402 = arith.addf %2401, %2400 : vector<2x32xf32>
    %2403 = arith.divf %2401, %2402 : vector<2x32xf32>
    %2404 = arith.mulf %2398, %2403 : vector<2x32xf32>
    %cst_488 = arith.constant dense<0.000000e+00> : vector<2x32xf32>
    %2405 = tpu.matmul %2404, %4, %cst_488 {dimension_numbers = #tpu.dot_dimension_numbers<[1], [0], [0], [1], [0, 0, 1, 1], [], []>} : vector<2x32xf32>, vector<32x32xf32>, vector<2x32xf32> -> vector<2x32xf32>
    %2406 = vector.broadcast %12 : vector<1x32xf32> to vector<2x32xf32>
    %2407 = arith.addf %2405, %2406 : vector<2x32xf32>
    %2408 = arith.negf %2407 : vector<2x32xf32>
    %2409 = math.exp %2408 : vector<2x32xf32>
    %cst_489 = arith.constant 1.000000e+00 : f32
    %2410 = vector.broadcast %cst_489 : f32 to vector<2x32xf32>
    %2411 = arith.addf %2410, %2409 : vector<2x32xf32>
    %2412 = arith.divf %2410, %2411 : vector<2x32xf32>
    %2413 = arith.mulf %2407, %2412 : vector<2x32xf32>
    %cst_490 = arith.constant dense<0.000000e+00> : vector<2x32xf32>
    %2414 = tpu.matmul %2413, %5, %cst_490 {dimension_numbers = #tpu.dot_dimension_numbers<[1], [0], [0], [1], [0, 0, 1, 1], [], []>} : vector<2x32xf32>, vector<32x32xf32>, vector<2x32xf32> -> vector<2x32xf32>
    %2415 = vector.broadcast %13 : vector<1x32xf32> to vector<2x32xf32>
    %2416 = arith.addf %2414, %2415 : vector<2x32xf32>
    %cst_491 = arith.constant 0.0911458358 : f32
    %2417 = arith.mulf %2095, %cst_491 : f32
    %2418 = vector.broadcast %2417 : f32 to vector<2x32xf32>
    %2419 = arith.mulf %2418, %2141 : vector<2x32xf32>
    %2420 = arith.addf %2091, %2419 : vector<2x32xf32>
    %cst_492 = arith.constant 0.449236304 : f32
    %2421 = arith.mulf %2095, %cst_492 : f32
    %2422 = vector.broadcast %2421 : f32 to vector<2x32xf32>
    %2423 = arith.mulf %2422, %2239 : vector<2x32xf32>
    %2424 = arith.addf %2420, %2423 : vector<2x32xf32>
    %cst_493 = arith.constant 0.651041686 : f32
    %2425 = arith.mulf %2095, %cst_493 : f32
    %2426 = vector.broadcast %2425 : f32 to vector<2x32xf32>
    %2427 = arith.mulf %2426, %2294 : vector<2x32xf32>
    %2428 = arith.addf %2424, %2427 : vector<2x32xf32>
    %cst_494 = arith.constant -0.322376192 : f32
    %2429 = arith.mulf %2095, %cst_494 : f32
    %2430 = vector.broadcast %2429 : f32 to vector<2x32xf32>
    %2431 = arith.mulf %2430, %2353 : vector<2x32xf32>
    %2432 = arith.addf %2428, %2431 : vector<2x32xf32>
    %cst_495 = arith.constant 0.130952388 : f32
    %2433 = arith.mulf %2095, %cst_495 : f32
    %2434 = vector.broadcast %2433 : f32 to vector<2x32xf32>
    %2435 = arith.mulf %2434, %2416 : vector<2x32xf32>
    %2436 = arith.addf %2432, %2435 : vector<2x32xf32>
    %c14 = arith.constant 14 : index
    %c0_496 = arith.constant 0 : index
    %2437 = vector.load %arg10[%c14, %c0_496] : memref<16x32xf32, #tpu.memory_space<vmem>>, vector<2x32xf32>
    tpu.vector_store %arg10[%c14, %c0_496], %2436 {strides = array<i32>} : memref<16x32xf32, #tpu.memory_space<vmem>>, vector<2x32xf32>,
    %c0_497 = arith.constant 0 : index
    %c0_498 = arith.constant 0 : index
    %2438 = vector.load %arg10[%c0_497, %c0_498] : memref<16x32xf32, #tpu.memory_space<vmem>>, vector<16x32xf32>
    %cst_499 = arith.constant dense<0.000000e+00> : vector<16x4xf32>
    %2439 = tpu.matmul %2438, %7, %cst_499 {dimension_numbers = #tpu.dot_dimension_numbers<[1], [0], [0], [1], [0, 0, 1, 1], [], []>} : vector<16x32xf32>, vector<32x4xf32>, vector<16x4xf32> -> vector<16x4xf32>
    %2440 = vector.broadcast %15 : vector<1x4xf32> to vector<16x4xf32>
    %2441 = arith.addf %2439, %2440 : vector<16x4xf32>
    %c0_500 = arith.constant 0 : index
    %c0_501 = arith.constant 0 : index
    %2442 = vector.load %arg9[%c0_500, %c0_501] : memref<16x4xf32, #tpu.memory_space<vmem>>, vector<16x4xf32>
    tpu.vector_store %arg9[%c0_500, %c0_501], %2441 {strides = array<i32>} : memref<16x4xf32, #tpu.memory_space<vmem>>, vector<16x4xf32>,
    return
  }
}

</mosaic_0001>

<bundles_post_ra>
// kernel: neural_ode_forward.1
= control target key start
LH: loop header
LB: loop body
LE: loop exit
PB: predicated region body
PF: predicated region fallthrough
CT: control target
= control target key end

     0   :  { %14 = vsyncpa [#allocation4], 0  ;;  %s22214_s0 = inlined_call_operand.vmem [shape: f32[8], index: 0, kind: input, shape index: {}]   ;;  %s22215_s1 = inlined_call_operand.vmem [shape: f32[7,8,4], index: 1, kind: input, shape index: {}]   ;;  %s22216_s2 = inlined_call_operand.vmem [shape: f32[36,32], index: 2, kind: input, shape index: {}]   ;;  %s22217_s3 = inlined_call_operand.vmem [shape: f32[32,32], index: 3, kind: input, shape index: {}]   ;;  %s22218_s4 = inlined_call_operand.vmem [shape: f32[32,32], index: 4, kind: input, shape index: {}]   ;;  %s22219_s5 = inlined_call_operand.vmem [shape: f32[32,32], index: 5, kind: input, shape index: {}]   ;;  %s22220_s6 = inlined_call_operand.vmem [shape: f32[4,32], index: 6, kind: input, shape index: {}]   ;;  %s22221_s7 = inlined_call_operand.vmem [shape: f32[32,4], index: 7, kind: input, shape index: {}]   ;;  %s22222_s8 = inlined_call_operand.vmem [shape: f32[8,32], index: 8, kind: input, shape index: {}]   ;;  %s22223_s9 = inlined_call_operand.vmem [shape: f32[16,4], index: 9, kind: output, shape index: {}]  }
   0x1   :  { %s21_s11 = sshll.u32 %s22214_s0, 4  ;;  %s22_s11 = int_to_ptr.vmem [resolvable:$true] %s21_s11 }
   0x2   :  { %s19716_s12 = scalar_lea.vmem %s22_s11, 16  ;;  %p19721_p1 = scmp.lt.s32.totalorder %s22_s11, %s22_s11 }
   0x3   :  { %p19717_p0 = scmp.ne.s32.totalorder %s22_s11, %s19716_s12  ;;  %p19722_p2 = scmp.lt.s32.totalorder %s19716_s12, %s19716_s12 }
   0x5   :  { %p19723_p3 = por %p19722_p2, %p19721_p1 }
   0x7   :  { %p19724_p4 = pnand %p19723_p3, %p19717_p0 }
   0x9   :  { %19727 = shalt.err (!%p19724_p4)
}
   0xa   :  { %s19730_s13 = smov [#allocation3]  }
   0xb   :  { %24 = dma.vmem_to_smem %s22_s11, 16, %s19730_s13, [#allocation4]  }
   0xc   :  { %19728 = dma.done.wait [#allocation4], 16  }
   0xd   :  { %19729 = vsyncadd [#allocation4], 4294967280 }
   0xe   :  { %44 = sfence }
   0xf   :  { %v62_v0 = vld [vmem:[%s22220_s6] sm:$0xf]  ;;  %vm77_vm0 = vcmask 1043456   ;;  %v19731_v2 = vmov 0.0   ;;  %vm19732_vm1 = vmmov 0   ;;  %vm73_vm2 = vcmask 31744  }
  0x10   :  { %v68_v1 = vld [vmem:[%s22215_s1] sm:$0xff]  ;;  %16452 = vmatprep.subr.mxu0 %v19731_v2  ;;  %16454 = vmatprep.mubr.msk.f32.mxu0 %vm19732_vm1, %v19731_v2  ;;  %v46_v5 = vld [vmem:[%s22216_s2 + $0x8] sm:$0xff]  ;;  %v19733_v7 = vmov 0.0|0.0   ;;  %v47_v8 = vld [vmem:[%s22216_s2 + $0x10] sm:$0xff]  ;;  %v69_v14 = vlaneseq  ;;  %vm151_vm3 = vcmask 254976   ;;  %vm251_vm4 = vcmask 261120  }
  0x11   :  { %v49_v3 = vld [vmem:[%s22216_s2 + $0x20] sm:$0xf]  ;;  %16453 = vmatpush3.msk.msra.mxu0 %vm77_vm0, %v62_v0  ;;  %16457 = vmatprep.subr.mxu1 %v19731_v2  ;;  %v48_v9 = vld [vmem:[%s22216_s2 + $0x18] sm:$0xff]  ;;  %v51_v12 = vld [vmem:[%s22217_s3 + $0x8] sm:$0xff]  ;;  %s19871_s15 = sld [smem:[#allocation3]]  ;;  %s19873_s16 = sld [smem:[#allocation3 + $0x1]] }
  0x12   :  { %v45_v4 = vld [vmem:[%s22216_s2] sm:$0xff]  ;;  %16455 = vmatmul.mubr.msk.f32.vlgmr.msra.gmra.mrb[0].mxu0 %vm73_vm2, %v68_v1  ;;  %16458 = vmatpush3.msk.msra.mxu1 %vm77_vm0, %v49_v3  ;;  %v19828_v10 = vpack.c.bf16 %v48_v9, %v47_v8  ;;  %v19842_v15 = vshrl.u32 %v69_v14, 7  ;;  %v52_v24 = vld [vmem:[%s22217_s3 + $0x10] sm:$0xff]  ;;  %v53_v25 = vld [vmem:[%s22217_s3 + $0x18] sm:$0xff] }
  0x13   :  { %v19807_v6 = vpack.c.bf16 %v46_v5, %v45_v4  ;;  %16459 = vmatprep.mubr.msk.f32.mxu1 %vm19732_vm1, %v19731_v2  ;;  %18351 = vmatprep.subr.bf16.mxu0 %v19733_v7  ;;  %v50_v11 = vld [vmem:[%s22217_s3] sm:$0xff]  ;;  %v19867_v26 = vpack.c.bf16 %v53_v25, %v52_v24  ;;  %v55_v48 = vld [vmem:[%s22218_s4 + $0x8] sm:$0xff]  ;;  %v56_v50 = vld [vmem:[%s22218_s4 + $0x10] sm:$0xff] }
  0x14   :  { %16460 = vmatmul.mubr.msk.f32.vlgmr.msra.gmra.mrb[0].mxu1 %vm73_vm2, %v68_v1  ;;  %16470 = vmatprep.mubr.msk.f32.mxu0 %vm19732_vm1, %v19731_v2  ;;  %v19838_v13 = vpack.c.bf16 %v51_v12, %v50_v11  ;;  %v71_v16 = vsub.s32 5, %v19842_v15  ;;  %v19848_v17 = vld [vmem:[%s22222_s8] sm:$0xff]  ;;  %v19889_v38 = vsub.s32 0, %v19842_v15  ;;  %v57_v51 = vld [vmem:[%s22218_s4 + $0x18] sm:$0xff]  ;;  %v338_v53 = vsub.s32 2, %v19842_v15  ;;  %v59_v0 = vld [vmem:[%s22219_s5 + $0x8] sm:$0xff] }
  0x15   :  { %18353 = vmatpush3.bf16.msra.mxu0 %v19807_v6  ;;  %18357 = vmatprep.subr.bf16.mxu1 %v19733_v7  ;;  %v19886_v37 = vrot.slane %v19848_v17, 1  ;;  %v54_v47 = vld [vmem:[%s22218_s4] sm:$0xff]  ;;  %v19913_v52 = vpack.c.bf16 %v57_v51, %v56_v50  ;;  %v60_v3 = vld [vmem:[%s22219_s5 + $0x10] sm:$0xff]  ;;  %v61_v4 = vld [vmem:[%s22219_s5 + $0x18] sm:$0xff]  ;;  %v422_v8 = vsub.s32 3, %v19842_v15  ;;  %v506_v24 = vsub.s32 4, %v19842_v15 }
  0x16   :  { %18354 = vmatprep.subr.bf16.mxu0 %v19733_v7  ;;  %16481 = vmatprep.mubr.msk.f32.mxu1 %vm19732_vm1, %v19731_v2  ;;  %v72_v18 = vrot.slane %v19848_v17, %v71_v16  ;;  %v19903_v49 = vpack.c.bf16 %v55_v48, %v54_v47  ;;  %v19919_v54 = vrot.slane %v19848_v17, %v338_v53  ;;  %v58_v63 = vld [vmem:[%s22219_s5] sm:$0xff] }
  0x17   :  { %18359 = vmatpush3.bf16.msra.mxu1 %v19838_v13  ;;  %s19877_s0 = ssub.f32 %s19873_s16, %s19871_s15  ;;  %v19935_v1 = vpack.c.bf16 %v59_v0, %v58_v63  ;;  %v19945_v5 = vpack.c.bf16 %v61_v4, %v60_v3  ;;  %v19951_v9 = vrot.slane %v19848_v17, %v422_v8  ;;  %v19963_v25 = vrot.slane %v19848_v17, %v506_v24 }
  0x18   :  { %18360 = vmatprep.subr.bf16.mxu1 %v19733_v7 }
  0x19   :  { %18356 = vmatpush3.bf16.msra.mxu0 %v19828_v10  ;;  %s233_s17 = smul.f32 0.0, %s19877_s0 }
  0x1a   :  { %18363 = vmatprep.subr.bf16.mxu0 %v19733_v7  ;;  %s581_s5 = smul.f32 0.2, %s19877_s0 }
  0x1b   :  { %18362 = vmatpush3.bf16.msra.mxu1 %v19867_v26  ;;  %v235_v27 = vstv %s233_s17  ;;  %s234_s3 = sadd.f32 %s233_s17, %s19871_s15  ;;  %s915_s12 = smul.f32 0.075, %s19877_s0 }
  0x1c   :  { %18369 = vmatprep.subr.bf16.mxu1 %v19733_v7  ;;  %s585_s11 = sadd.f32 %s581_s5, %s19871_s15  ;;  %s1255_s13 = smul.f32 0.9777778, %s19877_s0 }
  0x1d   :  { %v325_v34 = vstv %s234_s3  ;;  %s1599_s14 = smul.f32 2.9525986, %s19877_s0 }
  0x1e   :  { %v326_v36 = vmul.f32 %v325_v34, %v19848_v17  ;;  %s1947_s17 = smul.f32 2.8462753, %s19877_s0 }
  0x1f   :  { %s919_s3 = smul.f32 0.225, %s19877_s0 }
  0x20   :  { %v330_v40 = vadd.f32 %v19886_v37, %v326_v36  ;;  %s1259_s18 = smul.f32 -3.7333333, %s19877_s0 }
  0x21   :  { %s1603_s19 = smul.f32 -11.595794, %s19877_s0 }
  0x22   :  { %v334_v42 = vrot.slane %v330_v40, %v19889_v38  ;;  %s1951_s20 = smul.f32 -10.757576, %s19877_s0 }
  0x23   :  { %s923_s6 = smul.f32 0.3, %s19877_s0 }
  0x24   :  { %s2298_s22 = smul.f32 0.091145836, %s19877_s0 }
  0x25   :  { %s924_s21 = sadd.f32 %s923_s6, %s19871_s15  ;;  %s1263_s23 = smul.f32 3.5555556, %s19877_s0 }
  0x26   :  { %s1607_s24 = smul.f32 9.822893, %s19877_s0 }
  0x27   :  { %s1955_s4 = smul.f32 8.906423, %s19877_s0 }
  0x28   :  { %s2302_s25 = smul.f32 0.4492363, %s19877_s0 }
  0x29   :  { %s1267_s26 = smul.f32 0.8, %s19877_s0 }
  0x2a   :  { %s1611_s28 = smul.f32 -0.29080933, %s19877_s0 }
  0x2b   :  { %s1268_s27 = sadd.f32 %s1267_s26, %s19871_s15  ;;  %s1959_s29 = smul.f32 0.2784091, %s19877_s0 }
  0x2c   :  { %s2306_s30 = smul.f32 0.6510417, %s19877_s0 }
  0x2d   :  { %s1615_s10 = smul.f32 0.8888889, %s19877_s0 }
  0xe5   :  { %v147_v19 = vpop.f32.mrb[0].mxu0 }
  0xe6   :  { %v19851_v20 = vadd.f32 %v147_v19, %v72_v18  ;;  %v16456_v21 = vpop.f32.mrb[1].mxu0 }
  0xe7   :  { %v19853_v22 = vpop.f32.mrb[0].mxu1 }
  0xe8   :  { %152 = vst.msk [vmem:[#allocation2] sm:$0x3] %vm151_vm3, %v19851_v20  ;;  %16471 = vmatmul.mubr.msk.f32.vlgmr.msra.gmra.mrb[2].mxu0 %vm251_vm4, %v19851_v20  ;;  %v16461_v23 = vpop.f32.mrb[1].mxu1  ;;  %v236_v28 = vmul.f32 %v235_v27, %v19853_v22 }
  0xe9   :  { %16492 = vmatprep.mubr.msk.f32.mxu0 %vm19732_vm1, %v19731_v2  ;;  %18365 = vmatpush3.bf16.msra.mxu0 %v19903_v49 }
  0xea   :  { %v238_v29 = vrot.slane %v236_v28, 2  ;;  %18366 = vmatprep.subr.bf16.mxu0 %v19733_v7 }
  0xec   :  { %v240_v30 = vadd.f32 %v238_v29, %v19853_v22 }
  0xed   :  { %18368 = vmatpush3.bf16.msra.mxu0 %v19913_v52 }
  0xee   :  { %v241_v31 = vmul.f32 %v240_v30, %v235_v27  ;;  %18375 = vmatprep.subr.bf16.mxu0 %v19733_v7  ;;  %v582_v30 = vstv %s581_s5  ;;  %s1616_s5 = sadd.f32 %s1615_s10, %s19871_s15 }
  0xf0   :  { %v243_v32 = vrot.slane %v241_v31, 2 }
  0xf2   :  { %v245_v33 = vadd.f32 %v243_v32, %v19853_v22 }
  0xf4   :  { %v246_v35 = vmul.f32 %v245_v33, %v235_v27  ;;  %v586_v33 = vmul.f32 %v582_v30, %v19853_v22 }
  0xf6   :  { %v248_v39 = vrot.slane %v246_v35, 2  ;;  %v588_v34 = vrot.slane %v586_v33, 2  ;;  %v1604_v33 = vstv %s1603_s19 }
  0xf8   :  { %v250_v41 = vadd.f32 %v248_v39, %v19853_v22  ;;  %v590_v35 = vadd.f32 %v588_v34, %v19853_v22  ;;  %v1952_v34 = vstv %s1951_s20 }
  0xfa   :  { %v591_v36 = vmul.f32 %v590_v35, %v582_v30 }
  0xfc   :  { %v593_v39 = vrot.slane %v591_v36, 2 }
  0xfe   :  { %v595_v40 = vadd.f32 %v593_v39, %v19853_v22 }
 0x1bb   :  { %v321_v43 = vpop.f32.mrb[2].mxu0 }
 0x1bc   :  { %v322_v44 = vadd.f32 %v321_v43, %v250_v41  ;;  %v16472_v45 = vpop.f32.mrb[3].mxu0  ;;  %v674_v41 = vstv %s585_s11  ;;  %s1963_s11 = smul.f32 -0.27353132, %s19877_s0 }
 0x1bd   :  { %v675_v43 = vmul.f32 %v674_v41, %v19848_v17 }
 0x1be   :  { %v335_v46 = vadd.f32 %v334_v42, %v322_v44  ;;  %v596_v42 = vmul.f32 %v595_v40, %v582_v30 }
 0x1bf   :  { %v676_v45 = vadd.f32 %v675_v43, %v19886_v37 }
 0x1c0   :  { %16482 = vmatmul.mubr.msk.f32.vlgmr.msra.gmra.mrb[2].mxu1 %vm251_vm4, %v335_v46  ;;  %v598_v44 = vrot.slane %v596_v42, 2 }
 0x1c1   :  { %16503 = vmatprep.mubr.msk.f32.mxu1 %vm19732_vm1, %v19731_v2  ;;  %18371 = vmatpush3.bf16.msra.mxu1 %v19935_v1  ;;  %v680_v47 = vrot.slane %v676_v45, %v19889_v38 }
 0x1c2   :  { %18372 = vmatprep.subr.bf16.mxu1 %v19733_v7  ;;  %v600_v46 = vadd.f32 %v598_v44, %v19853_v22 }
 0x1c5   :  { %18374 = vmatpush3.bf16.msra.mxu1 %v19945_v5 }
 0x1c6   :  { %18381 = vmatprep.subr.bf16.mxu1 %v19733_v7 }
 0x293   :  { %v409_v55 = vpop.f32.mrb[2].mxu1 }
 0x294   :  { %v410_v56 = vadd.f32 %v409_v55, %v19919_v54  ;;  %v16483_v57 = vpop.f32.mrb[3].mxu1 }
 0x296   :  { %v15308_v58 = vmul.f32 -1.442695, %v410_v56 }
 0x298   :  { %19371 = vpow2.f32 %v15308_v58 }
 0x2a2   :  { %v19372_v59 = vpop.eup %19371 }
 0x2a3   :  { %v416_v60 = vadd.f32 1.0, %v19372_v59 }
 0x2a5   :  { %19373 = vrcp.f32 %v416_v60 }
 0x2af   :  { %v19374_v61 = vpop.eup %19373 }
 0x2b0   :  { %v419_v62 = vmul.f32 %v19374_v61, %v410_v56 }
 0x2b2   :  { %16493 = vmatmul.mubr.msk.f32.vlgmr.msra.gmra.mrb[4].mxu0 %vm251_vm4, %v419_v62 }
 0x2b3   :  { %18377 = vmatpush3.bf16.msra.mxu0 %v19807_v6  ;;  %16514 = vmatprep.mubr.msk.f32.mxu0 %vm19732_vm1, %v19731_v2 }
 0x2b4   :  { %18378 = vmatprep.subr.bf16.mxu0 %v19733_v7 }
 0x2b7   :  { %18380 = vmatpush3.bf16.msra.mxu0 %v19828_v10 }
 0x2b8   :  { %18387 = vmatprep.subr.bf16.mxu0 %v19733_v7 }
 0x385   :  { %v493_v11 = vpop.f32.mrb[4].mxu0 }
 0x386   :  { %v494_v12 = vadd.f32 %v493_v11, %v19951_v9  ;;  %v16494_v14 = vpop.f32.mrb[5].mxu0 }
 0x388   :  { %v15310_v16 = vmul.f32 -1.442695, %v494_v12 }
 0x38a   :  { %19375 = vpow2.f32 %v15310_v16  ;;  %v916_v16 = vstv %s915_s12  ;;  %s2310_s12 = smul.f32 -0.3223762, %s19877_s0 }
 0x394   :  { %v19376_v18 = vpop.eup %19375 }
 0x395   :  { %v500_v19 = vadd.f32 1.0, %v19376_v18  ;;  %v1256_v18 = vstv %s1255_s13  ;;  %s1967_s13 = sadd.f32 %s19877_s0, %s19871_s15 }
 0x397   :  { %19377 = vrcp.f32 %v500_v19  ;;  %v1600_v19 = vstv %s1599_s14 }
 0x3a1   :  { %v19378_v21 = vpop.eup %19377 }
 0x3a2   :  { %v503_v23 = vmul.f32 %v19378_v21, %v494_v12  ;;  %v1948_v21 = vstv %s1947_s17 }
 0x3a4   :  { %16504 = vmatmul.mubr.msk.f32.vlgmr.msra.gmra.mrb[4].mxu1 %vm251_vm4, %v503_v23 }
 0x3a5   :  { %18383 = vmatpush3.bf16.msra.mxu1 %v19838_v13  ;;  %16525 = vmatprep.mubr.msk.f32.mxu1 %vm19732_vm1, %v19731_v2 }
 0x3a6   :  { %18384 = vmatprep.subr.bf16.mxu1 %v19733_v7 }
 0x3a9   :  { %18386 = vmatpush3.bf16.msra.mxu1 %v19867_v26 }
 0x3aa   :  { %18393 = vmatprep.subr.bf16.mxu1 %v19733_v7 }
 0x477   :  { %v577_v27 = vpop.f32.mrb[4].mxu1 }
 0x478   :  { %v19967_v28 = vadd.f32 %v577_v27, %v19963_v25  ;;  %v16505_v29 = vpop.f32.mrb[5].mxu1 }
 0x47a   :  { %v583_v31 = vmul.f32 %v582_v30, %v19967_v28  ;;  %v917_v23 = vmul.f32 %v916_v16, %v19967_v28  ;;  %v1257_v24 = vmul.f32 %v1256_v18, %v19967_v28  ;;  %v1601_v27 = vmul.f32 %v1600_v19, %v19967_v28 }
 0x47b   :  { %v1949_v29 = vmul.f32 %v1948_v21, %v19967_v28 }
 0x47c   :  { %v584_v32 = vadd.f32 %v583_v31, %v19851_v20  ;;  %v920_v31 = vstv %s919_s3  ;;  %v918_v39 = vadd.f32 %v917_v23, %v19851_v20  ;;  %v1258_v40 = vadd.f32 %v1257_v24, %v19851_v20 }
 0x47d   :  { %v1602_v41 = vadd.f32 %v1601_v27, %v19851_v20  ;;  %v1950_v42 = vadd.f32 %v1949_v29, %v19851_v20 }
 0x47e   :  { %16515 = vmatmul.mubr.msk.f32.vlgmr.msra.gmra.mrb[6].mxu0 %vm251_vm4, %v584_v32  ;;  %v1260_v32 = vstv %s1259_s18  ;;  %s2314_s18 = smul.f32 0.13095239, %s19877_s0 }
 0x47f   :  { %18389 = vmatpush3.bf16.msra.mxu0 %v19903_v49  ;;  %16536 = vmatprep.mubr.msk.f32.mxu0 %vm19732_vm1, %v19731_v2 }
 0x480   :  { %18390 = vmatprep.subr.bf16.mxu0 %v19733_v7 }
 0x483   :  { %18392 = vmatpush3.bf16.msra.mxu0 %v19913_v52 }
 0x484   :  { %18399 = vmatprep.subr.bf16.mxu0 %v19733_v7 }
 0x551   :  { %v670_v48 = vpop.f32.mrb[6].mxu0 }
 0x552   :  { %v671_v50 = vadd.f32 %v670_v48, %v600_v46  ;;  %v16516_v51 = vpop.f32.mrb[7].mxu0 }
 0x554   :  { %v681_v53 = vadd.f32 %v680_v47, %v671_v50 }
 0x556   :  { %16526 = vmatmul.mubr.msk.f32.vlgmr.msra.gmra.mrb[6].mxu1 %vm251_vm4, %v681_v53  ;;  %v925_v53 = vstv %s923_s6 }
 0x557   :  { %18395 = vmatpush3.bf16.msra.mxu1 %v19935_v1  ;;  %16547 = vmatprep.mubr.msk.f32.mxu1 %vm19732_vm1, %v19731_v2 }
 0x558   :  { %18396 = vmatprep.subr.bf16.mxu1 %v19733_v7 }
 0x55b   :  { %18398 = vmatpush3.bf16.msra.mxu1 %v19945_v5 }
 0x55c   :  { %18405 = vmatprep.subr.bf16.mxu1 %v19733_v7 }
 0x629   :  { %v751_v55 = vpop.f32.mrb[6].mxu1 }
 0x62a   :  { %v752_v56 = vadd.f32 %v751_v55, %v19919_v54  ;;  %v16527_v57 = vpop.f32.mrb[7].mxu1  ;;  %v926_v55 = vmul.f32 %v925_v53, %v19853_v22 }
 0x62c   :  { %v15314_v58 = vmul.f32 -1.442695, %v752_v56 }
 0x62e   :  { %19379 = vpow2.f32 %v15314_v58 }
 0x638   :  { %v19380_v59 = vpop.eup %19379 }
 0x639   :  { %v758_v60 = vadd.f32 1.0, %v19380_v59 }
 0x63b   :  { %19381 = vrcp.f32 %v758_v60 }
 0x645   :  { %v19382_v61 = vpop.eup %19381 }
 0x646   :  { %v761_v62 = vmul.f32 %v19382_v61, %v752_v56  ;;  %v928_v56 = vrot.slane %v926_v55, 2  ;;  %v1014_v61 = vstv %s924_s21 }
 0x648   :  { %16537 = vmatmul.mubr.msk.f32.vlgmr.msra.gmra.mrb[8].mxu0 %vm251_vm4, %v761_v62  ;;  %v930_v57 = vadd.f32 %v928_v56, %v19853_v22 }
 0x649   :  { %18401 = vmatpush3.bf16.msra.mxu0 %v19807_v6  ;;  %16558 = vmatprep.mubr.msk.f32.mxu0 %vm19732_vm1, %v19731_v2 }
 0x64a   :  { %18402 = vmatprep.subr.bf16.mxu0 %v19733_v7  ;;  %v931_v58 = vmul.f32 %v930_v57, %v925_v53 }
 0x64c   :  { %v933_v59 = vrot.slane %v931_v58, 2 }
 0x64d   :  { %18404 = vmatpush3.bf16.msra.mxu0 %v19828_v10 }
 0x64e   :  { %18411 = vmatprep.subr.bf16.mxu0 %v19733_v7  ;;  %v935_v60 = vadd.f32 %v933_v59, %v19853_v22 }
 0x650   :  { %v936_v62 = vmul.f32 %v935_v60, %v925_v53 }
 0x71b   :  { %v831_v63 = vpop.f32.mrb[8].mxu0 }
 0x71c   :  { %v832_v0 = vadd.f32 %v831_v63, %v19951_v9  ;;  %v16538_v3 = vpop.f32.mrb[9].mxu0  ;;  %v1015_v63 = vmul.f32 %v1014_v61, %v19848_v17 }
 0x71e   :  { %v15316_v4 = vmul.f32 -1.442695, %v832_v0  ;;  %v1016_v3 = vadd.f32 %v1015_v63, %v19886_v37 }
 0x720   :  { %19383 = vpow2.f32 %v15316_v4 }
 0x72a   :  { %v19384_v8 = vpop.eup %19383 }
 0x72b   :  { %v838_v11 = vadd.f32 1.0, %v19384_v8  ;;  %v1020_v8 = vrot.slane %v1016_v3, %v19889_v38 }
 0x72d   :  { %19385 = vrcp.f32 %v838_v11 }
 0x737   :  { %v19386_v12 = vpop.eup %19385 }
 0x738   :  { %v841_v14 = vmul.f32 %v19386_v12, %v832_v0  ;;  %v938_v0 = vrot.slane %v936_v62, 2 }
 0x73a   :  { %16548 = vmatmul.mubr.msk.f32.vlgmr.msra.gmra.mrb[8].mxu1 %vm251_vm4, %v841_v14  ;;  %v940_v4 = vadd.f32 %v938_v0, %v19853_v22 }
 0x73b   :  { %18407 = vmatpush3.bf16.msra.mxu1 %v19838_v13  ;;  %16569 = vmatprep.mubr.msk.f32.mxu1 %vm19732_vm1, %v19731_v2 }
 0x73c   :  { %18408 = vmatprep.subr.bf16.mxu1 %v19733_v7 }
 0x73f   :  { %18410 = vmatpush3.bf16.msra.mxu1 %v19867_v26 }
 0x740   :  { %18417 = vmatprep.subr.bf16.mxu1 %v19733_v7 }
 0x80d   :  { %v911_v30 = vpop.f32.mrb[8].mxu1 }
 0x80e   :  { %v912_v35 = vadd.f32 %v911_v30, %v19963_v25  ;;  %v16549_v36 = vpop.f32.mrb[9].mxu1 }
 0x810   :  { %v921_v43 = vmul.f32 %v920_v31, %v912_v35  ;;  %v1261_v44 = vmul.f32 %v1260_v32, %v912_v35  ;;  %v1605_v45 = vmul.f32 %v1604_v33, %v912_v35  ;;  %v1953_v46 = vmul.f32 %v1952_v34, %v912_v35 }
 0x812   :  { %v922_v47 = vadd.f32 %v921_v43, %v918_v39  ;;  %v20026_v48 = vadd.f32 %v1261_v44, %v1258_v40  ;;  %v20028_v50 = vadd.f32 %v1605_v45, %v1602_v41  ;;  %v20030_v51 = vadd.f32 %v1953_v46, %v1950_v42 }
 0x813   :  { %v2299_v41 = vstv %s2298_s22  ;;  %v1264_v44 = vstv %s1263_s23  ;;  %v1608_v45 = vstv %s1607_s24  ;;  %v1956_v46 = vstv %s1955_s4 }
 0x814   :  { %16559 = vmatmul.mubr.msk.f32.vlgmr.msra.gmra.mrb[10].mxu0 %vm251_vm4, %v922_v47  ;;  %v2300_v42 = vmul.f32 %v2299_v41, %v19967_v28  ;;  %v2303_v47 = vstv %s2302_s25 }
 0x815   :  { %18413 = vmatpush3.bf16.msra.mxu0 %v19903_v49  ;;  %16580 = vmatprep.mubr.msk.f32.mxu0 %vm19732_vm1, %v19731_v2 }
 0x816   :  { %18414 = vmatprep.subr.bf16.mxu0 %v19733_v7  ;;  %v2301_v56 = vadd.f32 %v2300_v42, %v19851_v20  ;;  %v1269_v20 = vstv %s1267_s26 }
 0x819   :  { %18416 = vmatpush3.bf16.msra.mxu0 %v19913_v52 }
 0x81a   :  { %18423 = vmatprep.subr.bf16.mxu0 %v19733_v7 }
 0x8e7   :  { %v1010_v11 = vpop.f32.mrb[10].mxu0 }
 0x8e8   :  { %v1011_v12 = vadd.f32 %v1010_v11, %v940_v4  ;;  %v16560_v14 = vpop.f32.mrb[11].mxu0 }
 0x8ea   :  { %v1021_v16 = vadd.f32 %v1020_v8, %v1011_v12  ;;  %v1358_v8 = vstv %s1268_s27 }
 0x8eb   :  { %v1359_v12 = vmul.f32 %v1358_v8, %v19848_v17  ;;  %v1706_v8 = vstv %s1616_s5 }
 0x8ec   :  { %16570 = vmatmul.mubr.msk.f32.vlgmr.msra.gmra.mrb[10].mxu1 %vm251_vm4, %v1021_v16 }
 0x8ed   :  { %18419 = vmatpush3.bf16.msra.mxu1 %v19935_v1  ;;  %16591 = vmatprep.mubr.msk.f32.mxu1 %vm19732_vm1, %v19731_v2  ;;  %v1360_v16 = vadd.f32 %v1359_v12, %v19886_v37  ;;  %v1707_v12 = vmul.f32 %v1706_v8, %v19848_v17 }
 0x8ee   :  { %18420 = vmatprep.subr.bf16.mxu1 %v19733_v7 }
 0x8f1   :  { %18422 = vmatpush3.bf16.msra.mxu1 %v19945_v5 }
 0x8f2   :  { %18429 = vmatprep.subr.bf16.mxu1 %v19733_v7 }
 0x9bf   :  { %v1091_v18 = vpop.f32.mrb[10].mxu1 }
 0x9c0   :  { %v1092_v19 = vadd.f32 %v1091_v18, %v19919_v54  ;;  %v16571_v21 = vpop.f32.mrb[11].mxu1 }
 0x9c2   :  { %v15320_v23 = vmul.f32 -1.442695, %v1092_v19 }
 0x9c4   :  { %19387 = vpow2.f32 %v15320_v23 }
 0x9ce   :  { %v19388_v24 = vpop.eup %19387 }
 0x9cf   :  { %v1098_v27 = vadd.f32 1.0, %v19388_v24 }
 0x9d1   :  { %19389 = vrcp.f32 %v1098_v27 }
 0x9db   :  { %v19390_v29 = vpop.eup %19389 }
 0x9dc   :  { %v1101_v30 = vmul.f32 %v19390_v29, %v1092_v19  ;;  %v1364_v19 = vrot.slane %v1360_v16, %v19889_v38  ;;  %v1708_v16 = vadd.f32 %v1707_v12, %v19886_v37 }
 0x9de   :  { %16581 = vmatmul.mubr.msk.f32.vlgmr.msra.gmra.mrb[12].mxu0 %vm251_vm4, %v1101_v30 }
 0x9df   :  { %18425 = vmatpush3.bf16.msra.mxu0 %v19807_v6  ;;  %16602 = vmatprep.mubr.msk.f32.mxu0 %vm19732_vm1, %v19731_v2 }
 0x9e0   :  { %18426 = vmatprep.subr.bf16.mxu0 %v19733_v7 }
 0x9e3   :  { %18428 = vmatpush3.bf16.msra.mxu0 %v19828_v10 }
 0x9e4   :  { %18435 = vmatprep.subr.bf16.mxu0 %v19733_v7 }
 0xab1   :  { %v1171_v31 = vpop.f32.mrb[12].mxu0 }
 0xab2   :  { %v1172_v32 = vadd.f32 %v1171_v31, %v19951_v9  ;;  %v16582_v33 = vpop.f32.mrb[13].mxu0 }
 0xab4   :  { %v15322_v34 = vmul.f32 -1.442695, %v1172_v32 }
 0xab6   :  { %19391 = vpow2.f32 %v15322_v34 }
 0xac0   :  { %v19392_v35 = vpop.eup %19391 }
 0xac1   :  { %v1178_v36 = vadd.f32 1.0, %v19392_v35 }
 0xac3   :  { %19393 = vrcp.f32 %v1178_v36 }
 0xacd   :  { %v19394_v39 = vpop.eup %19393 }
 0xace   :  { %v1181_v40 = vmul.f32 %v19394_v39, %v1172_v32 }
 0xad0   :  { %16592 = vmatmul.mubr.msk.f32.vlgmr.msra.gmra.mrb[12].mxu1 %vm251_vm4, %v1181_v40 }
 0xad1   :  { %18431 = vmatpush3.bf16.msra.mxu1 %v19838_v13  ;;  %16613 = vmatprep.mubr.msk.f32.mxu1 %vm19732_vm1, %v19731_v2 }
 0xad2   :  { %18432 = vmatprep.subr.bf16.mxu1 %v19733_v7 }
 0xad5   :  { %18434 = vmatpush3.bf16.msra.mxu1 %v19867_v26 }
 0xad6   :  { %18441 = vmatprep.subr.bf16.mxu1 %v19733_v7 }
 0xba3   :  { %v1251_v43 = vpop.f32.mrb[12].mxu1 }
 0xba4   :  { %v1252_v53 = vadd.f32 %v1251_v43, %v19963_v25  ;;  %v16593_v55 = vpop.f32.mrb[13].mxu1 }
 0xba5   :  { %v1960_v55 = vstv %s1959_s29 }
 0xba6   :  { %v1265_v57 = vmul.f32 %v1264_v44, %v1252_v53  ;;  %v1609_v58 = vmul.f32 %v1608_v45, %v1252_v53  ;;  %v1957_v59 = vmul.f32 %v1956_v46, %v1252_v53  ;;  %v2304_v60 = vmul.f32 %v2303_v47, %v1252_v53 }
 0xba7   :  { %v1612_v53 = vstv %s1611_s28 }
 0xba8   :  { %v1266_v61 = vadd.f32 %v1265_v57, %v20026_v48  ;;  %v20081_v62 = vadd.f32 %v1609_v58, %v20028_v50  ;;  %v20084_v28 = vadd.f32 %v1957_v59, %v20030_v51  ;;  %v20086_v63 = vadd.f32 %v2304_v60, %v2301_v56 }
 0xba9   :  { %v1270_v48 = vmul.f32 %v1269_v20, %v19853_v22  ;;  %v2307_v56 = vstv %s2306_s30 }
 0xbaa   :  { %16603 = vmatmul.mubr.msk.f32.vlgmr.msra.gmra.mrb[14].mxu0 %vm251_vm4, %v1266_v61 }
 0xbab   :  { %18437 = vmatpush3.bf16.msra.mxu0 %v19903_v49  ;;  %16624 = vmatprep.mubr.msk.f32.mxu0 %vm19732_vm1, %v19731_v2  ;;  %v1272_v50 = vrot.slane %v1270_v48, 2 }
 0xbac   :  { %18438 = vmatprep.subr.bf16.mxu0 %v19733_v7 }
 0xbad   :  { %v1274_v51 = vadd.f32 %v1272_v50, %v19853_v22 }
 0xbaf   :  { %18440 = vmatpush3.bf16.msra.mxu0 %v19913_v52  ;;  %v1275_v0 = vmul.f32 %v1274_v51, %v1269_v20 }
 0xbb0   :  { %18447 = vmatprep.subr.bf16.mxu0 %v19733_v7 }
 0xbb1   :  { %v1277_v3 = vrot.slane %v1275_v0, 2 }
 0xbb3   :  { %v1279_v4 = vadd.f32 %v1277_v3, %v19853_v22 }
 0xbb5   :  { %v1280_v11 = vmul.f32 %v1279_v4, %v1269_v20 }
 0xbb7   :  { %v1282_v14 = vrot.slane %v1280_v11, 2 }
 0xbb9   :  { %v1284_v18 = vadd.f32 %v1282_v14, %v19853_v22 }
 0xc7d   :  { %v1354_v21 = vpop.f32.mrb[14].mxu0 }
 0xc7e   :  { %v1355_v23 = vadd.f32 %v1354_v21, %v1284_v18  ;;  %v16604_v24 = vpop.f32.mrb[15].mxu0 }
 0xc80   :  { %v1365_v27 = vadd.f32 %v1364_v19, %v1355_v23  ;;  %v1712_v19 = vrot.slane %v1708_v16, %v19889_v38 }
 0xc82   :  { %16614 = vmatmul.mubr.msk.f32.vlgmr.msra.gmra.mrb[14].mxu1 %vm251_vm4, %v1365_v27 }
 0xc83   :  { %18443 = vmatpush3.bf16.msra.mxu1 %v19935_v1  ;;  %16635 = vmatprep.mubr.msk.f32.mxu1 %vm19732_vm1, %v19731_v2 }
 0xc84   :  { %18444 = vmatprep.subr.bf16.mxu1 %v19733_v7 }
 0xc87   :  { %18446 = vmatpush3.bf16.msra.mxu1 %v19945_v5 }
 0xc88   :  { %18453 = vmatprep.subr.bf16.mxu1 %v19733_v7 }
 0xd55   :  { %v1435_v29 = vpop.f32.mrb[14].mxu1 }
 0xd56   :  { %v1436_v30 = vadd.f32 %v1435_v29, %v19919_v54  ;;  %v16615_v31 = vpop.f32.mrb[15].mxu1 }
 0xd58   :  { %v15326_v32 = vmul.f32 -1.442695, %v1436_v30 }
 0xd5a   :  { %19395 = vpow2.f32 %v15326_v32 }
 0xd64   :  { %v19396_v33 = vpop.eup %19395 }
 0xd65   :  { %v1442_v34 = vadd.f32 1.0, %v19396_v33 }
 0xd67   :  { %19397 = vrcp.f32 %v1442_v34 }
 0xd71   :  { %v19398_v35 = vpop.eup %19397 }
 0xd72   :  { %v1445_v36 = vmul.f32 %v19398_v35, %v1436_v30 }
 0xd74   :  { %16625 = vmatmul.mubr.msk.f32.vlgmr.msra.gmra.mrb[16].mxu0 %vm251_vm4, %v1445_v36 }
 0xd75   :  { %18449 = vmatpush3.bf16.msra.mxu0 %v19807_v6  ;;  %16646 = vmatprep.mubr.msk.f32.mxu0 %vm19732_vm1, %v19731_v2 }
 0xd76   :  { %18450 = vmatprep.subr.bf16.mxu0 %v19733_v7 }
 0xd79   :  { %18452 = vmatpush3.bf16.msra.mxu0 %v19828_v10 }
 0xd7a   :  { %18459 = vmatprep.subr.bf16.mxu0 %v19733_v7 }
 0xe47   :  { %v1515_v39 = vpop.f32.mrb[16].mxu0 }
 0xe48   :  { %v1516_v40 = vadd.f32 %v1515_v39, %v19951_v9  ;;  %v16626_v41 = vpop.f32.mrb[17].mxu0 }
 0xe4a   :  { %v15328_v42 = vmul.f32 -1.442695, %v1516_v40 }
 0xe4c   :  { %19399 = vpow2.f32 %v15328_v42 }
 0xe56   :  { %v19400_v43 = vpop.eup %19399 }
 0xe57   :  { %v1522_v44 = vadd.f32 1.0, %v19400_v43 }
 0xe59   :  { %19401 = vrcp.f32 %v1522_v44 }
 0xe63   :  { %v19402_v45 = vpop.eup %19401 }
 0xe64   :  { %v1525_v46 = vmul.f32 %v19402_v45, %v1516_v40 }
 0xe66   :  { %16636 = vmatmul.mubr.msk.f32.vlgmr.msra.gmra.mrb[16].mxu1 %vm251_vm4, %v1525_v46 }
 0xe67   :  { %18455 = vmatpush3.bf16.msra.mxu1 %v19838_v13  ;;  %16657 = vmatprep.mubr.msk.f32.mxu1 %vm19732_vm1, %v19731_v2 }
 0xe68   :  { %18456 = vmatprep.subr.bf16.mxu1 %v19733_v7 }
 0xe6b   :  { %18458 = vmatpush3.bf16.msra.mxu1 %v19867_v26 }
 0xe6c   :  { %18465 = vmatprep.subr.bf16.mxu1 %v19733_v7 }
 0xf39   :  { %v1595_v47 = vpop.f32.mrb[16].mxu1 }
 0xf3a   :  { %v1596_v57 = vadd.f32 %v1595_v47, %v19963_v25  ;;  %v16637_v58 = vpop.f32.mrb[17].mxu1 }
 0xf3c   :  { %v1613_v59 = vmul.f32 %v1612_v53, %v1596_v57  ;;  %v1961_v60 = vmul.f32 %v1960_v55, %v1596_v57  ;;  %v2308_v61 = vmul.f32 %v2307_v56, %v1596_v57  ;;  %v1964_v53 = vstv %s1963_s11 }
 0xf3d   :  { %v2311_v55 = vstv %s2310_s12 }
 0xf3e   :  { %v1614_v20 = vadd.f32 %v1613_v59, %v20081_v62  ;;  %v20133_v48 = vadd.f32 %v1961_v60, %v20084_v28  ;;  %v20136_v50 = vadd.f32 %v2308_v61, %v20086_v63  ;;  %v1617_v62 = vstv %s1615_s10 }
 0xf3f   :  { %v1618_v28 = vmul.f32 %v1617_v62, %v19853_v22 }
 0xf40   :  { %16647 = vmatmul.mubr.msk.f32.vlgmr.msra.gmra.mrb[18].mxu0 %vm251_vm4, %v1614_v20  ;;  %v1968_v20 = vstv %s19877_s0  ;;  %s20255_s0 = sld [smem:[#allocation3 + $0x2]] }
 0xf41   :  { %18461 = vmatpush3.bf16.msra.mxu0 %v19903_v49  ;;  %16668 = vmatprep.mubr.msk.f32.mxu0 %vm19732_vm1, %v19731_v2  ;;  %v1620_v51 = vrot.slane %v1618_v28, 2 }
 0xf42   :  { %18462 = vmatprep.subr.bf16.mxu0 %v19733_v7 }
 0xf43   :  { %v1622_v63 = vadd.f32 %v1620_v51, %v19853_v22 }
 0xf45   :  { %18464 = vmatpush3.bf16.msra.mxu0 %v19913_v52  ;;  %v1623_v0 = vmul.f32 %v1622_v63, %v1617_v62 }
 0xf46   :  { %18471 = vmatprep.subr.bf16.mxu0 %v19733_v7  ;;  %s20259_s19 = ssub.f32 %s20255_s0, %s19873_s16 }
 0xf47   :  { %v1625_v3 = vrot.slane %v1623_v0, 2  ;;  %v2057_v0 = vstv %s1967_s13 }
 0xf48   :  { %s2397_s20 = smul.f32 0.0, %s20259_s19 }
 0xf49   :  { %v1627_v4 = vadd.f32 %v1625_v3, %v19853_v22  ;;  %s2729_s23 = smul.f32 0.2, %s20259_s19 }
 0xf4a   :  { %s2398_s6 = sadd.f32 %s19873_s16, %s2397_s20  ;;  %s3063_s4 = smul.f32 0.075, %s20259_s19 }
 0xf4b   :  { %v1628_v11 = vmul.f32 %v1627_v4, %v1617_v62  ;;  %v1969_v62 = vmul.f32 %v1968_v20, %v19853_v22  ;;  %v2058_v4 = vmul.f32 %v2057_v0, %v19848_v17  ;;  %s2733_s24 = sadd.f32 %s19873_s16, %s2729_s23  ;;  %s3403_s25 = smul.f32 0.9777778, %s20259_s19 }
 0xf4c   :  { %s3747_s26 = smul.f32 2.9525986, %s20259_s19 }
 0xf4d   :  { %v1630_v14 = vrot.slane %v1628_v11, 2  ;;  %v2059_v11 = vadd.f32 %v2058_v4, %v19886_v37  ;;  %s4095_s27 = smul.f32 2.8462753, %s20259_s19 }
 0xf4e   :  { %s3067_s28 = smul.f32 0.225, %s20259_s19 }
 0xf4f   :  { %v1632_v18 = vadd.f32 %v1630_v14, %v19853_v22  ;;  %v2063_v14 = vrot.slane %v2059_v11, %v19889_v38  ;;  %s3407_s29 = smul.f32 -3.7333333, %s20259_s19 }
 0xf50   :  { %s3751_s30 = smul.f32 -11.595794, %s20259_s19 }
 0xf51   :  { %s4099_s10 = smul.f32 -10.757576, %s20259_s19 }
 0xf52   :  { %s3071_s5 = smul.f32 0.3, %s20259_s19 }
 0xf53   :  { %s4446_s12 = smul.f32 0.091145836, %s20259_s19 }
 0xf54   :  { %s3072_s11 = sadd.f32 %s19873_s16, %s3071_s5  ;;  %s3411_s13 = smul.f32 3.5555556, %s20259_s19 }
 0xf55   :  { %s3755_s15 = smul.f32 9.822893, %s20259_s19 }
 0xf56   :  { %s4103_s14 = smul.f32 8.906423, %s20259_s19 }
 0xf57   :  { %s4450_s17 = smul.f32 0.4492363, %s20259_s19 }
 0xf58   :  { %s3415_s3 = smul.f32 0.8, %s20259_s19 }
 0xf59   :  { %s4454_s21 = smul.f32 0.6510417, %s20259_s19 }
 0xf5a   :  { %s3763_s22 = smul.f32 0.8888889, %s20259_s19 }
0x1013   :  { %v1702_v21 = vpop.f32.mrb[18].mxu0 }
0x1014   :  { %v1703_v23 = vadd.f32 %v1702_v21, %v1632_v18  ;;  %v16648_v24 = vpop.f32.mrb[19].mxu0 }
0x1016   :  { %v1713_v27 = vadd.f32 %v1712_v19, %v1703_v23 }
0x1018   :  { %16658 = vmatmul.mubr.msk.f32.vlgmr.msra.gmra.mrb[18].mxu1 %vm251_vm4, %v1713_v27 }
0x1019   :  { %18467 = vmatpush3.bf16.msra.mxu1 %v19935_v1  ;;  %16679 = vmatprep.mubr.msk.f32.mxu1 %vm19732_vm1, %v19731_v2 }
0x101a   :  { %18468 = vmatprep.subr.bf16.mxu1 %v19733_v7 }
0x101d   :  { %18470 = vmatpush3.bf16.msra.mxu1 %v19945_v5 }
0x101e   :  { %18477 = vmatprep.subr.bf16.mxu1 %v19733_v7 }
0x10eb   :  { %v1783_v29 = vpop.f32.mrb[18].mxu1 }
0x10ec   :  { %v1784_v30 = vadd.f32 %v1783_v29, %v19919_v54  ;;  %v16659_v31 = vpop.f32.mrb[19].mxu1 }
0x10ee   :  { %v15332_v32 = vmul.f32 -1.442695, %v1784_v30 }
0x10f0   :  { %19403 = vpow2.f32 %v15332_v32 }
0x10fa   :  { %v19404_v33 = vpop.eup %19403 }
0x10fb   :  { %v1790_v34 = vadd.f32 1.0, %v19404_v33 }
0x10fd   :  { %19405 = vrcp.f32 %v1790_v34 }
0x1107   :  { %v19406_v35 = vpop.eup %19405 }
0x1108   :  { %v1793_v36 = vmul.f32 %v19406_v35, %v1784_v30 }
0x110a   :  { %16669 = vmatmul.mubr.msk.f32.vlgmr.msra.gmra.mrb[20].mxu0 %vm251_vm4, %v1793_v36 }
0x110b   :  { %18473 = vmatpush3.bf16.msra.mxu0 %v19807_v6  ;;  %16690 = vmatprep.mubr.msk.f32.mxu0 %vm19732_vm1, %v19731_v2 }
0x110c   :  { %18474 = vmatprep.subr.bf16.mxu0 %v19733_v7 }
0x110f   :  { %18476 = vmatpush3.bf16.msra.mxu0 %v19828_v10 }
0x1110   :  { %18483 = vmatprep.subr.bf16.mxu0 %v19733_v7 }
0x11dd   :  { %v1863_v39 = vpop.f32.mrb[20].mxu0 }
0x11de   :  { %v1864_v40 = vadd.f32 %v1863_v39, %v19951_v9  ;;  %v16670_v41 = vpop.f32.mrb[21].mxu0 }
0x11e0   :  { %v15334_v42 = vmul.f32 -1.442695, %v1864_v40 }
0x11e2   :  { %19407 = vpow2.f32 %v15334_v42  ;;  %v20221_v42 = vld [vmem:[%s22216_s2 + $0x20] sm:$0xf] }
0x11ec   :  { %v19408_v43 = vpop.eup %19407 }
0x11ed   :  { %v1870_v44 = vadd.f32 1.0, %v19408_v43  ;;  %v15344_v43 = vld [vmem:[%s22215_s1 + $0x8] sm:$0xff] }
0x11ef   :  { %19409 = vrcp.f32 %v1870_v44 }
0x11f9   :  { %v19410_v45 = vpop.eup %19409 }
0x11fa   :  { %v1873_v46 = vmul.f32 %v19410_v45, %v1864_v40  ;;  %v2315_v45 = vstv %s2314_s18  ;;  %s3416_s18 = sadd.f32 %s19873_s16, %s3415_s3 }
0x11fc   :  { %16680 = vmatmul.mubr.msk.f32.vlgmr.msra.gmra.mrb[20].mxu1 %vm251_vm4, %v1873_v46 }
0x11fd   :  { %18479 = vmatpush3.bf16.msra.mxu1 %v19838_v13  ;;  %16701 = vmatprep.mubr.msk.f32.mxu1 %vm19732_vm1, %v19731_v2 }
0x11fe   :  { %18480 = vmatprep.subr.bf16.mxu1 %v19733_v7 }
0x1201   :  { %18482 = vmatpush3.bf16.msra.mxu1 %v19867_v26 }
0x1202   :  { %18489 = vmatprep.subr.bf16.mxu1 %v19733_v7 }
0x12cf   :  { %v1943_v47 = vpop.f32.mrb[20].mxu1 }
0x12d0   :  { %v1944_v56 = vadd.f32 %v1943_v47, %v19963_v25  ;;  %v16681_v57 = vpop.f32.mrb[21].mxu1 }
0x12d2   :  { %v1965_v58 = vmul.f32 %v1964_v53, %v1944_v56  ;;  %v2312_v59 = vmul.f32 %v2311_v55, %v1944_v56 }
0x12d4   :  { %v1966_v60 = vadd.f32 %v1965_v58, %v20133_v48  ;;  %v20182_v61 = vadd.f32 %v2312_v59, %v20136_v50  ;;  %v1971_v48 = vrot.slane %v1969_v62, 2  ;;  %v2399_v58 = vstv %s2397_s20  ;;  %s3759_s20 = smul.f32 -0.29080933, %s20259_s19 }
0x12d6   :  { %16691 = vmatmul.mubr.msk.f32.vlgmr.msra.gmra.mrb[22].mxu0 %vm251_vm4, %v1966_v60  ;;  %v1973_v50 = vadd.f32 %v1971_v48, %v19853_v22 }
0x12d7   :  { %18485 = vmatpush3.bf16.msra.mxu0 %v19903_v49  ;;  %16712 = vmatprep.mubr.msk.f32.mxu0 %vm19732_vm1, %v19731_v2 }
0x12d8   :  { %18486 = vmatprep.subr.bf16.mxu0 %v19733_v7  ;;  %v1974_v28 = vmul.f32 %v1973_v50, %v1968_v20  ;;  %v2488_v50 = vstv %s2398_s6  ;;  %s4107_s6 = smul.f32 0.2784091, %s20259_s19 }
0x12da   :  { %v1976_v51 = vrot.slane %v1974_v28, 2 }
0x12db   :  { %18488 = vmatpush3.bf16.msra.mxu0 %v19913_v52 }
0x12dc   :  { %18501 = vmatprep.subr.bf16.mxu0 %v19733_v7  ;;  %v1978_v63 = vadd.f32 %v1976_v51, %v19853_v22  ;;  %v20269_v51 = vld [vmem:[%s22222_s8] sm:$0xff] }
0x12de   :  { %v1979_v3 = vmul.f32 %v1978_v63, %v1968_v20  ;;  %v2489_v63 = vmul.f32 %v20269_v51, %v2488_v50 }
0x12e0   :  { %v1981_v8 = vrot.slane %v1979_v3, 2  ;;  %v2490_v3 = vadd.f32 %v2489_v63, %v19886_v37 }
0x12e2   :  { %v1983_v12 = vadd.f32 %v1981_v8, %v19853_v22  ;;  %v2494_v8 = vrot.slane %v2490_v3, %v19889_v38 }
0x13a9   :  { %v2053_v16 = vpop.f32.mrb[22].mxu0 }
0x13aa   :  { %v2054_v18 = vadd.f32 %v2053_v16, %v1983_v12  ;;  %v16692_v19 = vpop.f32.mrb[23].mxu0 }
0x13ac   :  { %v2064_v21 = vadd.f32 %v2063_v14, %v2054_v18 }
0x13ae   :  { %16702 = vmatmul.mubr.msk.f32.vlgmr.msra.gmra.mrb[22].mxu1 %vm251_vm4, %v2064_v21 }
0x13af   :  { %18491 = vmatpush3.bf16.msra.mxu1 %v19935_v1  ;;  %16723 = vmatprep.mubr.msk.f32.mxu1 %vm19732_vm1, %v19731_v2 }
0x13b0   :  { %18492 = vmatprep.subr.bf16.mxu1 %v19733_v7 }
0x13b3   :  { %18494 = vmatpush3.bf16.msra.mxu1 %v19945_v5 }
0x13b4   :  { %16726 = vmatprep.subr.mxu1 %v19731_v2 }
0x1481   :  { %v2134_v17 = vpop.f32.mrb[22].mxu1 }
0x1482   :  { %v2135_v22 = vadd.f32 %v2134_v17, %v19919_v54  ;;  %v16703_v23 = vpop.f32.mrb[23].mxu1 }
0x1484   :  { %v15338_v24 = vmul.f32 -1.442695, %v2135_v22 }
0x1486   :  { %19411 = vpow2.f32 %v15338_v24 }
0x1490   :  { %v19412_v27 = vpop.eup %19411 }
0x1491   :  { %v2141_v29 = vadd.f32 1.0, %v19412_v27 }
0x1493   :  { %19413 = vrcp.f32 %v2141_v29 }
0x149d   :  { %v19414_v30 = vpop.eup %19413 }
0x149e   :  { %v2144_v31 = vmul.f32 %v19414_v30, %v2135_v22 }
0x14a0   :  { %16713 = vmatmul.mubr.msk.f32.vlgmr.msra.gmra.mrb[24].mxu0 %vm251_vm4, %v2144_v31 }
0x14a1   :  { %18503 = vmatpush3.bf16.msra.mxu0 %v19838_v13  ;;  %16750 = vmatprep.mubr.msk.f32.mxu0 %vm19732_vm1, %v19731_v2 }
0x14a2   :  { %18504 = vmatprep.subr.bf16.mxu0 %v19733_v7 }
0x14a5   :  { %18506 = vmatpush3.bf16.msra.mxu0 %v19867_v26 }
0x14a6   :  { %18513 = vmatprep.subr.bf16.mxu0 %v19733_v7 }
0x1573   :  { %v2214_v32 = vpop.f32.mrb[24].mxu0 }
0x1574   :  { %v2215_v33 = vadd.f32 %v2214_v32, %v19951_v9  ;;  %v16714_v34 = vpop.f32.mrb[25].mxu0 }
0x1576   :  { %v15340_v35 = vmul.f32 -1.442695, %v2215_v33 }
0x1578   :  { %19415 = vpow2.f32 %v15340_v35 }
0x1582   :  { %v19416_v36 = vpop.eup %19415 }
0x1583   :  { %v2221_v39 = vadd.f32 1.0, %v19416_v36 }
0x1585   :  { %19417 = vrcp.f32 %v2221_v39 }
0x158f   :  { %v19418_v40 = vpop.eup %19417 }
0x1590   :  { %v2224_v41 = vmul.f32 %v19418_v40, %v2215_v33 }
0x1592   :  { %16724 = vmatmul.mubr.msk.f32.vlgmr.msra.gmra.mrb[24].mxu1 %vm251_vm4, %v2224_v41 }
0x1593   :  { %16727 = vmatpush3.msk.msra.mxu1 %vm77_vm0, %v20221_v42  ;;  %16728 = vmatprep.mubr.msk.f32.mxu1 %vm19732_vm1, %v19731_v2 }
0x1594   :  { %18495 = vmatprep.subr.bf16.mxu1 %v19733_v7 }
0x1596   :  { %16729 = vmatmul.mubr.msk.f32.vlgmr.msra.gmra.mrb[26].mxu1 %vm73_vm2, %v15344_v43  ;;  %v2730_v43 = vstv %s2729_s23  ;;  %s3764_s23 = sadd.f32 %s19873_s16, %s3763_s22 }
0x1597   :  { %18497 = vmatpush3.bf16.msra.mxu1 %v19807_v6  ;;  %16739 = vmatprep.mubr.msk.f32.mxu1 %vm19732_vm1, %v19731_v2 }
0x1598   :  { %18498 = vmatprep.subr.bf16.mxu1 %v19733_v7 }
0x159b   :  { %18500 = vmatpush3.bf16.msra.mxu1 %v19828_v10 }
0x159c   :  { %18507 = vmatprep.subr.bf16.mxu1 %v19733_v7 }
0x1665   :  { %v2294_v44 = vpop.f32.mrb[24].mxu1 }
0x1666   :  { %v2295_v46 = vadd.f32 %v2294_v44, %v19963_v25  ;;  %v16725_v47 = vpop.f32.mrb[25].mxu1 }
0x1668   :  { %v2316_v53 = vmul.f32 %v2315_v45, %v2295_v46 }
0x1669   :  { %v20240_v55 = vpop.f32.mrb[26].mxu1 }
0x166a   :  { %v20243_v56 = vadd.f32 %v2316_v53, %v20182_v61  ;;  %v16730_v57 = vpop.f32.mrb[27].mxu1  ;;  %v2400_v59 = vmul.f32 %v2399_v58, %v20240_v55  ;;  %v2734_v46 = vmul.f32 %v2730_v43, %v20240_v55 }
0x166c   :  { %2318 = vst.msk [vmem:[#allocation2 + $0x2] sm:$0x3] %vm151_vm3, %v20243_v56  ;;  %16740 = vmatmul.mubr.msk.f32.vlgmr.msra.gmra.mrb[28].mxu1 %vm251_vm4, %v20243_v56  ;;  %v2402_v60 = vrot.slane %v2400_v59, 2  ;;  %v2736_v47 = vrot.slane %v2734_v46, 2  ;;  %v3408_v46 = vstv %s3407_s29 }
0x166d   :  { %18509 = vmatpush3.bf16.msra.mxu1 %v19903_v49  ;;  %16761 = vmatprep.mubr.msk.f32.mxu1 %vm19732_vm1, %v19731_v2 }
0x166e   :  { %18510 = vmatprep.subr.bf16.mxu1 %v19733_v7  ;;  %v2404_v61 = vadd.f32 %v2402_v60, %v20240_v55  ;;  %v2738_v53 = vadd.f32 %v2736_v47, %v20240_v55  ;;  %v2822_v60 = vstv %s2733_s24  ;;  %v3752_v47 = vstv %s3751_s30  ;;  %s4111_s24 = smul.f32 -0.27353132, %s20259_s19 }
0x1670   :  { %v2405_v20 = vmul.f32 %v2404_v61, %v2399_v58  ;;  %v2739_v57 = vmul.f32 %v2738_v53, %v2730_v43  ;;  %v4100_v53 = vstv %s4099_s10 }
0x1671   :  { %18512 = vmatpush3.bf16.msra.mxu1 %v19913_v52 }
0x1672   :  { %18519 = vmatprep.subr.bf16.mxu1 %v19733_v7  ;;  %v2407_v62 = vrot.slane %v2405_v20, 2  ;;  %v2823_v20 = vmul.f32 %v20269_v51, %v2822_v60 }
0x1674   :  { %v2409_v48 = vadd.f32 %v2407_v62, %v20240_v55 }
0x1676   :  { %v2410_v28 = vmul.f32 %v2409_v48, %v2399_v58  ;;  %v2741_v58 = vrot.slane %v2739_v57, 2  ;;  %v2824_v48 = vadd.f32 %v2823_v20, %v19886_v37 }
0x1678   :  { %v2412_v0 = vrot.slane %v2410_v28, 2  ;;  %v2743_v59 = vadd.f32 %v2741_v58, %v20240_v55  ;;  %v2828_v28 = vrot.slane %v2824_v48, %v19889_v38 }
0x167a   :  { %v2414_v4 = vadd.f32 %v2412_v0, %v20240_v55  ;;  %v2744_v61 = vmul.f32 %v2743_v59, %v2730_v43 }
0x167c   :  { %v2746_v62 = vrot.slane %v2744_v61, 2 }
0x167e   :  { %v2748_v50 = vadd.f32 %v2746_v62, %v20240_v55 }
0x173f   :  { %v2484_v11 = vpop.f32.mrb[28].mxu1 }
0x1740   :  { %v2485_v12 = vadd.f32 %v2484_v11, %v2414_v4  ;;  %v16741_v14 = vpop.f32.mrb[29].mxu1 }
0x1742   :  { %v2495_v16 = vadd.f32 %v2494_v8, %v2485_v12 }
0x1744   :  { %16751 = vmatmul.mubr.msk.f32.vlgmr.msra.gmra.mrb[26].mxu0 %vm251_vm4, %v2495_v16 }
0x1745   :  { %18515 = vmatpush3.bf16.msra.mxu0 %v19935_v1  ;;  %16772 = vmatprep.mubr.msk.f32.mxu0 %vm19732_vm1, %v19731_v2 }
0x1746   :  { %18516 = vmatprep.subr.bf16.mxu0 %v19733_v7 }
0x1749   :  { %18518 = vmatpush3.bf16.msra.mxu0 %v19945_v5 }
0x174a   :  { %18525 = vmatprep.subr.bf16.mxu0 %v19733_v7 }
0x1817   :  { %v2565_v18 = vpop.f32.mrb[26].mxu0 }
0x1818   :  { %v2566_v19 = vadd.f32 %v2565_v18, %v19919_v54  ;;  %v16752_v21 = vpop.f32.mrb[27].mxu0 }
0x181a   :  { %v15349_v17 = vmul.f32 -1.442695, %v2566_v19 }
0x181c   :  { %19419 = vpow2.f32 %v15349_v17 }
0x1826   :  { %v19420_v22 = vpop.eup %19419 }
0x1827   :  { %v2572_v23 = vadd.f32 1.0, %v19420_v22 }
0x1829   :  { %19421 = vrcp.f32 %v2572_v23 }
0x1833   :  { %v19422_v24 = vpop.eup %19421 }
0x1834   :  { %v2575_v27 = vmul.f32 %v19422_v24, %v2566_v19 }
0x1836   :  { %16762 = vmatmul.mubr.msk.f32.vlgmr.msra.gmra.mrb[30].mxu1 %vm251_vm4, %v2575_v27 }
0x1837   :  { %18521 = vmatpush3.bf16.msra.mxu1 %v19807_v6  ;;  %16783 = vmatprep.mubr.msk.f32.mxu1 %vm19732_vm1, %v19731_v2 }
0x1838   :  { %18522 = vmatprep.subr.bf16.mxu1 %v19733_v7 }
0x183b   :  { %18524 = vmatpush3.bf16.msra.mxu1 %v19828_v10 }
0x183c   :  { %18531 = vmatprep.subr.bf16.mxu1 %v19733_v7 }
0x1909   :  { %v2645_v29 = vpop.f32.mrb[30].mxu1 }
0x190a   :  { %v2646_v30 = vadd.f32 %v2645_v29, %v19951_v9  ;;  %v16763_v31 = vpop.f32.mrb[31].mxu1 }
0x190c   :  { %v15351_v32 = vmul.f32 -1.442695, %v2646_v30 }
0x190e   :  { %19423 = vpow2.f32 %v15351_v32  ;;  %v3064_v32 = vstv %s3063_s4  ;;  %s4458_s4 = smul.f32 -0.3223762, %s20259_s19 }
0x1918   :  { %v19424_v33 = vpop.eup %19423 }
0x1919   :  { %v2652_v34 = vadd.f32 1.0, %v19424_v33  ;;  %v3404_v33 = vstv %s3403_s25  ;;  %s4115_s25 = sadd.f32 %s19873_s16, %s20259_s19 }
0x191b   :  { %19425 = vrcp.f32 %v2652_v34  ;;  %v3748_v34 = vstv %s3747_s26 }
0x1925   :  { %v19426_v35 = vpop.eup %19425 }
0x1926   :  { %v2655_v36 = vmul.f32 %v19426_v35, %v2646_v30  ;;  %v4096_v35 = vstv %s4095_s27  ;;  %s4462_s27 = smul.f32 0.13095239, %s20259_s19 }
0x1928   :  { %16773 = vmatmul.mubr.msk.f32.vlgmr.msra.gmra.mrb[28].mxu0 %vm251_vm4, %v2655_v36 }
0x1929   :  { %18527 = vmatpush3.bf16.msra.mxu0 %v19838_v13  ;;  %16794 = vmatprep.mubr.msk.f32.mxu0 %vm19732_vm1, %v19731_v2 }
0x192a   :  { %18528 = vmatprep.subr.bf16.mxu0 %v19733_v7 }
0x192d   :  { %18530 = vmatpush3.bf16.msra.mxu0 %v19867_v26 }
0x192e   :  { %18537 = vmatprep.subr.bf16.mxu0 %v19733_v7 }
0x19fb   :  { %v2725_v39 = vpop.f32.mrb[28].mxu0 }
0x19fc   :  { %v20300_v40 = vadd.f32 %v2725_v39, %v19963_v25  ;;  %v16774_v41 = vpop.f32.mrb[29].mxu0 }
0x19fe   :  { %v2731_v44 = vmul.f32 %v2730_v43, %v20300_v40  ;;  %v3065_v36 = vmul.f32 %v3064_v32, %v20300_v40  ;;  %v3405_v39 = vmul.f32 %v3404_v33, %v20300_v40  ;;  %v3749_v41 = vmul.f32 %v3748_v34, %v20300_v40 }
0x19ff   :  { %v4097_v43 = vmul.f32 %v4096_v35, %v20300_v40 }
0x1a00   :  { %v2732_v45 = vadd.f32 %v2731_v44, %v20243_v56  ;;  %v3066_v59 = vadd.f32 %v3065_v36, %v20243_v56  ;;  %v3406_v60 = vadd.f32 %v3405_v39, %v20243_v56  ;;  %v3750_v61 = vadd.f32 %v3749_v41, %v20243_v56 }
0x1a01   :  { %v4098_v20 = vadd.f32 %v4097_v43, %v20243_v56 }
0x1a02   :  { %16784 = vmatmul.mubr.msk.f32.vlgmr.msra.gmra.mrb[32].mxu1 %vm251_vm4, %v2732_v45  ;;  %v3068_v45 = vstv %s3067_s28 }
0x1a03   :  { %18533 = vmatpush3.bf16.msra.mxu1 %v19903_v49  ;;  %16805 = vmatprep.mubr.msk.f32.mxu1 %vm19732_vm1, %v19731_v2 }
0x1a04   :  { %18534 = vmatprep.subr.bf16.mxu1 %v19733_v7 }
0x1a07   :  { %18536 = vmatpush3.bf16.msra.mxu1 %v19913_v52 }
0x1a08   :  { %18543 = vmatprep.subr.bf16.mxu1 %v19733_v7 }
0x1ad5   :  { %v2818_v63 = vpop.f32.mrb[32].mxu1 }
0x1ad6   :  { %v2819_v0 = vadd.f32 %v2818_v63, %v2748_v50  ;;  %v16785_v3 = vpop.f32.mrb[33].mxu1 }
0x1ad8   :  { %v2829_v4 = vadd.f32 %v2828_v28, %v2819_v0 }
0x1ada   :  { %16795 = vmatmul.mubr.msk.f32.vlgmr.msra.gmra.mrb[30].mxu0 %vm251_vm4, %v2829_v4 }
0x1adb   :  { %18539 = vmatpush3.bf16.msra.mxu0 %v19935_v1  ;;  %16816 = vmatprep.mubr.msk.f32.mxu0 %vm19732_vm1, %v19731_v2 }
0x1adc   :  { %18540 = vmatprep.subr.bf16.mxu0 %v19733_v7 }
0x1adf   :  { %18542 = vmatpush3.bf16.msra.mxu0 %v19945_v5 }
0x1ae0   :  { %18549 = vmatprep.subr.bf16.mxu0 %v19733_v7 }
0x1bad   :  { %v2899_v8 = vpop.f32.mrb[30].mxu0 }
0x1bae   :  { %v2900_v11 = vadd.f32 %v2899_v8, %v19919_v54  ;;  %v16796_v12 = vpop.f32.mrb[31].mxu0  ;;  %v3073_v8 = vstv %s3071_s5 }
0x1bb0   :  { %v15355_v14 = vmul.f32 -1.442695, %v2900_v11 }
0x1bb2   :  { %19427 = vpow2.f32 %v15355_v14 }
0x1bbc   :  { %v19428_v16 = vpop.eup %19427 }
0x1bbd   :  { %v2906_v18 = vadd.f32 1.0, %v19428_v16 }
0x1bbf   :  { %19429 = vrcp.f32 %v2906_v18 }
0x1bc9   :  { %v19430_v19 = vpop.eup %19429 }
0x1bca   :  { %v2909_v21 = vmul.f32 %v19430_v19, %v2900_v11  ;;  %v3074_v11 = vmul.f32 %v3073_v8, %v20240_v55 }
0x1bcc   :  { %16806 = vmatmul.mubr.msk.f32.vlgmr.msra.gmra.mrb[34].mxu1 %vm251_vm4, %v2909_v21  ;;  %v3076_v12 = vrot.slane %v3074_v11, 2  ;;  %v3162_v21 = vstv %s3072_s11 }
0x1bcd   :  { %18545 = vmatpush3.bf16.msra.mxu1 %v19807_v6  ;;  %16827 = vmatprep.mubr.msk.f32.mxu1 %vm19732_vm1, %v19731_v2 }
0x1bce   :  { %18546 = vmatprep.subr.bf16.mxu1 %v19733_v7  ;;  %v3078_v14 = vadd.f32 %v3076_v12, %v20240_v55 }
0x1bd0   :  { %v3079_v16 = vmul.f32 %v3078_v14, %v3073_v8 }
0x1bd1   :  { %18548 = vmatpush3.bf16.msra.mxu1 %v19828_v10 }
0x1bd2   :  { %18555 = vmatprep.subr.bf16.mxu1 %v19733_v7  ;;  %v3081_v18 = vrot.slane %v3079_v16, 2 }
0x1bd4   :  { %v3083_v19 = vadd.f32 %v3081_v18, %v20240_v55 }
0x1c9f   :  { %v2979_v17 = vpop.f32.mrb[34].mxu1 }
0x1ca0   :  { %v2980_v22 = vadd.f32 %v2979_v17, %v19951_v9  ;;  %v16807_v23 = vpop.f32.mrb[35].mxu1  ;;  %v3084_v17 = vmul.f32 %v3083_v19, %v3073_v8  ;;  %v4451_v8 = vstv %s4450_s17 }
0x1ca2   :  { %v15357_v24 = vmul.f32 -1.442695, %v2980_v22  ;;  %v3086_v23 = vrot.slane %v3084_v17, 2 }
0x1ca4   :  { %19431 = vpow2.f32 %v15357_v24 }
0x1cae   :  { %v19432_v27 = vpop.eup %19431 }
0x1caf   :  { %v2986_v29 = vadd.f32 1.0, %v19432_v27  ;;  %v3088_v27 = vadd.f32 %v3086_v23, %v20240_v55 }
0x1cb1   :  { %19433 = vrcp.f32 %v2986_v29 }
0x1cbb   :  { %v19434_v30 = vpop.eup %19433 }
0x1cbc   :  { %v2989_v31 = vmul.f32 %v19434_v30, %v2980_v22  ;;  %v3163_v22 = vmul.f32 %v20269_v51, %v3162_v21 }
0x1cbe   :  { %16817 = vmatmul.mubr.msk.f32.vlgmr.msra.gmra.mrb[32].mxu0 %vm251_vm4, %v2989_v31  ;;  %v3164_v24 = vadd.f32 %v3163_v22, %v19886_v37 }
0x1cbf   :  { %18551 = vmatpush3.bf16.msra.mxu0 %v19838_v13  ;;  %16838 = vmatprep.mubr.msk.f32.mxu0 %vm19732_vm1, %v19731_v2 }
0x1cc0   :  { %18552 = vmatprep.subr.bf16.mxu0 %v19733_v7  ;;  %v3168_v29 = vrot.slane %v3164_v24, %v19889_v38 }
0x1cc3   :  { %18554 = vmatpush3.bf16.msra.mxu0 %v19867_v26 }
0x1cc4   :  { %18561 = vmatprep.subr.bf16.mxu0 %v19733_v7 }
0x1d91   :  { %v3059_v44 = vpop.f32.mrb[32].mxu0 }
0x1d92   :  { %v3060_v57 = vadd.f32 %v3059_v44, %v19963_v25  ;;  %v16818_v58 = vpop.f32.mrb[33].mxu0 }
0x1d94   :  { %v3069_v62 = vmul.f32 %v3068_v45, %v3060_v57  ;;  %v3409_v48 = vmul.f32 %v3408_v46, %v3060_v57  ;;  %v3753_v50 = vmul.f32 %v3752_v47, %v3060_v57  ;;  %v4101_v28 = vmul.f32 %v4100_v53, %v3060_v57 }
0x1d96   :  { %v3070_v63 = vadd.f32 %v3069_v62, %v3066_v59  ;;  %v20359_v0 = vadd.f32 %v3409_v48, %v3406_v60  ;;  %v20361_v3 = vadd.f32 %v3753_v50, %v3750_v61  ;;  %v20363_v4 = vadd.f32 %v4101_v28, %v4098_v20 }
0x1d97   :  { %v4447_v20 = vstv %s4446_s12  ;;  %v3412_v50 = vstv %s3411_s13  ;;  %v3756_v28 = vstv %s3755_s15 }
0x1d98   :  { %16828 = vmatmul.mubr.msk.f32.vlgmr.msra.gmra.mrb[36].mxu1 %vm251_vm4, %v3070_v63  ;;  %v4448_v62 = vmul.f32 %v4447_v20, %v20300_v40  ;;  %v4104_v63 = vstv %s4103_s14 }
0x1d99   :  { %18557 = vmatpush3.bf16.msra.mxu1 %v19903_v49  ;;  %16849 = vmatprep.mubr.msk.f32.mxu1 %vm19732_vm1, %v19731_v2 }
0x1d9a   :  { %18558 = vmatprep.subr.bf16.mxu1 %v19733_v7  ;;  %v4449_v14 = vadd.f32 %v4448_v62, %v20243_v56  ;;  %v3417_v56 = vstv %s3415_s3 }
0x1d9d   :  { %18560 = vmatpush3.bf16.msra.mxu1 %v19913_v52 }
0x1d9e   :  { %18567 = vmatprep.subr.bf16.mxu1 %v19733_v7 }
0x1e6b   :  { %v3158_v30 = vpop.f32.mrb[36].mxu1 }
0x1e6c   :  { %v3159_v31 = vadd.f32 %v3158_v30, %v3088_v27  ;;  %v16829_v32 = vpop.f32.mrb[37].mxu1  ;;  %v3506_v30 = vstv %s3416_s18 }
0x1e6d   :  { %v3507_v32 = vmul.f32 %v20269_v51, %v3506_v30 }
0x1e6e   :  { %v3169_v33 = vadd.f32 %v3168_v29, %v3159_v31 }
0x1e70   :  { %16839 = vmatmul.mubr.msk.f32.vlgmr.msra.gmra.mrb[34].mxu0 %vm251_vm4, %v3169_v33 }
0x1e71   :  { %18563 = vmatpush3.bf16.msra.mxu0 %v19935_v1  ;;  %16860 = vmatprep.mubr.msk.f32.mxu0 %vm19732_vm1, %v19731_v2 }
0x1e72   :  { %18564 = vmatprep.subr.bf16.mxu0 %v19733_v7 }
0x1e75   :  { %18566 = vmatpush3.bf16.msra.mxu0 %v19945_v5 }
0x1e76   :  { %18573 = vmatprep.subr.bf16.mxu0 %v19733_v7 }
0x1f43   :  { %v3239_v34 = vpop.f32.mrb[34].mxu0 }
0x1f44   :  { %v3240_v35 = vadd.f32 %v3239_v34, %v19919_v54  ;;  %v16840_v36 = vpop.f32.mrb[35].mxu0  ;;  %v3508_v34 = vadd.f32 %v3507_v32, %v19886_v37 }
0x1f46   :  { %v15361_v39 = vmul.f32 -1.442695, %v3240_v35  ;;  %v3512_v36 = vrot.slane %v3508_v34, %v19889_v38 }
0x1f48   :  { %19435 = vpow2.f32 %v15361_v39 }
0x1f52   :  { %v19436_v41 = vpop.eup %19435 }
0x1f53   :  { %v3246_v43 = vadd.f32 1.0, %v19436_v41 }
0x1f55   :  { %19437 = vrcp.f32 %v3246_v43 }
0x1f5f   :  { %v19438_v44 = vpop.eup %19437 }
0x1f60   :  { %v3249_v45 = vmul.f32 %v19438_v44, %v3240_v35 }
0x1f62   :  { %16850 = vmatmul.mubr.msk.f32.vlgmr.msra.gmra.mrb[38].mxu1 %vm251_vm4, %v3249_v45 }
0x1f63   :  { %18569 = vmatpush3.bf16.msra.mxu1 %v19807_v6  ;;  %16871 = vmatprep.mubr.msk.f32.mxu1 %vm19732_vm1, %v19731_v2 }
0x1f64   :  { %18570 = vmatprep.subr.bf16.mxu1 %v19733_v7 }
0x1f67   :  { %18572 = vmatpush3.bf16.msra.mxu1 %v19828_v10 }
0x1f68   :  { %18579 = vmatprep.subr.bf16.mxu1 %v19733_v7 }
0x2035   :  { %v3319_v46 = vpop.f32.mrb[38].mxu1 }
0x2036   :  { %v3320_v47 = vadd.f32 %v3319_v46, %v19951_v9  ;;  %v16851_v53 = vpop.f32.mrb[39].mxu1 }
0x2038   :  { %v15363_v57 = vmul.f32 -1.442695, %v3320_v47 }
0x203a   :  { %19439 = vpow2.f32 %v15363_v57 }
0x2044   :  { %v19440_v58 = vpop.eup %19439 }
0x2045   :  { %v3326_v59 = vadd.f32 1.0, %v19440_v58 }
0x2047   :  { %19441 = vrcp.f32 %v3326_v59 }
0x2051   :  { %v19442_v60 = vpop.eup %19441 }
0x2052   :  { %v3329_v61 = vmul.f32 %v19442_v60, %v3320_v47 }
0x2054   :  { %16861 = vmatmul.mubr.msk.f32.vlgmr.msra.gmra.mrb[36].mxu0 %vm251_vm4, %v3329_v61 }
0x2055   :  { %18575 = vmatpush3.bf16.msra.mxu0 %v19838_v13  ;;  %16882 = vmatprep.mubr.msk.f32.mxu0 %vm19732_vm1, %v19731_v2 }
0x2056   :  { %18576 = vmatprep.subr.bf16.mxu0 %v19733_v7 }
0x2059   :  { %18578 = vmatpush3.bf16.msra.mxu0 %v19867_v26 }
0x205a   :  { %18585 = vmatprep.subr.bf16.mxu0 %v19733_v7 }
0x2127   :  { %v3399_v48 = vpop.f32.mrb[36].mxu0 }
0x2128   :  { %v3400_v11 = vadd.f32 %v3399_v48, %v19963_v25  ;;  %v16862_v12 = vpop.f32.mrb[37].mxu0 }
0x2129   :  { %v3760_v12 = vstv %s3759_s20 }
0x212a   :  { %v3413_v16 = vmul.f32 %v3412_v50, %v3400_v11  ;;  %v3757_v18 = vmul.f32 %v3756_v28, %v3400_v11  ;;  %v4105_v19 = vmul.f32 %v4104_v63, %v3400_v11  ;;  %v4452_v21 = vmul.f32 %v4451_v8, %v3400_v11 }
0x212c   :  { %v3414_v17 = vadd.f32 %v3413_v16, %v20359_v0  ;;  %v20414_v22 = vadd.f32 %v3757_v18, %v20361_v3  ;;  %v20417_v40 = vadd.f32 %v4105_v19, %v20363_v4  ;;  %v20419_v23 = vadd.f32 %v4452_v21, %v4449_v14 }
0x212d   :  { %v3418_v0 = vmul.f32 %v3417_v56, %v20240_v55  ;;  %v4108_v14 = vstv %s4107_s6  ;;  %v4455_v16 = vstv %s4454_s21 }
0x212e   :  { %16872 = vmatmul.mubr.msk.f32.vlgmr.msra.gmra.mrb[40].mxu1 %vm251_vm4, %v3414_v17 }
0x212f   :  { %18581 = vmatpush3.bf16.msra.mxu1 %v19903_v49  ;;  %16893 = vmatprep.mubr.msk.f32.mxu1 %vm19732_vm1, %v19731_v2  ;;  %v3420_v3 = vrot.slane %v3418_v0, 2 }
0x2130   :  { %18582 = vmatprep.subr.bf16.mxu1 %v19733_v7 }
0x2131   :  { %v3422_v4 = vadd.f32 %v3420_v3, %v20240_v55 }
0x2133   :  { %18584 = vmatpush3.bf16.msra.mxu1 %v19913_v52  ;;  %v3423_v24 = vmul.f32 %v3422_v4, %v3417_v56 }
0x2134   :  { %18591 = vmatprep.subr.bf16.mxu1 %v19733_v7 }
0x2135   :  { %v3425_v27 = vrot.slane %v3423_v24, 2 }
0x2137   :  { %v3427_v29 = vadd.f32 %v3425_v27, %v20240_v55 }
0x2139   :  { %v3428_v31 = vmul.f32 %v3427_v29, %v3417_v56 }
0x213b   :  { %v3430_v33 = vrot.slane %v3428_v31, 2  ;;  %v3854_v31 = vstv %s3764_s23 }
0x213d   :  { %v3432_v35 = vadd.f32 %v3430_v33, %v20240_v55  ;;  %v3855_v33 = vmul.f32 %v20269_v51, %v3854_v31 }
0x2201   :  { %v3502_v39 = vpop.f32.mrb[40].mxu1 }
0x2202   :  { %v3503_v41 = vadd.f32 %v3502_v39, %v3432_v35  ;;  %v16873_v43 = vpop.f32.mrb[41].mxu1  ;;  %v3856_v35 = vadd.f32 %v3855_v33, %v19886_v37 }
0x2204   :  { %v3513_v44 = vadd.f32 %v3512_v36, %v3503_v41  ;;  %v3860_v39 = vrot.slane %v3856_v35, %v19889_v38 }
0x2206   :  { %16883 = vmatmul.mubr.msk.f32.vlgmr.msra.gmra.mrb[38].mxu0 %vm251_vm4, %v3513_v44 }
0x2207   :  { %18587 = vmatpush3.bf16.msra.mxu0 %v19935_v1  ;;  %16904 = vmatprep.mubr.msk.f32.mxu0 %vm19732_vm1, %v19731_v2 }
0x2208   :  { %18588 = vmatprep.subr.bf16.mxu0 %v19733_v7 }
0x220b   :  { %18590 = vmatpush3.bf16.msra.mxu0 %v19945_v5 }
0x220c   :  { %18597 = vmatprep.subr.bf16.mxu0 %v19733_v7 }
0x22d9   :  { %v3583_v45 = vpop.f32.mrb[38].mxu0 }
0x22da   :  { %v3584_v46 = vadd.f32 %v3583_v45, %v19919_v54  ;;  %v16884_v47 = vpop.f32.mrb[39].mxu0 }
0x22dc   :  { %v15367_v53 = vmul.f32 -1.442695, %v3584_v46 }
0x22de   :  { %19443 = vpow2.f32 %v15367_v53 }
0x22e8   :  { %v19444_v57 = vpop.eup %19443 }
0x22e9   :  { %v3590_v58 = vadd.f32 1.0, %v19444_v57 }
0x22eb   :  { %19445 = vrcp.f32 %v3590_v58 }
0x22f5   :  { %v19446_v59 = vpop.eup %19445 }
0x22f6   :  { %v3593_v60 = vmul.f32 %v19446_v59, %v3584_v46 }
0x22f8   :  { %16894 = vmatmul.mubr.msk.f32.vlgmr.msra.gmra.mrb[42].mxu1 %vm251_vm4, %v3593_v60 }
0x22f9   :  { %18593 = vmatpush3.bf16.msra.mxu1 %v19807_v6  ;;  %16915 = vmatprep.mubr.msk.f32.mxu1 %vm19732_vm1, %v19731_v2 }
0x22fa   :  { %18594 = vmatprep.subr.bf16.mxu1 %v19733_v7 }
0x22fd   :  { %18596 = vmatpush3.bf16.msra.mxu1 %v19828_v10 }
0x22fe   :  { %18603 = vmatprep.subr.bf16.mxu1 %v19733_v7 }
0x23cb   :  { %v3663_v61 = vpop.f32.mrb[42].mxu1 }
0x23cc   :  { %v3664_v20 = vadd.f32 %v3663_v61, %v19951_v9  ;;  %v16895_v62 = vpop.f32.mrb[43].mxu1 }
0x23ce   :  { %v15369_v48 = vmul.f32 -1.442695, %v3664_v20 }
0x23d0   :  { %19447 = vpow2.f32 %v15369_v48 }
0x23da   :  { %v19448_v50 = vpop.eup %19447 }
0x23db   :  { %v3670_v28 = vadd.f32 1.0, %v19448_v50 }
0x23dd   :  { %19449 = vrcp.f32 %v3670_v28 }
0x23e7   :  { %v19450_v63 = vpop.eup %19449 }
0x23e8   :  { %v3673_v8 = vmul.f32 %v19450_v63, %v3664_v20 }
0x23ea   :  { %16905 = vmatmul.mubr.msk.f32.vlgmr.msra.gmra.mrb[40].mxu0 %vm251_vm4, %v3673_v8 }
0x23eb   :  { %18599 = vmatpush3.bf16.msra.mxu0 %v19838_v13  ;;  %16926 = vmatprep.mubr.msk.f32.mxu0 %vm19732_vm1, %v19731_v2 }
0x23ec   :  { %18600 = vmatprep.subr.bf16.mxu0 %v19733_v7 }
0x23ef   :  { %18602 = vmatpush3.bf16.msra.mxu0 %v19867_v26 }
0x23f0   :  { %18609 = vmatprep.subr.bf16.mxu0 %v19733_v7 }
0x24bd   :  { %v3743_v11 = vpop.f32.mrb[40].mxu0 }
0x24be   :  { %v3744_v18 = vadd.f32 %v3743_v11, %v19963_v25  ;;  %v16906_v19 = vpop.f32.mrb[41].mxu0 }
0x24c0   :  { %v3761_v21 = vmul.f32 %v3760_v12, %v3744_v18  ;;  %v4109_v17 = vmul.f32 %v4108_v14, %v3744_v18  ;;  %v4456_v56 = vmul.f32 %v4455_v16, %v3744_v18  ;;  %v4112_v14 = vstv %s4111_s24 }
0x24c1   :  { %v4459_v16 = vstv %s4458_s4 }
0x24c2   :  { %v3762_v0 = vadd.f32 %v3761_v21, %v20414_v22  ;;  %v20466_v3 = vadd.f32 %v4109_v17, %v20417_v40  ;;  %v20469_v4 = vadd.f32 %v4456_v56, %v20419_v23  ;;  %v3765_v22 = vstv %s3763_s22 }
0x24c3   :  { %v3766_v40 = vmul.f32 %v3765_v22, %v20240_v55 }
0x24c4   :  { %16916 = vmatmul.mubr.msk.f32.vlgmr.msra.gmra.mrb[44].mxu1 %vm251_vm4, %v3762_v0 }
0x24c5   :  { %18605 = vmatpush3.bf16.msra.mxu1 %v19903_v49  ;;  %16937 = vmatprep.mubr.msk.f32.mxu1 %vm19732_vm1, %v19731_v2  ;;  %v3768_v24 = vrot.slane %v3766_v40, 2 }
0x24c6   :  { %18606 = vmatprep.subr.bf16.mxu1 %v19733_v7 }
0x24c7   :  { %v3770_v23 = vadd.f32 %v3768_v24, %v20240_v55 }
0x24c9   :  { %18608 = vmatpush3.bf16.msra.mxu1 %v19913_v52  ;;  %v3771_v27 = vmul.f32 %v3770_v23, %v3765_v22 }
0x24ca   :  { %18615 = vmatprep.subr.bf16.mxu1 %v19733_v7 }
0x24cb   :  { %v3773_v29 = vrot.slane %v3771_v27, 2 }
0x24cd   :  { %v3775_v30 = vadd.f32 %v3773_v29, %v20240_v55  ;;  %v4205_v29 = vstv %s4115_s25 }
0x24ce   :  { %v4206_v31 = vmul.f32 %v20269_v51, %v4205_v29 }
0x24cf   :  { %v3776_v32 = vmul.f32 %v3775_v30, %v3765_v22  ;;  %v4116_v22 = vstv %s20259_s19  ;;  %s20583_s19 = sld [smem:[#allocation3 + $0x3]] }
0x24d0   :  { %v4117_v40 = vmul.f32 %v4116_v22, %v20240_v55  ;;  %v4207_v33 = vadd.f32 %v4206_v31, %v19886_v37 }
0x24d1   :  { %v3778_v34 = vrot.slane %v3776_v32, 2 }
0x24d2   :  { %v4211_v35 = vrot.slane %v4207_v33, %v19889_v38 }
0x24d3   :  { %v3780_v36 = vadd.f32 %v3778_v34, %v20240_v55 }
0x24d5   :  { %s20587_s28 = ssub.f32 %s20583_s19, %s20255_s0 }
0x24d7   :  { %s4545_s29 = smul.f32 0.0, %s20587_s28 }
0x24d8   :  { %s4877_s10 = smul.f32 0.2, %s20587_s28 }
0x24d9   :  { %s4546_s30 = sadd.f32 %s20255_s0, %s4545_s29  ;;  %s5211_s13 = smul.f32 0.075, %s20587_s28 }
0x24da   :  { %s4881_s5 = sadd.f32 %s20255_s0, %s4877_s10  ;;  %s5551_s15 = smul.f32 0.9777778, %s20587_s28 }
0x24db   :  { %s5895_s14 = smul.f32 2.9525986, %s20587_s28 }
0x24dc   :  { %s6243_s17 = smul.f32 2.8462753, %s20587_s28 }
0x24dd   :  { %s5215_s3 = smul.f32 0.225, %s20587_s28 }
0x24de   :  { %s5555_s18 = smul.f32 -3.7333333, %s20587_s28 }
0x24df   :  { %s5899_s20 = smul.f32 -11.595794, %s20587_s28 }
0x24e0   :  { %s6247_s6 = smul.f32 -10.757576, %s20587_s28 }
0x24e1   :  { %s5219_s21 = smul.f32 0.3, %s20587_s28 }
0x24e2   :  { %s6594_s23 = smul.f32 0.091145836, %s20587_s28 }
0x24e3   :  { %s5220_s22 = sadd.f32 %s20255_s0, %s5219_s21  ;;  %s5559_s24 = smul.f32 3.5555556, %s20587_s28 }
0x24e4   :  { %s5903_s4 = smul.f32 9.822893, %s20587_s28 }
0x24e5   :  { %s6251_s25 = smul.f32 8.906423, %s20587_s28 }
0x24e6   :  { %s6598_s16 = smul.f32 0.4492363, %s20587_s28 }
0x24e7   :  { %s5563_s26 = smul.f32 0.8, %s20587_s28 }
0x24e8   :  { %s6259_s12 = smul.f32 -0.27353132, %s20587_s28 }
0x2597   :  { %v3850_v41 = vpop.f32.mrb[44].mxu1 }
0x2598   :  { %v3851_v43 = vadd.f32 %v3850_v41, %v3780_v36  ;;  %v16917_v44 = vpop.f32.mrb[45].mxu1 }
0x259a   :  { %v3861_v45 = vadd.f32 %v3860_v39, %v3851_v43 }
0x259c   :  { %16927 = vmatmul.mubr.msk.f32.vlgmr.msra.gmra.mrb[42].mxu0 %vm251_vm4, %v3861_v45 }
0x259d   :  { %18611 = vmatpush3.bf16.msra.mxu0 %v19935_v1  ;;  %16948 = vmatprep.mubr.msk.f32.mxu0 %vm19732_vm1, %v19731_v2 }
0x259e   :  { %18612 = vmatprep.subr.bf16.mxu0 %v19733_v7 }
0x25a1   :  { %18614 = vmatpush3.bf16.msra.mxu0 %v19945_v5 }
0x25a2   :  { %18621 = vmatprep.subr.bf16.mxu0 %v19733_v7 }
0x266f   :  { %v3931_v46 = vpop.f32.mrb[42].mxu0 }
0x2670   :  { %v3932_v47 = vadd.f32 %v3931_v46, %v19919_v54  ;;  %v16928_v53 = vpop.f32.mrb[43].mxu0 }
0x2672   :  { %v15373_v57 = vmul.f32 -1.442695, %v3932_v47 }
0x2674   :  { %19451 = vpow2.f32 %v15373_v57 }
0x267e   :  { %v19452_v58 = vpop.eup %19451 }
0x267f   :  { %v3938_v59 = vadd.f32 1.0, %v19452_v58 }
0x2681   :  { %19453 = vrcp.f32 %v3938_v59  ;;  %v15385_v59 = vld [vmem:[%s22215_s1 + $0x10] sm:$0xff] }
0x268b   :  { %v19454_v60 = vpop.eup %19453 }
0x268c   :  { %v3941_v61 = vmul.f32 %v19454_v60, %v3932_v47 }
0x268e   :  { %16938 = vmatmul.mubr.msk.f32.vlgmr.msra.gmra.mrb[46].mxu1 %vm251_vm4, %v3941_v61 }
0x268f   :  { %18617 = vmatpush3.bf16.msra.mxu1 %v19807_v6  ;;  %16959 = vmatprep.mubr.msk.f32.mxu1 %vm19732_vm1, %v19731_v2 }
0x2690   :  { %18618 = vmatprep.subr.bf16.mxu1 %v19733_v7 }
0x2693   :  { %18620 = vmatpush3.bf16.msra.mxu1 %v19828_v10 }
0x2694   :  { %18627 = vmatprep.subr.bf16.mxu1 %v19733_v7 }
0x2761   :  { %v4011_v20 = vpop.f32.mrb[46].mxu1 }
0x2762   :  { %v4012_v62 = vadd.f32 %v4011_v20, %v19951_v9  ;;  %v16939_v48 = vpop.f32.mrb[47].mxu1 }
0x2764   :  { %v15375_v50 = vmul.f32 -1.442695, %v4012_v62 }
0x2766   :  { %19455 = vpow2.f32 %v15375_v50 }
0x2770   :  { %v19456_v28 = vpop.eup %19455 }
0x2771   :  { %v4018_v63 = vadd.f32 1.0, %v19456_v28 }
0x2773   :  { %19457 = vrcp.f32 %v4018_v63 }
0x277d   :  { %v19458_v8 = vpop.eup %19457 }
0x277e   :  { %v4021_v11 = vmul.f32 %v19458_v8, %v4012_v62 }
0x2780   :  { %16949 = vmatmul.mubr.msk.f32.vlgmr.msra.gmra.mrb[44].mxu0 %vm251_vm4, %v4021_v11 }
0x2781   :  { %18623 = vmatpush3.bf16.msra.mxu0 %v19838_v13  ;;  %16970 = vmatprep.mubr.msk.f32.mxu0 %vm19732_vm1, %v19731_v2 }
0x2782   :  { %18624 = vmatprep.subr.bf16.mxu0 %v19733_v7 }
0x2785   :  { %18626 = vmatpush3.bf16.msra.mxu0 %v19867_v26 }
0x2786   :  { %18633 = vmatprep.subr.bf16.mxu0 %v19733_v7 }
0x2853   :  { %v4091_v12 = vpop.f32.mrb[44].mxu0 }
0x2854   :  { %v4092_v18 = vadd.f32 %v4091_v12, %v19963_v25  ;;  %v16950_v19 = vpop.f32.mrb[45].mxu0  ;;  %v4463_v12 = vstv %s4462_s27  ;;  %s5564_s27 = sadd.f32 %s20255_s0, %s5563_s26 }
0x2856   :  { %v4113_v21 = vmul.f32 %v4112_v14, %v4092_v18  ;;  %v4460_v17 = vmul.f32 %v4459_v16, %v4092_v18 }
0x2858   :  { %v4114_v56 = vadd.f32 %v4113_v21, %v20466_v3  ;;  %v20515_v0 = vadd.f32 %v4460_v17, %v20469_v4  ;;  %v4119_v3 = vrot.slane %v4117_v40, 2  ;;  %v4547_v21 = vstv %s4545_s29  ;;  %s5907_s29 = smul.f32 -0.29080933, %s20587_s28 }
0x285a   :  { %16960 = vmatmul.mubr.msk.f32.vlgmr.msra.gmra.mrb[48].mxu1 %vm251_vm4, %v4114_v56  ;;  %v4121_v4 = vadd.f32 %v4119_v3, %v20240_v55 }
0x285b   :  { %18629 = vmatpush3.bf16.msra.mxu1 %v19903_v49  ;;  %16981 = vmatprep.mubr.msk.f32.mxu1 %vm19732_vm1, %v19731_v2 }
0x285c   :  { %18630 = vmatprep.subr.bf16.mxu1 %v19733_v7  ;;  %v4122_v24 = vmul.f32 %v4121_v4, %v4116_v22  ;;  %v4636_v4 = vstv %s4546_s30  ;;  %s6255_s30 = smul.f32 0.2784091, %s20587_s28 }
0x285e   :  { %v4124_v23 = vrot.slane %v4122_v24, 2 }
0x285f   :  { %18632 = vmatpush3.bf16.msra.mxu1 %v19913_v52 }
0x2860   :  { %16995 = vmatprep.subr.mxu1 %v19731_v2  ;;  %v4126_v27 = vadd.f32 %v4124_v23, %v20240_v55  ;;  %v4637_v23 = vmul.f32 %v20269_v51, %v4636_v4 }
0x2862   :  { %v4127_v30 = vmul.f32 %v4126_v27, %v4116_v22  ;;  %v4638_v29 = vadd.f32 %v4637_v23, %v19886_v37 }
0x2864   :  { %v4129_v32 = vrot.slane %v4127_v30, 2  ;;  %v4642_v31 = vrot.slane %v4638_v29, %v19889_v38 }
0x2866   :  { %v4131_v34 = vadd.f32 %v4129_v32, %v20240_v55 }
0x292d   :  { %v4201_v36 = vpop.f32.mrb[48].mxu1 }
0x292e   :  { %v4202_v39 = vadd.f32 %v4201_v36, %v4131_v34  ;;  %v16961_v41 = vpop.f32.mrb[49].mxu1 }
0x2930   :  { %v4212_v43 = vadd.f32 %v4211_v35, %v4202_v39 }
0x2932   :  { %16971 = vmatmul.mubr.msk.f32.vlgmr.msra.gmra.mrb[46].mxu0 %vm251_vm4, %v4212_v43 }
0x2933   :  { %18635 = vmatpush3.bf16.msra.mxu0 %v19935_v1  ;;  %16992 = vmatprep.mubr.msk.f32.mxu0 %vm19732_vm1, %v19731_v2 }
0x2934   :  { %18636 = vmatprep.subr.bf16.mxu0 %v19733_v7 }
0x2937   :  { %18638 = vmatpush3.bf16.msra.mxu0 %v19945_v5 }
0x2938   :  { %18639 = vmatprep.subr.bf16.mxu0 %v19733_v7 }
0x2a05   :  { %v4282_v55 = vpop.f32.mrb[46].mxu0 }
0x2a06   :  { %v4283_v44 = vadd.f32 %v4282_v55, %v19919_v54  ;;  %v16972_v45 = vpop.f32.mrb[47].mxu0 }
0x2a08   :  { %v15379_v46 = vmul.f32 -1.442695, %v4283_v44 }
0x2a0a   :  { %19459 = vpow2.f32 %v15379_v46 }
0x2a14   :  { %v19460_v47 = vpop.eup %19459 }
0x2a15   :  { %v4289_v53 = vadd.f32 1.0, %v19460_v47 }
0x2a17   :  { %19461 = vrcp.f32 %v4289_v53 }
0x2a21   :  { %v19462_v57 = vpop.eup %19461 }
0x2a22   :  { %v4292_v58 = vmul.f32 %v19462_v57, %v4283_v44 }
0x2a24   :  { %16982 = vmatmul.mubr.msk.f32.vlgmr.msra.gmra.mrb[50].mxu1 %vm251_vm4, %v4292_v58 }
0x2a25   :  { %16996 = vmatpush3.msk.msra.mxu1 %vm77_vm0, %v20221_v42  ;;  %16997 = vmatprep.mubr.msk.f32.mxu1 %vm19732_vm1, %v19731_v2 }
0x2a26   :  { %18645 = vmatprep.subr.bf16.mxu1 %v19733_v7 }
0x2a28   :  { %16998 = vmatmul.mubr.msk.f32.vlgmr.msra.gmra.mrb[52].mxu1 %vm73_vm2, %v15385_v59 }
0x2a29   :  { %18647 = vmatpush3.bf16.msra.mxu1 %v19838_v13  ;;  %17019 = vmatprep.mubr.msk.f32.mxu1 %vm19732_vm1, %v19731_v2 }
0x2a2a   :  { %18648 = vmatprep.subr.bf16.mxu1 %v19733_v7 }
0x2a2d   :  { %18650 = vmatpush3.bf16.msra.mxu1 %v19867_v26 }
0x2a2e   :  { %18657 = vmatprep.subr.bf16.mxu1 %v19733_v7 }
0x2af7   :  { %v4362_v42 = vpop.f32.mrb[50].mxu1 }
0x2af8   :  { %v4363_v60 = vadd.f32 %v4362_v42, %v19951_v9  ;;  %v16983_v61 = vpop.f32.mrb[51].mxu1 }
0x2afa   :  { %v15381_v20 = vmul.f32 -1.442695, %v4363_v60 }
0x2afb   :  { %v20566_v63 = vpop.f32.mrb[52].mxu1 }
0x2afc   :  { %19463 = vpow2.f32 %v15381_v20  ;;  %v16999_v8 = vpop.f32.mrb[53].mxu1  ;;  %v4548_v17 = vmul.f32 %v4547_v21, %v20566_v63 }
0x2afe   :  { %v4550_v56 = vrot.slane %v4548_v17, 2 }
0x2b06   :  { %v19464_v62 = vpop.eup %19463 }
0x2b07   :  { %v4369_v48 = vadd.f32 1.0, %v19464_v62 }
0x2b09   :  { %19465 = vrcp.f32 %v4369_v48  ;;  %v4878_v48 = vstv %s4877_s10  ;;  %s6602_s10 = smul.f32 0.6510417, %s20587_s28 }
0x2b0a   :  { %v4882_v8 = vmul.f32 %v4878_v48, %v20566_v63 }
0x2b13   :  { %v19466_v50 = vpop.eup %19465 }
0x2b14   :  { %v4372_v28 = vmul.f32 %v19466_v50, %v4363_v60 }
0x2b16   :  { %16993 = vmatmul.mubr.msk.f32.vlgmr.msra.gmra.mrb[48].mxu0 %vm251_vm4, %v4372_v28 }
0x2b17   :  { %18641 = vmatpush3.bf16.msra.mxu0 %v19807_v6  ;;  %17008 = vmatprep.mubr.msk.f32.mxu0 %vm19732_vm1, %v19731_v2 }
0x2b18   :  { %18642 = vmatprep.subr.bf16.mxu0 %v19733_v7 }
0x2b1b   :  { %18644 = vmatpush3.bf16.msra.mxu0 %v19828_v10 }
0x2b1c   :  { %18651 = vmatprep.subr.bf16.mxu0 %v19733_v7 }
0x2be9   :  { %v4442_v11 = vpop.f32.mrb[48].mxu0 }
0x2bea   :  { %v4443_v14 = vadd.f32 %v4442_v11, %v19963_v25  ;;  %v16994_v16 = vpop.f32.mrb[49].mxu0  ;;  %v4884_v11 = vrot.slane %v4882_v8, 2  ;;  %v5900_v8 = vstv %s5899_s20 }
0x2bec   :  { %v4464_v18 = vmul.f32 %v4463_v12, %v4443_v14  ;;  %v4886_v12 = vadd.f32 %v4884_v11, %v20566_v63  ;;  %v6248_v11 = vstv %s6247_s6 }
0x2bee   :  { %v20571_v19 = vadd.f32 %v4464_v18, %v20515_v0  ;;  %v4552_v0 = vadd.f32 %v4550_v56, %v20566_v63  ;;  %v4887_v14 = vmul.f32 %v4886_v12, %v4878_v48  ;;  %v20641_v56 = vld [vmem:[%s22222_s8] sm:$0xff] }
0x2bf0   :  { %4466 = vst.msk [vmem:[#allocation2 + $0x4] sm:$0x3] %vm151_vm3, %v20571_v19  ;;  %17009 = vmatmul.mubr.msk.f32.vlgmr.msra.gmra.mrb[50].mxu0 %vm251_vm4, %v20571_v19  ;;  %v4553_v22 = vmul.f32 %v4552_v0, %v4547_v21  ;;  %v4889_v16 = vrot.slane %v4887_v14, 2 }
0x2bf1   :  { %18653 = vmatpush3.bf16.msra.mxu0 %v19903_v49  ;;  %17030 = vmatprep.mubr.msk.f32.mxu0 %vm19732_vm1, %v19731_v2 }
0x2bf2   :  { %18654 = vmatprep.subr.bf16.mxu0 %v19733_v7  ;;  %v4555_v40 = vrot.slane %v4553_v22, 2  ;;  %v4891_v18 = vadd.f32 %v4889_v16, %v20566_v63 }
0x2bf4   :  { %v4557_v3 = vadd.f32 %v4555_v40, %v20566_v63  ;;  %v4892_v17 = vmul.f32 %v4891_v18, %v4878_v48 }
0x2bf5   :  { %18656 = vmatpush3.bf16.msra.mxu0 %v19913_v52 }
0x2bf6   :  { %18663 = vmatprep.subr.bf16.mxu0 %v19733_v7  ;;  %v4558_v24 = vmul.f32 %v4557_v3, %v4547_v21  ;;  %v4970_v21 = vstv %s4881_s5  ;;  %v4894_v22 = vrot.slane %v4892_v17, 2  ;;  %s5911_s5 = smul.f32 0.8888889, %s20587_s28 }
0x2bf7   :  { %v4971_v0 = vmul.f32 %v20641_v56, %v4970_v21 }
0x2bf8   :  { %v4560_v27 = vrot.slane %v4558_v24, 2  ;;  %v4896_v3 = vadd.f32 %v4894_v22, %v20566_v63  ;;  %s5912_s11 = sadd.f32 %s20255_s0, %s5911_s5 }
0x2bf9   :  { %v4972_v40 = vadd.f32 %v4971_v0, %v19886_v37 }
0x2bfa   :  { %v4562_v30 = vadd.f32 %v4560_v27, %v20566_v63 }
0x2bfb   :  { %v4976_v4 = vrot.slane %v4972_v40, %v19889_v38 }
0x2cc3   :  { %v4632_v32 = vpop.f32.mrb[50].mxu0 }
0x2cc4   :  { %v4633_v33 = vadd.f32 %v4632_v32, %v4562_v30  ;;  %v17010_v34 = vpop.f32.mrb[51].mxu0 }
0x2cc6   :  { %v4643_v35 = vadd.f32 %v4642_v31, %v4633_v33 }
0x2cc8   :  { %17020 = vmatmul.mubr.msk.f32.vlgmr.msra.gmra.mrb[54].mxu1 %vm251_vm4, %v4643_v35 }
0x2cc9   :  { %18659 = vmatpush3.bf16.msra.mxu1 %v19935_v1  ;;  %17041 = vmatprep.mubr.msk.f32.mxu1 %vm19732_vm1, %v19731_v2 }
0x2cca   :  { %18660 = vmatprep.subr.bf16.mxu1 %v19733_v7 }
0x2ccd   :  { %18662 = vmatpush3.bf16.msra.mxu1 %v19945_v5 }
0x2cce   :  { %18669 = vmatprep.subr.bf16.mxu1 %v19733_v7 }
0x2d9b   :  { %v4713_v51 = vpop.f32.mrb[54].mxu1 }
0x2d9c   :  { %v4714_v36 = vadd.f32 %v4713_v51, %v19919_v54  ;;  %v17021_v39 = vpop.f32.mrb[55].mxu1 }
0x2d9e   :  { %v15390_v41 = vmul.f32 -1.442695, %v4714_v36 }
0x2da0   :  { %19467 = vpow2.f32 %v15390_v41 }
0x2daa   :  { %v19468_v43 = vpop.eup %19467 }
0x2dab   :  { %v4720_v55 = vadd.f32 1.0, %v19468_v43 }
0x2dad   :  { %19469 = vrcp.f32 %v4720_v55 }
0x2db7   :  { %v19470_v44 = vpop.eup %19469 }
0x2db8   :  { %v4723_v45 = vmul.f32 %v19470_v44, %v4714_v36 }
0x2dba   :  { %17031 = vmatmul.mubr.msk.f32.vlgmr.msra.gmra.mrb[52].mxu0 %vm251_vm4, %v4723_v45 }
0x2dbb   :  { %18665 = vmatpush3.bf16.msra.mxu0 %v19807_v6  ;;  %17052 = vmatprep.mubr.msk.f32.mxu0 %vm19732_vm1, %v19731_v2 }
0x2dbc   :  { %18666 = vmatprep.subr.bf16.mxu0 %v19733_v7 }
0x2dbf   :  { %18668 = vmatpush3.bf16.msra.mxu0 %v19828_v10 }
0x2dc0   :  { %18675 = vmatprep.subr.bf16.mxu0 %v19733_v7 }
0x2e8d   :  { %v4793_v46 = vpop.f32.mrb[52].mxu0 }
0x2e8e   :  { %v4794_v47 = vadd.f32 %v4793_v46, %v19951_v9  ;;  %v17032_v53 = vpop.f32.mrb[53].mxu0 }
0x2e8f   :  { %v5212_v53 = vstv %s5211_s13  ;;  %s6606_s13 = smul.f32 -0.3223762, %s20587_s28 }
0x2e90   :  { %v15392_v57 = vmul.f32 -1.442695, %v4794_v47 }
0x2e92   :  { %19471 = vpow2.f32 %v15392_v57  ;;  %v5552_v57 = vstv %s5551_s15  ;;  %s6263_s15 = sadd.f32 %s20255_s0, %s20587_s28 }
0x2e9c   :  { %v19472_v58 = vpop.eup %19471 }
0x2e9d   :  { %v4800_v59 = vadd.f32 1.0, %v19472_v58  ;;  %v5896_v58 = vstv %s5895_s14 }
0x2e9f   :  { %19473 = vrcp.f32 %v4800_v59  ;;  %v6244_v59 = vstv %s6243_s17 }
0x2ea9   :  { %v19474_v42 = vpop.eup %19473 }
0x2eaa   :  { %v4803_v60 = vmul.f32 %v19474_v42, %v4794_v47 }
0x2eac   :  { %17042 = vmatmul.mubr.msk.f32.vlgmr.msra.gmra.mrb[56].mxu1 %vm251_vm4, %v4803_v60 }
0x2ead   :  { %18671 = vmatpush3.bf16.msra.mxu1 %v19838_v13  ;;  %17063 = vmatprep.mubr.msk.f32.mxu1 %vm19732_vm1, %v19731_v2 }
0x2eae   :  { %18672 = vmatprep.subr.bf16.mxu1 %v19733_v7 }
0x2eb1   :  { %18674 = vmatpush3.bf16.msra.mxu1 %v19867_v26 }
0x2eb2   :  { %18681 = vmatprep.subr.bf16.mxu1 %v19733_v7 }
0x2f7f   :  { %v4873_v61 = vpop.f32.mrb[56].mxu1 }
0x2f80   :  { %v20623_v20 = vadd.f32 %v4873_v61, %v19963_v25  ;;  %v17043_v62 = vpop.f32.mrb[57].mxu1 }
0x2f82   :  { %v4879_v50 = vmul.f32 %v4878_v48, %v20623_v20  ;;  %v5213_v42 = vmul.f32 %v5212_v53, %v20623_v20  ;;  %v5553_v60 = vmul.f32 %v5552_v57, %v20623_v20  ;;  %v5897_v61 = vmul.f32 %v5896_v58, %v20623_v20 }
0x2f83   :  { %v6245_v62 = vmul.f32 %v6244_v59, %v20623_v20 }
0x2f84   :  { %v4880_v28 = vadd.f32 %v4879_v50, %v20571_v19  ;;  %v5216_v50 = vstv %s5215_s3  ;;  %v5214_v16 = vadd.f32 %v5213_v42, %v20571_v19  ;;  %v5554_v18 = vadd.f32 %v5553_v60, %v20571_v19 }
0x2f85   :  { %v5898_v21 = vadd.f32 %v5897_v61, %v20571_v19  ;;  %v6246_v17 = vadd.f32 %v6245_v62, %v20571_v19 }
0x2f86   :  { %17053 = vmatmul.mubr.msk.f32.vlgmr.msra.gmra.mrb[54].mxu0 %vm251_vm4, %v4880_v28  ;;  %v5556_v28 = vstv %s5555_s18  ;;  %s6610_s18 = smul.f32 0.13095239, %s20587_s28 }
0x2f87   :  { %18677 = vmatpush3.bf16.msra.mxu0 %v19903_v49  ;;  %17074 = vmatprep.mubr.msk.f32.mxu0 %vm19732_vm1, %v19731_v2 }
0x2f88   :  { %18678 = vmatprep.subr.bf16.mxu0 %v19733_v7 }
0x2f8b   :  { %18680 = vmatpush3.bf16.msra.mxu0 %v19913_v52 }
0x2f8c   :  { %18687 = vmatprep.subr.bf16.mxu0 %v19733_v7 }
0x3059   :  { %v4966_v24 = vpop.f32.mrb[54].mxu0 }
0x305a   :  { %v4967_v23 = vadd.f32 %v4966_v24, %v4896_v3  ;;  %v17054_v27 = vpop.f32.mrb[55].mxu0 }
0x305c   :  { %v4977_v29 = vadd.f32 %v4976_v4, %v4967_v23 }
0x305e   :  { %17064 = vmatmul.mubr.msk.f32.vlgmr.msra.gmra.mrb[58].mxu1 %vm251_vm4, %v4977_v29  ;;  %v5221_v29 = vstv %s5219_s21 }
0x305f   :  { %18683 = vmatpush3.bf16.msra.mxu1 %v19935_v1  ;;  %17085 = vmatprep.mubr.msk.f32.mxu1 %vm19732_vm1, %v19731_v2 }
0x3060   :  { %18684 = vmatprep.subr.bf16.mxu1 %v19733_v7 }
0x3063   :  { %18686 = vmatpush3.bf16.msra.mxu1 %v19945_v5 }
0x3064   :  { %18693 = vmatprep.subr.bf16.mxu1 %v19733_v7 }
0x3131   :  { %v5047_v30 = vpop.f32.mrb[58].mxu1 }
0x3132   :  { %v5048_v31 = vadd.f32 %v5047_v30, %v19919_v54  ;;  %v17065_v32 = vpop.f32.mrb[59].mxu1  ;;  %v5222_v30 = vmul.f32 %v5221_v29, %v20566_v63 }
0x3134   :  { %v15396_v33 = vmul.f32 -1.442695, %v5048_v31 }
0x3136   :  { %19475 = vpow2.f32 %v15396_v33 }
0x3140   :  { %v19476_v34 = vpop.eup %19475 }
0x3141   :  { %v5054_v35 = vadd.f32 1.0, %v19476_v34 }
0x3143   :  { %19477 = vrcp.f32 %v5054_v35 }
0x314d   :  { %v19478_v51 = vpop.eup %19477 }
0x314e   :  { %v5057_v36 = vmul.f32 %v19478_v51, %v5048_v31  ;;  %v5224_v31 = vrot.slane %v5222_v30, 2  ;;  %v5310_v51 = vstv %s5220_s22 }
0x3150   :  { %17075 = vmatmul.mubr.msk.f32.vlgmr.msra.gmra.mrb[56].mxu0 %vm251_vm4, %v5057_v36  ;;  %v5226_v32 = vadd.f32 %v5224_v31, %v20566_v63 }
0x3151   :  { %18689 = vmatpush3.bf16.msra.mxu0 %v19807_v6  ;;  %17096 = vmatprep.mubr.msk.f32.mxu0 %vm19732_vm1, %v19731_v2 }
0x3152   :  { %18690 = vmatprep.subr.bf16.mxu0 %v19733_v7  ;;  %v5227_v33 = vmul.f32 %v5226_v32, %v5221_v29 }
0x3154   :  { %v5229_v34 = vrot.slane %v5227_v33, 2 }
0x3155   :  { %18692 = vmatpush3.bf16.msra.mxu0 %v19828_v10 }
0x3156   :  { %18699 = vmatprep.subr.bf16.mxu0 %v19733_v7  ;;  %v5231_v35 = vadd.f32 %v5229_v34, %v20566_v63 }
0x3158   :  { %v5232_v36 = vmul.f32 %v5231_v35, %v5221_v29 }
0x3223   :  { %v5127_v39 = vpop.f32.mrb[56].mxu0 }
0x3224   :  { %v5128_v41 = vadd.f32 %v5127_v39, %v19951_v9  ;;  %v17076_v43 = vpop.f32.mrb[57].mxu0  ;;  %v5311_v39 = vmul.f32 %v20641_v56, %v5310_v51 }
0x3226   :  { %v15398_v55 = vmul.f32 -1.442695, %v5128_v41  ;;  %v5312_v43 = vadd.f32 %v5311_v39, %v19886_v37 }
0x3228   :  { %19479 = vpow2.f32 %v15398_v55 }
0x3232   :  { %v19480_v44 = vpop.eup %19479 }
0x3233   :  { %v5134_v45 = vadd.f32 1.0, %v19480_v44  ;;  %v5316_v44 = vrot.slane %v5312_v43, %v19889_v38 }
0x3235   :  { %19481 = vrcp.f32 %v5134_v45 }
0x323f   :  { %v19482_v46 = vpop.eup %19481 }
0x3240   :  { %v5137_v47 = vmul.f32 %v19482_v46, %v5128_v41  ;;  %v5234_v41 = vrot.slane %v5232_v36, 2 }
0x3242   :  { %17086 = vmatmul.mubr.msk.f32.vlgmr.msra.gmra.mrb[60].mxu1 %vm251_vm4, %v5137_v47  ;;  %v5236_v55 = vadd.f32 %v5234_v41, %v20566_v63 }
0x3243   :  { %18695 = vmatpush3.bf16.msra.mxu1 %v19838_v13  ;;  %17107 = vmatprep.mubr.msk.f32.mxu1 %vm19732_vm1, %v19731_v2 }
0x3244   :  { %18696 = vmatprep.subr.bf16.mxu1 %v19733_v7 }
0x3247   :  { %18698 = vmatpush3.bf16.msra.mxu1 %v19867_v26 }
0x3248   :  { %18705 = vmatprep.subr.bf16.mxu1 %v19733_v7 }
0x3315   :  { %v5207_v48 = vpop.f32.mrb[60].mxu1 }
0x3316   :  { %v5208_v12 = vadd.f32 %v5207_v48, %v19963_v25  ;;  %v17087_v14 = vpop.f32.mrb[61].mxu1 }
0x3318   :  { %v5217_v0 = vmul.f32 %v5216_v50, %v5208_v12  ;;  %v5557_v22 = vmul.f32 %v5556_v28, %v5208_v12  ;;  %v5901_v40 = vmul.f32 %v5900_v8, %v5208_v12  ;;  %v6249_v3 = vmul.f32 %v6248_v11, %v5208_v12 }
0x331a   :  { %v5218_v4 = vadd.f32 %v5217_v0, %v5214_v16  ;;  %v20687_v24 = vadd.f32 %v5557_v22, %v5554_v18  ;;  %v20689_v23 = vadd.f32 %v5901_v40, %v5898_v21  ;;  %v20691_v27 = vadd.f32 %v6249_v3, %v6246_v17 }
0x331b   :  { %v6595_v21 = vstv %s6594_s23  ;;  %v5560_v22 = vstv %s5559_s24  ;;  %v5904_v40 = vstv %s5903_s4  ;;  %v6252_v3 = vstv %s6251_s25 }
0x331c   :  { %17097 = vmatmul.mubr.msk.f32.vlgmr.msra.gmra.mrb[58].mxu0 %vm251_vm4, %v5218_v4  ;;  %v6596_v17 = vmul.f32 %v6595_v21, %v20623_v20  ;;  %v6599_v4 = vstv %s6598_s16 }
0x331d   :  { %18701 = vmatpush3.bf16.msra.mxu0 %v19903_v49  ;;  %17118 = vmatprep.mubr.msk.f32.mxu0 %vm19732_vm1, %v19731_v2 }
0x331e   :  { %18702 = vmatprep.subr.bf16.mxu0 %v19733_v7  ;;  %v6597_v31 = vadd.f32 %v6596_v17, %v20571_v19  ;;  %v5565_v19 = vstv %s5563_s26 }
0x3321   :  { %18704 = vmatpush3.bf16.msra.mxu0 %v19913_v52 }
0x3322   :  { %18711 = vmatprep.subr.bf16.mxu0 %v19733_v7 }
0x33ef   :  { %v5306_v45 = vpop.f32.mrb[58].mxu0 }
0x33f0   :  { %v5307_v46 = vadd.f32 %v5306_v45, %v5236_v55  ;;  %v17098_v47 = vpop.f32.mrb[59].mxu0 }
0x33f2   :  { %v5317_v53 = vadd.f32 %v5316_v44, %v5307_v46  ;;  %v5654_v44 = vstv %s5564_s27 }
0x33f3   :  { %v5655_v46 = vmul.f32 %v20641_v56, %v5654_v44  ;;  %v6002_v44 = vstv %s5912_s11 }
0x33f4   :  { %17108 = vmatmul.mubr.msk.f32.vlgmr.msra.gmra.mrb[62].mxu1 %vm251_vm4, %v5317_v53 }
0x33f5   :  { %18707 = vmatpush3.bf16.msra.mxu1 %v19935_v1  ;;  %17129 = vmatprep.mubr.msk.f32.mxu1 %vm19732_vm1, %v19731_v2  ;;  %v5656_v53 = vadd.f32 %v5655_v46, %v19886_v37  ;;  %v6003_v46 = vmul.f32 %v20641_v56, %v6002_v44 }
0x33f6   :  { %18708 = vmatprep.subr.bf16.mxu1 %v19733_v7 }
0x33f9   :  { %18710 = vmatpush3.bf16.msra.mxu1 %v19945_v5 }
0x33fa   :  { %18717 = vmatprep.subr.bf16.mxu1 %v19733_v7 }
0x34c7   :  { %v5387_v57 = vpop.f32.mrb[62].mxu1 }
0x34c8   :  { %v5388_v58 = vadd.f32 %v5387_v57, %v19919_v54  ;;  %v17109_v59 = vpop.f32.mrb[63].mxu1 }
0x34ca   :  { %v15402_v42 = vmul.f32 -1.442695, %v5388_v58 }
0x34cc   :  { %19483 = vpow2.f32 %v15402_v42 }
0x34d6   :  { %v19484_v60 = vpop.eup %19483 }
0x34d7   :  { %v5394_v61 = vadd.f32 1.0, %v19484_v60 }
0x34d9   :  { %19485 = vrcp.f32 %v5394_v61 }
0x34e3   :  { %v19486_v62 = vpop.eup %19485 }
0x34e4   :  { %v5397_v48 = vmul.f32 %v19486_v62, %v5388_v58  ;;  %v5660_v58 = vrot.slane %v5656_v53, %v19889_v38  ;;  %v6004_v53 = vadd.f32 %v6003_v46, %v19886_v37 }
0x34e6   :  { %17119 = vmatmul.mubr.msk.f32.vlgmr.msra.gmra.mrb[60].mxu0 %vm251_vm4, %v5397_v48 }
0x34e7   :  { %18713 = vmatpush3.bf16.msra.mxu0 %v19807_v6  ;;  %17140 = vmatprep.mubr.msk.f32.mxu0 %vm19732_vm1, %v19731_v2 }
0x34e8   :  { %18714 = vmatprep.subr.bf16.mxu0 %v19733_v7 }
0x34eb   :  { %18716 = vmatpush3.bf16.msra.mxu0 %v19828_v10 }
0x34ec   :  { %18723 = vmatprep.subr.bf16.mxu0 %v19733_v7 }
0x35b9   :  { %v5467_v50 = vpop.f32.mrb[60].mxu0 }
0x35ba   :  { %v5468_v28 = vadd.f32 %v5467_v50, %v19951_v9  ;;  %v17120_v8 = vpop.f32.mrb[61].mxu0 }
0x35bc   :  { %v15404_v11 = vmul.f32 -1.442695, %v5468_v28 }
0x35be   :  { %19487 = vpow2.f32 %v15404_v11 }
0x35c8   :  { %v19488_v12 = vpop.eup %19487 }
0x35c9   :  { %v5474_v14 = vadd.f32 1.0, %v19488_v12 }
0x35cb   :  { %19489 = vrcp.f32 %v5474_v14 }
0x35d5   :  { %v19490_v16 = vpop.eup %19489 }
0x35d6   :  { %v5477_v18 = vmul.f32 %v19490_v16, %v5468_v28 }
0x35d8   :  { %17130 = vmatmul.mubr.msk.f32.vlgmr.msra.gmra.mrb[64].mxu1 %vm251_vm4, %v5477_v18 }
0x35d9   :  { %18719 = vmatpush3.bf16.msra.mxu1 %v19838_v13  ;;  %17151 = vmatprep.mubr.msk.f32.mxu1 %vm19732_vm1, %v19731_v2 }
0x35da   :  { %18720 = vmatprep.subr.bf16.mxu1 %v19733_v7 }
0x35dd   :  { %18722 = vmatpush3.bf16.msra.mxu1 %v19867_v26 }
0x35de   :  { %18729 = vmatprep.subr.bf16.mxu1 %v19733_v7 }
0x36ab   :  { %v5547_v0 = vpop.f32.mrb[64].mxu1 }
0x36ac   :  { %v5548_v29 = vadd.f32 %v5547_v0, %v19963_v25  ;;  %v17131_v30 = vpop.f32.mrb[65].mxu1 }
0x36ad   :  { %v6256_v30 = vstv %s6255_s30 }
0x36ae   :  { %v5561_v32 = vmul.f32 %v5560_v22, %v5548_v29  ;;  %v5905_v33 = vmul.f32 %v5904_v40, %v5548_v29  ;;  %v6253_v34 = vmul.f32 %v6252_v3, %v5548_v29  ;;  %v6600_v35 = vmul.f32 %v6599_v4, %v5548_v29 }
0x36af   :  { %v5908_v29 = vstv %s5907_s29 }
0x36b0   :  { %v5562_v51 = vadd.f32 %v5561_v32, %v20687_v24  ;;  %v20742_v36 = vadd.f32 %v5905_v33, %v20689_v23  ;;  %v20745_v20 = vadd.f32 %v6253_v34, %v20691_v27  ;;  %v20747_v39 = vadd.f32 %v6600_v35, %v6597_v31 }
0x36b1   :  { %v5566_v24 = vmul.f32 %v5565_v19, %v20566_v63  ;;  %v6603_v31 = vstv %s6602_s10 }
0x36b2   :  { %17141 = vmatmul.mubr.msk.f32.vlgmr.msra.gmra.mrb[62].mxu0 %vm251_vm4, %v5562_v51 }
0x36b3   :  { %18725 = vmatpush3.bf16.msra.mxu0 %v19903_v49  ;;  %17162 = vmatprep.mubr.msk.f32.mxu0 %vm19732_vm1, %v19731_v2  ;;  %v5568_v23 = vrot.slane %v5566_v24, 2 }
0x36b4   :  { %18726 = vmatprep.subr.bf16.mxu0 %v19733_v7 }
0x36b5   :  { %v5570_v27 = vadd.f32 %v5568_v23, %v20566_v63 }
0x36b7   :  { %18728 = vmatpush3.bf16.msra.mxu0 %v19913_v52  ;;  %v5571_v41 = vmul.f32 %v5570_v27, %v5565_v19 }
0x36b8   :  { %18735 = vmatprep.subr.bf16.mxu0 %v19733_v7 }
0x36b9   :  { %v5573_v43 = vrot.slane %v5571_v41, 2 }
0x36bb   :  { %v5575_v55 = vadd.f32 %v5573_v43, %v20566_v63 }
0x36bd   :  { %v5576_v45 = vmul.f32 %v5575_v55, %v5565_v19 }
0x36bf   :  { %v5578_v47 = vrot.slane %v5576_v45, 2 }
0x36c1   :  { %v5580_v57 = vadd.f32 %v5578_v47, %v20566_v63 }
0x3785   :  { %v5650_v59 = vpop.f32.mrb[62].mxu0 }
0x3786   :  { %v5651_v42 = vadd.f32 %v5650_v59, %v5580_v57  ;;  %v17142_v60 = vpop.f32.mrb[63].mxu0 }
0x3788   :  { %v5661_v61 = vadd.f32 %v5660_v58, %v5651_v42  ;;  %v6008_v58 = vrot.slane %v6004_v53, %v19889_v38 }
0x378a   :  { %17152 = vmatmul.mubr.msk.f32.vlgmr.msra.gmra.mrb[66].mxu1 %vm251_vm4, %v5661_v61 }
0x378b   :  { %18731 = vmatpush3.bf16.msra.mxu1 %v19935_v1  ;;  %17173 = vmatprep.mubr.msk.f32.mxu1 %vm19732_vm1, %v19731_v2 }
0x378c   :  { %18732 = vmatprep.subr.bf16.mxu1 %v19733_v7 }
0x378f   :  { %18734 = vmatpush3.bf16.msra.mxu1 %v19945_v5 }
0x3790   :  { %18741 = vmatprep.subr.bf16.mxu1 %v19733_v7 }
0x385d   :  { %v5731_v62 = vpop.f32.mrb[66].mxu1 }
0x385e   :  { %v5732_v48 = vadd.f32 %v5731_v62, %v19919_v54  ;;  %v17153_v50 = vpop.f32.mrb[67].mxu1 }
0x3860   :  { %v15408_v28 = vmul.f32 -1.442695, %v5732_v48 }
0x3862   :  { %19491 = vpow2.f32 %v15408_v28 }
0x386c   :  { %v19492_v8 = vpop.eup %19491 }
0x386d   :  { %v5738_v11 = vadd.f32 1.0, %v19492_v8 }
0x386f   :  { %19493 = vrcp.f32 %v5738_v11 }
0x3879   :  { %v19494_v12 = vpop.eup %19493 }
0x387a   :  { %v5741_v14 = vmul.f32 %v19494_v12, %v5732_v48 }
0x387c   :  { %17163 = vmatmul.mubr.msk.f32.vlgmr.msra.gmra.mrb[64].mxu0 %vm251_vm4, %v5741_v14 }
0x387d   :  { %18737 = vmatpush3.bf16.msra.mxu0 %v19807_v6  ;;  %17184 = vmatprep.mubr.msk.f32.mxu0 %vm19732_vm1, %v19731_v2 }
0x387e   :  { %18738 = vmatprep.subr.bf16.mxu0 %v19733_v7 }
0x3881   :  { %18740 = vmatpush3.bf16.msra.mxu0 %v19828_v10 }
0x3882   :  { %18747 = vmatprep.subr.bf16.mxu0 %v19733_v7 }
0x394f   :  { %v5811_v16 = vpop.f32.mrb[64].mxu0 }
0x3950   :  { %v5812_v18 = vadd.f32 %v5811_v16, %v19951_v9  ;;  %v17164_v21 = vpop.f32.mrb[65].mxu0 }
0x3952   :  { %v15410_v17 = vmul.f32 -1.442695, %v5812_v18 }
0x3954   :  { %19495 = vpow2.f32 %v15410_v17 }
0x395e   :  { %v19496_v0 = vpop.eup %19495 }
0x395f   :  { %v5818_v22 = vadd.f32 1.0, %v19496_v0 }
0x3961   :  { %19497 = vrcp.f32 %v5818_v22 }
0x396b   :  { %v19498_v40 = vpop.eup %19497 }
0x396c   :  { %v5821_v3 = vmul.f32 %v19498_v40, %v5812_v18 }
0x396e   :  { %17174 = vmatmul.mubr.msk.f32.vlgmr.msra.gmra.mrb[68].mxu1 %vm251_vm4, %v5821_v3 }
0x396f   :  { %18743 = vmatpush3.bf16.msra.mxu1 %v19838_v13  ;;  %17195 = vmatprep.mubr.msk.f32.mxu1 %vm19732_vm1, %v19731_v2 }
0x3970   :  { %18744 = vmatprep.subr.bf16.mxu1 %v19733_v7 }
0x3973   :  { %18746 = vmatpush3.bf16.msra.mxu1 %v19867_v26 }
0x3974   :  { %18753 = vmatprep.subr.bf16.mxu1 %v19733_v7 }
0x3a41   :  { %v5891_v4 = vpop.f32.mrb[68].mxu1 }
0x3a42   :  { %v5892_v32 = vadd.f32 %v5891_v4, %v19963_v25  ;;  %v17175_v33 = vpop.f32.mrb[69].mxu1 }
0x3a44   :  { %v5909_v34 = vmul.f32 %v5908_v29, %v5892_v32  ;;  %v6257_v35 = vmul.f32 %v6256_v30, %v5892_v32  ;;  %v6604_v51 = vmul.f32 %v6603_v31, %v5892_v32  ;;  %v6260_v29 = vstv %s6259_s12 }
0x3a45   :  { %v6607_v30 = vstv %s6606_s13 }
0x3a46   :  { %v5910_v19 = vadd.f32 %v5909_v34, %v20742_v36  ;;  %v20794_v24 = vadd.f32 %v6257_v35, %v20745_v20  ;;  %v20797_v23 = vadd.f32 %v6604_v51, %v20747_v39  ;;  %v5913_v36 = vstv %s5911_s5 }
0x3a47   :  { %v5914_v20 = vmul.f32 %v5913_v36, %v20566_v63 }
0x3a48   :  { %17185 = vmatmul.mubr.msk.f32.vlgmr.msra.gmra.mrb[66].mxu0 %vm251_vm4, %v5910_v19  ;;  %v6264_v19 = vstv %s20587_s28  ;;  %s20916_s28 = sld [smem:[#allocation3 + $0x4]] }
0x3a49   :  { %18749 = vmatpush3.bf16.msra.mxu0 %v19903_v49  ;;  %17206 = vmatprep.mubr.msk.f32.mxu0 %vm19732_vm1, %v19731_v2  ;;  %v5916_v27 = vrot.slane %v5914_v20, 2 }
0x3a4a   :  { %18750 = vmatprep.subr.bf16.mxu0 %v19733_v7 }
0x3a4b   :  { %v5918_v39 = vadd.f32 %v5916_v27, %v20566_v63 }
0x3a4d   :  { %18752 = vmatpush3.bf16.msra.mxu0 %v19913_v52  ;;  %v5919_v41 = vmul.f32 %v5918_v39, %v5913_v36 }
0x3a4e   :  { %18759 = vmatprep.subr.bf16.mxu0 %v19733_v7  ;;  %s20920_s20 = ssub.f32 %s20916_s28, %s20583_s19 }
0x3a4f   :  { %v5921_v43 = vrot.slane %v5919_v41, 2  ;;  %v6353_v41 = vstv %s6263_s15 }
0x3a50   :  { %s6693_s6 = smul.f32 0.0, %s20920_s20 }
0x3a51   :  { %v5923_v55 = vadd.f32 %v5921_v43, %v20566_v63  ;;  %s7025_s22 = smul.f32 0.2, %s20920_s20 }
0x3a52   :  { %s6694_s21 = sadd.f32 %s20583_s19, %s6693_s6  ;;  %s7359_s24 = smul.f32 0.075, %s20920_s20 }
0x3a53   :  { %v5924_v45 = vmul.f32 %v5923_v55, %v5913_v36  ;;  %v6265_v36 = vmul.f32 %v6264_v19, %v20566_v63  ;;  %v6354_v55 = vmul.f32 %v20641_v56, %v6353_v41  ;;  %s7029_s23 = sadd.f32 %s20583_s19, %s7025_s22  ;;  %s7699_s4 = smul.f32 0.9777778, %s20920_s20 }
0x3a54   :  { %s8043_s25 = smul.f32 2.9525986, %s20920_s20 }
0x3a55   :  { %v5926_v47 = vrot.slane %v5924_v45, 2  ;;  %v6355_v45 = vadd.f32 %v6354_v55, %v19886_v37  ;;  %s8391_s16 = smul.f32 2.8462753, %s20920_s20 }
0x3a56   :  { %s7363_s26 = smul.f32 0.225, %s20920_s20 }
0x3a57   :  { %v5928_v57 = vadd.f32 %v5926_v47, %v20566_v63  ;;  %v6359_v47 = vrot.slane %v6355_v45, %v19889_v38  ;;  %s7703_s27 = smul.f32 -3.7333333, %s20920_s20 }
0x3a58   :  { %s8047_s29 = smul.f32 -11.595794, %s20920_s20 }
0x3a59   :  { %s8395_s30 = smul.f32 -10.757576, %s20920_s20 }
0x3a5a   :  { %s7367_s10 = smul.f32 0.3, %s20920_s20 }
0x3a5b   :  { %s8742_s13 = smul.f32 0.091145836, %s20920_s20 }
0x3a5c   :  { %s7368_s5 = sadd.f32 %s20583_s19, %s7367_s10  ;;  %s7707_s15 = smul.f32 3.5555556, %s20920_s20 }
0x3a5d   :  { %s8051_s0 = smul.f32 9.822893, %s20920_s20 }
0x3a5e   :  { %s8399_s14 = smul.f32 8.906423, %s20920_s20 }
0x3a5f   :  { %s8746_s17 = smul.f32 0.4492363, %s20920_s20 }
0x3a60   :  { %s7711_s3 = smul.f32 0.8, %s20920_s20 }
0x3b1b   :  { %v5998_v59 = vpop.f32.mrb[66].mxu0 }
0x3b1c   :  { %v5999_v42 = vadd.f32 %v5998_v59, %v5928_v57  ;;  %v17186_v60 = vpop.f32.mrb[67].mxu0 }
0x3b1e   :  { %v6009_v61 = vadd.f32 %v6008_v58, %v5999_v42 }
0x3b20   :  { %17196 = vmatmul.mubr.msk.f32.vlgmr.msra.gmra.mrb[70].mxu1 %vm251_vm4, %v6009_v61 }
0x3b21   :  { %18755 = vmatpush3.bf16.msra.mxu1 %v19935_v1  ;;  %17217 = vmatprep.mubr.msk.f32.mxu1 %vm19732_vm1, %v19731_v2 }
0x3b22   :  { %18756 = vmatprep.subr.bf16.mxu1 %v19733_v7 }
0x3b25   :  { %18758 = vmatpush3.bf16.msra.mxu1 %v19945_v5 }
0x3b26   :  { %18765 = vmatprep.subr.bf16.mxu1 %v19733_v7 }
0x3bf3   :  { %v6079_v62 = vpop.f32.mrb[70].mxu1 }
0x3bf4   :  { %v6080_v48 = vadd.f32 %v6079_v62, %v19919_v54  ;;  %v17197_v50 = vpop.f32.mrb[71].mxu1 }
0x3bf6   :  { %v15414_v28 = vmul.f32 -1.442695, %v6080_v48 }
0x3bf8   :  { %19499 = vpow2.f32 %v15414_v28 }
0x3c02   :  { %v19500_v8 = vpop.eup %19499 }
0x3c03   :  { %v6086_v11 = vadd.f32 1.0, %v19500_v8  ;;  %v20874_v8 = vld [vmem:[%s22216_s2 + $0x20] sm:$0xf] }
0x3c05   :  { %19501 = vrcp.f32 %v6086_v11  ;;  %v15426_v11 = vld [vmem:[%s22215_s1 + $0x18] sm:$0xff] }
0x3c0f   :  { %v19502_v12 = vpop.eup %19501 }
0x3c10   :  { %v6089_v14 = vmul.f32 %v19502_v12, %v6080_v48 }
0x3c12   :  { %17207 = vmatmul.mubr.msk.f32.vlgmr.msra.gmra.mrb[68].mxu0 %vm251_vm4, %v6089_v14 }
0x3c13   :  { %18761 = vmatpush3.bf16.msra.mxu0 %v19807_v6  ;;  %17228 = vmatprep.mubr.msk.f32.mxu0 %vm19732_vm1, %v19731_v2 }
0x3c14   :  { %18762 = vmatprep.subr.bf16.mxu0 %v19733_v7 }
0x3c17   :  { %18764 = vmatpush3.bf16.msra.mxu0 %v19828_v10 }
0x3c18   :  { %18771 = vmatprep.subr.bf16.mxu0 %v19733_v7 }
0x3ce5   :  { %v6159_v16 = vpop.f32.mrb[68].mxu0 }
0x3ce6   :  { %v6160_v18 = vadd.f32 %v6159_v16, %v19951_v9  ;;  %v17208_v21 = vpop.f32.mrb[69].mxu0 }
0x3ce8   :  { %v15416_v17 = vmul.f32 -1.442695, %v6160_v18 }
0x3cea   :  { %19503 = vpow2.f32 %v15416_v17 }
0x3cf4   :  { %v19504_v0 = vpop.eup %19503 }
0x3cf5   :  { %v6166_v22 = vadd.f32 1.0, %v19504_v0 }
0x3cf7   :  { %19505 = vrcp.f32 %v6166_v22 }
0x3d01   :  { %v19506_v40 = vpop.eup %19505 }
0x3d02   :  { %v6169_v3 = vmul.f32 %v19506_v40, %v6160_v18 }
0x3d04   :  { %17218 = vmatmul.mubr.msk.f32.vlgmr.msra.gmra.mrb[72].mxu1 %vm251_vm4, %v6169_v3 }
0x3d05   :  { %18767 = vmatpush3.bf16.msra.mxu1 %v19838_v13  ;;  %17239 = vmatprep.mubr.msk.f32.mxu1 %vm19732_vm1, %v19731_v2 }
0x3d06   :  { %18768 = vmatprep.subr.bf16.mxu1 %v19733_v7 }
0x3d09   :  { %18770 = vmatpush3.bf16.msra.mxu1 %v19867_v26 }
0x3d0a   :  { %18777 = vmatprep.subr.bf16.mxu1 %v19733_v7 }
0x3dd7   :  { %v6239_v4 = vpop.f32.mrb[72].mxu1 }
0x3dd8   :  { %v6240_v31 = vadd.f32 %v6239_v4, %v19963_v25  ;;  %v17219_v32 = vpop.f32.mrb[73].mxu1 }
0x3dda   :  { %v6261_v33 = vmul.f32 %v6260_v29, %v6240_v31  ;;  %v6608_v34 = vmul.f32 %v6607_v30, %v6240_v31  ;;  %v6611_v29 = vstv %s6610_s18  ;;  %s7712_s18 = sadd.f32 %s20583_s19, %s7711_s3 }
0x3ddc   :  { %v6262_v35 = vadd.f32 %v6261_v33, %v20794_v24  ;;  %v20843_v51 = vadd.f32 %v6608_v34, %v20797_v23  ;;  %v6267_v24 = vrot.slane %v6265_v36, 2  ;;  %v6695_v34 = vstv %s6693_s6  ;;  %s8055_s6 = smul.f32 -0.29080933, %s20920_s20 }
0x3dde   :  { %17229 = vmatmul.mubr.msk.f32.vlgmr.msra.gmra.mrb[70].mxu0 %vm251_vm4, %v6262_v35  ;;  %v6269_v23 = vadd.f32 %v6267_v24, %v20566_v63 }
0x3ddf   :  { %18773 = vmatpush3.bf16.msra.mxu0 %v19903_v49  ;;  %17250 = vmatprep.mubr.msk.f32.mxu0 %vm19732_vm1, %v19731_v2 }
0x3de0   :  { %18774 = vmatprep.subr.bf16.mxu0 %v19733_v7  ;;  %v6270_v20 = vmul.f32 %v6269_v23, %v6264_v19 }
0x3de2   :  { %v6272_v27 = vrot.slane %v6270_v20, 2  ;;  %v6784_v20 = vstv %s6694_s21  ;;  %s8403_s21 = smul.f32 0.2784091, %s20920_s20 }
0x3de3   :  { %18776 = vmatpush3.bf16.msra.mxu0 %v19913_v52 }
0x3de4   :  { %17264 = vmatprep.subr.mxu0 %v19731_v2  ;;  %v6274_v39 = vadd.f32 %v6272_v27, %v20566_v63 }
0x3de6   :  { %v6275_v43 = vmul.f32 %v6274_v39, %v6264_v19  ;;  %v6785_v39 = vmul.f32 %v20641_v56, %v6784_v20 }
0x3de8   :  { %v6277_v44 = vrot.slane %v6275_v43, 2  ;;  %v6786_v43 = vadd.f32 %v6785_v39, %v19886_v37 }
0x3dea   :  { %v6279_v46 = vadd.f32 %v6277_v44, %v20566_v63  ;;  %v6790_v44 = vrot.slane %v6786_v43, %v19889_v38 }
0x3eb1   :  { %v6349_v53 = vpop.f32.mrb[70].mxu0 }
0x3eb2   :  { %v6350_v57 = vadd.f32 %v6349_v53, %v6279_v46  ;;  %v17230_v58 = vpop.f32.mrb[71].mxu0 }
0x3eb4   :  { %v6360_v59 = vadd.f32 %v6359_v47, %v6350_v57 }
0x3eb6   :  { %17240 = vmatmul.mubr.msk.f32.vlgmr.msra.gmra.mrb[74].mxu1 %vm251_vm4, %v6360_v59 }
0x3eb7   :  { %18779 = vmatpush3.bf16.msra.mxu1 %v19935_v1  ;;  %17261 = vmatprep.mubr.msk.f32.mxu1 %vm19732_vm1, %v19731_v2 }
0x3eb8   :  { %18780 = vmatprep.subr.bf16.mxu1 %v19733_v7 }
0x3ebb   :  { %18782 = vmatpush3.bf16.msra.mxu1 %v19945_v5 }
0x3ebc   :  { %18783 = vmatprep.subr.bf16.mxu1 %v19733_v7 }
0x3f89   :  { %v6430_v63 = vpop.f32.mrb[74].mxu1 }
0x3f8a   :  { %v6431_v42 = vadd.f32 %v6430_v63, %v19919_v54  ;;  %v17241_v60 = vpop.f32.mrb[75].mxu1 }
0x3f8c   :  { %v15420_v61 = vmul.f32 -1.442695, %v6431_v42 }
0x3f8e   :  { %19507 = vpow2.f32 %v15420_v61 }
0x3f98   :  { %v19508_v62 = vpop.eup %19507 }
0x3f99   :  { %v6437_v48 = vadd.f32 1.0, %v19508_v62 }
0x3f9b   :  { %19509 = vrcp.f32 %v6437_v48 }
0x3fa5   :  { %v19510_v50 = vpop.eup %19509 }
0x3fa6   :  { %v6440_v28 = vmul.f32 %v19510_v50, %v6431_v42 }
0x3fa8   :  { %17251 = vmatmul.mubr.msk.f32.vlgmr.msra.gmra.mrb[72].mxu0 %vm251_vm4, %v6440_v28 }
0x3fa9   :  { %17265 = vmatpush3.msk.msra.mxu0 %vm77_vm0, %v20874_v8  ;;  %17266 = vmatprep.mubr.msk.f32.mxu0 %vm19732_vm1, %v19731_v2 }
0x3faa   :  { %18789 = vmatprep.subr.bf16.mxu0 %v19733_v7 }
0x3fac   :  { %17267 = vmatmul.mubr.msk.f32.vlgmr.msra.gmra.mrb[74].mxu0 %vm73_vm2, %v15426_v11 }
0x3fad   :  { %18791 = vmatpush3.bf16.msra.mxu0 %v19838_v13  ;;  %17288 = vmatprep.mubr.msk.f32.mxu0 %vm19732_vm1, %v19731_v2 }
0x3fae   :  { %18792 = vmatprep.subr.bf16.mxu0 %v19733_v7 }
0x3fb1   :  { %18794 = vmatpush3.bf16.msra.mxu0 %v19867_v26 }
0x3fb2   :  { %18801 = vmatprep.subr.bf16.mxu0 %v19733_v7 }
0x407b   :  { %v6510_v12 = vpop.f32.mrb[72].mxu0 }
0x407c   :  { %v6511_v14 = vadd.f32 %v6510_v12, %v19951_v9  ;;  %v17252_v16 = vpop.f32.mrb[73].mxu0 }
0x407e   :  { %v15422_v18 = vmul.f32 -1.442695, %v6511_v14 }
0x407f   :  { %v20899_v40 = vpop.f32.mrb[74].mxu0 }
0x4080   :  { %19511 = vpow2.f32 %v15422_v18  ;;  %v17268_v3 = vpop.f32.mrb[75].mxu0  ;;  %v6696_v35 = vmul.f32 %v6695_v34, %v20899_v40 }
0x408a   :  { %v19512_v21 = vpop.eup %19511 }
0x408b   :  { %v6517_v17 = vadd.f32 1.0, %v19512_v21 }
0x408d   :  { %19513 = vrcp.f32 %v6517_v17 }
0x4097   :  { %v19514_v0 = vpop.eup %19513 }
0x4098   :  { %v6520_v22 = vmul.f32 %v19514_v0, %v6511_v14 }
0x409a   :  { %17262 = vmatmul.mubr.msk.f32.vlgmr.msra.gmra.mrb[76].mxu1 %vm251_vm4, %v6520_v22  ;;  %v7026_v22 = vstv %s7025_s22  ;;  %s8750_s22 = smul.f32 0.6510417, %s20920_s20 }
0x409b   :  { %18785 = vmatpush3.bf16.msra.mxu1 %v19807_v6  ;;  %17277 = vmatprep.mubr.msk.f32.mxu1 %vm19732_vm1, %v19731_v2 }
0x409c   :  { %18786 = vmatprep.subr.bf16.mxu1 %v19733_v7 }
0x409f   :  { %18788 = vmatpush3.bf16.msra.mxu1 %v19828_v10 }
0x40a0   :  { %18795 = vmatprep.subr.bf16.mxu1 %v19733_v7 }
0x416d   :  { %v6590_v4 = vpop.f32.mrb[76].mxu1 }
0x416e   :  { %v6591_v30 = vadd.f32 %v6590_v4, %v19963_v25  ;;  %v17263_v31 = vpop.f32.mrb[77].mxu1 }
0x4170   :  { %v6612_v32 = vmul.f32 %v6611_v29, %v6591_v30  ;;  %v7030_v29 = vmul.f32 %v7026_v22, %v20899_v40 }
0x4172   :  { %v20904_v33 = vadd.f32 %v6612_v32, %v20843_v51  ;;  %v6698_v51 = vrot.slane %v6696_v35, 2  ;;  %v7032_v30 = vrot.slane %v7030_v29, 2  ;;  %v8048_v29 = vstv %s8047_s29 }
0x4174   :  { %6614 = vst.msk [vmem:[#allocation2 + $0x6] sm:$0x3] %vm151_vm3, %v20904_v33  ;;  %17278 = vmatmul.mubr.msk.f32.vlgmr.msra.gmra.mrb[78].mxu1 %vm251_vm4, %v20904_v33  ;;  %v6700_v19 = vadd.f32 %v6698_v51, %v20899_v40  ;;  %v7034_v31 = vadd.f32 %v7032_v30, %v20899_v40  ;;  %v7118_v51 = vstv %s7029_s23  ;;  %v8396_v30 = vstv %s8395_s30  ;;  %s8059_s23 = smul.f32 0.8888889, %s20920_s20 }
0x4175   :  { %18797 = vmatpush3.bf16.msra.mxu1 %v19903_v49  ;;  %17299 = vmatprep.mubr.msk.f32.mxu1 %vm19732_vm1, %v19731_v2 }
0x4176   :  { %18798 = vmatprep.subr.bf16.mxu1 %v19733_v7  ;;  %v6701_v36 = vmul.f32 %v6700_v19, %v6695_v34  ;;  %v7035_v32 = vmul.f32 %v7034_v31, %v7026_v22 }
0x4178   :  { %v6703_v24 = vrot.slane %v6701_v36, 2  ;;  %v7119_v36 = vmul.f32 %v20641_v56, %v7118_v51 }
0x4179   :  { %18800 = vmatpush3.bf16.msra.mxu1 %v19913_v52 }
0x417a   :  { %18807 = vmatprep.subr.bf16.mxu1 %v19733_v7  ;;  %v6705_v23 = vadd.f32 %v6703_v24, %v20899_v40 }
0x417c   :  { %v6706_v27 = vmul.f32 %v6705_v23, %v6695_v34  ;;  %v7037_v34 = vrot.slane %v7035_v32, 2  ;;  %v7120_v23 = vadd.f32 %v7119_v36, %v19886_v37 }
0x417e   :  { %v6708_v41 = vrot.slane %v6706_v27, 2  ;;  %v7039_v35 = vadd.f32 %v7037_v34, %v20899_v40  ;;  %v7124_v27 = vrot.slane %v7120_v23, %v19889_v38 }
0x4180   :  { %v6710_v55 = vadd.f32 %v6708_v41, %v20899_v40  ;;  %v7040_v19 = vmul.f32 %v7039_v35, %v7026_v22 }
0x4182   :  { %v7042_v24 = vrot.slane %v7040_v19, 2 }
0x4184   :  { %v7044_v20 = vadd.f32 %v7042_v24, %v20899_v40 }
0x4247   :  { %v6780_v45 = vpop.f32.mrb[78].mxu1 }
0x4248   :  { %v6781_v46 = vadd.f32 %v6780_v45, %v6710_v55  ;;  %v17279_v47 = vpop.f32.mrb[79].mxu1 }
0x424a   :  { %v6791_v53 = vadd.f32 %v6790_v44, %v6781_v46 }
0x424c   :  { %17289 = vmatmul.mubr.msk.f32.vlgmr.msra.gmra.mrb[76].mxu0 %vm251_vm4, %v6791_v53 }
0x424d   :  { %18803 = vmatpush3.bf16.msra.mxu0 %v19935_v1  ;;  %17310 = vmatprep.mubr.msk.f32.mxu0 %vm19732_vm1, %v19731_v2 }
0x424e   :  { %18804 = vmatprep.subr.bf16.mxu0 %v19733_v7 }
0x4251   :  { %18806 = vmatpush3.bf16.msra.mxu0 %v19945_v5 }
0x4252   :  { %18813 = vmatprep.subr.bf16.mxu0 %v19733_v7 }
0x431f   :  { %v6861_v57 = vpop.f32.mrb[76].mxu0 }
0x4320   :  { %v6862_v58 = vadd.f32 %v6861_v57, %v19919_v54  ;;  %v17290_v59 = vpop.f32.mrb[77].mxu0 }
0x4322   :  { %v15431_v63 = vmul.f32 -1.442695, %v6862_v58 }
0x4324   :  { %19515 = vpow2.f32 %v15431_v63 }
0x432e   :  { %v19516_v42 = vpop.eup %19515 }
0x432f   :  { %v6868_v60 = vadd.f32 1.0, %v19516_v42 }
0x4331   :  { %19517 = vrcp.f32 %v6868_v60 }
0x433b   :  { %v19518_v61 = vpop.eup %19517 }
0x433c   :  { %v6871_v62 = vmul.f32 %v19518_v61, %v6862_v58 }
0x433e   :  { %17300 = vmatmul.mubr.msk.f32.vlgmr.msra.gmra.mrb[80].mxu1 %vm251_vm4, %v6871_v62 }
0x433f   :  { %18809 = vmatpush3.bf16.msra.mxu1 %v19807_v6  ;;  %17321 = vmatprep.mubr.msk.f32.mxu1 %vm19732_vm1, %v19731_v2 }
0x4340   :  { %18810 = vmatprep.subr.bf16.mxu1 %v19733_v7 }
0x4343   :  { %18812 = vmatpush3.bf16.msra.mxu1 %v19828_v10 }
0x4344   :  { %18819 = vmatprep.subr.bf16.mxu1 %v19733_v7 }
0x4411   :  { %v6941_v48 = vpop.f32.mrb[80].mxu1 }
0x4412   :  { %v6942_v50 = vadd.f32 %v6941_v48, %v19951_v9  ;;  %v17301_v28 = vpop.f32.mrb[81].mxu1 }
0x4413   :  { %v7360_v28 = vstv %s7359_s24  ;;  %s8060_s24 = sadd.f32 %s20583_s19, %s8059_s23 }
0x4414   :  { %v15433_v11 = vmul.f32 -1.442695, %v6942_v50 }
0x4416   :  { %19519 = vpow2.f32 %v15433_v11  ;;  %v7700_v11 = vstv %s7699_s4  ;;  %s8407_s4 = smul.f32 -0.27353132, %s20920_s20 }
0x4420   :  { %v19520_v12 = vpop.eup %19519 }
0x4421   :  { %v6948_v14 = vadd.f32 1.0, %v19520_v12  ;;  %v8044_v12 = vstv %s8043_s25  ;;  %s8754_s25 = smul.f32 -0.3223762, %s20920_s20 }
0x4423   :  { %19521 = vrcp.f32 %v6948_v14  ;;  %v8392_v14 = vstv %s8391_s16  ;;  %s8411_s16 = sadd.f32 %s20583_s19, %s20920_s20 }
0x442d   :  { %v19522_v16 = vpop.eup %19521 }
0x442e   :  { %v6951_v18 = vmul.f32 %v19522_v16, %v6942_v50 }
0x4430   :  { %17311 = vmatmul.mubr.msk.f32.vlgmr.msra.gmra.mrb[78].mxu0 %vm251_vm4, %v6951_v18 }
0x4431   :  { %18815 = vmatpush3.bf16.msra.mxu0 %v19838_v13  ;;  %17332 = vmatprep.mubr.msk.f32.mxu0 %vm19732_vm1, %v19731_v2 }
0x4432   :  { %18816 = vmatprep.subr.bf16.mxu0 %v19733_v7 }
0x4435   :  { %18818 = vmatpush3.bf16.msra.mxu0 %v19867_v26 }
0x4436   :  { %18825 = vmatprep.subr.bf16.mxu0 %v19733_v7 }
0x4503   :  { %v7021_v21 = vpop.f32.mrb[78].mxu0 }
0x4504   :  { %v20956_v17 = vadd.f32 %v7021_v21, %v19963_v25  ;;  %v17312_v0 = vpop.f32.mrb[79].mxu0 }
0x4506   :  { %v7027_v3 = vmul.f32 %v7026_v22, %v20956_v17  ;;  %v7361_v16 = vmul.f32 %v7360_v28, %v20956_v17  ;;  %v7701_v18 = vmul.f32 %v7700_v11, %v20956_v17  ;;  %v8045_v21 = vmul.f32 %v8044_v12, %v20956_v17 }
0x4507   :  { %v8393_v0 = vmul.f32 %v8392_v14, %v20956_v17 }
0x4508   :  { %v7028_v4 = vadd.f32 %v7027_v3, %v20904_v33  ;;  %v7364_v3 = vstv %s7363_s26  ;;  %v7362_v34 = vadd.f32 %v7361_v16, %v20904_v33  ;;  %v7702_v35 = vadd.f32 %v7701_v18, %v20904_v33 }
0x4509   :  { %v8046_v51 = vadd.f32 %v8045_v21, %v20904_v33  ;;  %v8394_v19 = vadd.f32 %v8393_v0, %v20904_v33 }
0x450a   :  { %17322 = vmatmul.mubr.msk.f32.vlgmr.msra.gmra.mrb[82].mxu1 %vm251_vm4, %v7028_v4  ;;  %v7704_v4 = vstv %s7703_s27  ;;  %s8758_s27 = smul.f32 0.13095239, %s20920_s20 }
0x450b   :  { %18821 = vmatpush3.bf16.msra.mxu1 %v19903_v49  ;;  %17343 = vmatprep.mubr.msk.f32.mxu1 %vm19732_vm1, %v19731_v2 }
0x450c   :  { %18822 = vmatprep.subr.bf16.mxu1 %v19733_v7 }
0x450f   :  { %18824 = vmatpush3.bf16.msra.mxu1 %v19913_v52 }
0x4510   :  { %18831 = vmatprep.subr.bf16.mxu1 %v19733_v7 }
0x45dd   :  { %v7114_v39 = vpop.f32.mrb[82].mxu1 }
0x45de   :  { %v7115_v41 = vadd.f32 %v7114_v39, %v7044_v20  ;;  %v17323_v43 = vpop.f32.mrb[83].mxu1 }
0x45e0   :  { %v7125_v55 = vadd.f32 %v7124_v27, %v7115_v41 }
0x45e2   :  { %17333 = vmatmul.mubr.msk.f32.vlgmr.msra.gmra.mrb[80].mxu0 %vm251_vm4, %v7125_v55  ;;  %v7369_v55 = vstv %s7367_s10 }
0x45e3   :  { %18827 = vmatpush3.bf16.msra.mxu0 %v19935_v1  ;;  %17354 = vmatprep.mubr.msk.f32.mxu0 %vm19732_vm1, %v19731_v2 }
0x45e4   :  { %18828 = vmatprep.subr.bf16.mxu0 %v19733_v7 }
0x45e7   :  { %18830 = vmatpush3.bf16.msra.mxu0 %v19945_v5 }
0x45e8   :  { %18837 = vmatprep.subr.bf16.mxu0 %v19733_v7 }
0x46b5   :  { %v7195_v56 = vpop.f32.mrb[80].mxu0 }
0x46b6   :  { %v7196_v44 = vadd.f32 %v7195_v56, %v19919_v54  ;;  %v17334_v45 = vpop.f32.mrb[81].mxu0  ;;  %v7370_v56 = vmul.f32 %v7369_v55, %v20899_v40 }
0x46b8   :  { %v15437_v46 = vmul.f32 -1.442695, %v7196_v44 }
0x46ba   :  { %19523 = vpow2.f32 %v15437_v46 }
0x46c4   :  { %v19524_v47 = vpop.eup %19523 }
0x46c5   :  { %v7202_v53 = vadd.f32 1.0, %v19524_v47 }
0x46c7   :  { %19525 = vrcp.f32 %v7202_v53 }
0x46d1   :  { %v19526_v57 = vpop.eup %19525 }
0x46d2   :  { %v7205_v58 = vmul.f32 %v19526_v57, %v7196_v44  ;;  %v7372_v44 = vrot.slane %v7370_v56, 2  ;;  %v7458_v57 = vstv %s7368_s5 }
0x46d4   :  { %17344 = vmatmul.mubr.msk.f32.vlgmr.msra.gmra.mrb[84].mxu1 %vm251_vm4, %v7205_v58  ;;  %v7374_v45 = vadd.f32 %v7372_v44, %v20899_v40 }
0x46d5   :  { %18833 = vmatpush3.bf16.msra.mxu1 %v19807_v6  ;;  %17365 = vmatprep.mubr.msk.f32.mxu1 %vm19732_vm1, %v19731_v2 }
0x46d6   :  { %18834 = vmatprep.subr.bf16.mxu1 %v19733_v7  ;;  %v7375_v46 = vmul.f32 %v7374_v45, %v7369_v55 }
0x46d8   :  { %v7377_v47 = vrot.slane %v7375_v46, 2 }
0x46d9   :  { %18836 = vmatpush3.bf16.msra.mxu1 %v19828_v10 }
0x46da   :  { %18843 = vmatprep.subr.bf16.mxu1 %v19733_v7  ;;  %v7379_v53 = vadd.f32 %v7377_v47, %v20899_v40 }
0x46dc   :  { %v7380_v58 = vmul.f32 %v7379_v53, %v7369_v55  ;;  %v8747_v55 = vstv %s8746_s17 }
0x47a7   :  { %v7275_v59 = vpop.f32.mrb[84].mxu1 }
0x47a8   :  { %v7276_v63 = vadd.f32 %v7275_v59, %v19951_v9  ;;  %v17345_v42 = vpop.f32.mrb[85].mxu1  ;;  %v21036_v59 = vld [vmem:[%s22222_s8] sm:$0xff] }
0x47a9   :  { %v7382_v42 = vrot.slane %v7380_v58, 2 }
0x47aa   :  { %v15439_v60 = vmul.f32 -1.442695, %v7276_v63 }
0x47ac   :  { %19527 = vpow2.f32 %v15439_v60 }
0x47b6   :  { %v19528_v61 = vpop.eup %19527 }
0x47b7   :  { %v7282_v62 = vadd.f32 1.0, %v19528_v61  ;;  %v7384_v61 = vadd.f32 %v7382_v42, %v20899_v40 }
0x47b9   :  { %19529 = vrcp.f32 %v7282_v62 }
0x47c3   :  { %v19530_v48 = vpop.eup %19529 }
0x47c4   :  { %v7285_v50 = vmul.f32 %v19530_v48, %v7276_v63  ;;  %v7459_v63 = vmul.f32 %v21036_v59, %v7458_v57 }
0x47c6   :  { %17355 = vmatmul.mubr.msk.f32.vlgmr.msra.gmra.mrb[82].mxu0 %vm251_vm4, %v7285_v50  ;;  %v7460_v60 = vadd.f32 %v7459_v63, %v19886_v37 }
0x47c7   :  { %18839 = vmatpush3.bf16.msra.mxu0 %v19838_v13  ;;  %17376 = vmatprep.mubr.msk.f32.mxu0 %vm19732_vm1, %v19731_v2 }
0x47c8   :  { %18840 = vmatprep.subr.bf16.mxu0 %v19733_v7  ;;  %v7464_v62 = vrot.slane %v7460_v60, %v19889_v38 }
0x47cb   :  { %18842 = vmatpush3.bf16.msra.mxu0 %v19867_v26 }
0x47cc   :  { %18849 = vmatprep.subr.bf16.mxu0 %v19733_v7 }
0x4899   :  { %v7355_v22 = vpop.f32.mrb[82].mxu0 }
0x489a   :  { %v7356_v31 = vadd.f32 %v7355_v22, %v19963_v25  ;;  %v17356_v32 = vpop.f32.mrb[83].mxu0 }
0x489c   :  { %v7365_v36 = vmul.f32 %v7364_v3, %v7356_v31  ;;  %v7705_v24 = vmul.f32 %v7704_v4, %v7356_v31  ;;  %v8049_v23 = vmul.f32 %v8048_v29, %v7356_v31  ;;  %v8397_v20 = vmul.f32 %v8396_v30, %v7356_v31 }
0x489e   :  { %v7366_v27 = vadd.f32 %v7365_v36, %v7362_v34  ;;  %v21015_v39 = vadd.f32 %v7705_v24, %v7702_v35  ;;  %v21017_v41 = vadd.f32 %v8049_v23, %v8046_v51  ;;  %v21019_v43 = vadd.f32 %v8397_v20, %v8394_v19 }
0x489f   :  { %v8743_v19 = vstv %s8742_s13  ;;  %v7708_v23 = vstv %s7707_s15  ;;  %v8052_v20 = vstv %s8051_s0 }
0x48a0   :  { %17366 = vmatmul.mubr.msk.f32.vlgmr.msra.gmra.mrb[86].mxu1 %vm251_vm4, %v7366_v27  ;;  %v8744_v36 = vmul.f32 %v8743_v19, %v20956_v17  ;;  %v8400_v27 = vstv %s8399_s14 }
0x48a1   :  { %18845 = vmatpush3.bf16.msra.mxu1 %v19903_v49  ;;  %17387 = vmatprep.mubr.msk.f32.mxu1 %vm19732_vm1, %v19731_v2 }
0x48a2   :  { %18846 = vmatprep.subr.bf16.mxu1 %v19733_v7  ;;  %v8745_v45 = vadd.f32 %v8744_v36, %v20904_v33  ;;  %v7713_v33 = vstv %s7711_s3 }
0x48a5   :  { %18848 = vmatpush3.bf16.msra.mxu1 %v19913_v52 }
0x48a6   :  { %18855 = vmatprep.subr.bf16.mxu1 %v19733_v7 }
0x4973   :  { %v7454_v48 = vpop.f32.mrb[86].mxu1 }
0x4974   :  { %v7455_v50 = vadd.f32 %v7454_v48, %v7384_v61  ;;  %v17367_v28 = vpop.f32.mrb[87].mxu1  ;;  %v7802_v48 = vstv %s7712_s18 }
0x4975   :  { %v7803_v28 = vmul.f32 %v21036_v59, %v7802_v48 }
0x4976   :  { %v7465_v11 = vadd.f32 %v7464_v62, %v7455_v50 }
0x4978   :  { %17377 = vmatmul.mubr.msk.f32.vlgmr.msra.gmra.mrb[84].mxu0 %vm251_vm4, %v7465_v11 }
0x4979   :  { %18851 = vmatpush3.bf16.msra.mxu0 %v19935_v1  ;;  %17398 = vmatprep.mubr.msk.f32.mxu0 %vm19732_vm1, %v19731_v2 }
0x497a   :  { %18852 = vmatprep.subr.bf16.mxu0 %v19733_v7 }
0x497d   :  { %18854 = vmatpush3.bf16.msra.mxu0 %v19945_v5 }
0x497e   :  { %18861 = vmatprep.subr.bf16.mxu0 %v19733_v7 }
0x4a4b   :  { %v7535_v12 = vpop.f32.mrb[84].mxu0 }
0x4a4c   :  { %v7536_v14 = vadd.f32 %v7535_v12, %v19919_v54  ;;  %v17378_v16 = vpop.f32.mrb[85].mxu0  ;;  %v7804_v12 = vadd.f32 %v7803_v28, %v19886_v37 }
0x4a4e   :  { %v15443_v18 = vmul.f32 -1.442695, %v7536_v14  ;;  %v7808_v16 = vrot.slane %v7804_v12, %v19889_v38 }
0x4a50   :  { %19531 = vpow2.f32 %v15443_v18 }
0x4a5a   :  { %v19532_v21 = vpop.eup %19531 }
0x4a5b   :  { %v7542_v0 = vadd.f32 1.0, %v19532_v21 }
0x4a5d   :  { %19533 = vrcp.f32 %v7542_v0 }
0x4a67   :  { %v19534_v22 = vpop.eup %19533 }
0x4a68   :  { %v7545_v3 = vmul.f32 %v19534_v22, %v7536_v14 }
0x4a6a   :  { %17388 = vmatmul.mubr.msk.f32.vlgmr.msra.gmra.mrb[88].mxu1 %vm251_vm4, %v7545_v3 }
0x4a6b   :  { %18857 = vmatpush3.bf16.msra.mxu1 %v19807_v6  ;;  %17409 = vmatprep.mubr.msk.f32.mxu1 %vm19732_vm1, %v19731_v2 }
0x4a6c   :  { %18858 = vmatprep.subr.bf16.mxu1 %v19733_v7 }
0x4a6f   :  { %18860 = vmatpush3.bf16.msra.mxu1 %v19828_v10 }
0x4a70   :  { %18867 = vmatprep.subr.bf16.mxu1 %v19733_v7 }
0x4b3d   :  { %v7615_v4 = vpop.f32.mrb[88].mxu1 }
0x4b3e   :  { %v7616_v29 = vadd.f32 %v7615_v4, %v19951_v9  ;;  %v17389_v30 = vpop.f32.mrb[89].mxu1 }
0x4b40   :  { %v15445_v31 = vmul.f32 -1.442695, %v7616_v29 }
0x4b42   :  { %19535 = vpow2.f32 %v15445_v31 }
0x4b4c   :  { %v19536_v32 = vpop.eup %19535 }
0x4b4d   :  { %v7622_v34 = vadd.f32 1.0, %v19536_v32 }
0x4b4f   :  { %19537 = vrcp.f32 %v7622_v34 }
0x4b59   :  { %v19538_v35 = vpop.eup %19537 }
0x4b5a   :  { %v7625_v51 = vmul.f32 %v19538_v35, %v7616_v29 }
0x4b5c   :  { %17399 = vmatmul.mubr.msk.f32.vlgmr.msra.gmra.mrb[86].mxu0 %vm251_vm4, %v7625_v51 }
0x4b5d   :  { %18863 = vmatpush3.bf16.msra.mxu0 %v19838_v13  ;;  %17420 = vmatprep.mubr.msk.f32.mxu0 %vm19732_vm1, %v19731_v2 }
0x4b5e   :  { %18864 = vmatprep.subr.bf16.mxu0 %v19733_v7 }
0x4b61   :  { %18866 = vmatpush3.bf16.msra.mxu0 %v19867_v26 }
0x4b62   :  { %18873 = vmatprep.subr.bf16.mxu0 %v19733_v7 }
0x4c2f   :  { %v7695_v24 = vpop.f32.mrb[86].mxu0 }
0x4c30   :  { %v7696_v56 = vadd.f32 %v7695_v24, %v19963_v25  ;;  %v17400_v44 = vpop.f32.mrb[87].mxu0 }
0x4c31   :  { %v8056_v44 = vstv %s8055_s6 }
0x4c32   :  { %v7709_v46 = vmul.f32 %v7708_v23, %v7696_v56  ;;  %v8053_v47 = vmul.f32 %v8052_v20, %v7696_v56  ;;  %v8401_v53 = vmul.f32 %v8400_v27, %v7696_v56  ;;  %v8748_v57 = vmul.f32 %v8747_v55, %v7696_v56 }
0x4c34   :  { %v7710_v58 = vadd.f32 %v7709_v46, %v21015_v39  ;;  %v21075_v63 = vadd.f32 %v8053_v47, %v21017_v41  ;;  %v21078_v17 = vadd.f32 %v8401_v53, %v21019_v43  ;;  %v21080_v42 = vadd.f32 %v8748_v57, %v8745_v45 }
0x4c35   :  { %v7714_v39 = vmul.f32 %v7713_v33, %v20899_v40  ;;  %v8404_v45 = vstv %s8403_s21  ;;  %v8751_v46 = vstv %s8750_s22 }
0x4c36   :  { %17410 = vmatmul.mubr.msk.f32.vlgmr.msra.gmra.mrb[90].mxu1 %vm251_vm4, %v7710_v58 }
0x4c37   :  { %18869 = vmatpush3.bf16.msra.mxu1 %v19903_v49  ;;  %17431 = vmatprep.mubr.msk.f32.mxu1 %vm19732_vm1, %v19731_v2  ;;  %v7716_v41 = vrot.slane %v7714_v39, 2 }
0x4c38   :  { %18870 = vmatprep.subr.bf16.mxu1 %v19733_v7 }
0x4c39   :  { %v7718_v43 = vadd.f32 %v7716_v41, %v20899_v40 }
0x4c3b   :  { %18872 = vmatpush3.bf16.msra.mxu1 %v19913_v52  ;;  %v7719_v60 = vmul.f32 %v7718_v43, %v7713_v33 }
0x4c3c   :  { %18879 = vmatprep.subr.bf16.mxu1 %v19733_v7 }
0x4c3d   :  { %v7721_v61 = vrot.slane %v7719_v60, 2 }
0x4c3f   :  { %v7723_v62 = vadd.f32 %v7721_v61, %v20899_v40 }
0x4c41   :  { %v7724_v50 = vmul.f32 %v7723_v62, %v7713_v33 }
0x4c43   :  { %v7726_v11 = vrot.slane %v7724_v50, 2  ;;  %v8150_v50 = vstv %s8060_s24 }
0x4c45   :  { %v7728_v14 = vadd.f32 %v7726_v11, %v20899_v40  ;;  %v8151_v11 = vmul.f32 %v21036_v59, %v8150_v50 }
0x4d09   :  { %v7798_v18 = vpop.f32.mrb[90].mxu1 }
0x4d0a   :  { %v7799_v21 = vadd.f32 %v7798_v18, %v7728_v14  ;;  %v17411_v0 = vpop.f32.mrb[91].mxu1  ;;  %v8152_v14 = vadd.f32 %v8151_v11, %v19886_v37 }
0x4d0c   :  { %v7809_v22 = vadd.f32 %v7808_v16, %v7799_v21  ;;  %v8156_v18 = vrot.slane %v8152_v14, %v19889_v38 }
0x4d0e   :  { %17421 = vmatmul.mubr.msk.f32.vlgmr.msra.gmra.mrb[88].mxu0 %vm251_vm4, %v7809_v22 }
0x4d0f   :  { %18875 = vmatpush3.bf16.msra.mxu0 %v19935_v1  ;;  %17442 = vmatprep.mubr.msk.f32.mxu0 %vm19732_vm1, %v19731_v2 }
0x4d10   :  { %18876 = vmatprep.subr.bf16.mxu0 %v19733_v7 }
0x4d13   :  { %18878 = vmatpush3.bf16.msra.mxu0 %v19945_v5 }
0x4d14   :  { %18885 = vmatprep.subr.bf16.mxu0 %v19733_v7 }
0x4de1   :  { %v7879_v3 = vpop.f32.mrb[88].mxu0 }
0x4de2   :  { %v7880_v4 = vadd.f32 %v7879_v3, %v19919_v54  ;;  %v17422_v29 = vpop.f32.mrb[89].mxu0 }
0x4de4   :  { %v15449_v30 = vmul.f32 -1.442695, %v7880_v4 }
0x4de6   :  { %19539 = vpow2.f32 %v15449_v30 }
0x4df0   :  { %v19540_v31 = vpop.eup %19539 }
0x4df1   :  { %v7886_v32 = vadd.f32 1.0, %v19540_v31 }
0x4df3   :  { %19541 = vrcp.f32 %v7886_v32 }
0x4dfd   :  { %v19542_v34 = vpop.eup %19541 }
0x4dfe   :  { %v7889_v35 = vmul.f32 %v19542_v34, %v7880_v4 }
0x4e00   :  { %17432 = vmatmul.mubr.msk.f32.vlgmr.msra.gmra.mrb[92].mxu1 %vm251_vm4, %v7889_v35 }
0x4e01   :  { %18881 = vmatpush3.bf16.msra.mxu1 %v19807_v6  ;;  %17453 = vmatprep.mubr.msk.f32.mxu1 %vm19732_vm1, %v19731_v2 }
0x4e02   :  { %18882 = vmatprep.subr.bf16.mxu1 %v19733_v7 }
0x4e05   :  { %18884 = vmatpush3.bf16.msra.mxu1 %v19828_v10 }
0x4e06   :  { %18891 = vmatprep.subr.bf16.mxu1 %v19733_v7 }
0x4ed3   :  { %v7959_v51 = vpop.f32.mrb[92].mxu1 }
0x4ed4   :  { %v7960_v19 = vadd.f32 %v7959_v51, %v19951_v9  ;;  %v17433_v36 = vpop.f32.mrb[93].mxu1 }
0x4ed6   :  { %v15451_v24 = vmul.f32 -1.442695, %v7960_v19 }
0x4ed8   :  { %19543 = vpow2.f32 %v15451_v24 }
0x4ee2   :  { %v19544_v23 = vpop.eup %19543 }
0x4ee3   :  { %v7966_v20 = vadd.f32 1.0, %v19544_v23 }
0x4ee5   :  { %19545 = vrcp.f32 %v7966_v20 }
0x4eef   :  { %v19546_v27 = vpop.eup %19545 }
0x4ef0   :  { %v7969_v55 = vmul.f32 %v19546_v27, %v7960_v19 }
0x4ef2   :  { %17443 = vmatmul.mubr.msk.f32.vlgmr.msra.gmra.mrb[90].mxu0 %vm251_vm4, %v7969_v55 }
0x4ef3   :  { %18887 = vmatpush3.bf16.msra.mxu0 %v19838_v13  ;;  %17464 = vmatprep.mubr.msk.f32.mxu0 %vm19732_vm1, %v19731_v2 }
0x4ef4   :  { %18888 = vmatprep.subr.bf16.mxu0 %v19733_v7 }
0x4ef7   :  { %18890 = vmatpush3.bf16.msra.mxu0 %v19867_v26 }
0x4ef8   :  { %18897 = vmatprep.subr.bf16.mxu0 %v19733_v7 }
0x4fc5   :  { %v8039_v56 = vpop.f32.mrb[90].mxu0 }
0x4fc6   :  { %v8040_v47 = vadd.f32 %v8039_v56, %v19963_v25  ;;  %v17444_v53 = vpop.f32.mrb[91].mxu0 }
0x4fc8   :  { %v8057_v57 = vmul.f32 %v8056_v44, %v8040_v47  ;;  %v8405_v58 = vmul.f32 %v8404_v45, %v8040_v47  ;;  %v8752_v33 = vmul.f32 %v8751_v46, %v8040_v47  ;;  %v8408_v45 = vstv %s8407_s4 }
0x4fc9   :  { %v8755_v46 = vstv %s8754_s25 }
0x4fca   :  { %v8058_v39 = vadd.f32 %v8057_v57, %v21075_v63  ;;  %v21127_v41 = vadd.f32 %v8405_v58, %v21078_v17  ;;  %v21130_v43 = vadd.f32 %v8752_v33, %v21080_v42  ;;  %v8061_v63 = vstv %s8059_s23 }
0x4fcb   :  { %v8062_v17 = vmul.f32 %v8061_v63, %v20899_v40 }
0x4fcc   :  { %17454 = vmatmul.mubr.msk.f32.vlgmr.msra.gmra.mrb[94].mxu1 %vm251_vm4, %v8058_v39 }
0x4fcd   :  { %18893 = vmatpush3.bf16.msra.mxu1 %v19903_v49  ;;  %17475 = vmatprep.mubr.msk.f32.mxu1 %vm19732_vm1, %v19731_v2  ;;  %v8064_v60 = vrot.slane %v8062_v17, 2 }
0x4fce   :  { %18894 = vmatprep.subr.bf16.mxu1 %v19733_v7 }
0x4fcf   :  { %v8066_v42 = vadd.f32 %v8064_v60, %v20899_v40 }
0x4fd1   :  { %18896 = vmatpush3.bf16.msra.mxu1 %v19913_v52  ;;  %v8067_v61 = vmul.f32 %v8066_v42, %v8061_v63 }
0x4fd2   :  { %18903 = vmatprep.subr.bf16.mxu1 %v19733_v7 }
0x4fd3   :  { %v8069_v62 = vrot.slane %v8067_v61, 2 }
0x4fd5   :  { %v8071_v48 = vadd.f32 %v8069_v62, %v20899_v40  ;;  %v8501_v62 = vstv %s8411_s16 }
0x4fd6   :  { %v8502_v50 = vmul.f32 %v21036_v59, %v8501_v62 }
0x4fd7   :  { %v8072_v28 = vmul.f32 %v8071_v48, %v8061_v63  ;;  %v8412_v63 = vstv %s20920_s20  ;;  %s21244_s20 = sld [smem:[#allocation3 + $0x5]] }
0x4fd8   :  { %v8413_v17 = vmul.f32 %v8412_v63, %v20899_v40  ;;  %v8503_v11 = vadd.f32 %v8502_v50, %v19886_v37 }
0x4fd9   :  { %v8074_v12 = vrot.slane %v8072_v28, 2 }
0x4fda   :  { %v8507_v14 = vrot.slane %v8503_v11, %v19889_v38 }
0x4fdb   :  { %v8076_v16 = vadd.f32 %v8074_v12, %v20899_v40 }
0x4fdd   :  { %s21248_s29 = ssub.f32 %s21244_s20, %s20916_s28 }
0x4fdf   :  { %s8841_s30 = smul.f32 0.0, %s21248_s29 }
0x4fe0   :  { %s9173_s5 = smul.f32 0.2, %s21248_s29 }
0x4fe1   :  { %s8842_s10 = sadd.f32 %s20916_s28, %s8841_s30  ;;  %s9507_s12 = smul.f32 0.075, %s21248_s29 }
0x4fe2   :  { %s9177_s11 = sadd.f32 %s20916_s28, %s9173_s5  ;;  %s9847_s13 = smul.f32 0.9777778, %s21248_s29 }
0x4fe3   :  { %s10191_s15 = smul.f32 2.9525986, %s21248_s29 }
0x4fe4   :  { %s10539_s0 = smul.f32 2.8462753, %s21248_s29 }
0x4fe5   :  { %s9511_s14 = smul.f32 0.225, %s21248_s29 }
0x4fe6   :  { %s9851_s17 = smul.f32 -3.7333333, %s21248_s29 }
0x4fe7   :  { %s10195_s3 = smul.f32 -11.595794, %s21248_s29 }
0x4fe8   :  { %s10543_s18 = smul.f32 -10.757576, %s21248_s29 }
0x4fe9   :  { %s9515_s6 = smul.f32 0.3, %s21248_s29 }
0x4fea   :  { %s10890_s22 = smul.f32 0.091145836, %s21248_s29 }
0x4feb   :  { %s9516_s21 = sadd.f32 %s20916_s28, %s9515_s6  ;;  %s9855_s23 = smul.f32 3.5555556, %s21248_s29 }
0x4fec   :  { %s10199_s24 = smul.f32 9.822893, %s21248_s29 }
0x4fed   :  { %s10547_s4 = smul.f32 8.906423, %s21248_s29 }
0x4fee   :  { %s10894_s25 = smul.f32 0.4492363, %s21248_s29 }
0x4fef   :  { %s9859_s16 = smul.f32 0.8, %s21248_s29 }
0x4ff1   :  { %s9860_s19 = sadd.f32 %s20916_s28, %s9859_s16 }
0x509f   :  { %v8146_v21 = vpop.f32.mrb[94].mxu1 }
0x50a0   :  { %v8147_v0 = vadd.f32 %v8146_v21, %v8076_v16  ;;  %v17455_v22 = vpop.f32.mrb[95].mxu1 }
0x50a2   :  { %v8157_v3 = vadd.f32 %v8156_v18, %v8147_v0 }
0x50a4   :  { %17465 = vmatmul.mubr.msk.f32.vlgmr.msra.gmra.mrb[92].mxu0 %vm251_vm4, %v8157_v3 }
0x50a5   :  { %18899 = vmatpush3.bf16.msra.mxu0 %v19935_v1  ;;  %17486 = vmatprep.mubr.msk.f32.mxu0 %vm19732_vm1, %v19731_v2 }
0x50a6   :  { %18900 = vmatprep.subr.bf16.mxu0 %v19733_v7 }
0x50a9   :  { %18902 = vmatpush3.bf16.msra.mxu0 %v19945_v5 }
0x50aa   :  { %18909 = vmatprep.subr.bf16.mxu0 %v19733_v7 }
0x5177   :  { %v8227_v4 = vpop.f32.mrb[92].mxu0 }
0x5178   :  { %v8228_v29 = vadd.f32 %v8227_v4, %v19919_v54  ;;  %v17466_v30 = vpop.f32.mrb[93].mxu0 }
0x517a   :  { %v15455_v31 = vmul.f32 -1.442695, %v8228_v29 }
0x517c   :  { %19547 = vpow2.f32 %v15455_v31 }
0x5186   :  { %v19548_v32 = vpop.eup %19547 }
0x5187   :  { %v8234_v34 = vadd.f32 1.0, %v19548_v32 }
0x5189   :  { %19549 = vrcp.f32 %v8234_v34  ;;  %v15467_v34 = vld [vmem:[%s22215_s1 + $0x20] sm:$0xff] }
0x5193   :  { %v19550_v35 = vpop.eup %19549 }
0x5194   :  { %v8237_v51 = vmul.f32 %v19550_v35, %v8228_v29 }
0x5196   :  { %17476 = vmatmul.mubr.msk.f32.vlgmr.msra.gmra.mrb[96].mxu1 %vm251_vm4, %v8237_v51 }
0x5197   :  { %18905 = vmatpush3.bf16.msra.mxu1 %v19807_v6  ;;  %17497 = vmatprep.mubr.msk.f32.mxu1 %vm19732_vm1, %v19731_v2 }
0x5198   :  { %18906 = vmatprep.subr.bf16.mxu1 %v19733_v7 }
0x519b   :  { %18908 = vmatpush3.bf16.msra.mxu1 %v19828_v10 }
0x519c   :  { %18915 = vmatprep.subr.bf16.mxu1 %v19733_v7 }
0x5269   :  { %v8307_v19 = vpop.f32.mrb[96].mxu1 }
0x526a   :  { %v8308_v36 = vadd.f32 %v8307_v19, %v19951_v9  ;;  %v17477_v24 = vpop.f32.mrb[97].mxu1 }
0x526c   :  { %v15457_v23 = vmul.f32 -1.442695, %v8308_v36 }
0x526e   :  { %19551 = vpow2.f32 %v15457_v23 }
0x5278   :  { %v19552_v20 = vpop.eup %19551 }
0x5279   :  { %v8314_v27 = vadd.f32 1.0, %v19552_v20 }
0x527b   :  { %19553 = vrcp.f32 %v8314_v27 }
0x5285   :  { %v19554_v55 = vpop.eup %19553 }
0x5286   :  { %v8317_v56 = vmul.f32 %v19554_v55, %v8308_v36 }
0x5288   :  { %17487 = vmatmul.mubr.msk.f32.vlgmr.msra.gmra.mrb[94].mxu0 %vm251_vm4, %v8317_v56 }
0x5289   :  { %18911 = vmatpush3.bf16.msra.mxu0 %v19838_v13  ;;  %17508 = vmatprep.mubr.msk.f32.mxu0 %vm19732_vm1, %v19731_v2 }
0x528a   :  { %18912 = vmatprep.subr.bf16.mxu0 %v19733_v7 }
0x528d   :  { %18914 = vmatpush3.bf16.msra.mxu0 %v19867_v26 }
0x528e   :  { %18921 = vmatprep.subr.bf16.mxu0 %v19733_v7 }
0x535b   :  { %v8387_v44 = vpop.f32.mrb[94].mxu0 }
0x535c   :  { %v8388_v47 = vadd.f32 %v8387_v44, %v19963_v25  ;;  %v17488_v53 = vpop.f32.mrb[95].mxu0  ;;  %v8759_v44 = vstv %s8758_s27 }
0x535e   :  { %v8409_v57 = vmul.f32 %v8408_v45, %v8388_v47  ;;  %v8756_v58 = vmul.f32 %v8755_v46, %v8388_v47 }
0x5360   :  { %v8410_v33 = vadd.f32 %v8409_v57, %v21127_v41  ;;  %v21176_v39 = vadd.f32 %v8756_v58, %v21130_v43  ;;  %v8415_v41 = vrot.slane %v8413_v17, 2  ;;  %v8843_v57 = vstv %s8841_s30  ;;  %s10203_s30 = smul.f32 -0.29080933, %s21248_s29 }
0x5362   :  { %17498 = vmatmul.mubr.msk.f32.vlgmr.msra.gmra.mrb[98].mxu1 %vm251_vm4, %v8410_v33  ;;  %v8417_v43 = vadd.f32 %v8415_v41, %v20899_v40 }
0x5363   :  { %18917 = vmatpush3.bf16.msra.mxu1 %v19903_v49  ;;  %17519 = vmatprep.mubr.msk.f32.mxu1 %vm19732_vm1, %v19731_v2 }
0x5364   :  { %18918 = vmatprep.subr.bf16.mxu1 %v19733_v7  ;;  %v8418_v60 = vmul.f32 %v8417_v43, %v8412_v63  ;;  %v8932_v43 = vstv %s8842_s10  ;;  %s10551_s10 = smul.f32 0.2784091, %s21248_s29 }
0x5366   :  { %v8420_v42 = vrot.slane %v8418_v60, 2 }
0x5367   :  { %18920 = vmatpush3.bf16.msra.mxu1 %v19913_v52 }
0x5368   :  { %17533 = vmatprep.subr.mxu1 %v19731_v2  ;;  %v8422_v61 = vadd.f32 %v8420_v42, %v20899_v40  ;;  %v8933_v42 = vmul.f32 %v21036_v59, %v8932_v43 }
0x536a   :  { %v8423_v48 = vmul.f32 %v8422_v61, %v8412_v63  ;;  %v8934_v62 = vadd.f32 %v8933_v42, %v19886_v37 }
0x536c   :  { %v8425_v28 = vrot.slane %v8423_v48, 2  ;;  %v8938_v50 = vrot.slane %v8934_v62, %v19889_v38 }
0x536e   :  { %v8427_v12 = vadd.f32 %v8425_v28, %v20899_v40 }
0x5435   :  { %v8497_v16 = vpop.f32.mrb[98].mxu1 }
0x5436   :  { %v8498_v18 = vadd.f32 %v8497_v16, %v8427_v12  ;;  %v17499_v21 = vpop.f32.mrb[99].mxu1 }
0x5438   :  { %v8508_v0 = vadd.f32 %v8507_v14, %v8498_v18 }
0x543a   :  { %17509 = vmatmul.mubr.msk.f32.vlgmr.msra.gmra.mrb[96].mxu0 %vm251_vm4, %v8508_v0 }
0x543b   :  { %18923 = vmatpush3.bf16.msra.mxu0 %v19935_v1  ;;  %17530 = vmatprep.mubr.msk.f32.mxu0 %vm19732_vm1, %v19731_v2 }
0x543c   :  { %18924 = vmatprep.subr.bf16.mxu0 %v19733_v7 }
0x543f   :  { %18926 = vmatpush3.bf16.msra.mxu0 %v19945_v5 }
0x5440   :  { %18927 = vmatprep.subr.bf16.mxu0 %v19733_v7 }
0x550d   :  { %v8578_v40 = vpop.f32.mrb[96].mxu0 }
0x550e   :  { %v8579_v22 = vadd.f32 %v8578_v40, %v19919_v54  ;;  %v17510_v3 = vpop.f32.mrb[97].mxu0 }
0x5510   :  { %v15461_v4 = vmul.f32 -1.442695, %v8579_v22 }
0x5512   :  { %19555 = vpow2.f32 %v15461_v4 }
0x551c   :  { %v19556_v29 = vpop.eup %19555 }
0x551d   :  { %v8585_v30 = vadd.f32 1.0, %v19556_v29 }
0x551f   :  { %19557 = vrcp.f32 %v8585_v30 }
0x5529   :  { %v19558_v31 = vpop.eup %19557 }
0x552a   :  { %v8588_v32 = vmul.f32 %v19558_v31, %v8579_v22 }
0x552c   :  { %17520 = vmatmul.mubr.msk.f32.vlgmr.msra.gmra.mrb[100].mxu1 %vm251_vm4, %v8588_v32 }
0x552d   :  { %17534 = vmatpush3.msk.msra.mxu1 %vm77_vm0, %v20874_v8  ;;  %17535 = vmatprep.mubr.msk.f32.mxu1 %vm19732_vm1, %v19731_v2 }
0x552e   :  { %18933 = vmatprep.subr.bf16.mxu1 %v19733_v7 }
0x5530   :  { %17536 = vmatmul.mubr.msk.f32.vlgmr.msra.gmra.mrb[102].mxu1 %vm73_vm2, %v15467_v34 }
0x5531   :  { %18935 = vmatpush3.bf16.msra.mxu1 %v19838_v13  ;;  %17557 = vmatprep.mubr.msk.f32.mxu1 %vm19732_vm1, %v19731_v2 }
0x5532   :  { %18936 = vmatprep.subr.bf16.mxu1 %v19733_v7 }
0x5535   :  { %18938 = vmatpush3.bf16.msra.mxu1 %v19867_v26 }
0x5536   :  { %18945 = vmatprep.subr.bf16.mxu1 %v19733_v7 }
0x55ff   :  { %v8658_v8 = vpop.f32.mrb[100].mxu1 }
0x5600   :  { %v8659_v35 = vadd.f32 %v8658_v8, %v19951_v9  ;;  %v17521_v51 = vpop.f32.mrb[101].mxu1 }
0x5602   :  { %v15463_v19 = vmul.f32 -1.442695, %v8659_v35 }
0x5603   :  { %v21227_v27 = vpop.f32.mrb[102].mxu1 }
0x5604   :  { %19559 = vpow2.f32 %v15463_v19  ;;  %v17537_v55 = vpop.f32.mrb[103].mxu1  ;;  %v8844_v58 = vmul.f32 %v8843_v57, %v21227_v27 }
0x5606   :  { %v8846_v33 = vrot.slane %v8844_v58, 2  ;;  %v9266_v58 = vstv %s9177_s11  ;;  %s10207_s11 = smul.f32 0.8888889, %s21248_s29 }
0x560e   :  { %v19560_v36 = vpop.eup %19559 }
0x560f   :  { %v8665_v24 = vadd.f32 1.0, %v19560_v36 }
0x5611   :  { %19561 = vrcp.f32 %v8665_v24 }
0x561b   :  { %v19562_v23 = vpop.eup %19561 }
0x561c   :  { %v8668_v20 = vmul.f32 %v19562_v23, %v8659_v35  ;;  %v9174_v23 = vstv %s9173_s5  ;;  %s10898_s5 = smul.f32 0.6510417, %s21248_s29 }
0x561e   :  { %17531 = vmatmul.mubr.msk.f32.vlgmr.msra.gmra.mrb[98].mxu0 %vm251_vm4, %v8668_v20 }
0x561f   :  { %18929 = vmatpush3.bf16.msra.mxu0 %v19807_v6  ;;  %17546 = vmatprep.mubr.msk.f32.mxu0 %vm19732_vm1, %v19731_v2 }
0x5620   :  { %18930 = vmatprep.subr.bf16.mxu0 %v19733_v7 }
0x5623   :  { %18932 = vmatpush3.bf16.msra.mxu0 %v19828_v10 }
0x5624   :  { %18939 = vmatprep.subr.bf16.mxu0 %v19733_v7 }
0x56f1   :  { %v8738_v56 = vpop.f32.mrb[98].mxu0 }
0x56f2   :  { %v8739_v45 = vadd.f32 %v8738_v56, %v19963_v25  ;;  %v17532_v46 = vpop.f32.mrb[99].mxu0  ;;  %v9178_v56 = vmul.f32 %v9174_v23, %v21227_v27 }
0x56f4   :  { %v8760_v47 = vmul.f32 %v8759_v44, %v8739_v45  ;;  %v9180_v44 = vrot.slane %v9178_v56, 2  ;;  %v10196_v56 = vstv %s10195_s3 }
0x56f6   :  { %v21232_v53 = vadd.f32 %v8760_v47, %v21176_v39  ;;  %v8848_v39 = vadd.f32 %v8846_v33, %v21227_v27  ;;  %v9182_v45 = vadd.f32 %v9180_v44, %v21227_v27  ;;  %v10544_v44 = vstv %s10543_s18 }
0x56f8   :  { %8762 = vst.msk [vmem:[#allocation2 + $0x8] sm:$0x3] %vm151_vm3, %v21232_v53  ;;  %17547 = vmatmul.mubr.msk.f32.vlgmr.msra.gmra.mrb[100].mxu0 %vm251_vm4, %v21232_v53  ;;  %v8849_v63 = vmul.f32 %v8848_v39, %v8843_v57  ;;  %v9183_v46 = vmul.f32 %v9182_v45, %v9174_v23  ;;  %v9267_v39 = vmul.f32 %v21036_v59, %v9266_v58 }
0x56f9   :  { %18941 = vmatpush3.bf16.msra.mxu0 %v19903_v49  ;;  %17568 = vmatprep.mubr.msk.f32.mxu0 %vm19732_vm1, %v19731_v2 }
0x56fa   :  { %18942 = vmatprep.subr.bf16.mxu0 %v19733_v7  ;;  %v8851_v17 = vrot.slane %v8849_v63, 2  ;;  %v9185_v47 = vrot.slane %v9183_v46, 2 }
0x56fc   :  { %v8853_v41 = vadd.f32 %v8851_v17, %v21227_v27  ;;  %v9268_v17 = vadd.f32 %v9267_v39, %v19886_v37 }
0x56fd   :  { %18944 = vmatpush3.bf16.msra.mxu0 %v19913_v52 }
0x56fe   :  { %18951 = vmatprep.subr.bf16.mxu0 %v19733_v7  ;;  %v8854_v60 = vmul.f32 %v8853_v41, %v8843_v57  ;;  %v9187_v57 = vadd.f32 %v9185_v47, %v21227_v27  ;;  %v9272_v43 = vrot.slane %v9268_v17, %v19889_v38 }
0x5700   :  { %v8856_v61 = vrot.slane %v8854_v60, 2  ;;  %v9188_v33 = vmul.f32 %v9187_v57, %v9174_v23 }
0x5702   :  { %v8858_v48 = vadd.f32 %v8856_v61, %v21227_v27  ;;  %v9190_v63 = vrot.slane %v9188_v33, 2 }
0x5704   :  { %v9192_v41 = vadd.f32 %v9190_v63, %v21227_v27 }
0x57cb   :  { %v8928_v28 = vpop.f32.mrb[100].mxu0 }
0x57cc   :  { %v8929_v11 = vadd.f32 %v8928_v28, %v8858_v48  ;;  %v17548_v12 = vpop.f32.mrb[101].mxu0 }
0x57ce   :  { %v8939_v14 = vadd.f32 %v8938_v50, %v8929_v11 }
0x57d0   :  { %17558 = vmatmul.mubr.msk.f32.vlgmr.msra.gmra.mrb[104].mxu1 %vm251_vm4, %v8939_v14 }
0x57d1   :  { %18947 = vmatpush3.bf16.msra.mxu1 %v19935_v1  ;;  %17579 = vmatprep.mubr.msk.f32.mxu1 %vm19732_vm1, %v19731_v2 }
0x57d2   :  { %18948 = vmatprep.subr.bf16.mxu1 %v19733_v7 }
0x57d5   :  { %18950 = vmatpush3.bf16.msra.mxu1 %v19945_v5 }
0x57d6   :  { %18957 = vmatprep.subr.bf16.mxu1 %v19733_v7 }
0x58a3   :  { %v9009_v16 = vpop.f32.mrb[104].mxu1 }
0x58a4   :  { %v9010_v18 = vadd.f32 %v9009_v16, %v19919_v54  ;;  %v17559_v21 = vpop.f32.mrb[105].mxu1 }
0x58a6   :  { %v15472_v0 = vmul.f32 -1.442695, %v9010_v18 }
0x58a8   :  { %19563 = vpow2.f32 %v15472_v0 }
0x58b2   :  { %v19564_v40 = vpop.eup %19563 }
0x58b3   :  { %v9016_v22 = vadd.f32 1.0, %v19564_v40 }
0x58b5   :  { %19565 = vrcp.f32 %v9016_v22 }
0x58bf   :  { %v19566_v3 = vpop.eup %19565 }
0x58c0   :  { %v9019_v4 = vmul.f32 %v19566_v3, %v9010_v18 }
0x58c2   :  { %17569 = vmatmul.mubr.msk.f32.vlgmr.msra.gmra.mrb[102].mxu0 %vm251_vm4, %v9019_v4 }
0x58c3   :  { %18953 = vmatpush3.bf16.msra.mxu0 %v19807_v6  ;;  %17590 = vmatprep.mubr.msk.f32.mxu0 %vm19732_vm1, %v19731_v2 }
0x58c4   :  { %18954 = vmatprep.subr.bf16.mxu0 %v19733_v7 }
0x58c7   :  { %18956 = vmatpush3.bf16.msra.mxu0 %v19828_v10 }
0x58c8   :  { %18963 = vmatprep.subr.bf16.mxu0 %v19733_v7 }
0x5995   :  { %v9089_v29 = vpop.f32.mrb[102].mxu0 }
0x5996   :  { %v9090_v30 = vadd.f32 %v9089_v29, %v19951_v9  ;;  %v17570_v31 = vpop.f32.mrb[103].mxu0 }
0x5997   :  { %v9508_v31 = vstv %s9507_s12  ;;  %s10208_s12 = sadd.f32 %s20916_s28, %s10207_s11 }
0x5998   :  { %v15474_v32 = vmul.f32 -1.442695, %v9090_v30 }
0x599a   :  { %19567 = vpow2.f32 %v15474_v32  ;;  %v9848_v32 = vstv %s9847_s13  ;;  %s10555_s13 = smul.f32 -0.27353132, %s21248_s29 }
0x59a4   :  { %v19568_v34 = vpop.eup %19567 }
0x59a5   :  { %v9096_v8 = vadd.f32 1.0, %v19568_v34  ;;  %v10192_v34 = vstv %s10191_s15  ;;  %s10902_s15 = smul.f32 -0.3223762, %s21248_s29 }
0x59a7   :  { %19569 = vrcp.f32 %v9096_v8  ;;  %v10540_v8 = vstv %s10539_s0  ;;  %s10559_s0 = sadd.f32 %s20916_s28, %s21248_s29 }
0x59b1   :  { %v19570_v35 = vpop.eup %19569 }
0x59b2   :  { %v9099_v51 = vmul.f32 %v19570_v35, %v9090_v30 }
0x59b4   :  { %17580 = vmatmul.mubr.msk.f32.vlgmr.msra.gmra.mrb[106].mxu1 %vm251_vm4, %v9099_v51 }
0x59b5   :  { %18959 = vmatpush3.bf16.msra.mxu1 %v19838_v13  ;;  %17601 = vmatprep.mubr.msk.f32.mxu1 %vm19732_vm1, %v19731_v2 }
0x59b6   :  { %18960 = vmatprep.subr.bf16.mxu1 %v19733_v7 }
0x59b9   :  { %18962 = vmatpush3.bf16.msra.mxu1 %v19867_v26 }
0x59ba   :  { %18969 = vmatprep.subr.bf16.mxu1 %v19733_v7 }
0x5a87   :  { %v9169_v19 = vpop.f32.mrb[106].mxu1 }
0x5a88   :  { %v21284_v36 = vadd.f32 %v9169_v19, %v19963_v25  ;;  %v17581_v24 = vpop.f32.mrb[107].mxu1 }
0x5a8a   :  { %v9175_v20 = vmul.f32 %v9174_v23, %v21284_v36  ;;  %v9509_v35 = vmul.f32 %v9508_v31, %v21284_v36  ;;  %v9849_v51 = vmul.f32 %v9848_v32, %v21284_v36  ;;  %v10193_v19 = vmul.f32 %v10192_v34, %v21284_v36 }
0x5a8b   :  { %v10541_v24 = vmul.f32 %v10540_v8, %v21284_v36 }
0x5a8c   :  { %v9176_v55 = vadd.f32 %v9175_v20, %v21232_v53  ;;  %v9512_v20 = vstv %s9511_s14  ;;  %v9510_v47 = vadd.f32 %v9509_v35, %v21232_v53  ;;  %v9850_v57 = vadd.f32 %v9849_v51, %v21232_v53 }
0x5a8d   :  { %v10194_v58 = vadd.f32 %v10193_v19, %v21232_v53  ;;  %v10542_v33 = vadd.f32 %v10541_v24, %v21232_v53 }
0x5a8e   :  { %17591 = vmatmul.mubr.msk.f32.vlgmr.msra.gmra.mrb[104].mxu0 %vm251_vm4, %v9176_v55  ;;  %v9852_v55 = vstv %s9851_s17 }
0x5a8f   :  { %18965 = vmatpush3.bf16.msra.mxu0 %v19903_v49  ;;  %17612 = vmatprep.mubr.msk.f32.mxu0 %vm19732_vm1, %v19731_v2 }
0x5a90   :  { %18966 = vmatprep.subr.bf16.mxu0 %v19733_v7 }
0x5a93   :  { %18968 = vmatpush3.bf16.msra.mxu0 %v19913_v52 }
0x5a94   :  { %18975 = vmatprep.subr.bf16.mxu0 %v19733_v7 }
0x5b61   :  { %v9262_v60 = vpop.f32.mrb[104].mxu0 }
0x5b62   :  { %v9263_v42 = vadd.f32 %v9262_v60, %v9192_v41  ;;  %v17592_v61 = vpop.f32.mrb[105].mxu0 }
0x5b64   :  { %v9273_v62 = vadd.f32 %v9272_v43, %v9263_v42 }
0x5b66   :  { %17602 = vmatmul.mubr.msk.f32.vlgmr.msra.gmra.mrb[108].mxu1 %vm251_vm4, %v9273_v62  ;;  %v9517_v62 = vstv %s9515_s6 }
0x5b67   :  { %18971 = vmatpush3.bf16.msra.mxu1 %v19935_v1  ;;  %17623 = vmatprep.mubr.msk.f32.mxu1 %vm19732_vm1, %v19731_v2 }
0x5b68   :  { %18972 = vmatprep.subr.bf16.mxu1 %v19733_v7 }
0x5b6b   :  { %18974 = vmatpush3.bf16.msra.mxu1 %v19945_v5 }
0x5b6c   :  { %18981 = vmatprep.subr.bf16.mxu1 %v19733_v7 }
0x5c39   :  { %v9343_v48 = vpop.f32.mrb[108].mxu1 }
0x5c3a   :  { %v9344_v50 = vadd.f32 %v9343_v48, %v19919_v54  ;;  %v17603_v28 = vpop.f32.mrb[109].mxu1  ;;  %v9518_v48 = vmul.f32 %v9517_v62, %v21227_v27 }
0x5c3c   :  { %v15478_v11 = vmul.f32 -1.442695, %v9344_v50 }
0x5c3e   :  { %19571 = vpow2.f32 %v15478_v11 }
0x5c48   :  { %v19572_v12 = vpop.eup %19571 }
0x5c49   :  { %v9350_v14 = vadd.f32 1.0, %v19572_v12 }
0x5c4b   :  { %19573 = vrcp.f32 %v9350_v14 }
0x5c55   :  { %v19574_v16 = vpop.eup %19573 }
0x5c56   :  { %v9353_v18 = vmul.f32 %v19574_v16, %v9344_v50  ;;  %v9520_v50 = vrot.slane %v9518_v48, 2  ;;  %v9606_v16 = vstv %s9516_s21 }
0x5c58   :  { %17613 = vmatmul.mubr.msk.f32.vlgmr.msra.gmra.mrb[106].mxu0 %vm251_vm4, %v9353_v18  ;;  %v9522_v28 = vadd.f32 %v9520_v50, %v21227_v27 }
0x5c59   :  { %18977 = vmatpush3.bf16.msra.mxu0 %v19807_v6  ;;  %17634 = vmatprep.mubr.msk.f32.mxu0 %vm19732_vm1, %v19731_v2 }
0x5c5a   :  { %18978 = vmatprep.subr.bf16.mxu0 %v19733_v7  ;;  %v9523_v11 = vmul.f32 %v9522_v28, %v9517_v62 }
0x5c5c   :  { %v9525_v12 = vrot.slane %v9523_v11, 2 }
0x5c5d   :  { %18980 = vmatpush3.bf16.msra.mxu0 %v19828_v10 }
0x5c5e   :  { %18987 = vmatprep.subr.bf16.mxu0 %v19733_v7  ;;  %v9527_v14 = vadd.f32 %v9525_v12, %v21227_v27 }
0x5c60   :  { %v9528_v18 = vmul.f32 %v9527_v14, %v9517_v62 }
0x5d2b   :  { %v9423_v21 = vpop.f32.mrb[106].mxu0 }
0x5d2c   :  { %v9424_v0 = vadd.f32 %v9423_v21, %v19951_v9  ;;  %v17614_v40 = vpop.f32.mrb[107].mxu0  ;;  %v9607_v21 = vmul.f32 %v21036_v59, %v9606_v16 }
0x5d2e   :  { %v15480_v22 = vmul.f32 -1.442695, %v9424_v0  ;;  %v9608_v40 = vadd.f32 %v9607_v21, %v19886_v37 }
0x5d30   :  { %19575 = vpow2.f32 %v15480_v22 }
0x5d3a   :  { %v19576_v3 = vpop.eup %19575 }
0x5d3b   :  { %v9430_v4 = vadd.f32 1.0, %v19576_v3  ;;  %v9612_v3 = vrot.slane %v9608_v40, %v19889_v38 }
0x5d3d   :  { %19577 = vrcp.f32 %v9430_v4 }
0x5d47   :  { %v19578_v29 = vpop.eup %19577 }
0x5d48   :  { %v9433_v30 = vmul.f32 %v19578_v29, %v9424_v0  ;;  %v9530_v0 = vrot.slane %v9528_v18, 2 }
0x5d4a   :  { %17624 = vmatmul.mubr.msk.f32.vlgmr.msra.gmra.mrb[110].mxu1 %vm251_vm4, %v9433_v30  ;;  %v9532_v22 = vadd.f32 %v9530_v0, %v21227_v27 }
0x5d4b   :  { %18983 = vmatpush3.bf16.msra.mxu1 %v19838_v13  ;;  %17645 = vmatprep.mubr.msk.f32.mxu1 %vm19732_vm1, %v19731_v2 }
0x5d4c   :  { %18984 = vmatprep.subr.bf16.mxu1 %v19733_v7 }
0x5d4f   :  { %18986 = vmatpush3.bf16.msra.mxu1 %v19867_v26 }
0x5d50   :  { %18993 = vmatprep.subr.bf16.mxu1 %v19733_v7 }
0x5e1d   :  { %v9503_v23 = vpop.f32.mrb[110].mxu1 }
0x5e1e   :  { %v9504_v45 = vadd.f32 %v9503_v23, %v19963_v25  ;;  %v17625_v46 = vpop.f32.mrb[111].mxu1 }
0x5e20   :  { %v9513_v39 = vmul.f32 %v9512_v20, %v9504_v45  ;;  %v9853_v63 = vmul.f32 %v9852_v55, %v9504_v45  ;;  %v10197_v17 = vmul.f32 %v10196_v56, %v9504_v45  ;;  %v10545_v41 = vmul.f32 %v10544_v44, %v9504_v45 }
0x5e22   :  { %v9514_v43 = vadd.f32 %v9513_v39, %v9510_v47  ;;  %v21343_v60 = vadd.f32 %v9853_v63, %v9850_v57  ;;  %v21345_v42 = vadd.f32 %v10197_v17, %v10194_v58  ;;  %v21347_v61 = vadd.f32 %v10545_v41, %v10542_v33 }
0x5e23   :  { %v10891_v57 = vstv %s10890_s22  ;;  %v9856_v39 = vstv %s9855_s23  ;;  %v10200_v63 = vstv %s10199_s24  ;;  %v10548_v17 = vstv %s10547_s4 }
0x5e24   :  { %17635 = vmatmul.mubr.msk.f32.vlgmr.msra.gmra.mrb[108].mxu0 %vm251_vm4, %v9514_v43  ;;  %v10892_v58 = vmul.f32 %v10891_v57, %v21284_v36  ;;  %v10895_v41 = vstv %s10894_s25 }
0x5e25   :  { %18989 = vmatpush3.bf16.msra.mxu0 %v19903_v49  ;;  %17656 = vmatprep.mubr.msk.f32.mxu0 %vm19732_vm1, %v19731_v2 }
0x5e26   :  { %18990 = vmatprep.subr.bf16.mxu0 %v19733_v7  ;;  %v10893_v48 = vadd.f32 %v10892_v58, %v21232_v53  ;;  %v9861_v53 = vstv %s9859_s16 }
0x5e29   :  { %18992 = vmatpush3.bf16.msra.mxu0 %v19913_v52 }
0x5e2a   :  { %18999 = vmatprep.subr.bf16.mxu0 %v19733_v7 }
0x5ef7   :  { %v9602_v4 = vpop.f32.mrb[108].mxu0 }
0x5ef8   :  { %v9603_v29 = vadd.f32 %v9602_v4, %v9532_v22  ;;  %v17636_v30 = vpop.f32.mrb[109].mxu0  ;;  %v9950_v22 = vstv %s9860_s19  ;;  %v21420_v4 = vld [vmem:[%s22222_s8] sm:$0xff] }
0x5efa   :  { %v9613_v31 = vadd.f32 %v9612_v3, %v9603_v29  ;;  %v9951_v29 = vmul.f32 %v21420_v4, %v9950_v22  ;;  %v10298_v22 = vstv %s10208_s12 }
0x5efc   :  { %17646 = vmatmul.mubr.msk.f32.vlgmr.msra.gmra.mrb[112].mxu1 %vm251_vm4, %v9613_v31  ;;  %v9952_v31 = vadd.f32 %v9951_v29, %v19886_v37  ;;  %v10299_v29 = vmul.f32 %v21420_v4, %v10298_v22 }
0x5efd   :  { %18995 = vmatpush3.bf16.msra.mxu1 %v19935_v1  ;;  %17667 = vmatprep.mubr.msk.f32.mxu1 %vm19732_vm1, %v19731_v2 }
0x5efe   :  { %18996 = vmatprep.subr.bf16.mxu1 %v19733_v7 }
0x5f01   :  { %18998 = vmatpush3.bf16.msra.mxu1 %v19945_v5 }
0x5f02   :  { %19005 = vmatprep.subr.bf16.mxu1 %v19733_v7 }
0x5fcf   :  { %v9683_v59 = vpop.f32.mrb[112].mxu1 }
0x5fd0   :  { %v9684_v32 = vadd.f32 %v9683_v59, %v19919_v54  ;;  %v17647_v34 = vpop.f32.mrb[113].mxu1 }
0x5fd2   :  { %v15484_v8 = vmul.f32 -1.442695, %v9684_v32 }
0x5fd4   :  { %19579 = vpow2.f32 %v15484_v8 }
0x5fde   :  { %v19580_v35 = vpop.eup %19579 }
0x5fdf   :  { %v9690_v51 = vadd.f32 1.0, %v19580_v35 }
0x5fe1   :  { %19581 = vrcp.f32 %v9690_v51 }
0x5feb   :  { %v19582_v19 = vpop.eup %19581 }
0x5fec   :  { %v9693_v24 = vmul.f32 %v19582_v19, %v9684_v32  ;;  %v9956_v32 = vrot.slane %v9952_v31, %v19889_v38  ;;  %v10300_v31 = vadd.f32 %v10299_v29, %v19886_v37 }
0x5fee   :  { %17657 = vmatmul.mubr.msk.f32.vlgmr.msra.gmra.mrb[110].mxu0 %vm251_vm4, %v9693_v24 }
0x5fef   :  { %19001 = vmatpush3.bf16.msra.mxu0 %v19807_v6  ;;  %17678 = vmatprep.mubr.msk.f32.mxu0 %vm19732_vm1, %v19731_v2 }
0x5ff0   :  { %19002 = vmatprep.subr.bf16.mxu0 %v19733_v7 }
0x5ff3   :  { %19004 = vmatpush3.bf16.msra.mxu0 %v19828_v10 }
0x5ff4   :  { %19011 = vmatprep.subr.bf16.mxu0 %v19733_v7 }
0x60c1   :  { %v9763_v23 = vpop.f32.mrb[110].mxu0 }
0x60c2   :  { %v9764_v20 = vadd.f32 %v9763_v23, %v19951_v9  ;;  %v17658_v55 = vpop.f32.mrb[111].mxu0 }
0x60c4   :  { %v15486_v56 = vmul.f32 -1.442695, %v9764_v20 }
0x60c6   :  { %19583 = vpow2.f32 %v15486_v56 }
0x60d0   :  { %v19584_v44 = vpop.eup %19583 }
0x60d1   :  { %v9770_v45 = vadd.f32 1.0, %v19584_v44 }
0x60d3   :  { %19585 = vrcp.f32 %v9770_v45 }
0x60dd   :  { %v19586_v46 = vpop.eup %19585 }
0x60de   :  { %v9773_v47 = vmul.f32 %v19586_v46, %v9764_v20 }
0x60e0   :  { %17668 = vmatmul.mubr.msk.f32.vlgmr.msra.gmra.mrb[114].mxu1 %vm251_vm4, %v9773_v47 }
0x60e1   :  { %19007 = vmatpush3.bf16.msra.mxu1 %v19838_v13  ;;  %17689 = vmatprep.mubr.msk.f32.mxu1 %vm19732_vm1, %v19731_v2 }
0x60e2   :  { %19008 = vmatprep.subr.bf16.mxu1 %v19733_v7 }
0x60e5   :  { %19010 = vmatpush3.bf16.msra.mxu1 %v19867_v26 }
0x60e6   :  { %19017 = vmatprep.subr.bf16.mxu1 %v19733_v7 }
0x61b3   :  { %v9843_v33 = vpop.f32.mrb[114].mxu1 }
0x61b4   :  { %v9844_v43 = vadd.f32 %v9843_v33, %v19963_v25  ;;  %v17669_v62 = vpop.f32.mrb[115].mxu1 }
0x61b5   :  { %v10552_v62 = vstv %s10551_s10 }
0x61b6   :  { %v9857_v50 = vmul.f32 %v9856_v39, %v9844_v43  ;;  %v10201_v28 = vmul.f32 %v10200_v63, %v9844_v43  ;;  %v10549_v11 = vmul.f32 %v10548_v17, %v9844_v43  ;;  %v10896_v12 = vmul.f32 %v10895_v41, %v9844_v43 }
0x61b7   :  { %v10204_v43 = vstv %s10203_s30 }
0x61b8   :  { %v9858_v14 = vadd.f32 %v9857_v50, %v21343_v60  ;;  %v21398_v16 = vadd.f32 %v10201_v28, %v21345_v42  ;;  %v21401_v36 = vadd.f32 %v10549_v11, %v21347_v61  ;;  %v21403_v18 = vadd.f32 %v10896_v12, %v10893_v48 }
0x61b9   :  { %v9862_v60 = vmul.f32 %v9861_v53, %v21227_v27  ;;  %v10899_v48 = vstv %s10898_s5 }
0x61ba   :  { %17679 = vmatmul.mubr.msk.f32.vlgmr.msra.gmra.mrb[112].mxu0 %vm251_vm4, %v9858_v14 }
0x61bb   :  { %19013 = vmatpush3.bf16.msra.mxu0 %v19903_v49  ;;  %17700 = vmatprep.mubr.msk.f32.mxu0 %vm19732_vm1, %v19731_v2  ;;  %v9864_v42 = vrot.slane %v9862_v60, 2 }
0x61bc   :  { %19014 = vmatprep.subr.bf16.mxu0 %v19733_v7 }
0x61bd   :  { %v9866_v61 = vadd.f32 %v9864_v42, %v21227_v27 }
0x61bf   :  { %19016 = vmatpush3.bf16.msra.mxu0 %v19913_v52  ;;  %v9867_v21 = vmul.f32 %v9866_v61, %v9861_v53 }
0x61c0   :  { %19023 = vmatprep.subr.bf16.mxu0 %v19733_v7 }
0x61c1   :  { %v9869_v0 = vrot.slane %v9867_v21, 2 }
0x61c3   :  { %v9871_v40 = vadd.f32 %v9869_v0, %v21227_v27 }
0x61c5   :  { %v9872_v3 = vmul.f32 %v9871_v40, %v9861_v53 }
0x61c7   :  { %v9874_v30 = vrot.slane %v9872_v3, 2 }
0x61c9   :  { %v9876_v59 = vadd.f32 %v9874_v30, %v21227_v27 }
0x628d   :  { %v9946_v34 = vpop.f32.mrb[112].mxu0 }
0x628e   :  { %v9947_v8 = vadd.f32 %v9946_v34, %v9876_v59  ;;  %v17680_v35 = vpop.f32.mrb[113].mxu0 }
0x6290   :  { %v9957_v51 = vadd.f32 %v9956_v32, %v9947_v8  ;;  %v10304_v32 = vrot.slane %v10300_v31, %v19889_v38 }
0x6292   :  { %17690 = vmatmul.mubr.msk.f32.vlgmr.msra.gmra.mrb[116].mxu1 %vm251_vm4, %v9957_v51 }
0x6293   :  { %19019 = vmatpush3.bf16.msra.mxu1 %v19935_v1  ;;  %17711 = vmatprep.mubr.msk.f32.mxu1 %vm19732_vm1, %v19731_v2 }
0x6294   :  { %19020 = vmatprep.subr.bf16.mxu1 %v19733_v7 }
0x6297   :  { %19022 = vmatpush3.bf16.msra.mxu1 %v19945_v5 }
0x6298   :  { %19029 = vmatprep.subr.bf16.mxu1 %v19733_v7 }
0x6365   :  { %v10027_v19 = vpop.f32.mrb[116].mxu1 }
0x6366   :  { %v10028_v24 = vadd.f32 %v10027_v19, %v19919_v54  ;;  %v17691_v23 = vpop.f32.mrb[117].mxu1 }
0x6368   :  { %v15490_v20 = vmul.f32 -1.442695, %v10028_v24 }
0x636a   :  { %19587 = vpow2.f32 %v15490_v20 }
0x6374   :  { %v19588_v55 = vpop.eup %19587 }
0x6375   :  { %v10034_v56 = vadd.f32 1.0, %v19588_v55 }
0x6377   :  { %19589 = vrcp.f32 %v10034_v56 }
0x6381   :  { %v19590_v44 = vpop.eup %19589 }
0x6382   :  { %v10037_v45 = vmul.f32 %v19590_v44, %v10028_v24 }
0x6384   :  { %17701 = vmatmul.mubr.msk.f32.vlgmr.msra.gmra.mrb[114].mxu0 %vm251_vm4, %v10037_v45 }
0x6385   :  { %19025 = vmatpush3.bf16.msra.mxu0 %v19807_v6  ;;  %17722 = vmatprep.mubr.msk.f32.mxu0 %vm19732_vm1, %v19731_v2 }
0x6386   :  { %19026 = vmatprep.subr.bf16.mxu0 %v19733_v7 }
0x6389   :  { %19028 = vmatpush3.bf16.msra.mxu0 %v19828_v10 }
0x638a   :  { %19035 = vmatprep.subr.bf16.mxu0 %v19733_v7 }
0x6457   :  { %v10107_v46 = vpop.f32.mrb[114].mxu0 }
0x6458   :  { %v10108_v47 = vadd.f32 %v10107_v46, %v19951_v9  ;;  %v17702_v57 = vpop.f32.mrb[115].mxu0 }
0x645a   :  { %v15492_v58 = vmul.f32 -1.442695, %v10108_v47 }
0x645c   :  { %19591 = vpow2.f32 %v15492_v58 }
0x6466   :  { %v19592_v33 = vpop.eup %19591 }
0x6467   :  { %v10114_v39 = vadd.f32 1.0, %v19592_v33 }
0x6469   :  { %19593 = vrcp.f32 %v10114_v39 }
0x6473   :  { %v19594_v63 = vpop.eup %19593 }
0x6474   :  { %v10117_v17 = vmul.f32 %v19594_v63, %v10108_v47 }
0x6476   :  { %17712 = vmatmul.mubr.msk.f32.vlgmr.msra.gmra.mrb[118].mxu1 %vm251_vm4, %v10117_v17 }
0x6477   :  { %19031 = vmatpush3.bf16.msra.mxu1 %v19838_v13  ;;  %17733 = vmatprep.mubr.msk.f32.mxu1 %vm19732_vm1, %v19731_v2 }
0x6478   :  { %19032 = vmatprep.subr.bf16.mxu1 %v19733_v7 }
0x647b   :  { %19034 = vmatpush3.bf16.msra.mxu1 %v19867_v26 }
0x647c   :  { %19041 = vmatprep.subr.bf16.mxu1 %v19733_v7 }
0x6549   :  { %v10187_v41 = vpop.f32.mrb[118].mxu1 }
0x654a   :  { %v10188_v50 = vadd.f32 %v10187_v41, %v19963_v25  ;;  %v17713_v28 = vpop.f32.mrb[119].mxu1 }
0x654c   :  { %v10205_v11 = vmul.f32 %v10204_v43, %v10188_v50  ;;  %v10553_v12 = vmul.f32 %v10552_v62, %v10188_v50  ;;  %v10900_v14 = vmul.f32 %v10899_v48, %v10188_v50  ;;  %v10556_v43 = vstv %s10555_s13 }
0x654d   :  { %v10903_v62 = vstv %s10902_s15 }
0x654e   :  { %v10206_v53 = vadd.f32 %v10205_v11, %v21398_v16  ;;  %v21455_v60 = vadd.f32 %v10553_v12, %v21401_v36  ;;  %v21458_v42 = vadd.f32 %v10900_v14, %v21403_v18  ;;  %v10209_v16 = vstv %s10207_s11 }
0x654f   :  { %v10210_v36 = vmul.f32 %v10209_v16, %v21227_v27 }
0x6550   :  { %17723 = vmatmul.mubr.msk.f32.vlgmr.msra.gmra.mrb[116].mxu0 %vm251_vm4, %v10206_v53  ;;  %v10560_v53 = vstv %s21248_s29 }
0x6551   :  { %19037 = vmatpush3.bf16.msra.mxu0 %v19903_v49  ;;  %17744 = vmatprep.mubr.msk.f32.mxu0 %vm19732_vm1, %v19731_v2  ;;  %v10212_v61 = vrot.slane %v10210_v36, 2 }
0x6552   :  { %19038 = vmatprep.subr.bf16.mxu0 %v19733_v7 }
0x6553   :  { %v10214_v18 = vadd.f32 %v10212_v61, %v21227_v27 }
0x6555   :  { %19040 = vmatpush3.bf16.msra.mxu0 %v19913_v52  ;;  %v10215_v21 = vmul.f32 %v10214_v18, %v10209_v16 }
0x6556   :  { %19047 = vmatprep.subr.bf16.mxu0 %v19733_v7 }
0x6557   :  { %v10217_v0 = vrot.slane %v10215_v21, 2  ;;  %v10649_v21 = vstv %s10559_s0 }
0x6559   :  { %v10219_v40 = vadd.f32 %v10217_v0, %v21227_v27 }
0x655b   :  { %v10220_v3 = vmul.f32 %v10219_v40, %v10209_v16  ;;  %v10561_v16 = vmul.f32 %v10560_v53, %v21227_v27  ;;  %v10650_v40 = vmul.f32 %v21420_v4, %v10649_v21 }
0x655d   :  { %v10222_v30 = vrot.slane %v10220_v3, 2  ;;  %v10651_v3 = vadd.f32 %v10650_v40, %v19886_v37 }
0x655f   :  { %v10224_v59 = vadd.f32 %v10222_v30, %v21227_v27  ;;  %v10655_v30 = vrot.slane %v10651_v3, %v19889_v38 }
0x6623   :  { %v10294_v34 = vpop.f32.mrb[116].mxu0 }
0x6624   :  { %v10295_v8 = vadd.f32 %v10294_v34, %v10224_v59  ;;  %v17724_v35 = vpop.f32.mrb[117].mxu0 }
0x6626   :  { %v10305_v51 = vadd.f32 %v10304_v32, %v10295_v8 }
0x6628   :  { %17734 = vmatmul.mubr.msk.f32.vlgmr.msra.gmra.mrb[120].mxu1 %vm251_vm4, %v10305_v51 }
0x6629   :  { %19043 = vmatpush3.bf16.msra.mxu1 %v19935_v1  ;;  %17755 = vmatprep.mubr.msk.f32.mxu1 %vm19732_vm1, %v19731_v2 }
0x662a   :  { %19044 = vmatprep.subr.bf16.mxu1 %v19733_v7 }
0x662d   :  { %19046 = vmatpush3.bf16.msra.mxu1 %v19945_v5 }
0x662e   :  { %19053 = vmatprep.subr.bf16.mxu1 %v19733_v7 }
0x66fb   :  { %v10375_v19 = vpop.f32.mrb[120].mxu1 }
0x66fc   :  { %v10376_v24 = vadd.f32 %v10375_v19, %v19919_v54  ;;  %v17735_v23 = vpop.f32.mrb[121].mxu1 }
0x66fe   :  { %v15496_v20 = vmul.f32 -1.442695, %v10376_v24 }
0x6700   :  { %19595 = vpow2.f32 %v15496_v20 }
0x670a   :  { %v19596_v55 = vpop.eup %19595 }
0x670b   :  { %v10382_v56 = vadd.f32 1.0, %v19596_v55  ;;  %v21535_v55 = vld [vmem:[%s22216_s2 + $0x20] sm:$0xf]  ;;  %s10906_s2 = smul.f32 0.13095239, %s21248_s29  ;;  %s21577_s29 = sld [smem:[#allocation3 + $0x6]] }
0x670d   :  { %19597 = vrcp.f32 %v10382_v56  ;;  %v15508_v56 = vld [vmem:[%s22215_s1 + $0x28] sm:$0xff] }
0x6711   :  { %s21581_s18 = ssub.f32 %s21577_s29, %s21244_s20 }
0x6713   :  { %s10989_s6 = smul.f32 0.0, %s21581_s18 }
0x6714   :  { %s11321_s22 = smul.f32 0.2, %s21581_s18 }
0x6715   :  { %s10990_s21 = sadd.f32 %s21244_s20, %s10989_s6  ;;  %s11655_s24 = smul.f32 0.075, %s21581_s18 }
0x6716   :  { %s11325_s23 = sadd.f32 %s21244_s20, %s11321_s22  ;;  %s11995_s4 = smul.f32 0.9777778, %s21581_s18 }
0x6717   :  { %v19598_v44 = vpop.eup %19597  ;;  %s12339_s25 = smul.f32 2.9525986, %s21581_s18 }
0x6718   :  { %v10385_v45 = vmul.f32 %v19598_v44, %v10376_v24  ;;  %s12687_s16 = smul.f32 2.8462753, %s21581_s18 }
0x6719   :  { %s11659_s19 = smul.f32 0.225, %s21581_s18 }
0x671a   :  { %17745 = vmatmul.mubr.msk.f32.vlgmr.msra.gmra.mrb[118].mxu0 %vm251_vm4, %v10385_v45  ;;  %s11999_s26 = smul.f32 -3.7333333, %s21581_s18 }
0x671b   :  { %19049 = vmatpush3.bf16.msra.mxu0 %v19807_v6  ;;  %17766 = vmatprep.mubr.msk.f32.mxu0 %vm19732_vm1, %v19731_v2  ;;  %s12343_s27 = smul.f32 -11.595794, %s21581_s18 }
0x671c   :  { %19050 = vmatprep.subr.bf16.mxu0 %v19733_v7  ;;  %s12691_s30 = smul.f32 -10.757576, %s21581_s18 }
0x671d   :  { %s11663_s10 = smul.f32 0.3, %s21581_s18 }
0x671e   :  { %s13038_s11 = smul.f32 0.091145836, %s21581_s18 }
0x671f   :  { %19052 = vmatpush3.bf16.msra.mxu0 %v19828_v10  ;;  %s11664_s5 = sadd.f32 %s21244_s20, %s11663_s10  ;;  %s12003_s12 = smul.f32 3.5555556, %s21581_s18 }
0x6720   :  { %19059 = vmatprep.subr.bf16.mxu0 %v19733_v7  ;;  %s12347_s13 = smul.f32 9.822893, %s21581_s18 }
0x6721   :  { %s12695_s15 = smul.f32 8.906423, %s21581_s18 }
0x6722   :  { %s13042_s0 = smul.f32 0.4492363, %s21581_s18 }
0x6723   :  { %s12007_s28 = smul.f32 0.8, %s21581_s18 }
0x6724   :  { %s12351_s17 = smul.f32 -0.29080933, %s21581_s18 }
0x6725   :  { %s12008_s14 = sadd.f32 %s21244_s20, %s12007_s28  ;;  %s12699_s3 = smul.f32 0.2784091, %s21581_s18 }
0x67ed   :  { %v10455_v46 = vpop.f32.mrb[118].mxu0 }
0x67ee   :  { %v10456_v47 = vadd.f32 %v10455_v46, %v19951_v9  ;;  %v17746_v57 = vpop.f32.mrb[119].mxu0 }
0x67f0   :  { %v15498_v58 = vmul.f32 -1.442695, %v10456_v47 }
0x67f2   :  { %19599 = vpow2.f32 %v15498_v58 }
0x67fc   :  { %v19600_v33 = vpop.eup %19599 }
0x67fd   :  { %v10462_v39 = vadd.f32 1.0, %v19600_v33 }
0x67ff   :  { %19601 = vrcp.f32 %v10462_v39 }
0x6809   :  { %v19602_v63 = vpop.eup %19601 }
0x680a   :  { %v10465_v17 = vmul.f32 %v19602_v63, %v10456_v47 }
0x680c   :  { %17756 = vmatmul.mubr.msk.f32.vlgmr.msra.gmra.mrb[122].mxu1 %vm251_vm4, %v10465_v17 }
0x680d   :  { %19055 = vmatpush3.bf16.msra.mxu1 %v19838_v13  ;;  %17777 = vmatprep.mubr.msk.f32.mxu1 %vm19732_vm1, %v19731_v2 }
0x680e   :  { %19056 = vmatprep.subr.bf16.mxu1 %v19733_v7 }
0x6811   :  { %19058 = vmatpush3.bf16.msra.mxu1 %v19867_v26 }
0x6812   :  { %19065 = vmatprep.subr.bf16.mxu1 %v19733_v7 }
0x68df   :  { %v10535_v41 = vpop.f32.mrb[122].mxu1 }
0x68e0   :  { %v10536_v48 = vadd.f32 %v10535_v41, %v19963_v25  ;;  %v17757_v50 = vpop.f32.mrb[123].mxu1 }
0x68e2   :  { %v10557_v28 = vmul.f32 %v10556_v43, %v10536_v48  ;;  %v10904_v11 = vmul.f32 %v10903_v62, %v10536_v48  ;;  %v10907_v43 = vstv %s10906_s2  ;;  %s13046_s2 = smul.f32 0.6510417, %s21581_s18 }
0x68e4   :  { %v10558_v12 = vadd.f32 %v10557_v28, %v21455_v60  ;;  %v21504_v14 = vadd.f32 %v10904_v11, %v21458_v42  ;;  %v10563_v60 = vrot.slane %v10561_v16, 2  ;;  %v10991_v11 = vstv %s10989_s6  ;;  %s12355_s6 = smul.f32 0.8888889, %s21581_s18 }
0x68e6   :  { %17767 = vmatmul.mubr.msk.f32.vlgmr.msra.gmra.mrb[120].mxu0 %vm251_vm4, %v10558_v12  ;;  %v10565_v42 = vadd.f32 %v10563_v60, %v21227_v27 }
0x68e7   :  { %19061 = vmatpush3.bf16.msra.mxu0 %v19903_v49  ;;  %17788 = vmatprep.mubr.msk.f32.mxu0 %vm19732_vm1, %v19731_v2 }
0x68e8   :  { %19062 = vmatprep.subr.bf16.mxu0 %v19733_v7  ;;  %v10566_v36 = vmul.f32 %v10565_v42, %v10560_v53 }
0x68ea   :  { %v10568_v61 = vrot.slane %v10566_v36, 2  ;;  %v11080_v36 = vstv %s10990_s21  ;;  %s12356_s21 = sadd.f32 %s21244_s20, %s12355_s6 }
0x68eb   :  { %19064 = vmatpush3.bf16.msra.mxu0 %v19913_v52 }
0x68ec   :  { %17802 = vmatprep.subr.mxu0 %v19731_v2  ;;  %v10570_v18 = vadd.f32 %v10568_v61, %v21227_v27 }
0x68ee   :  { %v10571_v0 = vmul.f32 %v10570_v18, %v10560_v53  ;;  %v11081_v18 = vmul.f32 %v21420_v4, %v11080_v36 }
0x68f0   :  { %v10573_v22 = vrot.slane %v10571_v0, 2  ;;  %v11082_v0 = vadd.f32 %v11081_v18, %v19886_v37 }
0x68f2   :  { %v10575_v29 = vadd.f32 %v10573_v22, %v21227_v27  ;;  %v11086_v22 = vrot.slane %v11082_v0, %v19889_v38 }
0x69b9   :  { %v10645_v31 = vpop.f32.mrb[120].mxu0 }
0x69ba   :  { %v10646_v59 = vadd.f32 %v10645_v31, %v10575_v29  ;;  %v17768_v32 = vpop.f32.mrb[121].mxu0 }
0x69bc   :  { %v10656_v34 = vadd.f32 %v10655_v30, %v10646_v59 }
0x69be   :  { %17778 = vmatmul.mubr.msk.f32.vlgmr.msra.gmra.mrb[124].mxu1 %vm251_vm4, %v10656_v34 }
0x69bf   :  { %19067 = vmatpush3.bf16.msra.mxu1 %v19935_v1  ;;  %17799 = vmatprep.mubr.msk.f32.mxu1 %vm19732_vm1, %v19731_v2 }
0x69c0   :  { %19068 = vmatprep.subr.bf16.mxu1 %v19733_v7 }
0x69c3   :  { %19070 = vmatpush3.bf16.msra.mxu1 %v19945_v5 }
0x69c4   :  { %19071 = vmatprep.subr.bf16.mxu1 %v19733_v7 }
0x6a91   :  { %v10726_v27 = vpop.f32.mrb[124].mxu1 }
0x6a92   :  { %v10727_v8 = vadd.f32 %v10726_v27, %v19919_v54  ;;  %v17779_v35 = vpop.f32.mrb[125].mxu1 }
0x6a94   :  { %v15502_v51 = vmul.f32 -1.442695, %v10727_v8 }
0x6a96   :  { %19603 = vpow2.f32 %v15502_v51 }
0x6aa0   :  { %v19604_v19 = vpop.eup %19603 }
0x6aa1   :  { %v10733_v24 = vadd.f32 1.0, %v19604_v19 }
0x6aa3   :  { %19605 = vrcp.f32 %v10733_v24 }
0x6aad   :  { %v19606_v23 = vpop.eup %19605 }
0x6aae   :  { %v10736_v20 = vmul.f32 %v19606_v23, %v10727_v8 }
0x6ab0   :  { %17789 = vmatmul.mubr.msk.f32.vlgmr.msra.gmra.mrb[122].mxu0 %vm251_vm4, %v10736_v20 }
0x6ab1   :  { %17803 = vmatpush3.msk.msra.mxu0 %vm77_vm0, %v21535_v55  ;;  %17804 = vmatprep.mubr.msk.f32.mxu0 %vm19732_vm1, %v19731_v2 }
0x6ab2   :  { %19077 = vmatprep.subr.bf16.mxu0 %v19733_v7 }
0x6ab4   :  { %17805 = vmatmul.mubr.msk.f32.vlgmr.msra.gmra.mrb[124].mxu0 %vm73_vm2, %v15508_v56 }
0x6ab5   :  { %19079 = vmatpush3.bf16.msra.mxu0 %v19838_v13  ;;  %17826 = vmatprep.mubr.msk.f32.mxu0 %vm19732_vm1, %v19731_v2 }
0x6ab6   :  { %19080 = vmatprep.subr.bf16.mxu0 %v19733_v7 }
0x6ab9   :  { %19082 = vmatpush3.bf16.msra.mxu0 %v19867_v26 }
0x6aba   :  { %19089 = vmatprep.subr.bf16.mxu0 %v19733_v7 }
0x6b83   :  { %v10806_v44 = vpop.f32.mrb[122].mxu0 }
0x6b84   :  { %v10807_v45 = vadd.f32 %v10806_v44, %v19951_v9  ;;  %v17790_v46 = vpop.f32.mrb[123].mxu0 }
0x6b86   :  { %v15504_v47 = vmul.f32 -1.442695, %v10807_v45 }
0x6b87   :  { %v21560_v63 = vpop.f32.mrb[124].mxu0 }
0x6b88   :  { %19607 = vpow2.f32 %v15504_v47  ;;  %v17806_v17 = vpop.f32.mrb[125].mxu0  ;;  %v10992_v12 = vmul.f32 %v10991_v11, %v21560_v63 }
0x6b92   :  { %v19608_v57 = vpop.eup %19607 }
0x6b93   :  { %v10813_v58 = vadd.f32 1.0, %v19608_v57 }
0x6b95   :  { %19609 = vrcp.f32 %v10813_v58 }
0x6b9f   :  { %v19610_v33 = vpop.eup %19609 }
0x6ba0   :  { %v10816_v39 = vmul.f32 %v19610_v33, %v10807_v45 }
0x6ba2   :  { %17800 = vmatmul.mubr.msk.f32.vlgmr.msra.gmra.mrb[126].mxu1 %vm251_vm4, %v10816_v39  ;;  %v11322_v39 = vstv %s11321_s22 }
0x6ba3   :  { %19073 = vmatpush3.bf16.msra.mxu1 %v19807_v6  ;;  %17815 = vmatprep.mubr.msk.f32.mxu1 %vm19732_vm1, %v19731_v2 }
0x6ba4   :  { %19074 = vmatprep.subr.bf16.mxu1 %v19733_v7 }
0x6ba7   :  { %19076 = vmatpush3.bf16.msra.mxu1 %v19828_v10 }
0x6ba8   :  { %19083 = vmatprep.subr.bf16.mxu1 %v19733_v7 }
0x6c75   :  { %v10886_v41 = vpop.f32.mrb[126].mxu1 }
0x6c76   :  { %v10887_v62 = vadd.f32 %v10886_v41, %v19963_v25  ;;  %v17801_v48 = vpop.f32.mrb[127].mxu1 }
0x6c78   :  { %v10908_v50 = vmul.f32 %v10907_v43, %v10887_v62  ;;  %v11326_v43 = vmul.f32 %v11322_v39, %v21560_v63 }
0x6c7a   :  { %v21565_v28 = vadd.f32 %v10908_v50, %v21504_v14  ;;  %v10994_v14 = vrot.slane %v10992_v12, 2  ;;  %v11328_v62 = vrot.slane %v11326_v43, 2  ;;  %v12000_v43 = vstv %s11999_s26 }
0x6c7c   :  { %10910 = vst.msk [vmem:[#allocation2 + $0xa] sm:$0x3] %vm151_vm3, %v21565_v28  ;;  %17816 = vmatmul.mubr.msk.f32.vlgmr.msra.gmra.mrb[128].mxu1 %vm251_vm4, %v21565_v28  ;;  %v10996_v53 = vadd.f32 %v10994_v14, %v21560_v63  ;;  %v11330_v48 = vadd.f32 %v11328_v62, %v21560_v63  ;;  %v11414_v14 = vstv %s11325_s23  ;;  %v12344_v62 = vstv %s12343_s27 }
0x6c7d   :  { %19085 = vmatpush3.bf16.msra.mxu1 %v19903_v49  ;;  %17837 = vmatprep.mubr.msk.f32.mxu1 %vm19732_vm1, %v19731_v2 }
0x6c7e   :  { %19086 = vmatprep.subr.bf16.mxu1 %v19733_v7  ;;  %v10997_v16 = vmul.f32 %v10996_v53, %v10991_v11  ;;  %v11331_v50 = vmul.f32 %v11330_v48, %v11322_v39  ;;  %v12692_v48 = vstv %s12691_s30 }
0x6c80   :  { %v10999_v60 = vrot.slane %v10997_v16, 2  ;;  %v11415_v16 = vmul.f32 %v21420_v4, %v11414_v14 }
0x6c81   :  { %19088 = vmatpush3.bf16.msra.mxu1 %v19913_v52 }
0x6c82   :  { %19095 = vmatprep.subr.bf16.mxu1 %v19733_v7  ;;  %v11001_v42 = vadd.f32 %v10999_v60, %v21560_v63 }
0x6c84   :  { %v11002_v61 = vmul.f32 %v11001_v42, %v10991_v11  ;;  %v11333_v11 = vrot.slane %v11331_v50, 2  ;;  %v11416_v42 = vadd.f32 %v11415_v16, %v19886_v37 }
0x6c86   :  { %v11004_v21 = vrot.slane %v11002_v61, 2  ;;  %v11335_v12 = vadd.f32 %v11333_v11, %v21560_v63  ;;  %v11420_v61 = vrot.slane %v11416_v42, %v19889_v38 }
0x6c88   :  { %v11006_v40 = vadd.f32 %v11004_v21, %v21560_v63  ;;  %v11336_v53 = vmul.f32 %v11335_v12, %v11322_v39 }
0x6c8a   :  { %v11338_v60 = vrot.slane %v11336_v53, 2 }
0x6c8c   :  { %v11340_v36 = vadd.f32 %v11338_v60, %v21560_v63 }
0x6d4f   :  { %v11076_v3 = vpop.f32.mrb[128].mxu1 }
0x6d50   :  { %v11077_v29 = vadd.f32 %v11076_v3, %v11006_v40  ;;  %v17817_v30 = vpop.f32.mrb[129].mxu1 }
0x6d52   :  { %v11087_v31 = vadd.f32 %v11086_v22, %v11077_v29 }
0x6d54   :  { %17827 = vmatmul.mubr.msk.f32.vlgmr.msra.gmra.mrb[126].mxu0 %vm251_vm4, %v11087_v31 }
0x6d55   :  { %19091 = vmatpush3.bf16.msra.mxu0 %v19935_v1  ;;  %17848 = vmatprep.mubr.msk.f32.mxu0 %vm19732_vm1, %v19731_v2 }
0x6d56   :  { %19092 = vmatprep.subr.bf16.mxu0 %v19733_v7 }
0x6d59   :  { %19094 = vmatpush3.bf16.msra.mxu0 %v19945_v5 }
0x6d5a   :  { %19101 = vmatprep.subr.bf16.mxu0 %v19733_v7 }
0x6e27   :  { %v11157_v59 = vpop.f32.mrb[126].mxu0 }
0x6e28   :  { %v11158_v32 = vadd.f32 %v11157_v59, %v19919_v54  ;;  %v17828_v34 = vpop.f32.mrb[127].mxu0 }
0x6e2a   :  { %v15513_v27 = vmul.f32 -1.442695, %v11158_v32 }
0x6e2c   :  { %19611 = vpow2.f32 %v15513_v27 }
0x6e36   :  { %v19612_v8 = vpop.eup %19611 }
0x6e37   :  { %v11164_v35 = vadd.f32 1.0, %v19612_v8 }
0x6e39   :  { %19613 = vrcp.f32 %v11164_v35 }
0x6e43   :  { %v19614_v51 = vpop.eup %19613 }
0x6e44   :  { %v11167_v19 = vmul.f32 %v19614_v51, %v11158_v32 }
0x6e46   :  { %17838 = vmatmul.mubr.msk.f32.vlgmr.msra.gmra.mrb[130].mxu1 %vm251_vm4, %v11167_v19 }
0x6e47   :  { %19097 = vmatpush3.bf16.msra.mxu1 %v19807_v6  ;;  %17859 = vmatprep.mubr.msk.f32.mxu1 %vm19732_vm1, %v19731_v2 }
0x6e48   :  { %19098 = vmatprep.subr.bf16.mxu1 %v19733_v7 }
0x6e4b   :  { %19100 = vmatpush3.bf16.msra.mxu1 %v19828_v10 }
0x6e4c   :  { %19107 = vmatprep.subr.bf16.mxu1 %v19733_v7 }
0x6f19   :  { %v11237_v24 = vpop.f32.mrb[130].mxu1 }
0x6f1a   :  { %v11238_v23 = vadd.f32 %v11237_v24, %v19951_v9  ;;  %v17839_v20 = vpop.f32.mrb[131].mxu1 }
0x6f1c   :  { %v15515_v56 = vmul.f32 -1.442695, %v11238_v23 }
0x6f1e   :  { %19615 = vpow2.f32 %v15515_v56  ;;  %v11656_v56 = vstv %s11655_s24  ;;  %s12703_s24 = smul.f32 -0.27353132, %s21581_s18 }
0x6f28   :  { %v19616_v44 = vpop.eup %19615 }
0x6f29   :  { %v11244_v45 = vadd.f32 1.0, %v19616_v44  ;;  %v11996_v44 = vstv %s11995_s4  ;;  %s13050_s4 = smul.f32 -0.3223762, %s21581_s18 }
0x6f2b   :  { %19617 = vrcp.f32 %v11244_v45  ;;  %v12340_v45 = vstv %s12339_s25  ;;  %s12707_s25 = sadd.f32 %s21244_s20, %s21581_s18 }
0x6f35   :  { %v19618_v46 = vpop.eup %19617 }
0x6f36   :  { %v11247_v47 = vmul.f32 %v19618_v46, %v11238_v23  ;;  %v12688_v46 = vstv %s12687_s16 }
0x6f38   :  { %17849 = vmatmul.mubr.msk.f32.vlgmr.msra.gmra.mrb[128].mxu0 %vm251_vm4, %v11247_v47 }
0x6f39   :  { %19103 = vmatpush3.bf16.msra.mxu0 %v19838_v13  ;;  %17870 = vmatprep.mubr.msk.f32.mxu0 %vm19732_vm1, %v19731_v2 }
0x6f3a   :  { %19104 = vmatprep.subr.bf16.mxu0 %v19733_v7 }
0x6f3d   :  { %19106 = vmatpush3.bf16.msra.mxu0 %v19867_v26 }
0x6f3e   :  { %19113 = vmatprep.subr.bf16.mxu0 %v19733_v7 }
0x700b   :  { %v11317_v57 = vpop.f32.mrb[128].mxu0 }
0x700c   :  { %v21617_v58 = vadd.f32 %v11317_v57, %v19963_v25  ;;  %v17850_v33 = vpop.f32.mrb[129].mxu0 }
0x700e   :  { %v11323_v17 = vmul.f32 %v11322_v39, %v21617_v58  ;;  %v11657_v47 = vmul.f32 %v11656_v56, %v21617_v58  ;;  %v11997_v57 = vmul.f32 %v11996_v44, %v21617_v58  ;;  %v12341_v33 = vmul.f32 %v12340_v45, %v21617_v58 }
0x700f   :  { %v12689_v39 = vmul.f32 %v12688_v46, %v21617_v58 }
0x7010   :  { %v11324_v41 = vadd.f32 %v11323_v17, %v21565_v28  ;;  %v11658_v12 = vadd.f32 %v11657_v47, %v21565_v28  ;;  %v11998_v14 = vadd.f32 %v11997_v57, %v21565_v28  ;;  %v12342_v53 = vadd.f32 %v12341_v33, %v21565_v28 }
0x7011   :  { %v12690_v16 = vadd.f32 %v12689_v39, %v21565_v28 }
0x7012   :  { %17860 = vmatmul.mubr.msk.f32.vlgmr.msra.gmra.mrb[132].mxu1 %vm251_vm4, %v11324_v41  ;;  %v11660_v41 = vstv %s11659_s19 }
0x7013   :  { %19109 = vmatpush3.bf16.msra.mxu1 %v19903_v49  ;;  %17881 = vmatprep.mubr.msk.f32.mxu1 %vm19732_vm1, %v19731_v2 }
0x7014   :  { %19110 = vmatprep.subr.bf16.mxu1 %v19733_v7 }
0x7017   :  { %19112 = vmatpush3.bf16.msra.mxu1 %v19913_v52 }
0x7018   :  { %19119 = vmatprep.subr.bf16.mxu1 %v19733_v7 }
0x70e5   :  { %v11410_v18 = vpop.f32.mrb[132].mxu1 }
0x70e6   :  { %v11411_v21 = vadd.f32 %v11410_v18, %v11340_v36  ;;  %v17861_v0 = vpop.f32.mrb[133].mxu1 }
0x70e8   :  { %v11421_v40 = vadd.f32 %v11420_v61, %v11411_v21 }
0x70ea   :  { %17871 = vmatmul.mubr.msk.f32.vlgmr.msra.gmra.mrb[130].mxu0 %vm251_vm4, %v11421_v40 }
0x70eb   :  { %19115 = vmatpush3.bf16.msra.mxu0 %v19935_v1  ;;  %17892 = vmatprep.mubr.msk.f32.mxu0 %vm19732_vm1, %v19731_v2 }
0x70ec   :  { %19116 = vmatprep.subr.bf16.mxu0 %v19733_v7 }
0x70ef   :  { %19118 = vmatpush3.bf16.msra.mxu0 %v19945_v5 }
0x70f0   :  { %19125 = vmatprep.subr.bf16.mxu0 %v19733_v7 }
0x71bd   :  { %v11491_v22 = vpop.f32.mrb[130].mxu0 }
0x71be   :  { %v11492_v3 = vadd.f32 %v11491_v22, %v19919_v54  ;;  %v17872_v29 = vpop.f32.mrb[131].mxu0  ;;  %v11665_v22 = vstv %s11663_s10 }
0x71c0   :  { %v15519_v30 = vmul.f32 -1.442695, %v11492_v3 }
0x71c2   :  { %19619 = vpow2.f32 %v15519_v30 }
0x71cc   :  { %v19620_v31 = vpop.eup %19619 }
0x71cd   :  { %v11498_v59 = vadd.f32 1.0, %v19620_v31 }
0x71cf   :  { %19621 = vrcp.f32 %v11498_v59 }
0x71d9   :  { %v19622_v32 = vpop.eup %19621 }
0x71da   :  { %v11501_v34 = vmul.f32 %v19622_v32, %v11492_v3  ;;  %v11666_v3 = vmul.f32 %v11665_v22, %v21560_v63 }
0x71dc   :  { %17882 = vmatmul.mubr.msk.f32.vlgmr.msra.gmra.mrb[134].mxu1 %vm251_vm4, %v11501_v34  ;;  %v11668_v29 = vrot.slane %v11666_v3, 2  ;;  %v11754_v34 = vstv %s11664_s5 }
0x71dd   :  { %19121 = vmatpush3.bf16.msra.mxu1 %v19807_v6  ;;  %17903 = vmatprep.mubr.msk.f32.mxu1 %vm19732_vm1, %v19731_v2 }
0x71de   :  { %19122 = vmatprep.subr.bf16.mxu1 %v19733_v7  ;;  %v11670_v30 = vadd.f32 %v11668_v29, %v21560_v63 }
0x71e0   :  { %v11671_v31 = vmul.f32 %v11670_v30, %v11665_v22 }
0x71e1   :  { %19124 = vmatpush3.bf16.msra.mxu1 %v19828_v10 }
0x71e2   :  { %19131 = vmatprep.subr.bf16.mxu1 %v19733_v7  ;;  %v11673_v59 = vrot.slane %v11671_v31, 2 }
0x71e4   :  { %v11675_v32 = vadd.f32 %v11673_v59, %v21560_v63 }
0x72af   :  { %v11571_v27 = vpop.f32.mrb[134].mxu1 }
0x72b0   :  { %v11572_v8 = vadd.f32 %v11571_v27, %v19951_v9  ;;  %v17883_v35 = vpop.f32.mrb[135].mxu1  ;;  %v11676_v27 = vmul.f32 %v11675_v32, %v11665_v22  ;;  %v13043_v22 = vstv %s13042_s0 }
0x72b2   :  { %v15521_v51 = vmul.f32 -1.442695, %v11572_v8  ;;  %v11678_v35 = vrot.slane %v11676_v27, 2 }
0x72b4   :  { %19623 = vpow2.f32 %v15521_v51 }
0x72be   :  { %v19624_v19 = vpop.eup %19623 }
0x72bf   :  { %v11578_v24 = vadd.f32 1.0, %v19624_v19  ;;  %v11680_v19 = vadd.f32 %v11678_v35, %v21560_v63 }
0x72c1   :  { %19625 = vrcp.f32 %v11578_v24 }
0x72cb   :  { %v19626_v23 = vpop.eup %19625 }
0x72cc   :  { %v11581_v20 = vmul.f32 %v19626_v23, %v11572_v8  ;;  %v11755_v8 = vmul.f32 %v21420_v4, %v11754_v34 }
0x72ce   :  { %17893 = vmatmul.mubr.msk.f32.vlgmr.msra.gmra.mrb[132].mxu0 %vm251_vm4, %v11581_v20  ;;  %v11756_v51 = vadd.f32 %v11755_v8, %v19886_v37 }
0x72cf   :  { %19127 = vmatpush3.bf16.msra.mxu0 %v19838_v13  ;;  %17914 = vmatprep.mubr.msk.f32.mxu0 %vm19732_vm1, %v19731_v2 }
0x72d0   :  { %19128 = vmatprep.subr.bf16.mxu0 %v19733_v7  ;;  %v11760_v24 = vrot.slane %v11756_v51, %v19889_v38 }
0x72d3   :  { %19130 = vmatpush3.bf16.msra.mxu0 %v19867_v26 }
0x72d4   :  { %19137 = vmatprep.subr.bf16.mxu0 %v19733_v7 }
0x73a1   :  { %v11651_v17 = vpop.f32.mrb[132].mxu0 }
0x73a2   :  { %v11652_v50 = vadd.f32 %v11651_v17, %v19963_v25  ;;  %v17894_v11 = vpop.f32.mrb[133].mxu0 }
0x73a4   :  { %v11661_v60 = vmul.f32 %v11660_v41, %v11652_v50  ;;  %v12001_v42 = vmul.f32 %v12000_v43, %v11652_v50  ;;  %v12345_v36 = vmul.f32 %v12344_v62, %v11652_v50  ;;  %v12693_v61 = vmul.f32 %v12692_v48, %v11652_v50 }
0x73a6   :  { %v11662_v18 = vadd.f32 %v11661_v60, %v11658_v12  ;;  %v21676_v21 = vadd.f32 %v12001_v42, %v11998_v14  ;;  %v21678_v0 = vadd.f32 %v12345_v36, %v12342_v53  ;;  %v21680_v40 = vadd.f32 %v12693_v61, %v12690_v16 }
0x73a7   :  { %v13039_v16 = vstv %s13038_s11  ;;  %v12004_v36 = vstv %s12003_s12  ;;  %v12348_v61 = vstv %s12347_s13 }
0x73a8   :  { %17904 = vmatmul.mubr.msk.f32.vlgmr.msra.gmra.mrb[136].mxu1 %vm251_vm4, %v11662_v18  ;;  %v13040_v60 = vmul.f32 %v13039_v16, %v21617_v58  ;;  %v12696_v18 = vstv %s12695_s15 }
0x73a9   :  { %19133 = vmatpush3.bf16.msra.mxu1 %v19903_v49  ;;  %17925 = vmatprep.mubr.msk.f32.mxu1 %vm19732_vm1, %v19731_v2 }
0x73aa   :  { %19134 = vmatprep.subr.bf16.mxu1 %v19733_v7  ;;  %v13041_v30 = vadd.f32 %v13040_v60, %v21565_v28  ;;  %v12009_v28 = vstv %s12007_s28 }
0x73ad   :  { %19136 = vmatpush3.bf16.msra.mxu1 %v19913_v52 }
0x73ae   :  { %19143 = vmatprep.subr.bf16.mxu1 %v19733_v7 }
0x747b   :  { %v11750_v23 = vpop.f32.mrb[136].mxu1 }
0x747c   :  { %v11751_v20 = vadd.f32 %v11750_v23, %v11680_v19  ;;  %v17905_v56 = vpop.f32.mrb[137].mxu1  ;;  %v12098_v23 = vstv %s12008_s14 }
0x747d   :  { %v12099_v56 = vmul.f32 %v21420_v4, %v12098_v23  ;;  %v12446_v23 = vstv %s12356_s21 }
0x747e   :  { %v11761_v44 = vadd.f32 %v11760_v24, %v11751_v20 }
0x7480   :  { %17915 = vmatmul.mubr.msk.f32.vlgmr.msra.gmra.mrb[134].mxu0 %vm251_vm4, %v11761_v44 }
0x7481   :  { %19139 = vmatpush3.bf16.msra.mxu0 %v19935_v1  ;;  %17936 = vmatprep.mubr.msk.f32.mxu0 %vm19732_vm1, %v19731_v2 }
0x7482   :  { %19140 = vmatprep.subr.bf16.mxu0 %v19733_v7 }
0x7485   :  { %19142 = vmatpush3.bf16.msra.mxu0 %v19945_v5 }
0x7486   :  { %19149 = vmatprep.subr.bf16.mxu0 %v19733_v7 }
0x7553   :  { %v11831_v45 = vpop.f32.mrb[134].mxu0 }
0x7554   :  { %v11832_v46 = vadd.f32 %v11831_v45, %v19919_v54  ;;  %v17916_v47 = vpop.f32.mrb[135].mxu0  ;;  %v12100_v45 = vadd.f32 %v12099_v56, %v19886_v37  ;;  %v21803_v56 = vld [vmem:[%s22222_s8] sm:$0xff] }
0x7556   :  { %v15525_v57 = vmul.f32 -1.442695, %v11832_v46  ;;  %v12104_v47 = vrot.slane %v12100_v45, %v19889_v38 }
0x7558   :  { %19627 = vpow2.f32 %v15525_v57 }
0x7562   :  { %v19628_v33 = vpop.eup %19627 }
0x7563   :  { %v11838_v39 = vadd.f32 1.0, %v19628_v33 }
0x7565   :  { %19629 = vrcp.f32 %v11838_v39 }
0x756f   :  { %v19630_v17 = vpop.eup %19629 }
0x7570   :  { %v11841_v41 = vmul.f32 %v19630_v17, %v11832_v46 }
0x7572   :  { %17926 = vmatmul.mubr.msk.f32.vlgmr.msra.gmra.mrb[138].mxu1 %vm251_vm4, %v11841_v41 }
0x7573   :  { %19145 = vmatpush3.bf16.msra.mxu1 %v19807_v6  ;;  %17947 = vmatprep.mubr.msk.f32.mxu1 %vm19732_vm1, %v19731_v2 }
0x7574   :  { %19146 = vmatprep.subr.bf16.mxu1 %v19733_v7 }
0x7577   :  { %19148 = vmatpush3.bf16.msra.mxu1 %v19828_v10 }
0x7578   :  { %19155 = vmatprep.subr.bf16.mxu1 %v19733_v7 }
0x7645   :  { %v11911_v43 = vpop.f32.mrb[138].mxu1 }
0x7646   :  { %v11912_v62 = vadd.f32 %v11911_v43, %v19951_v9  ;;  %v17927_v48 = vpop.f32.mrb[139].mxu1 }
0x7648   :  { %v15527_v50 = vmul.f32 -1.442695, %v11912_v62 }
0x764a   :  { %19631 = vpow2.f32 %v15527_v50 }
0x7654   :  { %v19632_v11 = vpop.eup %19631 }
0x7655   :  { %v11918_v12 = vadd.f32 1.0, %v19632_v11 }
0x7657   :  { %19633 = vrcp.f32 %v11918_v12 }
0x7661   :  { %v19634_v14 = vpop.eup %19633 }
0x7662   :  { %v11921_v53 = vmul.f32 %v19634_v14, %v11912_v62 }
0x7664   :  { %17937 = vmatmul.mubr.msk.f32.vlgmr.msra.gmra.mrb[136].mxu0 %vm251_vm4, %v11921_v53 }
0x7665   :  { %19151 = vmatpush3.bf16.msra.mxu0 %v19838_v13  ;;  %17958 = vmatprep.mubr.msk.f32.mxu0 %vm19732_vm1, %v19731_v2 }
0x7666   :  { %19152 = vmatprep.subr.bf16.mxu0 %v19733_v7 }
0x7669   :  { %19154 = vmatpush3.bf16.msra.mxu0 %v19867_v26 }
0x766a   :  { %19161 = vmatprep.subr.bf16.mxu0 %v19733_v7 }
0x7737   :  { %v11991_v42 = vpop.f32.mrb[136].mxu0 }
0x7738   :  { %v11992_v3 = vadd.f32 %v11991_v42, %v19963_v25  ;;  %v17938_v29 = vpop.f32.mrb[137].mxu0 }
0x7739   :  { %v12700_v29 = vstv %s12699_s3 }
0x773a   :  { %v12005_v31 = vmul.f32 %v12004_v36, %v11992_v3  ;;  %v12349_v59 = vmul.f32 %v12348_v61, %v11992_v3  ;;  %v12697_v32 = vmul.f32 %v12696_v18, %v11992_v3  ;;  %v13044_v34 = vmul.f32 %v13043_v22, %v11992_v3 }
0x773b   :  { %v12352_v3 = vstv %s12351_s17 }
0x773c   :  { %v12006_v27 = vadd.f32 %v12005_v31, %v21676_v21  ;;  %v21731_v8 = vadd.f32 %v12349_v59, %v21678_v0  ;;  %v21734_v58 = vadd.f32 %v12697_v32, %v21680_v40  ;;  %v21736_v35 = vadd.f32 %v13044_v34, %v13041_v30 }
0x773d   :  { %v12010_v21 = vmul.f32 %v12009_v28, %v21560_v63  ;;  %v13047_v30 = vstv %s13046_s2 }
0x773e   :  { %17948 = vmatmul.mubr.msk.f32.vlgmr.msra.gmra.mrb[140].mxu1 %vm251_vm4, %v12006_v27 }
0x773f   :  { %19157 = vmatpush3.bf16.msra.mxu1 %v19903_v49  ;;  %17969 = vmatprep.mubr.msk.f32.mxu1 %vm19732_vm1, %v19731_v2  ;;  %v12012_v0 = vrot.slane %v12010_v21, 2 }
0x7740   :  { %19158 = vmatprep.subr.bf16.mxu1 %v19733_v7 }
0x7741   :  { %v12014_v40 = vadd.f32 %v12012_v0, %v21560_v63 }
0x7743   :  { %19160 = vmatpush3.bf16.msra.mxu1 %v19913_v52  ;;  %v12015_v51 = vmul.f32 %v12014_v40, %v12009_v28 }
0x7744   :  { %19167 = vmatprep.subr.bf16.mxu1 %v19733_v7 }
0x7745   :  { %v12017_v19 = vrot.slane %v12015_v51, 2 }
0x7747   :  { %v12019_v24 = vadd.f32 %v12017_v19, %v21560_v63 }
0x7749   :  { %v12020_v20 = vmul.f32 %v12019_v24, %v12009_v28 }
0x774b   :  { %v12022_v44 = vrot.slane %v12020_v20, 2 }
0x774d   :  { %v12024_v46 = vadd.f32 %v12022_v44, %v21560_v63  ;;  %v12447_v44 = vmul.f32 %v21803_v56, %v12446_v23 }
0x7811   :  { %v12094_v57 = vpop.f32.mrb[140].mxu1 }
0x7812   :  { %v12095_v33 = vadd.f32 %v12094_v57, %v12024_v46  ;;  %v17949_v39 = vpop.f32.mrb[141].mxu1  ;;  %v12448_v46 = vadd.f32 %v12447_v44, %v19886_v37 }
0x7814   :  { %v12105_v17 = vadd.f32 %v12104_v47, %v12095_v33  ;;  %v12452_v57 = vrot.slane %v12448_v46, %v19889_v38 }
0x7816   :  { %17959 = vmatmul.mubr.msk.f32.vlgmr.msra.gmra.mrb[138].mxu0 %vm251_vm4, %v12105_v17 }
0x7817   :  { %19163 = vmatpush3.bf16.msra.mxu0 %v19935_v1  ;;  %17980 = vmatprep.mubr.msk.f32.mxu0 %vm19732_vm1, %v19731_v2 }
0x7818   :  { %19164 = vmatprep.subr.bf16.mxu0 %v19733_v7 }
0x781b   :  { %19166 = vmatpush3.bf16.msra.mxu0 %v19945_v5 }
0x781c   :  { %19173 = vmatprep.subr.bf16.mxu0 %v19733_v7 }
0x78e9   :  { %v12175_v4 = vpop.f32.mrb[138].mxu0 }
0x78ea   :  { %v12176_v41 = vadd.f32 %v12175_v4, %v19919_v54  ;;  %v17960_v43 = vpop.f32.mrb[139].mxu0 }
0x78ec   :  { %v15531_v62 = vmul.f32 -1.442695, %v12176_v41 }
0x78ee   :  { %19635 = vpow2.f32 %v15531_v62 }
0x78f8   :  { %v19636_v48 = vpop.eup %19635 }
0x78f9   :  { %v12182_v50 = vadd.f32 1.0, %v19636_v48 }
0x78fb   :  { %19637 = vrcp.f32 %v12182_v50 }
0x7905   :  { %v19638_v11 = vpop.eup %19637 }
0x7906   :  { %v12185_v12 = vmul.f32 %v19638_v11, %v12176_v41 }
0x7908   :  { %17970 = vmatmul.mubr.msk.f32.vlgmr.msra.gmra.mrb[142].mxu1 %vm251_vm4, %v12185_v12 }
0x7909   :  { %19169 = vmatpush3.bf16.msra.mxu1 %v19807_v6  ;;  %17991 = vmatprep.mubr.msk.f32.mxu1 %vm19732_vm1, %v19731_v2 }
0x790a   :  { %19170 = vmatprep.subr.bf16.mxu1 %v19733_v7 }
0x790d   :  { %19172 = vmatpush3.bf16.msra.mxu1 %v19828_v10 }
0x790e   :  { %19179 = vmatprep.subr.bf16.mxu1 %v19733_v7 }
0x79db   :  { %v12255_v14 = vpop.f32.mrb[142].mxu1 }
0x79dc   :  { %v12256_v53 = vadd.f32 %v12255_v14, %v19951_v9  ;;  %v17971_v16 = vpop.f32.mrb[143].mxu1 }
0x79de   :  { %v15533_v60 = vmul.f32 -1.442695, %v12256_v53 }
0x79e0   :  { %19639 = vpow2.f32 %v15533_v60 }
0x79ea   :  { %v19640_v42 = vpop.eup %19639 }
0x79eb   :  { %v12262_v36 = vadd.f32 1.0, %v19640_v42 }
0x79ed   :  { %19641 = vrcp.f32 %v12262_v36 }
0x79f7   :  { %v19642_v61 = vpop.eup %19641 }
0x79f8   :  { %v12265_v18 = vmul.f32 %v19642_v61, %v12256_v53 }
0x79fa   :  { %17981 = vmatmul.mubr.msk.f32.vlgmr.msra.gmra.mrb[140].mxu0 %vm251_vm4, %v12265_v18 }
0x79fb   :  { %19175 = vmatpush3.bf16.msra.mxu0 %v19838_v13  ;;  %18002 = vmatprep.mubr.msk.f32.mxu0 %vm19732_vm1, %v19731_v2 }
0x79fc   :  { %19176 = vmatprep.subr.bf16.mxu0 %v19733_v7 }
0x79ff   :  { %19178 = vmatpush3.bf16.msra.mxu0 %v19867_v26 }
0x7a00   :  { %19185 = vmatprep.subr.bf16.mxu0 %v19733_v7 }
0x7acd   :  { %v12335_v22 = vpop.f32.mrb[140].mxu0 }
0x7ace   :  { %v12336_v31 = vadd.f32 %v12335_v22, %v19963_v25  ;;  %v17982_v59 = vpop.f32.mrb[141].mxu0 }
0x7ad0   :  { %v12353_v32 = vmul.f32 %v12352_v3, %v12336_v31  ;;  %v12701_v34 = vmul.f32 %v12700_v29, %v12336_v31  ;;  %v13048_v27 = vmul.f32 %v13047_v30, %v12336_v31  ;;  %v12704_v29 = vstv %s12703_s24 }
0x7ad1   :  { %v13051_v30 = vstv %s13050_s4 }
0x7ad2   :  { %v12354_v28 = vadd.f32 %v12353_v32, %v21731_v8  ;;  %v21783_v21 = vadd.f32 %v12701_v34, %v21734_v58  ;;  %v21786_v0 = vadd.f32 %v13048_v27, %v21736_v35  ;;  %v12357_v8 = vstv %s12355_s6 }
0x7ad3   :  { %v12358_v58 = vmul.f32 %v12357_v8, %v21560_v63 }
0x7ad4   :  { %17992 = vmatmul.mubr.msk.f32.vlgmr.msra.gmra.mrb[144].mxu1 %vm251_vm4, %v12354_v28 }
0x7ad5   :  { %19181 = vmatpush3.bf16.msra.mxu1 %v19903_v49  ;;  %18013 = vmatprep.mubr.msk.f32.mxu1 %vm19732_vm1, %v19731_v2  ;;  %v12360_v40 = vrot.slane %v12358_v58, 2 }
0x7ad6   :  { %19182 = vmatprep.subr.bf16.mxu1 %v19733_v7 }
0x7ad7   :  { %v12362_v35 = vadd.f32 %v12360_v40, %v21560_v63 }
0x7ad9   :  { %19184 = vmatpush3.bf16.msra.mxu1 %v19913_v52  ;;  %v12363_v51 = vmul.f32 %v12362_v35, %v12357_v8 }
0x7ada   :  { %19191 = vmatprep.subr.bf16.mxu1 %v19733_v7 }
0x7adb   :  { %v12365_v19 = vrot.slane %v12363_v51, 2 }
0x7add   :  { %v12367_v24 = vadd.f32 %v12365_v19, %v21560_v63  ;;  %v12797_v19 = vstv %s12707_s25 }
0x7ade   :  { %v12798_v23 = vmul.f32 %v21803_v56, %v12797_v19 }
0x7adf   :  { %v12368_v20 = vmul.f32 %v12367_v24, %v12357_v8  ;;  %v12708_v8 = vstv %s21581_s18 }
0x7ae0   :  { %v12709_v58 = vmul.f32 %v12708_v8, %v21560_v63  ;;  %v12799_v44 = vadd.f32 %v12798_v23, %v19886_v37 }
0x7ae1   :  { %v12370_v45 = vrot.slane %v12368_v20, 2 }
0x7ae2   :  { %v12803_v46 = vrot.slane %v12799_v44, %v19889_v38 }
0x7ae3   :  { %v12372_v47 = vadd.f32 %v12370_v45, %v21560_v63 }
0x7ba7   :  { %v12442_v33 = vpop.f32.mrb[144].mxu1 }
0x7ba8   :  { %v12443_v39 = vadd.f32 %v12442_v33, %v12372_v47  ;;  %v17993_v17 = vpop.f32.mrb[145].mxu1 }
0x7baa   :  { %v12453_v4 = vadd.f32 %v12452_v57, %v12443_v39 }
0x7bac   :  { %18003 = vmatmul.mubr.msk.f32.vlgmr.msra.gmra.mrb[142].mxu0 %vm251_vm4, %v12453_v4 }
0x7bad   :  { %19187 = vmatpush3.bf16.msra.mxu0 %v19935_v1  ;;  %18024 = vmatprep.mubr.msk.f32.mxu0 %vm19732_vm1, %v19731_v2 }
0x7bae   :  { %19188 = vmatprep.subr.bf16.mxu0 %v19733_v7 }
0x7bb1   :  { %19190 = vmatpush3.bf16.msra.mxu0 %v19945_v5 }
0x7bb2   :  { %19197 = vmatprep.subr.bf16.mxu0 %v19733_v7 }
0x7c7f   :  { %v12523_v41 = vpop.f32.mrb[142].mxu0 }
0x7c80   :  { %v12524_v43 = vadd.f32 %v12523_v41, %v19919_v54  ;;  %v18004_v62 = vpop.f32.mrb[143].mxu0 }
0x7c82   :  { %v15537_v48 = vmul.f32 -1.442695, %v12524_v43 }
0x7c84   :  { %19643 = vpow2.f32 %v15537_v48 }
0x7c8e   :  { %v19644_v50 = vpop.eup %19643 }
0x7c8f   :  { %v12530_v11 = vadd.f32 1.0, %v19644_v50 }
0x7c91   :  { %19645 = vrcp.f32 %v12530_v11  ;;  %v15549_v11 = vld [vmem:[%s22215_s1 + $0x30] sm:$0xff]  ;;  %s13054_s1 = smul.f32 0.13095239, %s21581_s18  ;;  %s15548_s18 = sld [smem:[#allocation3 + $0x7]] }
0x7c97   :  { %s21906_s19 = ssub.f32 %s15548_s18, %s21577_s29 }
0x7c99   :  { %s13137_s26 = smul.f32 0.0, %s21906_s19 }
0x7c9a   :  { %s13469_s30 = smul.f32 0.2, %s21906_s19 }
0x7c9b   :  { %v19646_v12 = vpop.eup %19645  ;;  %s13138_s27 = sadd.f32 %s21577_s29, %s13137_s26  ;;  %s13803_s5 = smul.f32 0.075, %s21906_s19 }
0x7c9c   :  { %v12533_v14 = vmul.f32 %v19646_v12, %v12524_v43  ;;  %s13473_s10 = sadd.f32 %s21577_s29, %s13469_s30  ;;  %s14143_s11 = smul.f32 0.9777778, %s21906_s19 }
0x7c9d   :  { %s14487_s12 = smul.f32 2.9525986, %s21906_s19 }
0x7c9e   :  { %18014 = vmatmul.mubr.msk.f32.vlgmr.msra.gmra.mrb[146].mxu1 %vm251_vm4, %v12533_v14  ;;  %s14835_s13 = smul.f32 2.8462753, %s21906_s19 }
0x7c9f   :  { %19193 = vmatpush3.bf16.msra.mxu1 %v19807_v6  ;;  %18035 = vmatprep.mubr.msk.f32.mxu1 %vm19732_vm1, %v19731_v2  ;;  %s13807_s15 = smul.f32 0.225, %s21906_s19 }
0x7ca0   :  { %19194 = vmatprep.subr.bf16.mxu1 %v19733_v7  ;;  %s14147_s0 = smul.f32 -3.7333333, %s21906_s19 }
0x7ca1   :  { %s14491_s28 = smul.f32 -11.595794, %s21906_s19 }
0x7ca2   :  { %s14839_s14 = smul.f32 -10.757576, %s21906_s19 }
0x7ca3   :  { %19196 = vmatpush3.bf16.msra.mxu1 %v19828_v10  ;;  %s13811_s17 = smul.f32 0.3, %s21906_s19 }
0x7ca4   :  { %19203 = vmatprep.subr.bf16.mxu1 %v19733_v7  ;;  %s15186_s2 = smul.f32 0.091145836, %s21906_s19 }
0x7ca5   :  { %s13812_s3 = sadd.f32 %s21577_s29, %s13811_s17  ;;  %s14151_s6 = smul.f32 3.5555556, %s21906_s19 }
0x7ca6   :  { %s14495_s21 = smul.f32 9.822893, %s21906_s19 }
0x7ca7   :  { %s14843_s22 = smul.f32 8.906423, %s21906_s19 }
0x7ca8   :  { %s15190_s23 = smul.f32 0.4492363, %s21906_s19 }
0x7ca9   :  { %s14155_s24 = smul.f32 0.8, %s21906_s19 }
0x7caa   :  { %s14499_s25 = smul.f32 -0.29080933, %s21906_s19 }
0x7cab   :  { %s14156_s4 = sadd.f32 %s21577_s29, %s14155_s24  ;;  %s14847_s20 = smul.f32 0.2784091, %s21906_s19 }
0x7cac   :  { %s15194_s16 = smul.f32 0.6510417, %s21906_s19 }
0x7d71   :  { %v12603_v53 = vpop.f32.mrb[146].mxu1 }
0x7d72   :  { %v12604_v16 = vadd.f32 %v12603_v53, %v19951_v9  ;;  %v18015_v60 = vpop.f32.mrb[147].mxu1 }
0x7d74   :  { %v15539_v42 = vmul.f32 -1.442695, %v12604_v16 }
0x7d76   :  { %19647 = vpow2.f32 %v15539_v42 }
0x7d80   :  { %v19648_v36 = vpop.eup %19647 }
0x7d81   :  { %v12610_v61 = vadd.f32 1.0, %v19648_v36 }
0x7d83   :  { %19649 = vrcp.f32 %v12610_v61 }
0x7d8d   :  { %v19650_v18 = vpop.eup %19649 }
0x7d8e   :  { %v12613_v22 = vmul.f32 %v19650_v18, %v12604_v16 }
0x7d90   :  { %18025 = vmatmul.mubr.msk.f32.vlgmr.msra.gmra.mrb[144].mxu0 %vm251_vm4, %v12613_v22 }
0x7d91   :  { %19199 = vmatpush3.bf16.msra.mxu0 %v19838_v13  ;;  %18046 = vmatprep.mubr.msk.f32.mxu0 %vm19732_vm1, %v19731_v2 }
0x7d92   :  { %19200 = vmatprep.subr.bf16.mxu0 %v19733_v7 }
0x7d95   :  { %19202 = vmatpush3.bf16.msra.mxu0 %v19867_v26 }
0x7d96   :  { %19209 = vmatprep.subr.bf16.mxu0 %v19733_v7 }
0x7e63   :  { %v12683_v3 = vpop.f32.mrb[144].mxu0 }
0x7e64   :  { %v12684_v31 = vadd.f32 %v12683_v3, %v19963_v25  ;;  %v18026_v59 = vpop.f32.mrb[145].mxu0  ;;  %v13055_v3 = vstv %s13054_s1  ;;  %s14503_s1 = smul.f32 0.8888889, %s21906_s19 }
0x7e66   :  { %v12705_v32 = vmul.f32 %v12704_v29, %v12684_v31  ;;  %v13052_v34 = vmul.f32 %v13051_v30, %v12684_v31  ;;  %s14504_s18 = sadd.f32 %s21577_s29, %s14503_s1 }
0x7e68   :  { %v12706_v27 = vadd.f32 %v12705_v32, %v21783_v21  ;;  %v21837_v28 = vadd.f32 %v13052_v34, %v21786_v0  ;;  %v12711_v21 = vrot.slane %v12709_v58, 2  ;;  %v13139_v32 = vstv %s13137_s26  ;;  %s14851_s26 = smul.f32 -0.27353132, %s21906_s19 }
0x7e6a   :  { %18036 = vmatmul.mubr.msk.f32.vlgmr.msra.gmra.mrb[148].mxu1 %vm251_vm4, %v12706_v27  ;;  %v12713_v0 = vadd.f32 %v12711_v21, %v21560_v63 }
0x7e6b   :  { %19205 = vmatpush3.bf16.msra.mxu1 %v19903_v49  ;;  %18057 = vmatprep.mubr.msk.f32.mxu1 %vm19732_vm1, %v19731_v2 }
0x7e6c   :  { %19206 = vmatprep.subr.bf16.mxu1 %v19733_v7  ;;  %v12714_v40 = vmul.f32 %v12713_v0, %v12708_v8  ;;  %v13228_v0 = vstv %s13138_s27  ;;  %s15198_s27 = smul.f32 -0.3223762, %s21906_s19 }
0x7e6e   :  { %v12716_v35 = vrot.slane %v12714_v40, 2 }
0x7e6f   :  { %19208 = vmatpush3.bf16.msra.mxu1 %v19913_v52 }
0x7e70   :  { %18071 = vmatprep.subr.mxu1 %v19731_v2  ;;  %v12718_v51 = vadd.f32 %v12716_v35, %v21560_v63  ;;  %v13229_v35 = vmul.f32 %v21803_v56, %v13228_v0 }
0x7e72   :  { %v12719_v24 = vmul.f32 %v12718_v51, %v12708_v8  ;;  %v13230_v19 = vadd.f32 %v13229_v35, %v19886_v37 }
0x7e74   :  { %v12721_v20 = vrot.slane %v12719_v24, 2  ;;  %v13234_v23 = vrot.slane %v13230_v19, %v19889_v38 }
0x7e76   :  { %v12723_v45 = vadd.f32 %v12721_v20, %v21560_v63 }
0x7f3d   :  { %v12793_v47 = vpop.f32.mrb[148].mxu1 }
0x7f3e   :  { %v12794_v57 = vadd.f32 %v12793_v47, %v12723_v45  ;;  %v18037_v33 = vpop.f32.mrb[149].mxu1 }
0x7f40   :  { %v12804_v39 = vadd.f32 %v12803_v46, %v12794_v57 }
0x7f42   :  { %18047 = vmatmul.mubr.msk.f32.vlgmr.msra.gmra.mrb[146].mxu0 %vm251_vm4, %v12804_v39 }
0x7f43   :  { %19211 = vmatpush3.bf16.msra.mxu0 %v19935_v1  ;;  %18068 = vmatprep.mubr.msk.f32.mxu0 %vm19732_vm1, %v19731_v2 }
0x7f44   :  { %19212 = vmatprep.subr.bf16.mxu0 %v19733_v7 }
0x7f47   :  { %19214 = vmatpush3.bf16.msra.mxu0 %v19945_v5 }
0x7f48   :  { %19215 = vmatprep.subr.bf16.mxu0 %v19733_v7 }
0x8015   :  { %v12874_v63 = vpop.f32.mrb[146].mxu0 }
0x8016   :  { %v12875_v17 = vadd.f32 %v12874_v63, %v19919_v54  ;;  %v18048_v4 = vpop.f32.mrb[147].mxu0 }
0x8018   :  { %v15543_v41 = vmul.f32 -1.442695, %v12875_v17 }
0x801a   :  { %19651 = vpow2.f32 %v15543_v41 }
0x8024   :  { %v19652_v43 = vpop.eup %19651 }
0x8025   :  { %v12881_v62 = vadd.f32 1.0, %v19652_v43 }
0x8027   :  { %19653 = vrcp.f32 %v12881_v62 }
0x8031   :  { %v19654_v48 = vpop.eup %19653 }
0x8032   :  { %v12884_v50 = vmul.f32 %v19654_v48, %v12875_v17 }
0x8034   :  { %18058 = vmatmul.mubr.msk.f32.vlgmr.msra.gmra.mrb[150].mxu1 %vm251_vm4, %v12884_v50 }
0x8035   :  { %18072 = vmatpush3.msk.msra.mxu1 %vm77_vm0, %v21535_v55  ;;  %18073 = vmatprep.mubr.msk.f32.mxu1 %vm19732_vm1, %v19731_v2 }
0x8036   :  { %19221 = vmatprep.subr.bf16.mxu1 %v19733_v7 }
0x8038   :  { %18074 = vmatmul.mubr.msk.f32.vlgmr.msra.gmra.mrb[152].mxu1 %vm73_vm2, %v15549_v11 }
0x8039   :  { %19223 = vmatpush3.bf16.msra.mxu1 %v19838_v13  ;;  %18095 = vmatprep.mubr.msk.f32.mxu1 %vm19732_vm1, %v19731_v2 }
0x803a   :  { %19224 = vmatprep.subr.bf16.mxu1 %v19733_v7 }
0x803d   :  { %19226 = vmatpush3.bf16.msra.mxu1 %v19867_v26 }
0x803e   :  { %19233 = vmatprep.subr.bf16.mxu1 %v19733_v7 }
0x8107   :  { %v12954_v55 = vpop.f32.mrb[150].mxu1 }
0x8108   :  { %v12955_v12 = vadd.f32 %v12954_v55, %v19951_v9  ;;  %v18059_v14 = vpop.f32.mrb[151].mxu1 }
0x810a   :  { %v15545_v53 = vmul.f32 -1.442695, %v12955_v12 }
0x810b   :  { %v21888_v61 = vpop.f32.mrb[152].mxu1 }
0x810c   :  { %19655 = vpow2.f32 %v15545_v53  ;;  %v18075_v18 = vpop.f32.mrb[153].mxu1  ;;  %v13140_v34 = vmul.f32 %v13139_v32, %v21888_v61 }
0x810e   :  { %v13142_v27 = vrot.slane %v13140_v34, 2  ;;  %v13562_v34 = vstv %s13473_s10 }
0x8116   :  { %v19656_v16 = vpop.eup %19655 }
0x8117   :  { %v12961_v60 = vadd.f32 1.0, %v19656_v16 }
0x8119   :  { %19657 = vrcp.f32 %v12961_v60 }
0x8123   :  { %v19658_v42 = vpop.eup %19657 }
0x8124   :  { %v12964_v36 = vmul.f32 %v19658_v42, %v12955_v12  ;;  %v13470_v42 = vstv %s13469_s30  ;;  %s14855_s30 = sadd.f32 %s21577_s29, %s21906_s19 }
0x8126   :  { %18069 = vmatmul.mubr.msk.f32.vlgmr.msra.gmra.mrb[148].mxu0 %vm251_vm4, %v12964_v36 }
0x8127   :  { %19217 = vmatpush3.bf16.msra.mxu0 %v19807_v6  ;;  %18084 = vmatprep.mubr.msk.f32.mxu0 %vm19732_vm1, %v19731_v2 }
0x8128   :  { %19218 = vmatprep.subr.bf16.mxu0 %v19733_v7 }
0x812b   :  { %19220 = vmatpush3.bf16.msra.mxu0 %v19828_v10 }
0x812c   :  { %19227 = vmatprep.subr.bf16.mxu0 %v19733_v7 }
0x81f9   :  { %v13034_v22 = vpop.f32.mrb[148].mxu0 }
0x81fa   :  { %v13035_v29 = vadd.f32 %v13034_v22, %v19963_v25  ;;  %v18070_v30 = vpop.f32.mrb[149].mxu0  ;;  %v13474_v22 = vmul.f32 %v13470_v42, %v21888_v61 }
0x81fc   :  { %v13056_v31 = vmul.f32 %v13055_v3, %v13035_v29  ;;  %v13476_v3 = vrot.slane %v13474_v22, 2  ;;  %v14492_v22 = vstv %s14491_s28 }
0x81fe   :  { %v21893_v59 = vadd.f32 %v13056_v31, %v21837_v28  ;;  %v13144_v28 = vadd.f32 %v13142_v27, %v21888_v61  ;;  %v13478_v29 = vadd.f32 %v13476_v3, %v21888_v61  ;;  %v14840_v3 = vstv %s14839_s14  ;;  %s15202_s14 = smul.f32 0.13095239, %s21906_s19 }
0x8200   :  { %13058 = vst.msk [vmem:[#allocation2 + $0xc] sm:$0x3] %vm151_vm3, %v21893_v59  ;;  %18085 = vmatmul.mubr.msk.f32.vlgmr.msra.gmra.mrb[150].mxu0 %vm251_vm4, %v21893_v59  ;;  %v13145_v8 = vmul.f32 %v13144_v28, %v13139_v32  ;;  %v13479_v30 = vmul.f32 %v13478_v29, %v13470_v42  ;;  %v13563_v28 = vmul.f32 %v21803_v56, %v13562_v34 }
0x8201   :  { %19229 = vmatpush3.bf16.msra.mxu0 %v19903_v49  ;;  %18106 = vmatprep.mubr.msk.f32.mxu0 %vm19732_vm1, %v19731_v2 }
0x8202   :  { %19230 = vmatprep.subr.bf16.mxu0 %v19733_v7  ;;  %v13147_v58 = vrot.slane %v13145_v8, 2  ;;  %v13481_v31 = vrot.slane %v13479_v30, 2 }
0x8204   :  { %v13149_v21 = vadd.f32 %v13147_v58, %v21888_v61  ;;  %v13564_v58 = vadd.f32 %v13563_v28, %v19886_v37 }
0x8205   :  { %19232 = vmatpush3.bf16.msra.mxu0 %v19913_v52 }
0x8206   :  { %19239 = vmatprep.subr.bf16.mxu0 %v19733_v7  ;;  %v13150_v40 = vmul.f32 %v13149_v21, %v13139_v32  ;;  %v13483_v32 = vadd.f32 %v13481_v31, %v21888_v61  ;;  %v13568_v0 = vrot.slane %v13564_v58, %v19889_v38 }
0x8208   :  { %v13152_v51 = vrot.slane %v13150_v40, 2  ;;  %v13484_v27 = vmul.f32 %v13483_v32, %v13470_v42 }
0x820a   :  { %v13154_v24 = vadd.f32 %v13152_v51, %v21888_v61  ;;  %v13486_v8 = vrot.slane %v13484_v27, 2 }
0x820c   :  { %v13488_v21 = vadd.f32 %v13486_v8, %v21888_v61 }
0x82d3   :  { %v13224_v20 = vpop.f32.mrb[150].mxu0 }
0x82d4   :  { %v13225_v44 = vadd.f32 %v13224_v20, %v13154_v24  ;;  %v18086_v45 = vpop.f32.mrb[151].mxu0 }
0x82d6   :  { %v13235_v46 = vadd.f32 %v13234_v23, %v13225_v44 }
0x82d8   :  { %18096 = vmatmul.mubr.msk.f32.vlgmr.msra.gmra.mrb[154].mxu1 %vm251_vm4, %v13235_v46 }
0x82d9   :  { %19235 = vmatpush3.bf16.msra.mxu1 %v19935_v1  ;;  %18117 = vmatprep.mubr.msk.f32.mxu1 %vm19732_vm1, %v19731_v2 }
0x82da   :  { %19236 = vmatprep.subr.bf16.mxu1 %v19733_v7 }
0x82dd   :  { %19238 = vmatpush3.bf16.msra.mxu1 %v19945_v5 }
0x82de   :  { %19245 = vmatprep.subr.bf16.mxu1 %v19733_v7 }
0x83ab   :  { %v13305_v47 = vpop.f32.mrb[154].mxu1 }
0x83ac   :  { %v13306_v57 = vadd.f32 %v13305_v47, %v19919_v54  ;;  %v18097_v33 = vpop.f32.mrb[155].mxu1 }
0x83ae   :  { %v15554_v39 = vmul.f32 -1.442695, %v13306_v57 }
0x83b0   :  { %19659 = vpow2.f32 %v15554_v39 }
0x83ba   :  { %v19660_v63 = vpop.eup %19659 }
0x83bb   :  { %v13312_v17 = vadd.f32 1.0, %v19660_v63 }
0x83bd   :  { %19661 = vrcp.f32 %v13312_v17 }
0x83c7   :  { %v19662_v4 = vpop.eup %19661 }
0x83c8   :  { %v13315_v41 = vmul.f32 %v19662_v4, %v13306_v57 }
0x83ca   :  { %18107 = vmatmul.mubr.msk.f32.vlgmr.msra.gmra.mrb[152].mxu0 %vm251_vm4, %v13315_v41 }
0x83cb   :  { %19241 = vmatpush3.bf16.msra.mxu0 %v19807_v6  ;;  %18128 = vmatprep.mubr.msk.f32.mxu0 %vm19732_vm1, %v19731_v2 }
0x83cc   :  { %19242 = vmatprep.subr.bf16.mxu0 %v19733_v7 }
0x83cf   :  { %19244 = vmatpush3.bf16.msra.mxu0 %v19828_v10 }
0x83d0   :  { %19251 = vmatprep.subr.bf16.mxu0 %v19733_v7 }
0x849d   :  { %v13385_v43 = vpop.f32.mrb[152].mxu0 }
0x849e   :  { %v13386_v62 = vadd.f32 %v13385_v43, %v19951_v9  ;;  %v18108_v48 = vpop.f32.mrb[153].mxu0 }
0x849f   :  { %v13804_v48 = vstv %s13803_s5 }
0x84a0   :  { %v15556_v50 = vmul.f32 -1.442695, %v13386_v62 }
0x84a2   :  { %19663 = vpow2.f32 %v15556_v50  ;;  %v14144_v50 = vstv %s14143_s11 }
0x84ac   :  { %v19664_v11 = vpop.eup %19663 }
0x84ad   :  { %v13392_v55 = vadd.f32 1.0, %v19664_v11  ;;  %v14488_v11 = vstv %s14487_s12 }
0x84af   :  { %19665 = vrcp.f32 %v13392_v55  ;;  %v14836_v55 = vstv %s14835_s13 }
0x84b9   :  { %v19666_v12 = vpop.eup %19665 }
0x84ba   :  { %v13395_v14 = vmul.f32 %v19666_v12, %v13386_v62 }
0x84bc   :  { %18118 = vmatmul.mubr.msk.f32.vlgmr.msra.gmra.mrb[156].mxu1 %vm251_vm4, %v13395_v14 }
0x84bd   :  { %19247 = vmatpush3.bf16.msra.mxu1 %v19838_v13  ;;  %18139 = vmatprep.mubr.msk.f32.mxu1 %vm19732_vm1, %v19731_v2 }
0x84be   :  { %19248 = vmatprep.subr.bf16.mxu1 %v19733_v7 }
0x84c1   :  { %19250 = vmatpush3.bf16.msra.mxu1 %v19867_v26 }
0x84c2   :  { %19257 = vmatprep.subr.bf16.mxu1 %v19733_v7 }
0x858f   :  { %v13465_v53 = vpop.f32.mrb[156].mxu1 }
0x8590   :  { %v21942_v16 = vadd.f32 %v13465_v53, %v19963_v25  ;;  %v18119_v60 = vpop.f32.mrb[157].mxu1 }
0x8592   :  { %v13471_v36 = vmul.f32 %v13470_v42, %v21942_v16  ;;  %v13805_v12 = vmul.f32 %v13804_v48, %v21942_v16  ;;  %v14145_v14 = vmul.f32 %v14144_v50, %v21942_v16  ;;  %v14489_v53 = vmul.f32 %v14488_v11, %v21942_v16 }
0x8593   :  { %v14837_v60 = vmul.f32 %v14836_v55, %v21942_v16 }
0x8594   :  { %v13472_v18 = vadd.f32 %v13471_v36, %v21893_v59  ;;  %v13808_v36 = vstv %s13807_s15  ;;  %v13806_v31 = vadd.f32 %v13805_v12, %v21893_v59  ;;  %v14146_v32 = vadd.f32 %v14145_v14, %v21893_v59 }
0x8595   :  { %v14490_v34 = vadd.f32 %v14489_v53, %v21893_v59  ;;  %v14838_v27 = vadd.f32 %v14837_v60, %v21893_v59 }
0x8596   :  { %18129 = vmatmul.mubr.msk.f32.vlgmr.msra.gmra.mrb[154].mxu0 %vm251_vm4, %v13472_v18  ;;  %v14148_v18 = vstv %s14147_s0 }
0x8597   :  { %19253 = vmatpush3.bf16.msra.mxu0 %v19903_v49  ;;  %18150 = vmatprep.mubr.msk.f32.mxu0 %vm19732_vm1, %v19731_v2 }
0x8598   :  { %19254 = vmatprep.subr.bf16.mxu0 %v19733_v7 }
0x859b   :  { %19256 = vmatpush3.bf16.msra.mxu0 %v19913_v52 }
0x859c   :  { %19263 = vmatprep.subr.bf16.mxu0 %v19733_v7 }
0x8669   :  { %v13558_v40 = vpop.f32.mrb[154].mxu0 }
0x866a   :  { %v13559_v35 = vadd.f32 %v13558_v40, %v13488_v21  ;;  %v18130_v51 = vpop.f32.mrb[155].mxu0 }
0x866c   :  { %v13569_v19 = vadd.f32 %v13568_v0, %v13559_v35 }
0x866e   :  { %18140 = vmatmul.mubr.msk.f32.vlgmr.msra.gmra.mrb[158].mxu1 %vm251_vm4, %v13569_v19  ;;  %v13813_v19 = vstv %s13811_s17 }
0x866f   :  { %19259 = vmatpush3.bf16.msra.mxu1 %v19935_v1  ;;  %18161 = vmatprep.mubr.msk.f32.mxu1 %vm19732_vm1, %v19731_v2 }
0x8670   :  { %19260 = vmatprep.subr.bf16.mxu1 %v19733_v7 }
0x8673   :  { %19262 = vmatpush3.bf16.msra.mxu1 %v19945_v5 }
0x8674   :  { %19269 = vmatprep.subr.bf16.mxu1 %v19733_v7 }
0x8741   :  { %v13639_v24 = vpop.f32.mrb[158].mxu1 }
0x8742   :  { %v13640_v23 = vadd.f32 %v13639_v24, %v19919_v54  ;;  %v18141_v20 = vpop.f32.mrb[159].mxu1  ;;  %v13814_v24 = vmul.f32 %v13813_v19, %v21888_v61 }
0x8744   :  { %v15560_v44 = vmul.f32 -1.442695, %v13640_v23 }
0x8746   :  { %19667 = vpow2.f32 %v15560_v44 }
0x8750   :  { %v19668_v45 = vpop.eup %19667 }
0x8751   :  { %v13646_v46 = vadd.f32 1.0, %v19668_v45 }
0x8753   :  { %19669 = vrcp.f32 %v13646_v46 }
0x875d   :  { %v19670_v47 = vpop.eup %19669 }
0x875e   :  { %v13649_v57 = vmul.f32 %v19670_v47, %v13640_v23  ;;  %v13816_v23 = vrot.slane %v13814_v24, 2  ;;  %v13902_v47 = vstv %s13812_s3 }
0x8760   :  { %18151 = vmatmul.mubr.msk.f32.vlgmr.msra.gmra.mrb[156].mxu0 %vm251_vm4, %v13649_v57  ;;  %v13818_v20 = vadd.f32 %v13816_v23, %v21888_v61 }
0x8761   :  { %19265 = vmatpush3.bf16.msra.mxu0 %v19807_v6  ;;  %18172 = vmatprep.mubr.msk.f32.mxu0 %vm19732_vm1, %v19731_v2 }
0x8762   :  { %19266 = vmatprep.subr.bf16.mxu0 %v19733_v7  ;;  %v13819_v44 = vmul.f32 %v13818_v20, %v13813_v19 }
0x8764   :  { %v13821_v45 = vrot.slane %v13819_v44, 2 }
0x8765   :  { %19268 = vmatpush3.bf16.msra.mxu0 %v19828_v10 }
0x8766   :  { %19275 = vmatprep.subr.bf16.mxu0 %v19733_v7  ;;  %v13823_v46 = vadd.f32 %v13821_v45, %v21888_v61 }
0x8768   :  { %v13824_v57 = vmul.f32 %v13823_v46, %v13813_v19 }
0x8833   :  { %v13719_v33 = vpop.f32.mrb[156].mxu0 }
0x8834   :  { %v13720_v39 = vadd.f32 %v13719_v33, %v19951_v9  ;;  %v18152_v63 = vpop.f32.mrb[157].mxu0  ;;  %v13903_v33 = vmul.f32 %v21803_v56, %v13902_v47 }
0x8836   :  { %v15562_v17 = vmul.f32 -1.442695, %v13720_v39  ;;  %v13904_v63 = vadd.f32 %v13903_v33, %v19886_v37 }
0x8838   :  { %19671 = vpow2.f32 %v15562_v17 }
0x8842   :  { %v19672_v4 = vpop.eup %19671 }
0x8843   :  { %v13726_v41 = vadd.f32 1.0, %v19672_v4  ;;  %v13908_v4 = vrot.slane %v13904_v63, %v19889_v38 }
0x8845   :  { %19673 = vrcp.f32 %v13726_v41 }
0x884f   :  { %v19674_v43 = vpop.eup %19673 }
0x8850   :  { %v13729_v62 = vmul.f32 %v19674_v43, %v13720_v39  ;;  %v13826_v39 = vrot.slane %v13824_v57, 2 }
0x8852   :  { %18162 = vmatmul.mubr.msk.f32.vlgmr.msra.gmra.mrb[160].mxu1 %vm251_vm4, %v13729_v62  ;;  %v13828_v17 = vadd.f32 %v13826_v39, %v21888_v61 }
0x8853   :  { %19271 = vmatpush3.bf16.msra.mxu1 %v19838_v13  ;;  %18183 = vmatprep.mubr.msk.f32.mxu1 %vm19732_vm1, %v19731_v2 }
0x8854   :  { %19272 = vmatprep.subr.bf16.mxu1 %v19733_v7 }
0x8857   :  { %19274 = vmatpush3.bf16.msra.mxu1 %v19867_v26 }
0x8858   :  { %19281 = vmatprep.subr.bf16.mxu1 %v19733_v7 }
0x8925   :  { %v13799_v42 = vpop.f32.mrb[160].mxu1 }
0x8926   :  { %v13800_v29 = vadd.f32 %v13799_v42, %v19963_v25  ;;  %v18163_v30 = vpop.f32.mrb[161].mxu1 }
0x8928   :  { %v13809_v28 = vmul.f32 %v13808_v36, %v13800_v29  ;;  %v14149_v8 = vmul.f32 %v14148_v18, %v13800_v29  ;;  %v14493_v58 = vmul.f32 %v14492_v22, %v13800_v29  ;;  %v14841_v21 = vmul.f32 %v14840_v3, %v13800_v29 }
0x892a   :  { %v13810_v0 = vadd.f32 %v13809_v28, %v13806_v31  ;;  %v22001_v40 = vadd.f32 %v14149_v8, %v14146_v32  ;;  %v22003_v35 = vadd.f32 %v14493_v58, %v14490_v34  ;;  %v22005_v51 = vadd.f32 %v14841_v21, %v14838_v27 }
0x892b   :  { %v15187_v34 = vstv %s15186_s2  ;;  %v14152_v8 = vstv %s14151_s6  ;;  %v14496_v58 = vstv %s14495_s21  ;;  %v14844_v21 = vstv %s14843_s22 }
0x892c   :  { %18173 = vmatmul.mubr.msk.f32.vlgmr.msra.gmra.mrb[158].mxu0 %vm251_vm4, %v13810_v0  ;;  %v15188_v27 = vmul.f32 %v15187_v34, %v21942_v16  ;;  %v15191_v0 = vstv %s15190_s23 }
0x892d   :  { %19277 = vmatpush3.bf16.msra.mxu0 %v19903_v49  ;;  %18194 = vmatprep.mubr.msk.f32.mxu0 %vm19732_vm1, %v19731_v2 }
0x892e   :  { %19278 = vmatprep.subr.bf16.mxu0 %v19733_v7  ;;  %v15189_v23 = vadd.f32 %v15188_v27, %v21893_v59  ;;  %v14157_v59 = vstv %s14155_s24 }
0x8931   :  { %19280 = vmatpush3.bf16.msra.mxu0 %v19913_v52 }
0x8932   :  { %19287 = vmatprep.subr.bf16.mxu0 %v19733_v7 }
0x89ff   :  { %v13898_v41 = vpop.f32.mrb[158].mxu0 }
0x8a00   :  { %v13899_v43 = vadd.f32 %v13898_v41, %v13828_v17  ;;  %v18174_v62 = vpop.f32.mrb[159].mxu0 }
0x8a02   :  { %v13909_v48 = vadd.f32 %v13908_v4, %v13899_v43  ;;  %v14246_v4 = vstv %s14156_s4 }
0x8a03   :  { %v14247_v43 = vmul.f32 %v21803_v56, %v14246_v4  ;;  %v14594_v4 = vstv %s14504_s18 }
0x8a04   :  { %18184 = vmatmul.mubr.msk.f32.vlgmr.msra.gmra.mrb[162].mxu1 %vm251_vm4, %v13909_v48 }
0x8a05   :  { %19283 = vmatpush3.bf16.msra.mxu1 %v19935_v1  ;;  %18205 = vmatprep.mubr.msk.f32.mxu1 %vm19732_vm1, %v19731_v2  ;;  %v14248_v48 = vadd.f32 %v14247_v43, %v19886_v37  ;;  %v14595_v43 = vmul.f32 %v21803_v56, %v14594_v4 }
0x8a06   :  { %19284 = vmatprep.subr.bf16.mxu1 %v19733_v7 }
0x8a09   :  { %19286 = vmatpush3.bf16.msra.mxu1 %v19945_v5 }
0x8a0a   :  { %19293 = vmatprep.subr.bf16.mxu1 %v19733_v7 }
0x8ad7   :  { %v13979_v50 = vpop.f32.mrb[162].mxu1 }
0x8ad8   :  { %v13980_v11 = vadd.f32 %v13979_v50, %v19919_v54  ;;  %v18185_v55 = vpop.f32.mrb[163].mxu1 }
0x8ada   :  { %v15566_v12 = vmul.f32 -1.442695, %v13980_v11 }
0x8adc   :  { %19675 = vpow2.f32 %v15566_v12 }
0x8ae6   :  { %v19676_v14 = vpop.eup %19675 }
0x8ae7   :  { %v13986_v53 = vadd.f32 1.0, %v19676_v14 }
0x8ae9   :  { %19677 = vrcp.f32 %v13986_v53 }
0x8af3   :  { %v19678_v60 = vpop.eup %19677 }
0x8af4   :  { %v13989_v42 = vmul.f32 %v19678_v60, %v13980_v11  ;;  %v14252_v11 = vrot.slane %v14248_v48, %v19889_v38  ;;  %v14596_v48 = vadd.f32 %v14595_v43, %v19886_v37 }
0x8af6   :  { %18195 = vmatmul.mubr.msk.f32.vlgmr.msra.gmra.mrb[160].mxu0 %vm251_vm4, %v13989_v42 }
0x8af7   :  { %19289 = vmatpush3.bf16.msra.mxu0 %v19807_v6  ;;  %18216 = vmatprep.mubr.msk.f32.mxu0 %vm19732_vm1, %v19731_v2 }
0x8af8   :  { %19290 = vmatprep.subr.bf16.mxu0 %v19733_v7 }
0x8afb   :  { %19292 = vmatpush3.bf16.msra.mxu0 %v19828_v10 }
0x8afc   :  { %19299 = vmatprep.subr.bf16.mxu0 %v19733_v7 }
0x8bc9   :  { %v14059_v36 = vpop.f32.mrb[160].mxu0 }
0x8bca   :  { %v14060_v18 = vadd.f32 %v14059_v36, %v19951_v9  ;;  %v18196_v22 = vpop.f32.mrb[161].mxu0 }
0x8bcc   :  { %v15568_v3 = vmul.f32 -1.442695, %v14060_v18 }
0x8bce   :  { %19679 = vpow2.f32 %v15568_v3 }
0x8bd8   :  { %v19680_v29 = vpop.eup %19679 }
0x8bd9   :  { %v14066_v30 = vadd.f32 1.0, %v19680_v29 }
0x8bdb   :  { %19681 = vrcp.f32 %v14066_v30 }
0x8be5   :  { %v19682_v31 = vpop.eup %19681 }
0x8be6   :  { %v14069_v32 = vmul.f32 %v19682_v31, %v14060_v18 }
0x8be8   :  { %18206 = vmatmul.mubr.msk.f32.vlgmr.msra.gmra.mrb[164].mxu1 %vm251_vm4, %v14069_v32 }
0x8be9   :  { %19295 = vmatpush3.bf16.msra.mxu1 %v19838_v13  ;;  %18227 = vmatprep.mubr.msk.f32.mxu1 %vm19732_vm1, %v19731_v2 }
0x8bea   :  { %19296 = vmatprep.subr.bf16.mxu1 %v19733_v7 }
0x8bed   :  { %19298 = vmatpush3.bf16.msra.mxu1 %v19867_v26 }
0x8bee   :  { %19305 = vmatprep.subr.bf16.mxu1 %v19733_v7 }
0x8cbb   :  { %v14139_v28 = vpop.f32.mrb[164].mxu1 }
0x8cbc   :  { %v14140_v19 = vadd.f32 %v14139_v28, %v19963_v25  ;;  %v18207_v24 = vpop.f32.mrb[165].mxu1 }
0x8cbd   :  { %v14848_v24 = vstv %s14847_s20 }
0x8cbe   :  { %v14153_v20 = vmul.f32 %v14152_v8, %v14140_v19  ;;  %v14497_v44 = vmul.f32 %v14496_v58, %v14140_v19  ;;  %v14845_v45 = vmul.f32 %v14844_v21, %v14140_v19  ;;  %v15192_v46 = vmul.f32 %v15191_v0, %v14140_v19 }
0x8cbf   :  { %v14500_v19 = vstv %s14499_s25 }
0x8cc0   :  { %v14154_v47 = vadd.f32 %v14153_v20, %v22001_v40  ;;  %v22056_v57 = vadd.f32 %v14497_v44, %v22003_v35  ;;  %v22059_v16 = vadd.f32 %v14845_v45, %v22005_v51  ;;  %v22061_v33 = vadd.f32 %v15192_v46, %v15189_v23 }
0x8cc1   :  { %v14158_v40 = vmul.f32 %v14157_v59, %v21888_v61  ;;  %v15195_v23 = vstv %s15194_s16 }
0x8cc2   :  { %18217 = vmatmul.mubr.msk.f32.vlgmr.msra.gmra.mrb[162].mxu0 %vm251_vm4, %v14154_v47 }
0x8cc3   :  { %19301 = vmatpush3.bf16.msra.mxu0 %v19903_v49  ;;  %18238 = vmatprep.mubr.msk.f32.mxu0 %vm19732_vm1, %v19731_v2  ;;  %v14160_v35 = vrot.slane %v14158_v40, 2 }
0x8cc4   :  { %19302 = vmatprep.subr.bf16.mxu0 %v19733_v7 }
0x8cc5   :  { %v14162_v51 = vadd.f32 %v14160_v35, %v21888_v61 }
0x8cc7   :  { %19304 = vmatpush3.bf16.msra.mxu0 %v19913_v52  ;;  %v14163_v39 = vmul.f32 %v14162_v51, %v14157_v59 }
0x8cc8   :  { %19311 = vmatprep.subr.bf16.mxu0 %v19733_v7 }
0x8cc9   :  { %v14165_v63 = vrot.slane %v14163_v39, 2 }
0x8ccb   :  { %v14167_v17 = vadd.f32 %v14165_v63, %v21888_v61 }
0x8ccd   :  { %v14168_v41 = vmul.f32 %v14167_v17, %v14157_v59 }
0x8ccf   :  { %v14170_v62 = vrot.slane %v14168_v41, 2 }
0x8cd1   :  { %v14172_v50 = vadd.f32 %v14170_v62, %v21888_v61 }
0x8d95   :  { %v14242_v55 = vpop.f32.mrb[162].mxu0 }
0x8d96   :  { %v14243_v12 = vadd.f32 %v14242_v55, %v14172_v50  ;;  %v18218_v14 = vpop.f32.mrb[163].mxu0 }
0x8d98   :  { %v14253_v53 = vadd.f32 %v14252_v11, %v14243_v12  ;;  %v14600_v11 = vrot.slane %v14596_v48, %v19889_v38 }
0x8d9a   :  { %18228 = vmatmul.mubr.msk.f32.vlgmr.msra.gmra.mrb[166].mxu1 %vm251_vm4, %v14253_v53 }
0x8d9b   :  { %19307 = vmatpush3.bf16.msra.mxu1 %v19935_v1  ;;  %18249 = vmatprep.mubr.msk.f32.mxu1 %vm19732_vm1, %v19731_v2 }
0x8d9c   :  { %19308 = vmatprep.subr.bf16.mxu1 %v19733_v7 }
0x8d9f   :  { %19310 = vmatpush3.bf16.msra.mxu1 %v19945_v5 }
0x8da0   :  { %19317 = vmatprep.subr.bf16.mxu1 %v19733_v7 }
0x8e6d   :  { %v14323_v60 = vpop.f32.mrb[166].mxu1 }
0x8e6e   :  { %v14324_v42 = vadd.f32 %v14323_v60, %v19919_v54  ;;  %v18229_v36 = vpop.f32.mrb[167].mxu1 }
0x8e70   :  { %v15572_v18 = vmul.f32 -1.442695, %v14324_v42 }
0x8e72   :  { %19683 = vpow2.f32 %v15572_v18 }
0x8e7c   :  { %v19684_v22 = vpop.eup %19683 }
0x8e7d   :  { %v14330_v3 = vadd.f32 1.0, %v19684_v22 }
0x8e7f   :  { %19685 = vrcp.f32 %v14330_v3 }
0x8e89   :  { %v19686_v29 = vpop.eup %19685 }
0x8e8a   :  { %v14333_v30 = vmul.f32 %v19686_v29, %v14324_v42 }
0x8e8c   :  { %18239 = vmatmul.mubr.msk.f32.vlgmr.msra.gmra.mrb[164].mxu0 %vm251_vm4, %v14333_v30 }
0x8e8d   :  { %19313 = vmatpush3.bf16.msra.mxu0 %v19807_v6  ;;  %18260 = vmatprep.mubr.msk.f32.mxu0 %vm19732_vm1, %v19731_v2 }
0x8e8e   :  { %19314 = vmatprep.subr.bf16.mxu0 %v19733_v7 }
0x8e91   :  { %19316 = vmatpush3.bf16.msra.mxu0 %v19828_v10 }
0x8e92   :  { %19323 = vmatprep.subr.bf16.mxu0 %v19733_v7 }
0x8f5f   :  { %v14403_v31 = vpop.f32.mrb[164].mxu0 }
0x8f60   :  { %v14404_v32 = vadd.f32 %v14403_v31, %v19951_v9  ;;  %v18240_v34 = vpop.f32.mrb[165].mxu0 }
0x8f62   :  { %v15574_v27 = vmul.f32 -1.442695, %v14404_v32 }
0x8f64   :  { %19687 = vpow2.f32 %v15574_v27 }
0x8f6e   :  { %v19688_v28 = vpop.eup %19687 }
0x8f6f   :  { %v14410_v8 = vadd.f32 1.0, %v19688_v28 }
0x8f71   :  { %19689 = vrcp.f32 %v14410_v8 }
0x8f7b   :  { %v19690_v58 = vpop.eup %19689 }
0x8f7c   :  { %v14413_v21 = vmul.f32 %v19690_v58, %v14404_v32  ;;  %v14852_v58 = vstv %s14851_s26 }
0x8f7e   :  { %18250 = vmatmul.mubr.msk.f32.vlgmr.msra.gmra.mrb[168].mxu1 %vm251_vm4, %v14413_v21  ;;  %v15199_v21 = vstv %s15198_s27 }
0x8f7f   :  { %19319 = vmatpush3.bf16.msra.mxu1 %v19838_v13  ;;  %18271 = vmatprep.mubr.msk.f32.mxu1 %vm19732_vm1, %v19731_v2 }
0x8f80   :  { %19320 = vmatprep.subr.bf16.mxu1 %v19733_v7 }
0x8f83   :  { %19322 = vmatpush3.bf16.msra.mxu1 %v19867_v26 }
0x8f84   :  { %19329 = vmatprep.subr.bf16.mxu1 %v19733_v7 }
0x9051   :  { %v14483_v0 = vpop.f32.mrb[168].mxu1 }
0x9052   :  { %v14484_v20 = vadd.f32 %v14483_v0, %v19963_v25  ;;  %v18251_v44 = vpop.f32.mrb[169].mxu1 }
0x9054   :  { %v14501_v45 = vmul.f32 %v14500_v19, %v14484_v20  ;;  %v14849_v46 = vmul.f32 %v14848_v24, %v14484_v20  ;;  %v15196_v47 = vmul.f32 %v15195_v23, %v14484_v20 }
0x9056   :  { %v14502_v59 = vadd.f32 %v14501_v45, %v22056_v57  ;;  %v22108_v40 = vadd.f32 %v14849_v46, %v22059_v16  ;;  %v22111_v35 = vadd.f32 %v15196_v47, %v22061_v33  ;;  %v14505_v57 = vstv %s14503_s1 }
0x9057   :  { %v14506_v16 = vmul.f32 %v14505_v57, %v21888_v61 }
0x9058   :  { %18261 = vmatmul.mubr.msk.f32.vlgmr.msra.gmra.mrb[166].mxu0 %vm251_vm4, %v14502_v59 }
0x9059   :  { %19325 = vmatpush3.bf16.msra.mxu0 %v19903_v49  ;;  %18282 = vmatprep.mubr.msk.f32.mxu0 %vm19732_vm1, %v19731_v2  ;;  %v14508_v51 = vrot.slane %v14506_v16, 2 }
0x905a   :  { %19326 = vmatprep.subr.bf16.mxu0 %v19733_v7 }
0x905b   :  { %v14510_v33 = vadd.f32 %v14508_v51, %v21888_v61 }
0x905d   :  { %19328 = vmatpush3.bf16.msra.mxu0 %v19913_v52  ;;  %v14511_v39 = vmul.f32 %v14510_v33, %v14505_v57 }
0x905e   :  { %19335 = vmatprep.subr.bf16.mxu0 %v19733_v7 }
0x905f   :  { %v14513_v63 = vrot.slane %v14511_v39, 2 }
0x9061   :  { %v14515_v17 = vadd.f32 %v14513_v63, %v21888_v61 }
0x9063   :  { %v14516_v41 = vmul.f32 %v14515_v17, %v14505_v57  ;;  %v19715_v57 = vld [vmem:[%s22222_s8] sm:$0xff] }
0x9065   :  { %v14518_v62 = vrot.slane %v14516_v41, 2 }
0x9067   :  { %v14520_v50 = vadd.f32 %v14518_v62, %v21888_v61 }
0x912b   :  { %v14590_v55 = vpop.f32.mrb[166].mxu0 }
0x912c   :  { %v14591_v12 = vadd.f32 %v14590_v55, %v14520_v50  ;;  %v18262_v14 = vpop.f32.mrb[167].mxu0 }
0x912e   :  { %v14601_v53 = vadd.f32 %v14600_v11, %v14591_v12 }
0x9130   :  { %18272 = vmatmul.mubr.msk.f32.vlgmr.msra.gmra.mrb[170].mxu1 %vm251_vm4, %v14601_v53 }
0x9131   :  { %19331 = vmatpush3.bf16.msra.mxu1 %v19935_v1  ;;  %18293 = vmatprep.mubr.msk.f32.mxu1 %vm19732_vm1, %v19731_v2 }
0x9132   :  { %19332 = vmatprep.subr.bf16.mxu1 %v19733_v7 }
0x9135   :  { %19334 = vmatpush3.bf16.msra.mxu1 %v19945_v5 }
0x9136   :  { %19341 = vmatprep.subr.bf16.mxu1 %v19733_v7 }
0x9203   :  { %v14671_v56 = vpop.f32.mrb[170].mxu1 }
0x9204   :  { %v14672_v60 = vadd.f32 %v14671_v56, %v19919_v54  ;;  %v18273_v42 = vpop.f32.mrb[171].mxu1  ;;  %v63_v56 = vld [vmem:[%s22221_s7] sm:$0xff] }
0x9205   :  { %v65_v42 = vld [vmem:[%s22221_s7 + $0x10] sm:$0xff] }
0x9206   :  { %v15578_v36 = vmul.f32 -1.442695, %v14672_v60 }
0x9208   :  { %19691 = vpow2.f32 %v15578_v36  ;;  %v66_v36 = vld [vmem:[%s22221_s7 + $0x18] sm:$0xff] }
0x9212   :  { %v19692_v18 = vpop.eup %19691 }
0x9213   :  { %v14678_v22 = vadd.f32 1.0, %v19692_v18  ;;  %v19363_v18 = vpack.c.bf16 %v66_v36, %v65_v42 }
0x9215   :  { %19693 = vrcp.f32 %v14678_v22 }
0x921f   :  { %v19694_v3 = vpop.eup %19693 }
0x9220   :  { %v14681_v29 = vmul.f32 %v19694_v3, %v14672_v60  ;;  %v64_v60 = vld [vmem:[%s22221_s7 + $0x8] sm:$0xff]  ;;  %v15203_v3 = vstv %s15202_s14 }
0x9222   :  { %18283 = vmatmul.mubr.msk.f32.vlgmr.msra.gmra.mrb[168].mxu0 %vm251_vm4, %v14681_v29 }
0x9223   :  { %19337 = vmatpush3.bf16.msra.mxu0 %v19807_v6  ;;  %18304 = vmatprep.mubr.msk.f32.mxu0 %vm19732_vm1, %v19731_v2 }
0x9224   :  { %19338 = vmatprep.subr.bf16.mxu0 %v19733_v7 }
0x9227   :  { %19340 = vmatpush3.bf16.msra.mxu0 %v19828_v10 }
0x9228   :  { %19347 = vmatprep.subr.bf16.mxu0 %v19733_v7 }
0x92f5   :  { %v14751_v30 = vpop.f32.mrb[168].mxu0 }
0x92f6   :  { %v14752_v31 = vadd.f32 %v14751_v30, %v19951_v9  ;;  %v18284_v32 = vpop.f32.mrb[169].mxu0 }
0x92f8   :  { %v15580_v34 = vmul.f32 -1.442695, %v14752_v31 }
0x92fa   :  { %19695 = vpow2.f32 %v15580_v34 }
0x9304   :  { %v19696_v27 = vpop.eup %19695 }
0x9305   :  { %v14758_v28 = vadd.f32 1.0, %v19696_v27  ;;  %v15211_v27 = vsub.s32 6, %v19842_v15 }
0x9307   :  { %19697 = vrcp.f32 %v14758_v28  ;;  %v15212_v28 = vrot.slane %v19715_v57, %v15211_v27 }
0x9311   :  { %v19698_v6 = vpop.eup %19697 }
0x9312   :  { %v14761_v8 = vmul.f32 %v19698_v6, %v14752_v31 }
0x9314   :  { %18294 = vmatmul.mubr.msk.f32.vlgmr.msra.gmra.mrb[172].mxu1 %vm251_vm4, %v14761_v8 }
0x9315   :  { %19343 = vmatpush3.bf16.msra.mxu1 %v19838_v13  ;;  %18315 = vmatprep.mubr.msk.f32.mxu1 %vm19732_vm1, %v19731_v2 }
0x9316   :  { %19344 = vmatprep.subr.bf16.mxu1 %v19733_v7 }
0x9319   :  { %19346 = vmatpush3.bf16.msra.mxu1 %v19867_v26  ;;  %v14856_v26 = vstv %s21906_s19 }
0x931a   :  { %19353 = vmatprep.subr.bf16.mxu1 %v19733_v7  ;;  %v14857_v44 = vmul.f32 %v14856_v26, %v21888_v61 }
0x931c   :  { %v14859_v45 = vrot.slane %v14857_v44, 2 }
0x931e   :  { %v14861_v46 = vadd.f32 %v14859_v45, %v21888_v61 }
0x9320   :  { %v14862_v47 = vmul.f32 %v14861_v46, %v14856_v26 }
0x9322   :  { %v14864_v59 = vrot.slane %v14862_v47, 2 }
0x93e7   :  { %v14831_v10 = vpop.f32.mrb[172].mxu1 }
0x93e8   :  { %v14832_v0 = vadd.f32 %v14831_v10, %v19963_v25  ;;  %v18295_v19 = vpop.f32.mrb[173].mxu1 }
0x93ea   :  { %v14853_v13 = vmul.f32 %v14852_v58, %v14832_v0  ;;  %v15200_v24 = vmul.f32 %v15199_v21, %v14832_v0 }
0x93ec   :  { %v14854_v23 = vadd.f32 %v14853_v13, %v22108_v40  ;;  %v22157_v20 = vadd.f32 %v15200_v24, %v22111_v35  ;;  %v14866_v40 = vadd.f32 %v14864_v59, %v21888_v61  ;;  %v14945_v35 = vstv %s14855_s30 }
0x93ed   :  { %v14946_v16 = vmul.f32 %v19715_v57, %v14945_v35 }
0x93ee   :  { %18305 = vmatmul.mubr.msk.f32.vlgmr.msra.gmra.mrb[170].mxu0 %vm251_vm4, %v14854_v23 }
0x93ef   :  { %19349 = vmatpush3.bf16.msra.mxu0 %v19903_v49  ;;  %18326 = vmatprep.mubr.msk.f32.mxu0 %vm19732_vm1, %v19731_v2  ;;  %v14867_v49 = vmul.f32 %v14866_v40, %v14856_v26 }
0x93f0   :  { %19350 = vmatprep.subr.bf16.mxu0 %v19733_v7 }
0x93f1   :  { %v14869_v51 = vrot.slane %v14867_v49, 2 }
0x93f3   :  { %19352 = vmatpush3.bf16.msra.mxu0 %v19913_v52  ;;  %v14947_v52 = vadd.f32 %v14946_v16, %v19886_v37  ;;  %v14871_v33 = vadd.f32 %v14869_v51, %v21888_v61 }
0x93f5   :  { %v14951_v39 = vrot.slane %v14947_v52, %v19889_v38 }
0x94c1   :  { %v14941_v63 = vpop.f32.mrb[170].mxu0 }
0x94c2   :  { %v14942_v17 = vadd.f32 %v14941_v63, %v14871_v33  ;;  %v18306_v4 = vpop.f32.mrb[171].mxu0 }
0x94c4   :  { %v14952_v41 = vadd.f32 %v14951_v39, %v14942_v17 }
0x94c6   :  { %18316 = vmatmul.mubr.msk.f32.vlgmr.msra.gmra.mrb[174].mxu1 %vm251_vm4, %v14952_v41 }
0x94c7   :  { %19355 = vmatpush3.bf16.msra.mxu1 %v19935_v1  ;;  %18337 = vmatprep.mubr.msk.f32.mxu1 %vm19732_vm1, %v19731_v2  ;;  %v15207_v1 = vld [vmem:[#allocation2] sm:$0xff] }
0x94c8   :  { %19356 = vmatprep.subr.bf16.mxu1 %v19733_v7 }
0x94cb   :  { %19358 = vmatpush3.bf16.msra.mxu1 %v19945_v5 }
0x9599   :  { %v15022_v37 = vpop.f32.mrb[174].mxu1 }
0x959a   :  { %v15023_v61 = vadd.f32 %v15022_v37, %v19919_v54  ;;  %v18317_v43 = vpop.f32.mrb[175].mxu1 }
0x959c   :  { %v15584_v38 = vmul.f32 -1.442695, %v15023_v61 }
0x959e   :  { %19699 = vpow2.f32 %v15584_v38 }
0x95a8   :  { %v19700_v62 = vpop.eup %19699 }
0x95a9   :  { %v15029_v48 = vadd.f32 1.0, %v19700_v62 }
0x95ab   :  { %19701 = vrcp.f32 %v15029_v48 }
0x95b5   :  { %v19702_v50 = vpop.eup %19701 }
0x95b6   :  { %v15032_v11 = vmul.f32 %v19702_v50, %v15023_v61 }
0x95b8   :  { %18327 = vmatmul.mubr.msk.f32.vlgmr.msra.gmra.mrb[172].mxu0 %vm251_vm4, %v15032_v11 }
0x95b9   :  { %18348 = vmatprep.mubr.msk.f32.mxu0 %vm251_vm4, %v15207_v1 }
0x968b   :  { %v15102_v2 = vpop.f32.mrb[172].mxu0 }
0x968c   :  { %v15103_v7 = vadd.f32 %v15102_v2, %v19951_v9  ;;  %v18328_v5 = vpop.f32.mrb[173].mxu0  ;;  %v19359_v9 = vpack.c.bf16 %v64_v60, %v63_v56 }
0x968e   :  { %v15586_v55 = vmul.f32 -1.442695, %v15103_v7  ;;  %19360 = vmatprep.subr.bf16.mxu0 %v19359_v9 }
0x968f   :  { %19362 = vmatpush3.bf16.msra.mxu0 %v19359_v9 }
0x9690   :  { %19703 = vpow2.f32 %v15586_v55  ;;  %19364 = vmatprep.subr.bf16.mxu0 %v19363_v18 }
0x9693   :  { %19366 = vmatpush3.bf16.msra.mxu0 %v19363_v18 }
0x969a   :  { %v19704_v54 = vpop.eup %19703 }
0x969b   :  { %v15109_v12 = vadd.f32 1.0, %v19704_v54 }
0x969d   :  { %19705 = vrcp.f32 %v15109_v12 }
0x96a7   :  { %v19706_v14 = vpop.eup %19705 }
0x96a8   :  { %v15112_v53 = vmul.f32 %v19706_v14, %v15103_v7 }
0x96aa   :  { %18338 = vmatmul.mubr.msk.f32.vlgmr.msra.gmra.mrb[176].mxu1 %vm251_vm4, %v15112_v53 }
0x977d   :  { %v15182_v22 = vpop.f32.mrb[176].mxu1 }
0x977e   :  { %v15183_v29 = vadd.f32 %v15182_v22, %v19963_v25  ;;  %v18339_v30 = vpop.f32.mrb[177].mxu1 }
0x9780   :  { %v15204_v31 = vmul.f32 %v15203_v3, %v15183_v29 }
0x9782   :  { %v15205_v32 = vadd.f32 %v15204_v31, %v22157_v20 }
0x9784   :  { %15206 = vst.msk [vmem:[#allocation2 + $0xe] sm:$0x3] %vm151_vm3, %v15205_v32 }
0x978b   :  { %v15208_v34 = vld [vmem:[#allocation2 + $0x8] sm:$0xff] }
0x978c   :  { %18349 = vmatmul.mubr.msk.f32.vlgmr.msra.gmra.mrb[174].mxu0 %vm251_vm4, %v15208_v34 }
0x985f   :  { %v18350_v6 = vpop.f32.mrb[174].mxu0 }
0x9860   :  { %v15291_v8 = vadd.f32 %v18350_v6, %v15212_v28  ;;  %v15285_v10 = vpop.f32.mrb[175].mxu0 }
0x9861   :  { %v15286_v58 = vadd.f32 %v15285_v10, %v15212_v28 }
0x9862   :  { %15295 = vst.msk [vmem:[%s22223_s9 + $0x8] sm:$0xff] %vm73_vm2, %v15291_v8 }
0x9863   :  { %15294 = vst.msk [vmem:[%s22223_s9] sm:$0xff] %vm73_vm2, %v15286_v58 }
0x9864   :  { %15300 = vsyncpa [#allocation4], 1 }

</bundles_post_ra>
